<compile_context>
chip_gen: v7x
topology: tpu7x:2x2x1
jax: 0.10.0
libtpu: 0.0.40
codegen_flags: <defaults>
</compile_context>

<pallas_src>
import functools

import numpy as np
import jax
import jax.numpy as jnp
from jax.experimental import pallas as pl
from jax.experimental.pallas import tpu as pltpu


# --------------------------------- kernel ---------------------------------- #

def _dqn_kernel(x_ref, w1_ref, b1_ref, w2_ref, b2_ref, w3_ref, b3_ref,
                wf1_ref, bf1_ref, wf2_ref, bf2_ref, out_ref,
                a1_ref, a2_ref, a3_ref, y3_ref, *, N, H1):
    H2, H3 = H1 // 2, H1 // 4
    f32 = jnp.float32
    bf16 = jnp.bfloat16

    # Zero the padded-activation scratches; their zero border rows implement the
    # height-direction 'same' padding (width padding is inside the banded weights).
    a1_ref[...] = jnp.zeros(a1_ref.shape, a1_ref.dtype)
    a2_ref[...] = jnp.zeros(a2_ref.shape, a2_ref.dtype)
    a3_ref[...] = jnp.zeros(a3_ref.shape, a3_ref.dtype)

    # Even/odd row selectors for the height direction of the 2x2 max-pool.
    def selectors(Hs):
        r = jax.lax.broadcasted_iota(jnp.int32, (Hs // 2, Hs), 0)
        c = jax.lax.broadcasted_iota(jnp.int32, (Hs // 2, Hs), 1)
        return (c == 2 * r).astype(f32), (c == 2 * r + 1).astype(f32)

    se1, so1 = selectors(H1)
    se2, so2 = selectors(H2)

    def conv3x3(a_ref, base, Hs, w_ref, b_ref):
        # rows = height, lanes = (w, cin); 3 matmuls, one per ky tap, f32 accumulation.
        acc = jnp.dot(a_ref[base:base + Hs, :], w_ref[0], preferred_element_type=f32)
        acc = acc + jnp.dot(a_ref[base + 1:base + 1 + Hs, :], w_ref[1],
                            preferred_element_type=f32)
        acc = acc + jnp.dot(a_ref[base + 2:base + 2 + Hs, :], w_ref[2],
                            preferred_element_type=f32)
        return jnp.maximum(acc + b_ref[...], 0.0)                      # bias + ReLU (f32)

    def pool_store(y, se, so, dst_ref, dst_base):
        # H-pool: max of even/odd row selections (tiny matmuls).
        hp = jnp.maximum(jnp.dot(se, y, preferred_element_type=f32),
                         jnp.dot(so, y, preferred_element_type=f32))
        # W-pool: conv output lanes are ordered (w parity, w//2, c), so the pool is a
        # max of the two aligned lane halves; result lanes come out as (w//2, c).
        half = hp.shape[1] // 2
        p = jnp.maximum(hp[:, :half], hp[:, half:])
        dst_ref[dst_base:dst_base + p.shape[0], :] = p.astype(dst_ref.dtype)

    for n in range(N):
        # Load this sample into the padded stage-1 scratch (interior rows), cast to bf16.
        a1_ref[n * (H1 + 2) + 1: n * (H1 + 2) + 1 + H1, :] = (
            x_ref[n * H1:(n + 1) * H1, :].astype(bf16))

        # conv1 + relu + pool  -> stage-2 padded input
        y1 = conv3x3(a1_ref, n * (H1 + 2), H1, w1_ref, b1_ref)
        pool_store(y1, se1, so1, a2_ref, n * (H2 + 2) + 1)

        # conv2 + relu + pool  -> stage-3 padded input
        y2 = conv3x3(a2_ref, n * (H2 + 2), H2, w2_ref, b2_ref)
        pool_store(y2, se2, so2, a3_ref, n * (H3 + 2) + 1)

        # conv3 + relu (no pool); keep in a small f32 scratch for the fc1 contraction
        y3_ref[...] = conv3x3(a3_ref, n * (H3 + 2), H3, w3_ref, b3_ref)

        # fc1: contract over (h, w, c).  wf1_ref[h] holds the fc1 rows for height h,
        # already permuted to the in-kernel (w, c) lane order.
        acc = jnp.dot(y3_ref[0:1, :].astype(bf16), wf1_ref[0], preferred_element_type=f32)
        for h in range(1, H3):
            acc = acc + jnp.dot(y3_ref[h:h + 1, :].astype(bf16), wf1_ref[h],
                                preferred_element_type=f32)
        z = jnp.maximum(acc + bf1_ref[...], 0.0)                       # (1, 512)

        # fc2 (output padded to 128 lanes; sliced outside the kernel)
        o = jnp.dot(z.astype(bf16), wf2_ref[...], preferred_element_type=f32) + bf2_ref[...]
        out_ref[n:n + 1, :] = o.astype(out_ref.dtype)


# ------------------------- parameter preparation --------------------------- #

def prepare_params(params, state_shape, num_actions):
    """One-time host-side repack: banded conv matrices, tiled biases, permuted fc1,
    lane-padded fc2 -- all matmul weights cast to bf16 once."""
    C0, H1, W1 = state_shape
    C1, C2, C3 = 32, 64, 64
    W2, W3 = W1 // 2, W1 // 4
    H3 = H1 // 4
    FC1 = 512
    OUTP = 128
    assert num_actions <= OUTP

    def banded(w_oihw, W, pool_permute):
        w = np.asarray(w_oihw, np.float32)          # (Cout, Cin, 3, 3)
        Cout, Cin = w.shape[0], w.shape[1]
        B = np.zeros((3, W * Cin, W * Cout), np.float32)
        for dy in range(3):
            for wo in range(W):
                blk = (wo % 2) * (W // 2) + (wo // 2) if pool_permute else wo
                for kx in range(3):
                    wi = wo + kx - 1
                    if 0 <= wi < W:
                        B[dy, wi * Cin:(wi + 1) * Cin, blk * Cout:(blk + 1) * Cout] = \
                            w[:, :, dy, kx].T
        return jnp.asarray(B, jnp.bfloat16)

    w1 = banded(params['conv1_w'], W1, True)        # (3,  64, 512)
    w2 = banded(params['conv2_w'], W2, True)        # (3, 256, 512)
    w3 = banded(params['conv3_w'], W3, False)       # (3, 256, 256)
    b1 = jnp.tile(params['conv1_b'].astype(jnp.float32), W1).reshape(1, W1 * C1)
    b2 = jnp.tile(params['conv2_b'].astype(jnp.float32), W2).reshape(1, W2 * C2)
    b3 = jnp.tile(params['conv3_b'].astype(jnp.float32), W3).reshape(1, W3 * C3)

    # fc1: torch layout (out, c*H3*W3 + h*W3 + w) -> (h, w*C3 + c, out)
    wf1 = np.asarray(params['fc1_w'], np.float32)
    wf1 = wf1.reshape(FC1, C3, H3, W3).transpose(2, 3, 1, 0).reshape(H3, W3 * C3, FC1)
    wf1 = jnp.asarray(wf1, jnp.bfloat16)
    bf1 = params['fc1_b'].astype(jnp.float32).reshape(1, FC1)

    # fc2: pad output lanes to 128
    wf2 = np.zeros((FC1, OUTP), np.float32)
    wf2[:, :num_actions] = np.asarray(params['fc2_w'], np.float32).T
    wf2 = jnp.asarray(wf2, jnp.bfloat16)
    bf2 = np.zeros((1, OUTP), np.float32)
    bf2[0, :num_actions] = np.asarray(params['fc2_b'], np.float32)
    bf2 = jnp.asarray(bf2)

    return dict(w1=w1, b1=b1, w2=w2, b2=b2, w3=w3, b3=b3,
                wf1=wf1, bf1=bf1, wf2=wf2, bf2=bf2)


# ------------------------------ forward wrapper ----------------------------- #

def make_dqn_forward(state_shape, num_actions):
    C0, H1, W1 = state_shape
    assert H1 == W1 and H1 % 4 == 0, "DQNAgent assumes square inputs divisible by 4"
    C1, C2, C3 = 32, 64, 64
    H2, H3 = H1 // 2, H1 // 4
    W2, W3 = W1 // 2, W1 // 4
    FC1, OUTP = 512, 128

    @jax.jit
    def forward(x_nchw, prep):
        N = x_nchw.shape[0]
        # NCHW -> (rows=(n,h), lanes=(w,c)); tiny one-off relayout of the 8 KB input.
        x2 = jnp.transpose(x_nchw, (0, 2, 3, 1)).reshape(N * H1, W1 * C0).astype(jnp.float32)

        kernel = functools.partial(_dqn_kernel, N=N, H1=H1)
        out = pl.pallas_call(
            kernel,
            out_shape=jax.ShapeDtypeStruct((N, OUTP), jnp.float32),
            grid=(1,),
            in_specs=[
                pl.BlockSpec((N * H1, W1 * C0), lambda i: (0, 0)),       # x
                pl.BlockSpec((3, W1 * C0, W1 * C1), lambda i: (0, 0, 0)),  # conv1 (banded)
                pl.BlockSpec((1, W1 * C1), lambda i: (0, 0)),             # b1
                pl.BlockSpec((3, W2 * C1, W2 * C2), lambda i: (0, 0, 0)),  # conv2 (banded)
                pl.BlockSpec((1, W2 * C2), lambda i: (0, 0)),             # b2
                pl.BlockSpec((3, W3 * C2, W3 * C3), lambda i: (0, 0, 0)),  # conv3 (banded)
                pl.BlockSpec((1, W3 * C3), lambda i: (0, 0)),             # b3
                pl.BlockSpec((H3, W3 * C3, FC1), lambda i: (0, 0, 0)),     # fc1 (per-h)
                pl.BlockSpec((1, FC1), lambda i: (0, 0)),                 # fc1 bias
                pl.BlockSpec((FC1, OUTP), lambda i: (0, 0)),              # fc2 (lane padded)
                pl.BlockSpec((1, OUTP), lambda i: (0, 0)),                # fc2 bias
            ],
            out_specs=pl.BlockSpec((N, OUTP), lambda i: (0, 0)),
            scratch_shapes=[
                pltpu.VMEM((N * (H1 + 2), W1 * C0), jnp.bfloat16),  # padded stage-1 input
                pltpu.VMEM((N * (H2 + 2), W2 * C1), jnp.bfloat16),  # padded stage-2 input
                pltpu.VMEM((N * (H3 + 2), W3 * C2), jnp.bfloat16),  # padded stage-3 input
                pltpu.VMEM((H3, W3 * C3), jnp.float32),             # conv3 output (per sample)
            ],
            compiler_params=pltpu.CompilerParams(
                dimension_semantics=("arbitrary",),
                vmem_limit_bytes=32 * 1024 * 1024),
        )(x2, prep['w1'], prep['b1'], prep['w2'], prep['b2'],
          prep['w3'], prep['b3'], prep['wf1'], prep['bf1'],
          prep['wf2'], prep['bf2'])
        return out[:, :num_actions]

    return forward


# ------------------------ deterministic parameter init --------------------- #

def init_params(key, state_shape, num_actions):
    c_in, H, _ = state_shape
    conv_size = H // 4
    ks = jax.random.split(key, 10)

    def nrm(k, shape, scale):
        return (scale * jax.random.normal(k, shape)).astype(jnp.float32)

    return {
        'conv1_w': nrm(ks[0], (32, c_in, 3, 3), 0.10),
        'conv1_b': nrm(ks[1], (32,), 0.10),
        'conv2_w': nrm(ks[2], (64, 32, 3, 3), 0.05),
        'conv2_b': nrm(ks[3], (64,), 0.05),
        'conv3_w': nrm(ks[4], (64, 64, 3, 3), 0.05),
        'conv3_b': nrm(ks[5], (64,), 0.05),
        'fc1_w': nrm(ks[6], (512, 64 * conv_size * conv_size), 0.02),
        'fc1_b': nrm(ks[7], (512,), 0.02),
        'fc2_w': nrm(ks[8], (num_actions, 512), 0.02),
        'fc2_b': nrm(ks[9], (num_actions,), 0.02),
    }


# ------------------------------ pure-JAX reference -------------------------- #

def ref_forward(x_nchw, params):
    P = jax.lax.Precision.HIGHEST

    def conv(x, w, b):
        y = jax.lax.conv_general_dilated(
            x, w, window_strides=(1, 1), padding=((1, 1), (1, 1)),
            dimension_numbers=('NCHW', 'OIHW', 'NCHW'), precision=P)
        return jax.nn.relu(y + b[None, :, None, None])

    def pool(x):
        return jax.lax.reduce_window(x, -jnp.inf, jax.lax.max,
                                     (1, 1, 2, 2), (1, 1, 2, 2), 'VALID')

    x = pool(conv(x_nchw, params['conv1_w'], params['conv1_b']))
    x = pool(conv(x, params['conv2_w'], params['conv2_b']))
    x = conv(x, params['conv3_w'], params['conv3_b'])
    x = x.reshape(x.shape[0], -1)
    x = jax.nn.relu(jnp.dot(x, params['fc1_w'].T, precision=P) + params['fc1_b'])
    x = jnp.dot(x, params['fc2_w'].T, precision=P) + params['fc2_b']
    return x


# ----------------------------------- main ----------------------------------- #

if __name__ == "__main__":
    key = jax.random.PRNGKey(0)
    state_shape = (4, 16, 16)       # (C, H, W) as in PyTorch DQNAgent(state_shape, num_actions)
    num_actions = 6
    batch = 2

    k_x, k_p = jax.random.split(key)
    x = jax.random.normal(k_x, (batch,) + state_shape, dtype=jnp.float32)
    params = init_params(k_p, state_shape, num_actions)

    prep = prepare_params(params, state_shape, num_actions)   # one-time weight repack
    forward = make_dqn_forward(state_shape, num_actions)

    out = jax.block_until_ready(forward(x, prep))
    assert out.shape == (batch, num_actions), out.shape

    ref = ref_forward(x, params)
    # bf16 MXU inputs with f32 accumulation vs f32 HIGHEST reference.
    np.testing.assert_allclose(np.asarray(out), np.asarray(ref), rtol=2e-2, atol=2e-2)

    print("KERNEL_OK")
</pallas_src>

<mosaic_0001>
module attributes {stable_mosaic.version = 11 : i64} {
  func.func @_dqn_kernel(%arg0: i32, %arg1: memref<32x64xf32, #tpu.memory_space<vmem>>, %arg2: memref<3x64x512xbf16, #tpu.memory_space<vmem>>, %arg3: memref<1x512xf32, #tpu.memory_space<vmem>>, %arg4: memref<3x256x512xbf16, #tpu.memory_space<vmem>>, %arg5: memref<1x512xf32, #tpu.memory_space<vmem>>, %arg6: memref<3x256x256xbf16, #tpu.memory_space<vmem>>, %arg7: memref<1x256xf32, #tpu.memory_space<vmem>>, %arg8: memref<4x256x512xbf16, #tpu.memory_space<vmem>>, %arg9: memref<1x512xf32, #tpu.memory_space<vmem>>, %arg10: memref<512x128xbf16, #tpu.memory_space<vmem>>, %arg11: memref<1x128xf32, #tpu.memory_space<vmem>>, %arg12: memref<2x128xf32, #tpu.memory_space<vmem>>, %arg13: memref<36x64xbf16, #tpu.memory_space<vmem>>, %arg14: memref<20x256xbf16, #tpu.memory_space<vmem>>, %arg15: memref<12x256xbf16, #tpu.memory_space<vmem>>, %arg16: memref<4x256xf32, #tpu.memory_space<vmem>>) attributes {dimension_semantics = [#tpu.dimension_semantics<arbitrary>], iteration_bounds = array<i64: 1>, scalar_prefetch = 0 : i64, scratch_operands = 4 : i64, tpu.core_type = #tpu.core_type<tc>, window_params = [{pipeline_mode = #tpu.pipeline_mode<synchronous>, transform_indices = @transform_0, window_bounds = array<i64: 32, 64>}, {pipeline_mode = #tpu.pipeline_mode<synchronous>, transform_indices = @transform_1, window_bounds = array<i64: 3, 64, 512>}, {pipeline_mode = #tpu.pipeline_mode<synchronous>, transform_indices = @transform_2, window_bounds = array<i64: 1, 512>}, {pipeline_mode = #tpu.pipeline_mode<synchronous>, transform_indices = @transform_3, window_bounds = array<i64: 3, 256, 512>}, {pipeline_mode = #tpu.pipeline_mode<synchronous>, transform_indices = @transform_4, window_bounds = array<i64: 1, 512>}, {pipeline_mode = #tpu.pipeline_mode<synchronous>, transform_indices = @transform_5, window_bounds = array<i64: 3, 256, 256>}, {pipeline_mode = #tpu.pipeline_mode<synchronous>, transform_indices = @transform_6, window_bounds = array<i64: 1, 256>}, {pipeline_mode = #tpu.pipeline_mode<synchronous>, transform_indices = @transform_7, window_bounds = array<i64: 4, 256, 512>}, {pipeline_mode = #tpu.pipeline_mode<synchronous>, transform_indices = @transform_8, window_bounds = array<i64: 1, 512>}, {pipeline_mode = #tpu.pipeline_mode<synchronous>, transform_indices = @transform_9, window_bounds = array<i64: 512, 128>}, {pipeline_mode = #tpu.pipeline_mode<synchronous>, transform_indices = @transform_10, window_bounds = array<i64: 1, 128>}, {pipeline_mode = #tpu.pipeline_mode<synchronous>, transform_indices = @transform_11, window_bounds = array<i64: 2, 128>}]} {
    %cst = arith.constant 0.000000e+00 : bf16
    %0 = vector.broadcast %cst : bf16 to vector<36x64xbf16>
    %c0 = arith.constant 0 : index
    %c0_0 = arith.constant 0 : index
    %1 = vector.load %arg13[%c0, %c0_0] : memref<36x64xbf16, #tpu.memory_space<vmem>>, vector<36x64xbf16>
    tpu.vector_store %arg13[%c0, %c0_0], %0 {strides = array<i32>} : memref<36x64xbf16, #tpu.memory_space<vmem>>, vector<36x64xbf16>,
    %cst_1 = arith.constant 0.000000e+00 : bf16
    %2 = vector.broadcast %cst_1 : bf16 to vector<20x256xbf16>
    %c0_2 = arith.constant 0 : index
    %c0_3 = arith.constant 0 : index
    %3 = vector.load %arg14[%c0_2, %c0_3] : memref<20x256xbf16, #tpu.memory_space<vmem>>, vector<20x256xbf16>
    tpu.vector_store %arg14[%c0_2, %c0_3], %2 {strides = array<i32>} : memref<20x256xbf16, #tpu.memory_space<vmem>>, vector<20x256xbf16>,
    %cst_4 = arith.constant 0.000000e+00 : bf16
    %4 = vector.broadcast %cst_4 : bf16 to vector<12x256xbf16>
    %c0_5 = arith.constant 0 : index
    %c0_6 = arith.constant 0 : index
    %5 = vector.load %arg15[%c0_5, %c0_6] : memref<12x256xbf16, #tpu.memory_space<vmem>>, vector<12x256xbf16>
    tpu.vector_store %arg15[%c0_5, %c0_6], %4 {strides = array<i32>} : memref<12x256xbf16, #tpu.memory_space<vmem>>, vector<12x256xbf16>,
    %6 = tpu.iota {dimensions = array<i32: 0>} : vector<8x16xi32>
    %7 = tpu.iota {dimensions = array<i32: 1>} : vector<8x16xi32>
    %c2_i32 = arith.constant 2 : i32
    %8 = vector.broadcast %c2_i32 : i32 to vector<8x16xi32>
    %9 = arith.muli %8, %6 : vector<8x16xi32>
    %10 = arith.cmpi eq, %7, %9 : vector<8x16xi32>
    %11 = arith.extui %10 : vector<8x16xi1> to vector<8x16xi32>
    %12 = arith.sitofp %11 : vector<8x16xi32> to vector<8x16xf32>
    %c2_i32_7 = arith.constant 2 : i32
    %13 = vector.broadcast %c2_i32_7 : i32 to vector<8x16xi32>
    %14 = arith.muli %13, %6 : vector<8x16xi32>
    %c1_i32 = arith.constant 1 : i32
    %15 = vector.broadcast %c1_i32 : i32 to vector<8x16xi32>
    %16 = arith.addi %14, %15 : vector<8x16xi32>
    %17 = arith.cmpi eq, %7, %16 : vector<8x16xi32>
    %18 = arith.extui %17 : vector<8x16xi1> to vector<8x16xi32>
    %19 = arith.sitofp %18 : vector<8x16xi32> to vector<8x16xf32>
    %20 = tpu.iota {dimensions = array<i32: 0>} : vector<4x8xi32>
    %21 = tpu.iota {dimensions = array<i32: 1>} : vector<4x8xi32>
    %c2_i32_8 = arith.constant 2 : i32
    %22 = vector.broadcast %c2_i32_8 : i32 to vector<4x8xi32>
    %23 = arith.muli %22, %20 : vector<4x8xi32>
    %24 = arith.cmpi eq, %21, %23 : vector<4x8xi32>
    %25 = arith.extui %24 : vector<4x8xi1> to vector<4x8xi32>
    %26 = arith.sitofp %25 : vector<4x8xi32> to vector<4x8xf32>
    %c2_i32_9 = arith.constant 2 : i32
    %27 = vector.broadcast %c2_i32_9 : i32 to vector<4x8xi32>
    %28 = arith.muli %27, %20 : vector<4x8xi32>
    %c1_i32_10 = arith.constant 1 : i32
    %29 = vector.broadcast %c1_i32_10 : i32 to vector<4x8xi32>
    %30 = arith.addi %28, %29 : vector<4x8xi32>
    %31 = arith.cmpi eq, %21, %30 : vector<4x8xi32>
    %32 = arith.extui %31 : vector<4x8xi1> to vector<4x8xi32>
    %33 = arith.sitofp %32 : vector<4x8xi32> to vector<4x8xf32>
    %c0_11 = arith.constant 0 : index
    %c0_12 = arith.constant 0 : index
    %34 = vector.load %arg1[%c0_11, %c0_12] : memref<32x64xf32, #tpu.memory_space<vmem>>, vector<16x64xf32>
    %35 = arith.truncf %34 : vector<16x64xf32> to vector<16x64xbf16>
    %c1 = arith.constant 1 : index
    %c0_13 = arith.constant 0 : index
    %36 = vector.load %arg13[%c1, %c0_13] : memref<36x64xbf16, #tpu.memory_space<vmem>>, vector<16x64xbf16>
    tpu.vector_store %arg13[%c1, %c0_13], %35 {strides = array<i32>} : memref<36x64xbf16, #tpu.memory_space<vmem>>, vector<16x64xbf16>,
    %c0_14 = arith.constant 0 : index
    %c0_15 = arith.constant 0 : index
    %37 = vector.load %arg13[%c0_14, %c0_15] : memref<36x64xbf16, #tpu.memory_space<vmem>>, vector<16x64xbf16>
    %c0_16 = arith.constant 0 : index
    %c0_17 = arith.constant 0 : index
    %c0_18 = arith.constant 0 : index
    %38 = vector.load %arg2[%c0_16, %c0_17, %c0_18] : memref<3x64x512xbf16, #tpu.memory_space<vmem>>, vector<1x64x512xbf16>
    %39 = vector.shape_cast %38 : vector<1x64x512xbf16> to vector<64x512xbf16>
    %cst_19 = arith.constant dense<0.000000e+00> : vector<16x512xf32>
    %40 = tpu.matmul %37, %39, %cst_19 {dimension_numbers = #tpu.dot_dimension_numbers<[1], [0], [0], [1], [0, 0, 1, 1], [], []>} : vector<16x64xbf16>, vector<64x512xbf16>, vector<16x512xf32> -> vector<16x512xf32>
    %c1_20 = arith.constant 1 : index
    %c0_21 = arith.constant 0 : index
    %41 = vector.load %arg13[%c1_20, %c0_21] : memref<36x64xbf16, #tpu.memory_space<vmem>>, vector<16x64xbf16>
    %c1_22 = arith.constant 1 : index
    %c0_23 = arith.constant 0 : index
    %c0_24 = arith.constant 0 : index
    %42 = vector.load %arg2[%c1_22, %c0_23, %c0_24] : memref<3x64x512xbf16, #tpu.memory_space<vmem>>, vector<1x64x512xbf16>
    %43 = vector.shape_cast %42 : vector<1x64x512xbf16> to vector<64x512xbf16>
    %cst_25 = arith.constant dense<0.000000e+00> : vector<16x512xf32>
    %44 = tpu.matmul %41, %43, %cst_25 {dimension_numbers = #tpu.dot_dimension_numbers<[1], [0], [0], [1], [0, 0, 1, 1], [], []>} : vector<16x64xbf16>, vector<64x512xbf16>, vector<16x512xf32> -> vector<16x512xf32>
    %45 = arith.addf %40, %44 : vector<16x512xf32>
    %c2 = arith.constant 2 : index
    %c0_26 = arith.constant 0 : index
    %46 = vector.load %arg13[%c2, %c0_26] : memref<36x64xbf16, #tpu.memory_space<vmem>>, vector<16x64xbf16>
    %c2_27 = arith.constant 2 : index
    %c0_28 = arith.constant 0 : index
    %c0_29 = arith.constant 0 : index
    %47 = vector.load %arg2[%c2_27, %c0_28, %c0_29] : memref<3x64x512xbf16, #tpu.memory_space<vmem>>, vector<1x64x512xbf16>
    %48 = vector.shape_cast %47 : vector<1x64x512xbf16> to vector<64x512xbf16>
    %cst_30 = arith.constant dense<0.000000e+00> : vector<16x512xf32>
    %49 = tpu.matmul %46, %48, %cst_30 {dimension_numbers = #tpu.dot_dimension_numbers<[1], [0], [0], [1], [0, 0, 1, 1], [], []>} : vector<16x64xbf16>, vector<64x512xbf16>, vector<16x512xf32> -> vector<16x512xf32>
    %50 = arith.addf %45, %49 : vector<16x512xf32>
    %c0_31 = arith.constant 0 : index
    %c0_32 = arith.constant 0 : index
    %51 = vector.load %arg3[%c0_31, %c0_32] : memref<1x512xf32, #tpu.memory_space<vmem>>, vector<1x512xf32>
    %52 = vector.broadcast %51 : vector<1x512xf32> to vector<16x512xf32>
    %53 = arith.addf %50, %52 : vector<16x512xf32>
    %cst_33 = arith.constant 0.000000e+00 : f32
    %54 = vector.broadcast %cst_33 : f32 to vector<16x512xf32>
    %55 = arith.maximumf %53, %54 : vector<16x512xf32>
    %cst_34 = arith.constant dense<0.000000e+00> : vector<8x512xf32>
    %56 = tpu.matmul %12, %55, %cst_34 {dimension_numbers = #tpu.dot_dimension_numbers<[1], [0], [0], [1], [0, 0, 1, 1], [], []>} : vector<8x16xf32>, vector<16x512xf32>, vector<8x512xf32> -> vector<8x512xf32>
    %cst_35 = arith.constant dense<0.000000e+00> : vector<8x512xf32>
    %57 = tpu.matmul %19, %55, %cst_35 {dimension_numbers = #tpu.dot_dimension_numbers<[1], [0], [0], [1], [0, 0, 1, 1], [], []>} : vector<8x16xf32>, vector<16x512xf32>, vector<8x512xf32> -> vector<8x512xf32>
    %58 = arith.maximumf %56, %57 : vector<8x512xf32>
    %59 = vector.extract_strided_slice %58 {offsets = [0, 0], sizes = [8, 256], strides = [1, 1]} : vector<8x512xf32> to vector<8x256xf32>
    %60 = vector.extract_strided_slice %58 {offsets = [0, 256], sizes = [8, 256], strides = [1, 1]} : vector<8x512xf32> to vector<8x256xf32>
    %61 = arith.maximumf %59, %60 : vector<8x256xf32>
    %62 = arith.truncf %61 : vector<8x256xf32> to vector<8x256xbf16>
    %c1_36 = arith.constant 1 : index
    %c0_37 = arith.constant 0 : index
    %63 = vector.load %arg14[%c1_36, %c0_37] : memref<20x256xbf16, #tpu.memory_space<vmem>>, vector<8x256xbf16>
    tpu.vector_store %arg14[%c1_36, %c0_37], %62 {strides = array<i32>} : memref<20x256xbf16, #tpu.memory_space<vmem>>, vector<8x256xbf16>,
    %c0_38 = arith.constant 0 : index
    %c0_39 = arith.constant 0 : index
    %64 = vector.load %arg14[%c0_38, %c0_39] : memref<20x256xbf16, #tpu.memory_space<vmem>>, vector<8x256xbf16>
    %c0_40 = arith.constant 0 : index
    %c0_41 = arith.constant 0 : index
    %c0_42 = arith.constant 0 : index
    %65 = vector.load %arg4[%c0_40, %c0_41, %c0_42] : memref<3x256x512xbf16, #tpu.memory_space<vmem>>, vector<1x256x512xbf16>
    %66 = vector.shape_cast %65 : vector<1x256x512xbf16> to vector<256x512xbf16>
    %cst_43 = arith.constant dense<0.000000e+00> : vector<8x512xf32>
    %67 = tpu.matmul %64, %66, %cst_43 {dimension_numbers = #tpu.dot_dimension_numbers<[1], [0], [0], [1], [0, 0, 1, 1], [], []>} : vector<8x256xbf16>, vector<256x512xbf16>, vector<8x512xf32> -> vector<8x512xf32>
    %c1_44 = arith.constant 1 : index
    %c0_45 = arith.constant 0 : index
    %68 = vector.load %arg14[%c1_44, %c0_45] : memref<20x256xbf16, #tpu.memory_space<vmem>>, vector<8x256xbf16>
    %c1_46 = arith.constant 1 : index
    %c0_47 = arith.constant 0 : index
    %c0_48 = arith.constant 0 : index
    %69 = vector.load %arg4[%c1_46, %c0_47, %c0_48] : memref<3x256x512xbf16, #tpu.memory_space<vmem>>, vector<1x256x512xbf16>
    %70 = vector.shape_cast %69 : vector<1x256x512xbf16> to vector<256x512xbf16>
    %cst_49 = arith.constant dense<0.000000e+00> : vector<8x512xf32>
    %71 = tpu.matmul %68, %70, %cst_49 {dimension_numbers = #tpu.dot_dimension_numbers<[1], [0], [0], [1], [0, 0, 1, 1], [], []>} : vector<8x256xbf16>, vector<256x512xbf16>, vector<8x512xf32> -> vector<8x512xf32>
    %72 = arith.addf %67, %71 : vector<8x512xf32>
    %c2_50 = arith.constant 2 : index
    %c0_51 = arith.constant 0 : index
    %73 = vector.load %arg14[%c2_50, %c0_51] : memref<20x256xbf16, #tpu.memory_space<vmem>>, vector<8x256xbf16>
    %c2_52 = arith.constant 2 : index
    %c0_53 = arith.constant 0 : index
    %c0_54 = arith.constant 0 : index
    %74 = vector.load %arg4[%c2_52, %c0_53, %c0_54] : memref<3x256x512xbf16, #tpu.memory_space<vmem>>, vector<1x256x512xbf16>
    %75 = vector.shape_cast %74 : vector<1x256x512xbf16> to vector<256x512xbf16>
    %cst_55 = arith.constant dense<0.000000e+00> : vector<8x512xf32>
    %76 = tpu.matmul %73, %75, %cst_55 {dimension_numbers = #tpu.dot_dimension_numbers<[1], [0], [0], [1], [0, 0, 1, 1], [], []>} : vector<8x256xbf16>, vector<256x512xbf16>, vector<8x512xf32> -> vector<8x512xf32>
    %77 = arith.addf %72, %76 : vector<8x512xf32>
    %c0_56 = arith.constant 0 : index
    %c0_57 = arith.constant 0 : index
    %78 = vector.load %arg5[%c0_56, %c0_57] : memref<1x512xf32, #tpu.memory_space<vmem>>, vector<1x512xf32>
    %79 = vector.broadcast %78 : vector<1x512xf32> to vector<8x512xf32>
    %80 = arith.addf %77, %79 : vector<8x512xf32>
    %cst_58 = arith.constant 0.000000e+00 : f32
    %81 = vector.broadcast %cst_58 : f32 to vector<8x512xf32>
    %82 = arith.maximumf %80, %81 : vector<8x512xf32>
    %cst_59 = arith.constant dense<0.000000e+00> : vector<4x512xf32>
    %83 = tpu.matmul %26, %82, %cst_59 {dimension_numbers = #tpu.dot_dimension_numbers<[1], [0], [0], [1], [0, 0, 1, 1], [], []>} : vector<4x8xf32>, vector<8x512xf32>, vector<4x512xf32> -> vector<4x512xf32>
    %cst_60 = arith.constant dense<0.000000e+00> : vector<4x512xf32>
    %84 = tpu.matmul %33, %82, %cst_60 {dimension_numbers = #tpu.dot_dimension_numbers<[1], [0], [0], [1], [0, 0, 1, 1], [], []>} : vector<4x8xf32>, vector<8x512xf32>, vector<4x512xf32> -> vector<4x512xf32>
    %85 = arith.maximumf %83, %84 : vector<4x512xf32>
    %86 = vector.extract_strided_slice %85 {offsets = [0, 0], sizes = [4, 256], strides = [1, 1]} : vector<4x512xf32> to vector<4x256xf32>
    %87 = vector.extract_strided_slice %85 {offsets = [0, 256], sizes = [4, 256], strides = [1, 1]} : vector<4x512xf32> to vector<4x256xf32>
    %88 = arith.maximumf %86, %87 : vector<4x256xf32>
    %89 = arith.truncf %88 : vector<4x256xf32> to vector<4x256xbf16>
    %c1_61 = arith.constant 1 : index
    %c0_62 = arith.constant 0 : index
    %90 = vector.load %arg15[%c1_61, %c0_62] : memref<12x256xbf16, #tpu.memory_space<vmem>>, vector<4x256xbf16>
    tpu.vector_store %arg15[%c1_61, %c0_62], %89 {strides = array<i32>} : memref<12x256xbf16, #tpu.memory_space<vmem>>, vector<4x256xbf16>,
    %c0_63 = arith.constant 0 : index
    %c0_64 = arith.constant 0 : index
    %91 = vector.load %arg15[%c0_63, %c0_64] : memref<12x256xbf16, #tpu.memory_space<vmem>>, vector<4x256xbf16>
    %c0_65 = arith.constant 0 : index
    %c0_66 = arith.constant 0 : index
    %c0_67 = arith.constant 0 : index
    %92 = vector.load %arg6[%c0_65, %c0_66, %c0_67] : memref<3x256x256xbf16, #tpu.memory_space<vmem>>, vector<1x256x256xbf16>
    %93 = vector.shape_cast %92 : vector<1x256x256xbf16> to vector<256x256xbf16>
    %cst_68 = arith.constant dense<0.000000e+00> : vector<4x256xf32>
    %94 = tpu.matmul %91, %93, %cst_68 {dimension_numbers = #tpu.dot_dimension_numbers<[1], [0], [0], [1], [0, 0, 1, 1], [], []>} : vector<4x256xbf16>, vector<256x256xbf16>, vector<4x256xf32> -> vector<4x256xf32>
    %c1_69 = arith.constant 1 : index
    %c0_70 = arith.constant 0 : index
    %95 = vector.load %arg15[%c1_69, %c0_70] : memref<12x256xbf16, #tpu.memory_space<vmem>>, vector<4x256xbf16>
    %c1_71 = arith.constant 1 : index
    %c0_72 = arith.constant 0 : index
    %c0_73 = arith.constant 0 : index
    %96 = vector.load %arg6[%c1_71, %c0_72, %c0_73] : memref<3x256x256xbf16, #tpu.memory_space<vmem>>, vector<1x256x256xbf16>
    %97 = vector.shape_cast %96 : vector<1x256x256xbf16> to vector<256x256xbf16>
    %cst_74 = arith.constant dense<0.000000e+00> : vector<4x256xf32>
    %98 = tpu.matmul %95, %97, %cst_74 {dimension_numbers = #tpu.dot_dimension_numbers<[1], [0], [0], [1], [0, 0, 1, 1], [], []>} : vector<4x256xbf16>, vector<256x256xbf16>, vector<4x256xf32> -> vector<4x256xf32>
    %99 = arith.addf %94, %98 : vector<4x256xf32>
    %c2_75 = arith.constant 2 : index
    %c0_76 = arith.constant 0 : index
    %100 = vector.load %arg15[%c2_75, %c0_76] : memref<12x256xbf16, #tpu.memory_space<vmem>>, vector<4x256xbf16>
    %c2_77 = arith.constant 2 : index
    %c0_78 = arith.constant 0 : index
    %c0_79 = arith.constant 0 : index
    %101 = vector.load %arg6[%c2_77, %c0_78, %c0_79] : memref<3x256x256xbf16, #tpu.memory_space<vmem>>, vector<1x256x256xbf16>
    %102 = vector.shape_cast %101 : vector<1x256x256xbf16> to vector<256x256xbf16>
    %cst_80 = arith.constant dense<0.000000e+00> : vector<4x256xf32>
    %103 = tpu.matmul %100, %102, %cst_80 {dimension_numbers = #tpu.dot_dimension_numbers<[1], [0], [0], [1], [0, 0, 1, 1], [], []>} : vector<4x256xbf16>, vector<256x256xbf16>, vector<4x256xf32> -> vector<4x256xf32>
    %104 = arith.addf %99, %103 : vector<4x256xf32>
    %c0_81 = arith.constant 0 : index
    %c0_82 = arith.constant 0 : index
    %105 = vector.load %arg7[%c0_81, %c0_82] : memref<1x256xf32, #tpu.memory_space<vmem>>, vector<1x256xf32>
    %106 = vector.broadcast %105 : vector<1x256xf32> to vector<4x256xf32>
    %107 = arith.addf %104, %106 : vector<4x256xf32>
    %cst_83 = arith.constant 0.000000e+00 : f32
    %108 = vector.broadcast %cst_83 : f32 to vector<4x256xf32>
    %109 = arith.maximumf %107, %108 : vector<4x256xf32>
    %c0_84 = arith.constant 0 : index
    %c0_85 = arith.constant 0 : index
    %110 = vector.load %arg16[%c0_84, %c0_85] : memref<4x256xf32, #tpu.memory_space<vmem>>, vector<4x256xf32>
    tpu.vector_store %arg16[%c0_84, %c0_85], %109 {strides = array<i32>} : memref<4x256xf32, #tpu.memory_space<vmem>>, vector<4x256xf32>,
    %c0_86 = arith.constant 0 : index
    %c0_87 = arith.constant 0 : index
    %111 = vector.load %arg16[%c0_86, %c0_87] : memref<4x256xf32, #tpu.memory_space<vmem>>, vector<1x256xf32>
    %112 = arith.truncf %111 : vector<1x256xf32> to vector<1x256xbf16>
    %c0_88 = arith.constant 0 : index
    %c0_89 = arith.constant 0 : index
    %c0_90 = arith.constant 0 : index
    %113 = vector.load %arg8[%c0_88, %c0_89, %c0_90] : memref<4x256x512xbf16, #tpu.memory_space<vmem>>, vector<1x256x512xbf16>
    %114 = vector.shape_cast %113 : vector<1x256x512xbf16> to vector<256x512xbf16>
    %cst_91 = arith.constant dense<0.000000e+00> : vector<1x512xf32>
    %115 = tpu.matmul %112, %114, %cst_91 {dimension_numbers = #tpu.dot_dimension_numbers<[1], [0], [0], [1], [0, 0, 1, 1], [], []>} : vector<1x256xbf16>, vector<256x512xbf16>, vector<1x512xf32> -> vector<1x512xf32>
    %c1_92 = arith.constant 1 : index
    %c0_93 = arith.constant 0 : index
    %116 = vector.load %arg16[%c1_92, %c0_93] : memref<4x256xf32, #tpu.memory_space<vmem>>, vector<1x256xf32>
    %117 = arith.truncf %116 : vector<1x256xf32> to vector<1x256xbf16>
    %c1_94 = arith.constant 1 : index
    %c0_95 = arith.constant 0 : index
    %c0_96 = arith.constant 0 : index
    %118 = vector.load %arg8[%c1_94, %c0_95, %c0_96] : memref<4x256x512xbf16, #tpu.memory_space<vmem>>, vector<1x256x512xbf16>
    %119 = vector.shape_cast %118 : vector<1x256x512xbf16> to vector<256x512xbf16>
    %cst_97 = arith.constant dense<0.000000e+00> : vector<1x512xf32>
    %120 = tpu.matmul %117, %119, %cst_97 {dimension_numbers = #tpu.dot_dimension_numbers<[1], [0], [0], [1], [0, 0, 1, 1], [], []>} : vector<1x256xbf16>, vector<256x512xbf16>, vector<1x512xf32> -> vector<1x512xf32>
    %121 = arith.addf %115, %120 : vector<1x512xf32>
    %c2_98 = arith.constant 2 : index
    %c0_99 = arith.constant 0 : index
    %122 = vector.load %arg16[%c2_98, %c0_99] : memref<4x256xf32, #tpu.memory_space<vmem>>, vector<1x256xf32>
    %123 = arith.truncf %122 : vector<1x256xf32> to vector<1x256xbf16>
    %c2_100 = arith.constant 2 : index
    %c0_101 = arith.constant 0 : index
    %c0_102 = arith.constant 0 : index
    %124 = vector.load %arg8[%c2_100, %c0_101, %c0_102] : memref<4x256x512xbf16, #tpu.memory_space<vmem>>, vector<1x256x512xbf16>
    %125 = vector.shape_cast %124 : vector<1x256x512xbf16> to vector<256x512xbf16>
    %cst_103 = arith.constant dense<0.000000e+00> : vector<1x512xf32>
    %126 = tpu.matmul %123, %125, %cst_103 {dimension_numbers = #tpu.dot_dimension_numbers<[1], [0], [0], [1], [0, 0, 1, 1], [], []>} : vector<1x256xbf16>, vector<256x512xbf16>, vector<1x512xf32> -> vector<1x512xf32>
    %127 = arith.addf %121, %126 : vector<1x512xf32>
    %c3 = arith.constant 3 : index
    %c0_104 = arith.constant 0 : index
    %128 = vector.load %arg16[%c3, %c0_104] : memref<4x256xf32, #tpu.memory_space<vmem>>, vector<1x256xf32>
    %129 = arith.truncf %128 : vector<1x256xf32> to vector<1x256xbf16>
    %c3_105 = arith.constant 3 : index
    %c0_106 = arith.constant 0 : index
    %c0_107 = arith.constant 0 : index
    %130 = vector.load %arg8[%c3_105, %c0_106, %c0_107] : memref<4x256x512xbf16, #tpu.memory_space<vmem>>, vector<1x256x512xbf16>
    %131 = vector.shape_cast %130 : vector<1x256x512xbf16> to vector<256x512xbf16>
    %cst_108 = arith.constant dense<0.000000e+00> : vector<1x512xf32>
    %132 = tpu.matmul %129, %131, %cst_108 {dimension_numbers = #tpu.dot_dimension_numbers<[1], [0], [0], [1], [0, 0, 1, 1], [], []>} : vector<1x256xbf16>, vector<256x512xbf16>, vector<1x512xf32> -> vector<1x512xf32>
    %133 = arith.addf %127, %132 : vector<1x512xf32>
    %c0_109 = arith.constant 0 : index
    %c0_110 = arith.constant 0 : index
    %134 = vector.load %arg9[%c0_109, %c0_110] : memref<1x512xf32, #tpu.memory_space<vmem>>, vector<1x512xf32>
    %135 = arith.addf %133, %134 : vector<1x512xf32>
    %cst_111 = arith.constant 0.000000e+00 : f32
    %136 = vector.broadcast %cst_111 : f32 to vector<1x512xf32>
    %137 = arith.maximumf %135, %136 : vector<1x512xf32>
    %138 = arith.truncf %137 : vector<1x512xf32> to vector<1x512xbf16>
    %c0_112 = arith.constant 0 : index
    %c0_113 = arith.constant 0 : index
    %139 = vector.load %arg10[%c0_112, %c0_113] : memref<512x128xbf16, #tpu.memory_space<vmem>>, vector<512x128xbf16>
    %cst_114 = arith.constant dense<0.000000e+00> : vector<1x128xf32>
    %140 = tpu.matmul %138, %139, %cst_114 {dimension_numbers = #tpu.dot_dimension_numbers<[1], [0], [0], [1], [0, 0, 1, 1], [], []>} : vector<1x512xbf16>, vector<512x128xbf16>, vector<1x128xf32> -> vector<1x128xf32>
    %c0_115 = arith.constant 0 : index
    %c0_116 = arith.constant 0 : index
    %141 = vector.load %arg11[%c0_115, %c0_116] : memref<1x128xf32, #tpu.memory_space<vmem>>, vector<1x128xf32>
    %142 = arith.addf %140, %141 : vector<1x128xf32>
    %c0_117 = arith.constant 0 : index
    %c0_118 = arith.constant 0 : index
    %143 = vector.load %arg12[%c0_117, %c0_118] : memref<2x128xf32, #tpu.memory_space<vmem>>, vector<1x128xf32>
    tpu.vector_store %arg12[%c0_117, %c0_118], %142 {strides = array<i32>} : memref<2x128xf32, #tpu.memory_space<vmem>>, vector<1x128xf32>,
    %c16 = arith.constant 16 : index
    %c0_119 = arith.constant 0 : index
    %144 = vector.load %arg1[%c16, %c0_119] : memref<32x64xf32, #tpu.memory_space<vmem>>, vector<16x64xf32>
    %145 = arith.truncf %144 : vector<16x64xf32> to vector<16x64xbf16>
    %c19 = arith.constant 19 : index
    %c0_120 = arith.constant 0 : index
    %146 = vector.load %arg13[%c19, %c0_120] : memref<36x64xbf16, #tpu.memory_space<vmem>>, vector<16x64xbf16>
    tpu.vector_store %arg13[%c19, %c0_120], %145 {strides = array<i32>} : memref<36x64xbf16, #tpu.memory_space<vmem>>, vector<16x64xbf16>,
    %c18 = arith.constant 18 : index
    %c0_121 = arith.constant 0 : index
    %147 = vector.load %arg13[%c18, %c0_121] : memref<36x64xbf16, #tpu.memory_space<vmem>>, vector<16x64xbf16>
    %c0_122 = arith.constant 0 : index
    %c0_123 = arith.constant 0 : index
    %c0_124 = arith.constant 0 : index
    %148 = vector.load %arg2[%c0_122, %c0_123, %c0_124] : memref<3x64x512xbf16, #tpu.memory_space<vmem>>, vector<1x64x512xbf16>
    %149 = vector.shape_cast %148 : vector<1x64x512xbf16> to vector<64x512xbf16>
    %cst_125 = arith.constant dense<0.000000e+00> : vector<16x512xf32>
    %150 = tpu.matmul %147, %149, %cst_125 {dimension_numbers = #tpu.dot_dimension_numbers<[1], [0], [0], [1], [0, 0, 1, 1], [], []>} : vector<16x64xbf16>, vector<64x512xbf16>, vector<16x512xf32> -> vector<16x512xf32>
    %c19_126 = arith.constant 19 : index
    %c0_127 = arith.constant 0 : index
    %151 = vector.load %arg13[%c19_126, %c0_127] : memref<36x64xbf16, #tpu.memory_space<vmem>>, vector<16x64xbf16>
    %c1_128 = arith.constant 1 : index
    %c0_129 = arith.constant 0 : index
    %c0_130 = arith.constant 0 : index
    %152 = vector.load %arg2[%c1_128, %c0_129, %c0_130] : memref<3x64x512xbf16, #tpu.memory_space<vmem>>, vector<1x64x512xbf16>
    %153 = vector.shape_cast %152 : vector<1x64x512xbf16> to vector<64x512xbf16>
    %cst_131 = arith.constant dense<0.000000e+00> : vector<16x512xf32>
    %154 = tpu.matmul %151, %153, %cst_131 {dimension_numbers = #tpu.dot_dimension_numbers<[1], [0], [0], [1], [0, 0, 1, 1], [], []>} : vector<16x64xbf16>, vector<64x512xbf16>, vector<16x512xf32> -> vector<16x512xf32>
    %155 = arith.addf %150, %154 : vector<16x512xf32>
    %c20 = arith.constant 20 : index
    %c0_132 = arith.constant 0 : index
    %156 = vector.load %arg13[%c20, %c0_132] : memref<36x64xbf16, #tpu.memory_space<vmem>>, vector<16x64xbf16>
    %c2_133 = arith.constant 2 : index
    %c0_134 = arith.constant 0 : index
    %c0_135 = arith.constant 0 : index
    %157 = vector.load %arg2[%c2_133, %c0_134, %c0_135] : memref<3x64x512xbf16, #tpu.memory_space<vmem>>, vector<1x64x512xbf16>
    %158 = vector.shape_cast %157 : vector<1x64x512xbf16> to vector<64x512xbf16>
    %cst_136 = arith.constant dense<0.000000e+00> : vector<16x512xf32>
    %159 = tpu.matmul %156, %158, %cst_136 {dimension_numbers = #tpu.dot_dimension_numbers<[1], [0], [0], [1], [0, 0, 1, 1], [], []>} : vector<16x64xbf16>, vector<64x512xbf16>, vector<16x512xf32> -> vector<16x512xf32>
    %160 = arith.addf %155, %159 : vector<16x512xf32>
    %c0_137 = arith.constant 0 : index
    %c0_138 = arith.constant 0 : index
    %161 = vector.load %arg3[%c0_137, %c0_138] : memref<1x512xf32, #tpu.memory_space<vmem>>, vector<1x512xf32>
    %162 = vector.broadcast %161 : vector<1x512xf32> to vector<16x512xf32>
    %163 = arith.addf %160, %162 : vector<16x512xf32>
    %cst_139 = arith.constant 0.000000e+00 : f32
    %164 = vector.broadcast %cst_139 : f32 to vector<16x512xf32>
    %165 = arith.maximumf %163, %164 : vector<16x512xf32>
    %cst_140 = arith.constant dense<0.000000e+00> : vector<8x512xf32>
    %166 = tpu.matmul %12, %165, %cst_140 {dimension_numbers = #tpu.dot_dimension_numbers<[1], [0], [0], [1], [0, 0, 1, 1], [], []>} : vector<8x16xf32>, vector<16x512xf32>, vector<8x512xf32> -> vector<8x512xf32>
    %cst_141 = arith.constant dense<0.000000e+00> : vector<8x512xf32>
    %167 = tpu.matmul %19, %165, %cst_141 {dimension_numbers = #tpu.dot_dimension_numbers<[1], [0], [0], [1], [0, 0, 1, 1], [], []>} : vector<8x16xf32>, vector<16x512xf32>, vector<8x512xf32> -> vector<8x512xf32>
    %168 = arith.maximumf %166, %167 : vector<8x512xf32>
    %169 = vector.extract_strided_slice %168 {offsets = [0, 0], sizes = [8, 256], strides = [1, 1]} : vector<8x512xf32> to vector<8x256xf32>
    %170 = vector.extract_strided_slice %168 {offsets = [0, 256], sizes = [8, 256], strides = [1, 1]} : vector<8x512xf32> to vector<8x256xf32>
    %171 = arith.maximumf %169, %170 : vector<8x256xf32>
    %172 = arith.truncf %171 : vector<8x256xf32> to vector<8x256xbf16>
    %c11 = arith.constant 11 : index
    %c0_142 = arith.constant 0 : index
    %173 = vector.load %arg14[%c11, %c0_142] : memref<20x256xbf16, #tpu.memory_space<vmem>>, vector<8x256xbf16>
    tpu.vector_store %arg14[%c11, %c0_142], %172 {strides = array<i32>} : memref<20x256xbf16, #tpu.memory_space<vmem>>, vector<8x256xbf16>,
    %c10 = arith.constant 10 : index
    %c0_143 = arith.constant 0 : index
    %174 = vector.load %arg14[%c10, %c0_143] : memref<20x256xbf16, #tpu.memory_space<vmem>>, vector<8x256xbf16>
    %c0_144 = arith.constant 0 : index
    %c0_145 = arith.constant 0 : index
    %c0_146 = arith.constant 0 : index
    %175 = vector.load %arg4[%c0_144, %c0_145, %c0_146] : memref<3x256x512xbf16, #tpu.memory_space<vmem>>, vector<1x256x512xbf16>
    %176 = vector.shape_cast %175 : vector<1x256x512xbf16> to vector<256x512xbf16>
    %cst_147 = arith.constant dense<0.000000e+00> : vector<8x512xf32>
    %177 = tpu.matmul %174, %176, %cst_147 {dimension_numbers = #tpu.dot_dimension_numbers<[1], [0], [0], [1], [0, 0, 1, 1], [], []>} : vector<8x256xbf16>, vector<256x512xbf16>, vector<8x512xf32> -> vector<8x512xf32>
    %c11_148 = arith.constant 11 : index
    %c0_149 = arith.constant 0 : index
    %178 = vector.load %arg14[%c11_148, %c0_149] : memref<20x256xbf16, #tpu.memory_space<vmem>>, vector<8x256xbf16>
    %c1_150 = arith.constant 1 : index
    %c0_151 = arith.constant 0 : index
    %c0_152 = arith.constant 0 : index
    %179 = vector.load %arg4[%c1_150, %c0_151, %c0_152] : memref<3x256x512xbf16, #tpu.memory_space<vmem>>, vector<1x256x512xbf16>
    %180 = vector.shape_cast %179 : vector<1x256x512xbf16> to vector<256x512xbf16>
    %cst_153 = arith.constant dense<0.000000e+00> : vector<8x512xf32>
    %181 = tpu.matmul %178, %180, %cst_153 {dimension_numbers = #tpu.dot_dimension_numbers<[1], [0], [0], [1], [0, 0, 1, 1], [], []>} : vector<8x256xbf16>, vector<256x512xbf16>, vector<8x512xf32> -> vector<8x512xf32>
    %182 = arith.addf %177, %181 : vector<8x512xf32>
    %c12 = arith.constant 12 : index
    %c0_154 = arith.constant 0 : index
    %183 = vector.load %arg14[%c12, %c0_154] : memref<20x256xbf16, #tpu.memory_space<vmem>>, vector<8x256xbf16>
    %c2_155 = arith.constant 2 : index
    %c0_156 = arith.constant 0 : index
    %c0_157 = arith.constant 0 : index
    %184 = vector.load %arg4[%c2_155, %c0_156, %c0_157] : memref<3x256x512xbf16, #tpu.memory_space<vmem>>, vector<1x256x512xbf16>
    %185 = vector.shape_cast %184 : vector<1x256x512xbf16> to vector<256x512xbf16>
    %cst_158 = arith.constant dense<0.000000e+00> : vector<8x512xf32>
    %186 = tpu.matmul %183, %185, %cst_158 {dimension_numbers = #tpu.dot_dimension_numbers<[1], [0], [0], [1], [0, 0, 1, 1], [], []>} : vector<8x256xbf16>, vector<256x512xbf16>, vector<8x512xf32> -> vector<8x512xf32>
    %187 = arith.addf %182, %186 : vector<8x512xf32>
    %c0_159 = arith.constant 0 : index
    %c0_160 = arith.constant 0 : index
    %188 = vector.load %arg5[%c0_159, %c0_160] : memref<1x512xf32, #tpu.memory_space<vmem>>, vector<1x512xf32>
    %189 = vector.broadcast %188 : vector<1x512xf32> to vector<8x512xf32>
    %190 = arith.addf %187, %189 : vector<8x512xf32>
    %cst_161 = arith.constant 0.000000e+00 : f32
    %191 = vector.broadcast %cst_161 : f32 to vector<8x512xf32>
    %192 = arith.maximumf %190, %191 : vector<8x512xf32>
    %cst_162 = arith.constant dense<0.000000e+00> : vector<4x512xf32>
    %193 = tpu.matmul %26, %192, %cst_162 {dimension_numbers = #tpu.dot_dimension_numbers<[1], [0], [0], [1], [0, 0, 1, 1], [], []>} : vector<4x8xf32>, vector<8x512xf32>, vector<4x512xf32> -> vector<4x512xf32>
    %cst_163 = arith.constant dense<0.000000e+00> : vector<4x512xf32>
    %194 = tpu.matmul %33, %192, %cst_163 {dimension_numbers = #tpu.dot_dimension_numbers<[1], [0], [0], [1], [0, 0, 1, 1], [], []>} : vector<4x8xf32>, vector<8x512xf32>, vector<4x512xf32> -> vector<4x512xf32>
    %195 = arith.maximumf %193, %194 : vector<4x512xf32>
    %196 = vector.extract_strided_slice %195 {offsets = [0, 0], sizes = [4, 256], strides = [1, 1]} : vector<4x512xf32> to vector<4x256xf32>
    %197 = vector.extract_strided_slice %195 {offsets = [0, 256], sizes = [4, 256], strides = [1, 1]} : vector<4x512xf32> to vector<4x256xf32>
    %198 = arith.maximumf %196, %197 : vector<4x256xf32>
    %199 = arith.truncf %198 : vector<4x256xf32> to vector<4x256xbf16>
    %c7 = arith.constant 7 : index
    %c0_164 = arith.constant 0 : index
    %200 = vector.load %arg15[%c7, %c0_164] : memref<12x256xbf16, #tpu.memory_space<vmem>>, vector<4x256xbf16>
    tpu.vector_store %arg15[%c7, %c0_164], %199 {strides = array<i32>} : memref<12x256xbf16, #tpu.memory_space<vmem>>, vector<4x256xbf16>,
    %c6 = arith.constant 6 : index
    %c0_165 = arith.constant 0 : index
    %201 = vector.load %arg15[%c6, %c0_165] : memref<12x256xbf16, #tpu.memory_space<vmem>>, vector<4x256xbf16>
    %c0_166 = arith.constant 0 : index
    %c0_167 = arith.constant 0 : index
    %c0_168 = arith.constant 0 : index
    %202 = vector.load %arg6[%c0_166, %c0_167, %c0_168] : memref<3x256x256xbf16, #tpu.memory_space<vmem>>, vector<1x256x256xbf16>
    %203 = vector.shape_cast %202 : vector<1x256x256xbf16> to vector<256x256xbf16>
    %cst_169 = arith.constant dense<0.000000e+00> : vector<4x256xf32>
    %204 = tpu.matmul %201, %203, %cst_169 {dimension_numbers = #tpu.dot_dimension_numbers<[1], [0], [0], [1], [0, 0, 1, 1], [], []>} : vector<4x256xbf16>, vector<256x256xbf16>, vector<4x256xf32> -> vector<4x256xf32>
    %c7_170 = arith.constant 7 : index
    %c0_171 = arith.constant 0 : index
    %205 = vector.load %arg15[%c7_170, %c0_171] : memref<12x256xbf16, #tpu.memory_space<vmem>>, vector<4x256xbf16>
    %c1_172 = arith.constant 1 : index
    %c0_173 = arith.constant 0 : index
    %c0_174 = arith.constant 0 : index
    %206 = vector.load %arg6[%c1_172, %c0_173, %c0_174] : memref<3x256x256xbf16, #tpu.memory_space<vmem>>, vector<1x256x256xbf16>
    %207 = vector.shape_cast %206 : vector<1x256x256xbf16> to vector<256x256xbf16>
    %cst_175 = arith.constant dense<0.000000e+00> : vector<4x256xf32>
    %208 = tpu.matmul %205, %207, %cst_175 {dimension_numbers = #tpu.dot_dimension_numbers<[1], [0], [0], [1], [0, 0, 1, 1], [], []>} : vector<4x256xbf16>, vector<256x256xbf16>, vector<4x256xf32> -> vector<4x256xf32>
    %209 = arith.addf %204, %208 : vector<4x256xf32>
    %c8 = arith.constant 8 : index
    %c0_176 = arith.constant 0 : index
    %210 = vector.load %arg15[%c8, %c0_176] : memref<12x256xbf16, #tpu.memory_space<vmem>>, vector<4x256xbf16>
    %c2_177 = arith.constant 2 : index
    %c0_178 = arith.constant 0 : index
    %c0_179 = arith.constant 0 : index
    %211 = vector.load %arg6[%c2_177, %c0_178, %c0_179] : memref<3x256x256xbf16, #tpu.memory_space<vmem>>, vector<1x256x256xbf16>
    %212 = vector.shape_cast %211 : vector<1x256x256xbf16> to vector<256x256xbf16>
    %cst_180 = arith.constant dense<0.000000e+00> : vector<4x256xf32>
    %213 = tpu.matmul %210, %212, %cst_180 {dimension_numbers = #tpu.dot_dimension_numbers<[1], [0], [0], [1], [0, 0, 1, 1], [], []>} : vector<4x256xbf16>, vector<256x256xbf16>, vector<4x256xf32> -> vector<4x256xf32>
    %214 = arith.addf %209, %213 : vector<4x256xf32>
    %c0_181 = arith.constant 0 : index
    %c0_182 = arith.constant 0 : index
    %215 = vector.load %arg7[%c0_181, %c0_182] : memref<1x256xf32, #tpu.memory_space<vmem>>, vector<1x256xf32>
    %216 = vector.broadcast %215 : vector<1x256xf32> to vector<4x256xf32>
    %217 = arith.addf %214, %216 : vector<4x256xf32>
    %cst_183 = arith.constant 0.000000e+00 : f32
    %218 = vector.broadcast %cst_183 : f32 to vector<4x256xf32>
    %219 = arith.maximumf %217, %218 : vector<4x256xf32>
    %c0_184 = arith.constant 0 : index
    %c0_185 = arith.constant 0 : index
    %220 = vector.load %arg16[%c0_184, %c0_185] : memref<4x256xf32, #tpu.memory_space<vmem>>, vector<4x256xf32>
    tpu.vector_store %arg16[%c0_184, %c0_185], %219 {strides = array<i32>} : memref<4x256xf32, #tpu.memory_space<vmem>>, vector<4x256xf32>,
    %c0_186 = arith.constant 0 : index
    %c0_187 = arith.constant 0 : index
    %221 = vector.load %arg16[%c0_186, %c0_187] : memref<4x256xf32, #tpu.memory_space<vmem>>, vector<1x256xf32>
    %222 = arith.truncf %221 : vector<1x256xf32> to vector<1x256xbf16>
    %c0_188 = arith.constant 0 : index
    %c0_189 = arith.constant 0 : index
    %c0_190 = arith.constant 0 : index
    %223 = vector.load %arg8[%c0_188, %c0_189, %c0_190] : memref<4x256x512xbf16, #tpu.memory_space<vmem>>, vector<1x256x512xbf16>
    %224 = vector.shape_cast %223 : vector<1x256x512xbf16> to vector<256x512xbf16>
    %cst_191 = arith.constant dense<0.000000e+00> : vector<1x512xf32>
    %225 = tpu.matmul %222, %224, %cst_191 {dimension_numbers = #tpu.dot_dimension_numbers<[1], [0], [0], [1], [0, 0, 1, 1], [], []>} : vector<1x256xbf16>, vector<256x512xbf16>, vector<1x512xf32> -> vector<1x512xf32>
    %c1_192 = arith.constant 1 : index
    %c0_193 = arith.constant 0 : index
    %226 = vector.load %arg16[%c1_192, %c0_193] : memref<4x256xf32, #tpu.memory_space<vmem>>, vector<1x256xf32>
    %227 = arith.truncf %226 : vector<1x256xf32> to vector<1x256xbf16>
    %c1_194 = arith.constant 1 : index
    %c0_195 = arith.constant 0 : index
    %c0_196 = arith.constant 0 : index
    %228 = vector.load %arg8[%c1_194, %c0_195, %c0_196] : memref<4x256x512xbf16, #tpu.memory_space<vmem>>, vector<1x256x512xbf16>
    %229 = vector.shape_cast %228 : vector<1x256x512xbf16> to vector<256x512xbf16>
    %cst_197 = arith.constant dense<0.000000e+00> : vector<1x512xf32>
    %230 = tpu.matmul %227, %229, %cst_197 {dimension_numbers = #tpu.dot_dimension_numbers<[1], [0], [0], [1], [0, 0, 1, 1], [], []>} : vector<1x256xbf16>, vector<256x512xbf16>, vector<1x512xf32> -> vector<1x512xf32>
    %231 = arith.addf %225, %230 : vector<1x512xf32>
    %c2_198 = arith.constant 2 : index
    %c0_199 = arith.constant 0 : index
    %232 = vector.load %arg16[%c2_198, %c0_199] : memref<4x256xf32, #tpu.memory_space<vmem>>, vector<1x256xf32>
    %233 = arith.truncf %232 : vector<1x256xf32> to vector<1x256xbf16>
    %c2_200 = arith.constant 2 : index
    %c0_201 = arith.constant 0 : index
    %c0_202 = arith.constant 0 : index
    %234 = vector.load %arg8[%c2_200, %c0_201, %c0_202] : memref<4x256x512xbf16, #tpu.memory_space<vmem>>, vector<1x256x512xbf16>
    %235 = vector.shape_cast %234 : vector<1x256x512xbf16> to vector<256x512xbf16>
    %cst_203 = arith.constant dense<0.000000e+00> : vector<1x512xf32>
    %236 = tpu.matmul %233, %235, %cst_203 {dimension_numbers = #tpu.dot_dimension_numbers<[1], [0], [0], [1], [0, 0, 1, 1], [], []>} : vector<1x256xbf16>, vector<256x512xbf16>, vector<1x512xf32> -> vector<1x512xf32>
    %237 = arith.addf %231, %236 : vector<1x512xf32>
    %c3_204 = arith.constant 3 : index
    %c0_205 = arith.constant 0 : index
    %238 = vector.load %arg16[%c3_204, %c0_205] : memref<4x256xf32, #tpu.memory_space<vmem>>, vector<1x256xf32>
    %239 = arith.truncf %238 : vector<1x256xf32> to vector<1x256xbf16>
    %c3_206 = arith.constant 3 : index
    %c0_207 = arith.constant 0 : index
    %c0_208 = arith.constant 0 : index
    %240 = vector.load %arg8[%c3_206, %c0_207, %c0_208] : memref<4x256x512xbf16, #tpu.memory_space<vmem>>, vector<1x256x512xbf16>
    %241 = vector.shape_cast %240 : vector<1x256x512xbf16> to vector<256x512xbf16>
    %cst_209 = arith.constant dense<0.000000e+00> : vector<1x512xf32>
    %242 = tpu.matmul %239, %241, %cst_209 {dimension_numbers = #tpu.dot_dimension_numbers<[1], [0], [0], [1], [0, 0, 1, 1], [], []>} : vector<1x256xbf16>, vector<256x512xbf16>, vector<1x512xf32> -> vector<1x512xf32>
    %243 = arith.addf %237, %242 : vector<1x512xf32>
    %c0_210 = arith.constant 0 : index
    %c0_211 = arith.constant 0 : index
    %244 = vector.load %arg9[%c0_210, %c0_211] : memref<1x512xf32, #tpu.memory_space<vmem>>, vector<1x512xf32>
    %245 = arith.addf %243, %244 : vector<1x512xf32>
    %cst_212 = arith.constant 0.000000e+00 : f32
    %246 = vector.broadcast %cst_212 : f32 to vector<1x512xf32>
    %247 = arith.maximumf %245, %246 : vector<1x512xf32>
    %248 = arith.truncf %247 : vector<1x512xf32> to vector<1x512xbf16>
    %c0_213 = arith.constant 0 : index
    %c0_214 = arith.constant 0 : index
    %249 = vector.load %arg10[%c0_213, %c0_214] : memref<512x128xbf16, #tpu.memory_space<vmem>>, vector<512x128xbf16>
    %cst_215 = arith.constant dense<0.000000e+00> : vector<1x128xf32>
    %250 = tpu.matmul %248, %249, %cst_215 {dimension_numbers = #tpu.dot_dimension_numbers<[1], [0], [0], [1], [0, 0, 1, 1], [], []>} : vector<1x512xbf16>, vector<512x128xbf16>, vector<1x128xf32> -> vector<1x128xf32>
    %c0_216 = arith.constant 0 : index
    %c0_217 = arith.constant 0 : index
    %251 = vector.load %arg11[%c0_216, %c0_217] : memref<1x128xf32, #tpu.memory_space<vmem>>, vector<1x128xf32>
    %252 = arith.addf %250, %251 : vector<1x128xf32>
    %c1_218 = arith.constant 1 : index
    %c0_219 = arith.constant 0 : index
    %253 = vector.load %arg12[%c1_218, %c0_219] : memref<2x128xf32, #tpu.memory_space<vmem>>, vector<1x128xf32>
    tpu.vector_store %arg12[%c1_218, %c0_219], %252 {strides = array<i32>} : memref<2x128xf32, #tpu.memory_space<vmem>>, vector<1x128xf32>,
    return
  }
  func.func @transform_0(%arg0: i32) -> (i32, i32) {
    %c0_i32 = arith.constant 0 : i32
    %c0_i32_0 = arith.constant 0 : i32
    %c0_i32_1 = arith.constant 0 : i32
    return %c0_i32, %c0_i32_0 : i32, i32
  }
  func.func @transform_1(%arg0: i32) -> (i32, i32, i32) {
    %c0_i32 = arith.constant 0 : i32
    %c0_i32_0 = arith.constant 0 : i32
    %c0_i32_1 = arith.constant 0 : i32
    %c0_i32_2 = arith.constant 0 : i32
    return %c0_i32, %c0_i32_0, %c0_i32_1 : i32, i32, i32
  }
  func.func @transform_2(%arg0: i32) -> (i32, i32) {
    %c0_i32 = arith.constant 0 : i32
    %c0_i32_0 = arith.constant 0 : i32
    %c0_i32_1 = arith.constant 0 : i32
    return %c0_i32, %c0_i32_0 : i32, i32
  }
  func.func @transform_3(%arg0: i32) -> (i32, i32, i32) {
    %c0_i32 = arith.constant 0 : i32
    %c0_i32_0 = arith.constant 0 : i32
    %c0_i32_1 = arith.constant 0 : i32
    %c0_i32_2 = arith.constant 0 : i32
    return %c0_i32, %c0_i32_0, %c0_i32_1 : i32, i32, i32
  }
  func.func @transform_4(%arg0: i32) -> (i32, i32) {
    %c0_i32 = arith.constant 0 : i32
    %c0_i32_0 = arith.constant 0 : i32
    %c0_i32_1 = arith.constant 0 : i32
    return %c0_i32, %c0_i32_0 : i32, i32
  }
  func.func @transform_5(%arg0: i32) -> (i32, i32, i32) {
    %c0_i32 = arith.constant 0 : i32
    %c0_i32_0 = arith.constant 0 : i32
    %c0_i32_1 = arith.constant 0 : i32
    %c0_i32_2 = arith.constant 0 : i32
    return %c0_i32, %c0_i32_0, %c0_i32_1 : i32, i32, i32
  }
  func.func @transform_6(%arg0: i32) -> (i32, i32) {
    %c0_i32 = arith.constant 0 : i32
    %c0_i32_0 = arith.constant 0 : i32
    %c0_i32_1 = arith.constant 0 : i32
    return %c0_i32, %c0_i32_0 : i32, i32
  }
  func.func @transform_7(%arg0: i32) -> (i32, i32, i32) {
    %c0_i32 = arith.constant 0 : i32
    %c0_i32_0 = arith.constant 0 : i32
    %c0_i32_1 = arith.constant 0 : i32
    %c0_i32_2 = arith.constant 0 : i32
    return %c0_i32, %c0_i32_0, %c0_i32_1 : i32, i32, i32
  }
  func.func @transform_8(%arg0: i32) -> (i32, i32) {
    %c0_i32 = arith.constant 0 : i32
    %c0_i32_0 = arith.constant 0 : i32
    %c0_i32_1 = arith.constant 0 : i32
    return %c0_i32, %c0_i32_0 : i32, i32
  }
  func.func @transform_9(%arg0: i32) -> (i32, i32) {
    %c0_i32 = arith.constant 0 : i32
    %c0_i32_0 = arith.constant 0 : i32
    %c0_i32_1 = arith.constant 0 : i32
    return %c0_i32, %c0_i32_0 : i32, i32
  }
  func.func @transform_10(%arg0: i32) -> (i32, i32) {
    %c0_i32 = arith.constant 0 : i32
    %c0_i32_0 = arith.constant 0 : i32
    %c0_i32_1 = arith.constant 0 : i32
    return %c0_i32, %c0_i32_0 : i32, i32
  }
  func.func @transform_11(%arg0: i32) -> (i32, i32) {
    %c0_i32 = arith.constant 0 : i32
    %c0_i32_0 = arith.constant 0 : i32
    %c0_i32_1 = arith.constant 0 : i32
    return %c0_i32, %c0_i32_0 : i32, i32
  }
}

</mosaic_0001>

<bundles_post_ra>
// kernel: forward.1
= control target key start
LH: loop header
LB: loop body
LE: loop exit
PB: predicated region body
PF: predicated region fallthrough
CT: control target
= control target key end

     0   :  { %16 = vsyncpa [#allocation7], 0  ;;  %s16244_s0 = inlined_call_operand.vmem [shape: f32[32,64], index: 0, kind: input, shape index: {}]   ;;  %s16245_s1 = inlined_call_operand.vmem [shape: bf16[3,64,512], index: 1, kind: input, shape index: {}]   ;;  %s16246_s2 = inlined_call_operand.vmem [shape: f32[1,512], index: 2, kind: input, shape index: {}]   ;;  %s16247_s3 = inlined_call_operand.hbm [shape: bf16[3,256,512], index: 3, kind: input, shape index: {}]   ;;  %s16248_s4 = inlined_call_operand.vmem [shape: f32[1,512], index: 4, kind: input, shape index: {}]   ;;  %s16249_s5 = inlined_call_operand.hbm [shape: bf16[3,256,256], index: 5, kind: input, shape index: {}]   ;;  %s16250_s6 = inlined_call_operand.vmem [shape: f32[1,256], index: 6, kind: input, shape index: {}]   ;;  %s16251_s7 = inlined_call_operand.hbm [shape: bf16[4,256,512], index: 7, kind: input, shape index: {}]   ;;  %s16252_s8 = inlined_call_operand.vmem [shape: f32[1,512], index: 8, kind: input, shape index: {}]   ;;  %s16253_s9 = inlined_call_operand.hbm [shape: bf16[512,128], index: 9, kind: input, shape index: {}]   ;;  %s16254_s10 = inlined_call_operand.vmem [shape: f32[1,128], index: 10, kind: input, shape index: {}]   ;;  %s16255_s11 = inlined_call_operand.hbm [shape: f32[2,128], index: 11, kind: output, shape index: {}]  }
   0x1   :  { %17 = vsyncpa [#allocation10], 0 }
   0x2   :  { %18 = vsyncpa [#allocation13], 0 }
   0x3   :  { %19 = vsyncpa [#allocation8], 0  ;;  %s15430_s17 = smov [#allocation9]   ;;  %s15312_s21 = scalar_lea.hbm %s16249_s5, 12288 }
   0x4   :  { %s45_s18 = sshll.u32 %s15430_s17, 4  ;;  %p15313_p0 = scmp.ne.s32.totalorder %s16249_s5, %s15312_s21  ;;  %s46_s18 = int_to_ptr.vmem [resolvable:$true] %s45_s18 }
   0x5   :  { %p15316_p1 = scmp.lt.u32.totalorder %s15312_s21, %s16249_s5 }
   0x7   :  { %p15318_p2 = pnand %p15316_p1, %p15313_p0 }
   0x9   :  { %15321 = shalt.err (!%p15318_p2)
}
   0xa   :  { %s15322_s26 = scalar_lea.vmem %s46_s18, 12288  ;;  %p15327_p4 = scmp.lt.s32.totalorder %s46_s18, %s46_s18 }
   0xb   :  { %p15323_p3 = scmp.ne.s32.totalorder %s46_s18, %s15322_s26  ;;  %p15328_p5 = scmp.lt.s32.totalorder %s15322_s26, %s15322_s26 }
   0xd   :  { %p15329_p6 = por %p15328_p5, %p15327_p4 }
   0xf   :  { %p15330_p7 = pnand %p15329_p6, %p15323_p3 }
  0x11   :  { %15333 = shalt.err (!%p15330_p7)
}
  0x12   :  { %s15431_s27 = smov 128   ;;  %s15432_s28 = smov 8  }
  0x13   :  { %51 = dma.hbm_to_vmem [thread:$0]  %s16249_s5, 12288, %s46_s18, [#allocation10], %s15431_s27, %s15431_s27, %s15432_s28  }
  0x14   :  { %s15433_s12 = smov [#allocation6]   ;;  %s15334_s16 = scalar_lea.hbm %s16247_s3, 24576 }
  0x15   :  { %s31_s13 = sshll.u32 %s15433_s12, 4  ;;  %p15335_p8 = scmp.ne.s32.totalorder %s16247_s3, %s15334_s16  ;;  %s32_s13 = int_to_ptr.vmem [resolvable:$true] %s31_s13 }
  0x16   :  { %p15338_p9 = scmp.lt.u32.totalorder %s15334_s16, %s16247_s3 }
  0x18   :  { %p15340_p10 = pnand %p15338_p9, %p15335_p8 }
  0x1a   :  { %15343 = shalt.err (!%p15340_p10)
}
  0x1b   :  { %s15344_s22 = scalar_lea.vmem %s32_s13, 24576  ;;  %p15349_p12 = scmp.lt.s32.totalorder %s32_s13, %s32_s13 }
  0x1c   :  { %p15345_p11 = scmp.ne.s32.totalorder %s32_s13, %s15344_s22  ;;  %p15350_p13 = scmp.lt.s32.totalorder %s15344_s22, %s15344_s22 }
  0x1e   :  { %p15351_p0 = por %p15350_p13, %p15349_p12 }
  0x20   :  { %p15352_p1 = pnand %p15351_p0, %p15345_p11 }
  0x22   :  { %15355 = shalt.err (!%p15352_p1)
}
  0x23   :  { %s15434_s5 = smov 256   ;;  %s15435_s18 = smov 16  }
  0x24   :  { %37 = dma.hbm_to_vmem [thread:$0]  %s16247_s3, 24576, %s32_s13, [#allocation7], %s15434_s5, %s15434_s5, %s15435_s18  }
  0x25   :  { %s15436_s25 = smov [#allocation11]   ;;  %s15437_s27 = smov [#allocation12]  }
  0x26   :  { %s59_s26 = sshll.u32 %s15436_s25, 4  ;;  %s73_s28 = sshll.u32 %s15437_s27, 4  ;;  %s60_s26 = int_to_ptr.vmem [resolvable:$true] %s59_s26  ;;  %s15527_s28 = int_to_ptr.vmem [resolvable:$true] %s73_s28 }
  0x27   :  { %s15356_s12 = scalar_lea.hbm %s16251_s7, 32768 }
  0x28   :  { %p15357_p2 = scmp.ne.s32.totalorder %s16251_s7, %s15356_s12  ;;  %p15360_p3 = scmp.lt.u32.totalorder %s15356_s12, %s16251_s7 }
  0x2a   :  { %p15362_p4 = pnand %p15360_p3, %p15357_p2 }
  0x2c   :  { %15365 = shalt.err (!%p15362_p4)
}
  0x2d   :  { %s15366_s3 = scalar_lea.vmem %s60_s26, 32768  ;;  %p15371_p6 = scmp.lt.s32.totalorder %s60_s26, %s60_s26 }
  0x2e   :  { %p15367_p5 = scmp.ne.s32.totalorder %s60_s26, %s15366_s3  ;;  %p15372_p7 = scmp.lt.s32.totalorder %s15366_s3, %s15366_s3 }
  0x30   :  { %p15373_p8 = por %p15372_p7, %p15371_p6 }
  0x32   :  { %p15374_p9 = pnand %p15373_p8, %p15367_p5 }
  0x34   :  { %15377 = shalt.err (!%p15374_p9)
}
  0x35   :  { %65 = dma.hbm_to_vmem [thread:$0]  %s16251_s7, 32768, %s60_s26, [#allocation10], %s15434_s5, %s15434_s5, %s15435_s18  }
  0x36   :  { %s15378_s22 = scalar_lea.hbm %s16253_s9, 4096 }
  0x37   :  { %p15379_p10 = scmp.ne.s32.totalorder %s16253_s9, %s15378_s22  ;;  %p15382_p11 = scmp.lt.u32.totalorder %s15378_s22, %s16253_s9 }
  0x39   :  { %p15384_p12 = pnand %p15382_p11, %p15379_p10 }
  0x3b   :  { %15387 = shalt.err (!%p15384_p12)
}
  0x3c   :  { %s15388_s29 = scalar_lea.vmem %s15527_s28, 4096  ;;  %p15393_p0 = scmp.lt.s32.totalorder %s15527_s28, %s15527_s28 }
  0x3d   :  { %p15389_p13 = scmp.ne.s32.totalorder %s15527_s28, %s15388_s29  ;;  %p15394_p1 = scmp.lt.s32.totalorder %s15388_s29, %s15388_s29 }
  0x3f   :  { %p15395_p2 = por %p15394_p1, %p15393_p0 }
  0x41   :  { %p15396_p3 = pnand %p15395_p2, %p15389_p13 }
  0x43   :  { %15399 = shalt.err (!%p15396_p3)
}
  0x44   :  { %s15438_s7 = smov 64   ;;  %s15439_s5 = smov 4  }
  0x45   :  { %79 = dma.hbm_to_vmem [thread:$0]  %s16253_s9, 4096, %s15527_s28, [#allocation13], %s15438_s7, %s15438_s7, %s15439_s5  }
  0x46   :  { %15422 = dma.done.wait [#allocation7], 24576  }
  0x47   :  { %15423 = vsyncadd [#allocation7], 4294942720 }
  0x48   :  { %15424 = dma.done.wait [#allocation10], 45056  }
  0x49   :  { %15425 = vsyncadd [#allocation10], 4294922240 }
  0x4a   :  { %15426 = dma.done.wait [#allocation13], 4096  }
  0x4b   :  { %15427 = vsyncadd [#allocation13], 4294963200  ;;  %vm95_vm0 = vcmask 519168   ;;  %v15440_v0 = vmov 0   ;;  %v13445_v1 = vld [vmem:[%s16245_s1 + $0x84] ss:$16 sps:$4 sm:$0xff]  }
  0x4c   :  { %335 = vmatprep.mubr.bf16.mxu0 %v15440_v0  ;;  %103 = vst [vmem:[#allocation3 + $0x8] sm:$0xff] %v15440_v0  ;;  %104 = vst [vmem:[#allocation3 + $0x10] sm:$0x33] %v15440_v0  ;;  %378 = vmatprep.mubr.bf16.mxu1 %v15440_v0  ;;  %v13447_v2 = vld [vmem:[%s16245_s1 + $0x8c] ss:$16 sps:$4 sm:$0xff]   ;;  %v119_v19 = vld [vmem:[%s16244_s0] sm:$0xff] }
  0x4d   :  { %105 = vst [vmem:[#allocation4] sm:$0xff] %v15440_v0  ;;  %106 = vst [vmem:[#allocation4 + $0x8] sm:$0x33] %v15440_v0  ;;  %303 = vmatprep.subr.bf16.mxu0 %v13445_v1  ;;  %v13449_v3 = vld [vmem:[%s16245_s1 + $0x80] ss:$16 sps:$4 sm:$0xff]   ;;  %346 = vmatprep.subr.bf16.mxu1 %v13447_v2  ;;  %v120_v20 = vld [vmem:[%s16244_s0 + $0x8] sm:$0xff]  ;;  %v13272_v21 = vpack.c.bf16 %v119_v19, %v119_v19 }
  0x4e   :  { %96 = vst.msk [vmem:[#allocation2] sm:$0xf] %vm95_vm0, %v15440_v0  ;;  %97 = vst.msk [vmem:[#allocation2 + $0x4] sm:$0xf] %vm95_vm0, %v15440_v0  ;;  %v13450_v4 = vld [vmem:[%s16245_s1 + $0x88] ss:$16 sps:$4 sm:$0xff]   ;;  %304 = vmatpush1.bf16.msra.mxu0 %v13449_v3  ;;  %v13273_v22 = vpack.c.bf16 %v120_v20, %v120_v20 }
  0x4f   :  { %98 = vst.msk [vmem:[#allocation2 + $0x8] sm:$0xf] %vm95_vm0, %v15440_v0  ;;  %99 = vst.msk [vmem:[#allocation2 + $0xc] sm:$0xf] %vm95_vm0, %v15440_v0  ;;  %v13451_v5 = vld [vmem:[%s16245_s1 + $0xa4] ss:$16 sps:$4 sm:$0xff]   ;;  %347 = vmatpush1.bf16.msra.mxu1 %v13450_v4 }
  0x50   :  { %v13453_v6 = vld [vmem:[%s16245_s1 + $0xac] ss:$16 sps:$4 sm:$0xff]   ;;  %v13455_v7 = vld [vmem:[%s16245_s1 + $0xa0] ss:$16 sps:$4 sm:$0xff]   ;;  %305 = vmatprep.subr.bf16.mxu0 %v13451_v5  ;;  %v13456_v8 = vld [vmem:[%s16245_s1 + $0xa8] ss:$16 sps:$4 sm:$0xff]  }
  0x51   :  { %348 = vmatprep.subr.bf16.mxu1 %v13453_v6  ;;  %v13457_v9 = vld [vmem:[%s16245_s1 + $0xc4] ss:$16 sps:$4 sm:$0xff]   ;;  %v13459_v10 = vld [vmem:[%s16245_s1 + $0xcc] ss:$16 sps:$4 sm:$0xff]   ;;  %v13461_v11 = vld [vmem:[%s16245_s1 + $0xc0] ss:$16 sps:$4 sm:$0xff]  }
  0x52   :  { %v13462_v12 = vld [vmem:[%s16245_s1 + $0xc8] ss:$16 sps:$4 sm:$0xff]   ;;  %306 = vmatpush1.bf16.msra.mxu0 %v13455_v7  ;;  %v13463_v13 = vld [vmem:[%s16245_s1 + $0xe4] ss:$16 sps:$4 sm:$0xff]   ;;  %v13465_v14 = vld [vmem:[%s16245_s1 + $0xec] ss:$16 sps:$4 sm:$0xff]  }
  0x53   :  { %349 = vmatpush1.bf16.msra.mxu1 %v13456_v8  ;;  %307 = vmatprep.subr.bf16.mxu0 %v13457_v9  ;;  %v13467_v15 = vld [vmem:[%s16245_s1 + $0xe0] ss:$16 sps:$4 sm:$0xff]   ;;  %v13468_v16 = vld [vmem:[%s16245_s1 + $0xe8] ss:$16 sps:$4 sm:$0xff]   ;;  %v13471_v17 = vld [vmem:[%s16245_s1 + $0x4] ss:$16 sps:$4 sm:$0xff]  }
  0x54   :  { %350 = vmatprep.subr.bf16.mxu1 %v13459_v10  ;;  %vm127_vm1 = vsmask.f32 256  ;;  %v13474_v18 = vld [vmem:[%s16245_s1 + $0xc] ss:$16 sps:$4 sm:$0xff]   ;;  %vm128_vm2 = vsmask.f32 4368 }
  0x55   :  { %vm151_vm3 = vsmask.f32 7938  ;;  %vm157_vm4 = vcmask 516096   ;;  %vm15633_vm5 = vmor %vm127_vm1, %vm128_vm2  ;;  %v131_v24 = vshrl.u32 %v13272_v21, 16  ;;  %v134_v25 = vshll.u32 %v13272_v21, 16  ;;  %s15442_s12 = smov [#allocation14]  }
  0x56   :  { %308 = vmatpush1.bf16.msra.mxu0 %v13461_v11  ;;  %v139_v26 = vshrl.u32 %v13273_v22, 16  ;;  %v142_v27 = vshll.u32 %v13273_v22, 16  ;;  %vm152_vm6 = vmand %vm95_vm0, %vm151_vm3  ;;  %v153_v30 = vld [vmem:[#allocation2] sm:$0xf]  ;;  %v159_v31 = vld [vmem:[#allocation2 + $0x8] sm:$0x1]  ;;  %v107_v22 = vlaneseq }
  0x57   :  { %351 = vmatpush1.bf16.msra.mxu1 %v13462_v12  ;;  %309 = vmatprep.subr.bf16.mxu0 %v13463_v13  ;;  %v133_v28 = vrot.slane %v131_v24, 7  ;;  %vm158_vm7 = vmand %vm157_vm4, %vm127_vm1  ;;  %v13469_v46 = vld [vmem:[%s16245_s1] ss:$16 sps:$4 sm:$0xff]   ;;  %v13472_v47 = vld [vmem:[%s16245_s1 + $0x8] ss:$16 sps:$4 sm:$0xff]   ;;  %vm299_vm9 = vcmask 523264  }
  0x58   :  { %352 = vmatprep.subr.bf16.mxu1 %v13465_v14  ;;  %v141_v29 = vrot.slane %v139_v26, 7  ;;  %vm206_vm8 = vsmask.f32 7424  ;;  %v13479_v50 = vld [vmem:[%s16245_s1 + $0x24] ss:$16 sps:$4 sm:$0xff]   ;;  %vm16257_vm10 = vcmask 1046528  }
  0x59   :  { %v136_v32 = vor.u32 %v134_v25, %v133_v28  ;;  %v137_v33 = vrot.slane %v133_v28, 4  ;;  %v13482_v51 = vld [vmem:[%s16245_s1 + $0x2c] ss:$16 sps:$4 sm:$0xff]   ;;  %v13477_v54 = vld [vmem:[%s16245_s1 + $0x20] ss:$16 sps:$4 sm:$0xff]   ;;  %v15441_v21 = vmov 0.0  }
  0x5a   :  { %310 = vmatpush1.bf16.msra.mxu0 %v13467_v15  ;;  %v144_v34 = vor.u32 %v142_v27, %v141_v29  ;;  %v146_v35 = vrot.slane %v141_v29, 4  ;;  %v13480_v55 = vld [vmem:[%s16245_s1 + $0x28] ss:$16 sps:$4 sm:$0xff]   ;;  %v13485_v56 = vld [vmem:[%s16245_s1 + $0x44] ss:$16 sps:$4 sm:$0xff]   ;;  %v108_v23 = vshrl.u32 %v107_v22, 7 }
  0x5b   :  { %353 = vmatpush1.bf16.msra.mxu1 %v13468_v16  ;;  %471 = vmatprep.subr.bf16.mxu0 %v13471_v17  ;;  %v154_v37 = vsel %vm152_vm6, %v136_v32, %v153_v30  ;;  %v13488_v57 = vld [vmem:[%s16245_s1 + $0x4c] ss:$16 sps:$4 sm:$0xff]   ;;  %v13483_v58 = vld [vmem:[%s16245_s1 + $0x40] ss:$16 sps:$4 sm:$0xff]   ;;  %v13486_v59 = vld [vmem:[%s16245_s1 + $0x48] ss:$16 sps:$4 sm:$0xff]  }
  0x5c   :  { %514 = vmatprep.subr.bf16.mxu1 %v13474_v18  ;;  %v145_v36 = vsel %vm15633_vm5, %v137_v33, %v144_v34  ;;  %v160_v38 = vsel %vm158_vm7, %v146_v35, %v159_v31  ;;  %155 = vst [vmem:[#allocation2] sm:$0xf] %v154_v37  ;;  %v13491_v60 = vld [vmem:[%s16245_s1 + $0x64] ss:$16 sps:$4 sm:$0xff]   ;;  %v13494_v61 = vld [vmem:[%s16245_s1 + $0x6c] ss:$16 sps:$4 sm:$0xff]  }
  0x5d   :  { %156 = vst.msk [vmem:[#allocation2 + $0x4] sm:$0xf] %vm95_vm0, %v145_v36  ;;  %161 = vst [vmem:[#allocation2 + $0x8] sm:$0x1] %v160_v38  ;;  %v13489_v62 = vld [vmem:[%s16245_s1 + $0x60] ss:$16 sps:$4 sm:$0xff]  }
  0x5e   :  { %v13492_v63 = vld [vmem:[%s16245_s1 + $0x68] ss:$16 sps:$4 sm:$0xff]   ;;  %v13497_v1 = vld [vmem:[%s16245_s1 + $0x104] ss:$16 sps:$4 sm:$0xff]   ;;  %v13500_v2 = vld [vmem:[%s16245_s1 + $0x10c] ss:$16 sps:$4 sm:$0xff]  }
  0x5f   :  { %v13495_v3 = vld [vmem:[%s16245_s1 + $0x100] ss:$16 sps:$4 sm:$0xff]   ;;  %v13498_v4 = vld [vmem:[%s16245_s1 + $0x108] ss:$16 sps:$4 sm:$0xff]   ;;  %v13503_v5 = vld [vmem:[%s16245_s1 + $0x124] ss:$16 sps:$4 sm:$0xff]  }
  0x60   :  { %v13506_v6 = vld [vmem:[%s16245_s1 + $0x12c] ss:$16 sps:$4 sm:$0xff]   ;;  %v13501_v7 = vld [vmem:[%s16245_s1 + $0x120] ss:$16 sps:$4 sm:$0xff]   ;;  %v13504_v8 = vld [vmem:[%s16245_s1 + $0x128] ss:$16 sps:$4 sm:$0xff]  }
  0x61   :  { %v13509_v9 = vld [vmem:[%s16245_s1 + $0x144] ss:$16 sps:$4 sm:$0xff]   ;;  %v13512_v10 = vld [vmem:[%s16245_s1 + $0x14c] ss:$16 sps:$4 sm:$0xff]   ;;  %v13507_v12 = vld [vmem:[%s16245_s1 + $0x140] ss:$16 sps:$4 sm:$0xff]  }
  0x62   :  { %v13510_v13 = vld [vmem:[%s16245_s1 + $0x148] ss:$16 sps:$4 sm:$0xff]   ;;  %v13515_v14 = vld [vmem:[%s16245_s1 + $0x164] ss:$16 sps:$4 sm:$0xff]   ;;  %v13518_v15 = vld [vmem:[%s16245_s1 + $0x16c] ss:$16 sps:$4 sm:$0xff]  }
  0x63   :  { %v162_v39 = vld [vmem:[#allocation2] sm:$0xf]  ;;  %v15757_v25 = vsub.s32 0, %v108_v23  ;;  %v15759_v26 = vsub.s32 2, %v108_v23  ;;  %v15761_v27 = vsub.s32 1, %v108_v23  ;;  %v15763_v28 = vsub.s32 3, %v108_v23 }
  0x64   :  { %v15643_v40 = vld [vmem:[#allocation2 + $0x4] sm:$0xf]  ;;  %v15646_v42 = vld [vmem:[#allocation2 + $0x8] ss:$0 sps:$4 sm:$0x11]   ;;  %vm16256_vm12 = vcmask 130048  }
  0x65   :  { %v11911_v41 = vcombine.low %v162_v39, %v15643_v40  ;;  %v215_v45 = vshll.u32 %v15646_v42, 16  ;;  %v557_v11 = vld [vmem:[#allocation2] sm:$0xe]  ;;  %v580_v19 = vrot.slane %v15646_v42, 1  ;;  %vm1111_vm14 = vcmask 1043456   ;;  %s11880_s14 = sshll.u32 %s15442_s12, 4  ;;  %s11881_s14 = int_to_ptr.vmem [resolvable:$true] %s11880_s14 }
  0x66   :  { %v11965_v16 = vcombine.low %v557_v11, %v15643_v40  ;;  %v13513_v17 = vld [vmem:[%s16245_s1 + $0x160] ss:$16 sps:$4 sm:$0xff]   ;;  %v13533_v11 = vld [vmem:[#allocation6 + $0x244] ss:$16 sps:$4 sm:$0xff]   ;;  %vm1113_vm15 = vcmask 1047556   ;;  %vm1120_vm4 = vcmask 1040384   ;;  %vm15786_vm6 = vmand %vm1111_vm14, %vm151_vm3  ;;  %p15405_p5 = scmp.lt.s32.totalorder %s11881_s14, %s11881_s14 }
  0x67   :  { %v208_v43 = vshrl.u32 %v11911_v41, 16  ;;  %v210_v44 = vshll.u32 %v11911_v41, 16  ;;  %v217_v49 = vrot.slane %v215_v45, 1  ;;  %v759_v24 = vld [vmem:[%s16246_s2] sm:$0xf]  ;;  %vm1122_vm5 = vcmask 1044484  }
  0x68   :  { %v579_v18 = vrot.slane %v11965_v16, 1  ;;  %v764_v29 = vrot.slane %v759_v24, %v15757_v25  ;;  %v772_v30 = vrot.slane %v759_v24, %v15759_v26  ;;  %v768_v31 = vrot.slane %v759_v24, %v15761_v27  ;;  %v13542_v16 = vld [vmem:[#allocation6 + $0x26c] ss:$16 sps:$4 sm:$0xff]   ;;  %s15400_s15 = scalar_lea.vmem %s11881_s14, 32 }
  0x69   :  { %v212_v48 = vrot.slane %v210_v44, 1  ;;  %v776_v32 = vrot.slane %v759_v24, %v15763_v28  ;;  %v13554_v24 = vld [vmem:[#allocation6 + $0x2ac] ss:$16 sps:$4 sm:$0xff]   ;;  %vm1114_vm2 = vsmask.f32 7954  ;;  %vm2913_vm3 = vcmask 1042432   ;;  %p15401_p4 = scmp.ne.s32.totalorder %s11881_s14, %s15400_s15  ;;  %p15406_p6 = scmp.lt.s32.totalorder %s15400_s15, %s15400_s15 }
  0x6a   :  { %v581_v20 = vsel %vm16257_vm10, %v579_v18, %v580_v19  ;;  %v13545_v18 = vld [vmem:[#allocation6 + $0x284] ss:$16 sps:$4 sm:$0xff]   ;;  %v13548_v19 = vld [vmem:[#allocation6 + $0x28c] ss:$16 sps:$4 sm:$0xff]   ;;  %vm1123_vm7 = vsmask.f32 4352 }
  0x6b   :  { %v213_v52 = vor.u32 %v212_v48, %v208_v43  ;;  %v111_v48 = vmul.u32 2, %v108_v23  ;;  %v13551_v23 = vld [vmem:[#allocation6 + $0x2a4] ss:$16 sps:$4 sm:$0xff]   ;;  %vm2917_vm14 = vsmask.f32 6418  ;;  %p15407_p7 = por %p15406_p6, %p15405_p5 }
  0x6d   :  { %v218_v53 = vsel %vm206_vm8, %v213_v52, %v217_v49  ;;  %vm1115_vm8 = vmand %vm1113_vm15, %vm1114_vm2  ;;  %p15408_p8 = pnand %p15407_p7, %p15401_p4 }
  0x6e   :  { %11929 = vmatmul.mubr.msk.bf16.vlgmr.msra.gmra.mrb[0].mxu0 %vm299_vm9, %v218_v53  ;;  %11930 = vmatmul.mubr.msk.bf16.vlgmr.msra.gmra.mrb[0].mxu1 %vm299_vm9, %v218_v53 }
  0x6f   :  { %472 = vmatpush1.bf16.msra.mxu0 %v13469_v46  ;;  %515 = vmatpush1.bf16.msra.mxu1 %v13472_v47  ;;  %v110_v47 = vand.u32 127, %v107_v22  ;;  %v13546_v22 = vld [vmem:[#allocation6 + $0x288] ss:$16 sps:$4 sm:$0xff]  }
  0x70   :  { %473 = vmatprep.subr.bf16.mxu0 %v13479_v50  ;;  %516 = vmatprep.subr.bf16.mxu1 %v13482_v51 }
  0x71   :  { %503 = vmatprep.mubr.bf16.mxu0 %v15440_v0  ;;  %546 = vmatprep.mubr.bf16.mxu1 %v15440_v0  ;;  %vm112_vm11 = vcmp.eq.s32.totalorder %v110_v47, %v111_v48 }
  0x73   :  { %474 = vmatpush1.bf16.msra.mxu0 %v13477_v54  ;;  %517 = vmatpush1.bf16.msra.mxu1 %v13480_v55 }
  0x74   :  { %475 = vmatprep.subr.bf16.mxu0 %v13485_v56  ;;  %518 = vmatprep.subr.bf16.mxu1 %v13488_v57 }
  0x77   :  { %476 = vmatpush1.bf16.msra.mxu0 %v13483_v58  ;;  %519 = vmatpush1.bf16.msra.mxu1 %v13486_v59 }
  0x78   :  { %477 = vmatprep.subr.bf16.mxu0 %v13491_v60  ;;  %520 = vmatprep.subr.bf16.mxu1 %v13494_v61 }
  0x7b   :  { %478 = vmatpush1.bf16.msra.mxu0 %v13489_v62  ;;  %521 = vmatpush1.bf16.msra.mxu1 %v13492_v63  ;;  %v115_v63 = vadd.s32 1, %v111_v48  ;;  %v13584_v48 = vld [vmem:[#allocation6 + $0x34c] ss:$16 sps:$4 sm:$0xff]  }
  0x7c   :  { %665 = vmatprep.subr.bf16.mxu0 %v13497_v1  ;;  %708 = vmatprep.subr.bf16.mxu1 %v13500_v2  ;;  %v15770_v1 = vsel %vm112_vm11, 1.0, %v15441_v21  ;;  %v13521_v2 = vld [vmem:[#allocation6 + $0x204] ss:$16 sps:$4 sm:$0xff]   ;;  %vm1121_vm11 = vmand %vm1120_vm4, %vm127_vm1  ;;  %vm2603_vm1 = vcmask 64512  }
  0x7d   :  { %vm116_vm13 = vcmp.eq.s32.totalorder %v110_v47, %v115_v63  ;;  %v13581_v47 = vld [vmem:[#allocation6 + $0x344] ss:$16 sps:$4 sm:$0xff]  }
  0x7e   :  { %11947 = vmatmul.mubr.msk.bf16.vlgmr.msra.gmra.mrb[0].mxu0 %vm299_vm9, %v11911_v41  ;;  %11948 = vmatmul.mubr.msk.bf16.vlgmr.msra.gmra.mrb[0].mxu1 %vm299_vm9, %v11911_v41  ;;  %v13605_v63 = vld [vmem:[#allocation6 + $0x3c4] ss:$16 sps:$4 sm:$0xff]  }
  0x7f   :  { %666 = vmatpush1.bf16.msra.mxu0 %v13495_v3  ;;  %709 = vmatpush1.bf16.msra.mxu1 %v13498_v4  ;;  %v13524_v3 = vld [vmem:[#allocation6 + $0x20c] ss:$16 sps:$4 sm:$0xff]   ;;  %v13519_v4 = vld [vmem:[#allocation6 + $0x200] ss:$16 sps:$4 sm:$0xff]  }
  0x80   :  { %667 = vmatprep.subr.bf16.mxu0 %v13503_v5  ;;  %710 = vmatprep.subr.bf16.mxu1 %v13506_v6  ;;  %v13522_v5 = vld [vmem:[#allocation6 + $0x208] ss:$16 sps:$4 sm:$0xff]   ;;  %v13527_v6 = vld [vmem:[#allocation6 + $0x224] ss:$16 sps:$4 sm:$0xff]  }
  0x81   :  { %697 = vmatprep.mubr.bf16.mxu0 %v15440_v0  ;;  %740 = vmatprep.mubr.bf16.mxu1 %v15440_v0  ;;  %v13516_v0 = vld [vmem:[%s16245_s1 + $0x168] ss:$16 sps:$4 sm:$0xff]  }
  0x83   :  { %668 = vmatpush1.bf16.msra.mxu0 %v13501_v7  ;;  %711 = vmatpush1.bf16.msra.mxu1 %v13504_v8  ;;  %v13530_v7 = vld [vmem:[#allocation6 + $0x22c] ss:$16 sps:$4 sm:$0xff]   ;;  %v15777_v8 = vsel %vm116_vm13, 1.0, %v15441_v21  ;;  %vm1124_vm13 = vmand %vm1122_vm5, %vm1123_vm7  ;;  %vm100_vm5 = vcmask 517120   ;;  %vm6002_vm7 = vsmask.f32 5392 }
  0x84   :  { %669 = vmatprep.subr.bf16.mxu0 %v13509_v9  ;;  %712 = vmatprep.subr.bf16.mxu1 %v13512_v10  ;;  %v13525_v9 = vld [vmem:[#allocation6 + $0x220] ss:$16 sps:$4 sm:$0xff]   ;;  %v13528_v10 = vld [vmem:[#allocation6 + $0x228] ss:$16 sps:$4 sm:$0xff]   ;;  %vm1125_vm10 = vmor %vm1124_vm13, %vm1121_vm11  ;;  %vm6026_vm13 = vcmask 519169  }
  0x87   :  { %670 = vmatpush1.bf16.msra.mxu0 %v13507_v12  ;;  %713 = vmatpush1.bf16.msra.mxu1 %v13510_v13  ;;  %v13536_v12 = vld [vmem:[#allocation6 + $0x24c] ss:$16 sps:$4 sm:$0xff]   ;;  %v13531_v13 = vld [vmem:[#allocation6 + $0x240] ss:$16 sps:$4 sm:$0xff]  }
  0x88   :  { %671 = vmatprep.subr.bf16.mxu0 %v13515_v14  ;;  %714 = vmatprep.subr.bf16.mxu1 %v13518_v15  ;;  %v13534_v14 = vld [vmem:[#allocation6 + $0x248] ss:$16 sps:$4 sm:$0xff]   ;;  %v13539_v15 = vld [vmem:[#allocation6 + $0x264] ss:$16 sps:$4 sm:$0xff]  }
  0x8b   :  { %672 = vmatpush1.bf16.msra.mxu0 %v13513_v17  ;;  %715 = vmatpush1.bf16.msra.mxu1 %v13516_v0  ;;  %v13537_v17 = vld [vmem:[#allocation6 + $0x260] ss:$16 sps:$4 sm:$0xff]   ;;  %v13540_v0 = vld [vmem:[#allocation6 + $0x268] ss:$16 sps:$4 sm:$0xff]  }
  0x8e   :  { %11982 = vmatmul.mubr.msk.bf16.vlgmr.msra.gmra.mrb[0].mxu0 %vm299_vm9, %v581_v20  ;;  %11983 = vmatmul.mubr.msk.bf16.vlgmr.msra.gmra.mrb[0].mxu1 %vm299_vm9, %v581_v20  ;;  %v13543_v20 = vld [vmem:[#allocation6 + $0x280] ss:$16 sps:$4 sm:$0xff]  }
  0x8f   :  { %865 = vmatprep.mubr.f32.mxu0 %v15441_v21  ;;  %936 = vmatprep.mubr.f32.mxu1 %v15441_v21 }
 0x161   :  { %v699_v33 = vpop.f32.mrb[0].mxu0  ;;  %v742_v34 = vpop.f32.mrb[0].mxu1 }
 0x162   :  { %v781_v35 = vadd.f32 %v764_v29, %v699_v33  ;;  %v783_v36 = vadd.f32 %v772_v30, %v742_v34  ;;  %v701_v37 = vpop.f32.mrb[1].mxu0  ;;  %v744_v38 = vpop.f32.mrb[1].mxu1  ;;  %v13555_v33 = vld [vmem:[#allocation6 + $0x2c0] ss:$16 sps:$4 sm:$0xff]   ;;  %v13558_v34 = vld [vmem:[#allocation6 + $0x2c8] ss:$16 sps:$4 sm:$0xff]  }
 0x163   :  { %v782_v39 = vadd.f32 %v768_v31, %v701_v37  ;;  %v784_v40 = vadd.f32 %v776_v32, %v744_v38  ;;  %v703_v41 = vpop.f32.mrb[2].mxu0  ;;  %v746_v42 = vpop.f32.mrb[2].mxu1  ;;  %v13561_v37 = vld [vmem:[#allocation6 + $0x2e0] ss:$16 sps:$4 sm:$0xff]   ;;  %v13564_v38 = vld [vmem:[#allocation6 + $0x2e8] ss:$16 sps:$4 sm:$0xff]  }
 0x164   :  { %v785_v43 = vadd.f32 %v764_v29, %v703_v41  ;;  %v787_v44 = vadd.f32 %v772_v30, %v746_v42  ;;  %v705_v45 = vpop.f32.mrb[3].mxu0  ;;  %v748_v46 = vpop.f32.mrb[3].mxu1  ;;  %v789_v49 = vmax.f32 %v781_v35, 0.0  ;;  %v791_v50 = vmax.f32 %v783_v36, 0.0  ;;  %v13549_v29 = vld [vmem:[#allocation6 + $0x2a0] ss:$16 sps:$4 sm:$0xff]  }
 0x165   :  { %v786_v51 = vadd.f32 %v768_v31, %v705_v45  ;;  %v788_v52 = vadd.f32 %v776_v32, %v748_v46  ;;  %v790_v53 = vmax.f32 %v782_v39, 0.0  ;;  %v792_v56 = vmax.f32 %v784_v40, 0.0  ;;  %v13552_v30 = vld [vmem:[#allocation6 + $0x2a8] ss:$16 sps:$4 sm:$0xff]   ;;  %v13557_v31 = vld [vmem:[#allocation6 + $0x2c4] ss:$16 sps:$4 sm:$0xff]  }
 0x166   :  { %v793_v54 = vmax.f32 %v785_v43, 0.0  ;;  %v795_v55 = vmax.f32 %v787_v44, 0.0  ;;  %v13560_v32 = vld [vmem:[#allocation6 + $0x2cc] ss:$16 sps:$4 sm:$0xff]   ;;  %v13563_v35 = vld [vmem:[#allocation6 + $0x2e4] ss:$16 sps:$4 sm:$0xff]  }
 0x167   :  { %v794_v57 = vmax.f32 %v786_v51, 0.0  ;;  %v796_v58 = vmax.f32 %v788_v52, 0.0  ;;  %v13566_v36 = vld [vmem:[#allocation6 + $0x2ec] ss:$16 sps:$4 sm:$0xff]   ;;  %v13567_v39 = vld [vmem:[#allocation6 + $0x300] ss:$16 sps:$4 sm:$0xff]  }
 0x168   :  { %v13370_v59 = vpack.c.bf16 %v793_v54, %v789_v49  ;;  %v13374_v60 = vpack.c.bf16 %v795_v55, %v791_v50  ;;  %v13569_v40 = vld [vmem:[#allocation6 + $0x304] ss:$16 sps:$4 sm:$0xff]   ;;  %v13570_v41 = vld [vmem:[#allocation6 + $0x308] ss:$16 sps:$4 sm:$0xff]   ;;  %v13572_v42 = vld [vmem:[#allocation6 + $0x30c] ss:$16 sps:$4 sm:$0xff]  }
 0x169   :  { %v13368_v61 = vpack.c.bf16 %v794_v57, %v790_v53  ;;  %v13372_v62 = vpack.c.bf16 %v796_v58, %v792_v56  ;;  %v13575_v43 = vld [vmem:[#allocation6 + $0x324] ss:$16 sps:$4 sm:$0xff]   ;;  %v13578_v44 = vld [vmem:[#allocation6 + $0x32c] ss:$16 sps:$4 sm:$0xff]   ;;  %v13573_v45 = vld [vmem:[#allocation6 + $0x320] ss:$16 sps:$4 sm:$0xff]  }
 0x16a   :  { %v13576_v46 = vld [vmem:[#allocation6 + $0x328] ss:$16 sps:$4 sm:$0xff]   ;;  %v13579_v49 = vld [vmem:[#allocation6 + $0x340] ss:$16 sps:$4 sm:$0xff]   ;;  %v13587_v51 = vld [vmem:[#allocation6 + $0x364] ss:$16 sps:$4 sm:$0xff]  }
 0x16b   :  { %13369 = vmatprep.subr.bf16.mxu0 %v13368_v61  ;;  %13373 = vmatprep.subr.bf16.mxu1 %v13372_v62  ;;  %v13582_v50 = vld [vmem:[#allocation6 + $0x348] ss:$16 sps:$4 sm:$0xff]   ;;  %v13590_v52 = vld [vmem:[#allocation6 + $0x36c] ss:$16 sps:$4 sm:$0xff]   ;;  %v13585_v53 = vld [vmem:[#allocation6 + $0x360] ss:$16 sps:$4 sm:$0xff]  }
 0x16c   :  { %13371 = vmatpush1.bf16.msra.mxu0 %v13370_v59  ;;  %13375 = vmatpush1.bf16.msra.mxu1 %v13374_v60  ;;  %v13588_v54 = vld [vmem:[#allocation6 + $0x368] ss:$16 sps:$4 sm:$0xff]   ;;  %v13593_v55 = vld [vmem:[#allocation6 + $0x384] ss:$16 sps:$4 sm:$0xff]   ;;  %v13591_v56 = vld [vmem:[#allocation6 + $0x380] ss:$16 sps:$4 sm:$0xff]  }
 0x16d   :  { %13377 = vmatprep.subr.bf16.mxu0 %v13368_v61  ;;  %13381 = vmatprep.subr.bf16.mxu1 %v13372_v62  ;;  %v13594_v57 = vld [vmem:[#allocation6 + $0x388] ss:$16 sps:$4 sm:$0xff]   ;;  %v13596_v58 = vld [vmem:[#allocation6 + $0x38c] ss:$16 sps:$4 sm:$0xff]  }
 0x16e   :  { %v13602_v61 = vld [vmem:[#allocation6 + $0x3ac] ss:$16 sps:$4 sm:$0xff]   ;;  %v13600_v62 = vld [vmem:[#allocation6 + $0x3a8] ss:$16 sps:$4 sm:$0xff]  }
 0x16f   :  { %11984 = vmatmul.mubr.msk.f32.vlgmr.msra.gmra.mrb[4].mxu0 %vm16256_vm12, %v15770_v1  ;;  %11985 = vmatmul.mubr.msk.f32.vlgmr.msra.gmra.mrb[4].mxu1 %vm16256_vm12, %v15770_v1 }
 0x170   :  { %13379 = vmatpush1.bf16.msra.mxu0 %v13370_v59  ;;  %13383 = vmatpush1.bf16.msra.mxu1 %v13374_v60  ;;  %v13597_v59 = vld [vmem:[#allocation6 + $0x3a0] ss:$16 sps:$4 sm:$0xff]   ;;  %v13599_v60 = vld [vmem:[#allocation6 + $0x3a4] ss:$16 sps:$4 sm:$0xff]  }
 0x171   :  { %1010 = vmatprep.mubr.f32.mxu0 %v15441_v21  ;;  %1081 = vmatprep.mubr.f32.mxu1 %v15441_v21 }
 0x172   :  { %1604 = vmatprep.subr.bf16.mxu0 %v13521_v2  ;;  %1645 = vmatprep.subr.bf16.mxu1 %v13524_v3  ;;  %v13603_v2 = vld [vmem:[#allocation6 + $0x3c0] ss:$16 sps:$4 sm:$0xff]   ;;  %v13608_v3 = vld [vmem:[#allocation6 + $0x3cc] ss:$16 sps:$4 sm:$0xff]  }
 0x173   :  { %11986 = vmatmul.mubr.msk.f32.vlgmr.msra.gmra.mrb[6].mxu0 %vm16256_vm12, %v15777_v8  ;;  %11987 = vmatmul.mubr.msk.f32.vlgmr.msra.gmra.mrb[6].mxu1 %vm16256_vm12, %v15777_v8  ;;  %vm1116_vm12 = vmor %vm1115_vm8, %vm15786_vm6  ;;  %vm6001_vm6 = vsmask.f32 1280 }
 0x174   :  { %1605 = vmatpush1.bf16.msra.mxu0 %v13519_v4  ;;  %1646 = vmatpush1.bf16.msra.mxu1 %v13522_v5  ;;  %v13606_v4 = vld [vmem:[#allocation6 + $0x3c8] ss:$16 sps:$4 sm:$0xff]   ;;  %v13611_v5 = vld [vmem:[#allocation6 + $0x3e4] ss:$16 sps:$4 sm:$0xff]   ;;  %vm15892_vm8 = vmand %vm100_vm5, %vm6001_vm6 }
 0x175   :  { %1606 = vmatprep.subr.bf16.mxu0 %v13527_v6  ;;  %1647 = vmatprep.subr.bf16.mxu1 %v13530_v7  ;;  %v13614_v6 = vld [vmem:[#allocation6 + $0x3ec] ss:$16 sps:$4 sm:$0xff]   ;;  %v13609_v7 = vld [vmem:[#allocation6 + $0x3e0] ss:$16 sps:$4 sm:$0xff]   ;;  %vm6003_vm11 = vmor %vm6001_vm6, %vm6002_vm7  ;;  %vm6993_vm7 = vcmask 1047557  }
 0x178   :  { %1607 = vmatpush1.bf16.msra.mxu0 %v13525_v9  ;;  %1648 = vmatpush1.bf16.msra.mxu1 %v13528_v10  ;;  %v13612_v9 = vld [vmem:[#allocation6 + $0x3e8] ss:$16 sps:$4 sm:$0xff]   ;;  %v13617_v10 = vld [vmem:[#allocation6 + $0x4] ss:$16 sps:$4 sm:$0xff]  }
 0x179   :  { %1608 = vmatprep.subr.bf16.mxu0 %v13533_v11  ;;  %1649 = vmatprep.subr.bf16.mxu1 %v13536_v12  ;;  %v13620_v11 = vld [vmem:[#allocation6 + $0xc] ss:$16 sps:$4 sm:$0xff]  }
 0x17c   :  { %1609 = vmatpush1.bf16.msra.mxu0 %v13531_v13  ;;  %1650 = vmatpush1.bf16.msra.mxu1 %v13534_v14 }
 0x17d   :  { %1610 = vmatprep.subr.bf16.mxu0 %v13539_v15  ;;  %1651 = vmatprep.subr.bf16.mxu1 %v13542_v16 }
 0x180   :  { %1611 = vmatpush1.bf16.msra.mxu0 %v13537_v17  ;;  %1652 = vmatpush1.bf16.msra.mxu1 %v13540_v0 }
 0x181   :  { %1612 = vmatprep.subr.bf16.mxu0 %v13545_v18  ;;  %1653 = vmatprep.subr.bf16.mxu1 %v13548_v19 }
 0x184   :  { %1613 = vmatpush1.bf16.msra.mxu0 %v13543_v20  ;;  %1654 = vmatpush1.bf16.msra.mxu1 %v13546_v22 }
 0x185   :  { %1614 = vmatprep.subr.bf16.mxu0 %v13551_v23  ;;  %1655 = vmatprep.subr.bf16.mxu1 %v13554_v24 }
 0x188   :  { %1615 = vmatpush1.bf16.msra.mxu0 %v13549_v29  ;;  %1656 = vmatpush1.bf16.msra.mxu1 %v13552_v30  ;;  %v13666_v29 = vld [vmem:[#allocation6 + $0x108] ss:$16 sps:$4 sm:$0xff]  }
 0x189   :  { %1616 = vmatprep.subr.bf16.mxu0 %v13557_v31  ;;  %1657 = vmatprep.subr.bf16.mxu1 %v13560_v32 }
 0x18c   :  { %1617 = vmatpush1.bf16.msra.mxu0 %v13555_v33  ;;  %1658 = vmatpush1.bf16.msra.mxu1 %v13558_v34 }
 0x18d   :  { %1618 = vmatprep.subr.bf16.mxu0 %v13563_v35  ;;  %1659 = vmatprep.subr.bf16.mxu1 %v13566_v36  ;;  %v1126_v35 = vld [vmem:[#allocation3 + $0x8] sm:$0x11] }
 0x190   :  { %1619 = vmatpush1.bf16.msra.mxu0 %v13561_v37  ;;  %1660 = vmatpush1.bf16.msra.mxu1 %v13564_v38  ;;  %v15795_v38 = vld [vmem:[#allocation3 + $0x8] sm:$0xff] }
 0x191   :  { %1620 = vmatprep.subr.bf16.mxu0 %v13569_v40  ;;  %1661 = vmatprep.subr.bf16.mxu1 %v13572_v42  ;;  %101 = vst.msk [vmem:[#allocation2 + $0x10] sm:$0x3] %vm100_vm5, %v15795_v38  ;;  %vm6991_vm5 = vcmask 1043457  }
 0x194   :  { %1621 = vmatpush1.bf16.msra.mxu0 %v13567_v39  ;;  %1662 = vmatpush1.bf16.msra.mxu1 %v13570_v41 }
 0x195   :  { %1622 = vmatprep.subr.bf16.mxu0 %v13575_v43  ;;  %1663 = vmatprep.subr.bf16.mxu1 %v13578_v44 }
 0x198   :  { %1623 = vmatpush1.bf16.msra.mxu0 %v13573_v45  ;;  %1664 = vmatpush1.bf16.msra.mxu1 %v13576_v46 }
 0x199   :  { %1624 = vmatprep.subr.bf16.mxu0 %v13581_v47  ;;  %1665 = vmatprep.subr.bf16.mxu1 %v13584_v48 }
 0x19c   :  { %1625 = vmatpush1.bf16.msra.mxu0 %v13579_v49  ;;  %1666 = vmatpush1.bf16.msra.mxu1 %v13582_v50 }
 0x19d   :  { %1626 = vmatprep.subr.bf16.mxu0 %v13587_v51  ;;  %1667 = vmatprep.subr.bf16.mxu1 %v13590_v52  ;;  %v13615_v51 = vld [vmem:[#allocation6] ss:$16 sps:$4 sm:$0xff]   ;;  %v13618_v52 = vld [vmem:[#allocation6 + $0x8] ss:$16 sps:$4 sm:$0xff]  }
 0x1a0   :  { %1627 = vmatpush1.bf16.msra.mxu0 %v13585_v53  ;;  %1668 = vmatpush1.bf16.msra.mxu1 %v13588_v54  ;;  %v13623_v54 = vld [vmem:[#allocation6 + $0x24] ss:$16 sps:$4 sm:$0xff]  }
 0x1a1   :  { %1628 = vmatprep.subr.bf16.mxu0 %v13593_v55  ;;  %1669 = vmatprep.subr.bf16.mxu1 %v13596_v58  ;;  %v13626_v55 = vld [vmem:[#allocation6 + $0x2c] ss:$16 sps:$4 sm:$0xff]   ;;  %v13624_v58 = vld [vmem:[#allocation6 + $0x28] ss:$16 sps:$4 sm:$0xff]  }
 0x1a4   :  { %1629 = vmatpush1.bf16.msra.mxu0 %v13591_v56  ;;  %1670 = vmatpush1.bf16.msra.mxu1 %v13594_v57  ;;  %v13621_v57 = vld [vmem:[#allocation6 + $0x20] ss:$16 sps:$4 sm:$0xff]  }
 0x1a5   :  { %1630 = vmatprep.subr.bf16.mxu0 %v13599_v60  ;;  %1671 = vmatprep.subr.bf16.mxu1 %v13602_v61  ;;  %v13632_v60 = vld [vmem:[#allocation6 + $0x4c] ss:$16 sps:$4 sm:$0xff]   ;;  %v13627_v61 = vld [vmem:[#allocation6 + $0x40] ss:$16 sps:$4 sm:$0xff]  }
 0x1a8   :  { %1631 = vmatpush1.bf16.msra.mxu0 %v13597_v59  ;;  %1672 = vmatpush1.bf16.msra.mxu1 %v13600_v62  ;;  %v13629_v59 = vld [vmem:[#allocation6 + $0x44] ss:$16 sps:$4 sm:$0xff]   ;;  %v13630_v62 = vld [vmem:[#allocation6 + $0x48] ss:$16 sps:$4 sm:$0xff]  }
 0x1a9   :  { %1632 = vmatprep.subr.bf16.mxu0 %v13605_v63  ;;  %1673 = vmatprep.subr.bf16.mxu1 %v13608_v3  ;;  %v13635_v63 = vld [vmem:[#allocation6 + $0x64] ss:$16 sps:$4 sm:$0xff]   ;;  %v13633_v3 = vld [vmem:[#allocation6 + $0x60] ss:$16 sps:$4 sm:$0xff]  }
 0x1ac   :  { %1633 = vmatpush1.bf16.msra.mxu0 %v13603_v2  ;;  %1674 = vmatpush1.bf16.msra.mxu1 %v13606_v4  ;;  %v13638_v2 = vld [vmem:[#allocation6 + $0x6c] ss:$16 sps:$4 sm:$0xff]   ;;  %v13636_v4 = vld [vmem:[#allocation6 + $0x68] ss:$16 sps:$4 sm:$0xff]  }
 0x1ad   :  { %1634 = vmatprep.subr.bf16.mxu0 %v13611_v5  ;;  %1675 = vmatprep.subr.bf16.mxu1 %v13614_v6  ;;  %v13641_v5 = vld [vmem:[#allocation6 + $0x84] ss:$16 sps:$4 sm:$0xff]   ;;  %v13644_v6 = vld [vmem:[#allocation6 + $0x8c] ss:$16 sps:$4 sm:$0xff]  }
 0x1b0   :  { %1635 = vmatpush1.bf16.msra.mxu0 %v13609_v7  ;;  %1676 = vmatpush1.bf16.msra.mxu1 %v13612_v9  ;;  %v13639_v7 = vld [vmem:[#allocation6 + $0x80] ss:$16 sps:$4 sm:$0xff]   ;;  %v13642_v9 = vld [vmem:[#allocation6 + $0x88] ss:$16 sps:$4 sm:$0xff]  }
 0x1b1   :  { %2010 = vmatprep.subr.bf16.mxu0 %v13617_v10  ;;  %2051 = vmatprep.subr.bf16.mxu1 %v13620_v11  ;;  %v13647_v10 = vld [vmem:[#allocation6 + $0xa4] ss:$16 sps:$4 sm:$0xff]   ;;  %v13650_v11 = vld [vmem:[#allocation6 + $0xac] ss:$16 sps:$4 sm:$0xff]  }
 0x242   :  { %v867_v12 = vpop.f32.mrb[4].mxu0  ;;  %v938_v13 = vpop.f32.mrb[4].mxu1 }
 0x243   :  { %v869_v14 = vpop.f32.mrb[5].mxu0  ;;  %v940_v15 = vpop.f32.mrb[5].mxu1 }
 0x246   :  { %v1012_v16 = vpop.f32.mrb[6].mxu0  ;;  %v1083_v17 = vpop.f32.mrb[6].mxu1 }
 0x247   :  { %v1088_v0 = vmax.f32 %v867_v12, %v1012_v16  ;;  %v1090_v18 = vmax.f32 %v938_v13, %v1083_v17  ;;  %v1014_v19 = vpop.f32.mrb[7].mxu0  ;;  %v1085_v20 = vpop.f32.mrb[7].mxu1  ;;  %v13645_v12 = vld [vmem:[#allocation6 + $0xa0] ss:$16 sps:$4 sm:$0xff]   ;;  %v13648_v13 = vld [vmem:[#allocation6 + $0xa8] ss:$16 sps:$4 sm:$0xff]  }
 0x248   :  { %v1089_v22 = vmax.f32 %v869_v14, %v1014_v19  ;;  %v1091_v23 = vmax.f32 %v940_v15, %v1085_v20  ;;  %v13653_v14 = vld [vmem:[#allocation6 + $0xc4] ss:$16 sps:$4 sm:$0xff]   ;;  %v13656_v15 = vld [vmem:[#allocation6 + $0xcc] ss:$16 sps:$4 sm:$0xff]   ;;  %v13651_v16 = vld [vmem:[#allocation6 + $0xc0] ss:$16 sps:$4 sm:$0xff]  }
 0x249   :  { %v1092_v24 = vmax.f32 %v1088_v0, %v1090_v18  ;;  %v13654_v17 = vld [vmem:[#allocation6 + $0xc8] ss:$16 sps:$4 sm:$0xff]   ;;  %v13659_v0 = vld [vmem:[#allocation6 + $0xe4] ss:$16 sps:$4 sm:$0xff]   ;;  %v13662_v18 = vld [vmem:[#allocation6 + $0xec] ss:$16 sps:$4 sm:$0xff]  }
 0x24a   :  { %v1093_v30 = vmax.f32 %v1089_v22, %v1091_v23  ;;  %v13657_v19 = vld [vmem:[#allocation6 + $0xe0] ss:$16 sps:$4 sm:$0xff]   ;;  %v13660_v20 = vld [vmem:[#allocation6 + $0xe8] ss:$16 sps:$4 sm:$0xff]   ;;  %v13665_v22 = vld [vmem:[#allocation6 + $0x104] ss:$16 sps:$4 sm:$0xff]  }
 0x24b   :  { %v13668_v23 = vld [vmem:[#allocation6 + $0x10c] ss:$16 sps:$4 sm:$0xff]  }
 0x24c   :  { %v13274_v31 = vpack.c.bf16 %v1093_v30, %v1092_v24  ;;  %v13663_v24 = vld [vmem:[#allocation6 + $0x100] ss:$16 sps:$4 sm:$0xff]   ;;  %v13671_v30 = vld [vmem:[#allocation6 + $0x124] ss:$16 sps:$4 sm:$0xff]  }
 0x24e   :  { %v1102_v32 = vshrl.u32 %v13274_v31, 16  ;;  %v1105_v34 = vshll.u32 %v13274_v31, 16  ;;  %v13674_v31 = vld [vmem:[#allocation6 + $0x12c] ss:$16 sps:$4 sm:$0xff]  }
 0x250   :  { %v1104_v33 = vrot.slane %v1102_v32, 7  ;;  %v13669_v32 = vld [vmem:[#allocation6 + $0x120] ss:$16 sps:$4 sm:$0xff]  }
 0x252   :  { %v1107_v36 = vor.u32 %v1105_v34, %v1104_v33  ;;  %v1108_v37 = vrot.slane %v1104_v33, 4  ;;  %v13672_v33 = vld [vmem:[#allocation6 + $0x128] ss:$16 sps:$4 sm:$0xff]   ;;  %v13677_v34 = vld [vmem:[#allocation6 + $0x144] ss:$16 sps:$4 sm:$0xff]  }
 0x254   :  { %v15798_v39 = vsel %vm1116_vm12, %v1107_v36, %v15795_v38  ;;  %v1127_v40 = vsel %vm1125_vm10, %v1108_v37, %v1126_v35  ;;  %v13680_v35 = vld [vmem:[#allocation6 + $0x14c] ss:$16 sps:$4 sm:$0xff]   ;;  %v13675_v36 = vld [vmem:[#allocation6 + $0x140] ss:$16 sps:$4 sm:$0xff]   ;;  %v13678_v37 = vld [vmem:[#allocation6 + $0x148] ss:$16 sps:$4 sm:$0xff]  }
 0x255   :  { %1119 = vst [vmem:[#allocation3] sm:$0xff] %v15798_v39  ;;  %1128 = vst [vmem:[#allocation3 + $0x8] sm:$0x11] %v1127_v40  ;;  %v12056_v56 = vcombine.high %v15798_v39, %v15798_v39  ;;  %v13683_v40 = vld [vmem:[#allocation6 + $0x164] ss:$16 sps:$4 sm:$0xff]   ;;  %vm2916_vm12 = vcmask 1046532  }
 0x256   :  { %vm2914_vm10 = vsmask.f32 2306  ;;  %vm2918_vm2 = vmand %vm2916_vm12, %vm2917_vm14  ;;  %vm16264_vm12 = vcmask 1046528   ;;  %vm6464_vm14 = vcmask 1045504  }
 0x257   :  { %vm2915_vm15 = vmand %vm2913_vm3, %vm2914_vm10  ;;  %vm6027_vm3 = vsmask.f32 7942 }
 0x258   :  { %vm2919_vm4 = vmor %vm2918_vm2, %vm2915_vm15 }
 0x259   :  { %vm6028_vm10 = vmand %vm6026_vm13, %vm6027_vm3 }
 0x25a   :  { %vm16121_vm13 = vmand %vm6991_vm5, %vm6027_vm3 }
 0x25c   :  { %v15801_v41 = vld [vmem:[#allocation3 + $0x8] sm:$0x11] }
 0x25d   :  { %v11990_v42 = vcombine.high %v15798_v39, %v15801_v41  ;;  %v11989_v43 = vcombine.low %v15798_v39, %v15801_v41 }
 0x25f   :  { %v1278_v44 = vshll.u32 %v11990_v42, 16  ;;  %v1271_v45 = vshll.u32 %v11989_v43, 16  ;;  %v1276_v46 = vshrl.u32 %v11990_v42, 16  ;;  %v1269_v48 = vshrl.u32 %v11989_v43, 16  ;;  %v13686_v42 = vld [vmem:[#allocation6 + $0x16c] ss:$16 sps:$4 sm:$0xff]  }
 0x260   :  { %v13681_v43 = vld [vmem:[#allocation6 + $0x160] ss:$16 sps:$4 sm:$0xff]  }
 0x261   :  { %v1280_v47 = vrot.slane %v1278_v44, 1  ;;  %v1273_v49 = vrot.slane %v1271_v45, 1  ;;  %v13684_v44 = vld [vmem:[#allocation6 + $0x168] ss:$16 sps:$4 sm:$0xff]   ;;  %v13689_v45 = vld [vmem:[#allocation6 + $0x184] ss:$16 sps:$4 sm:$0xff]  }
 0x263   :  { %v1281_v50 = vor.u32 %v1280_v47, %v1276_v46  ;;  %v1274_v53 = vor.u32 %v1273_v49, %v1269_v48  ;;  %v13692_v46 = vld [vmem:[#allocation6 + $0x18c] ss:$16 sps:$4 sm:$0xff]   ;;  %v13687_v47 = vld [vmem:[#allocation6 + $0x180] ss:$16 sps:$4 sm:$0xff]   ;;  %v13690_v48 = vld [vmem:[#allocation6 + $0x188] ss:$16 sps:$4 sm:$0xff]  }
 0x264   :  { %v13695_v49 = vld [vmem:[#allocation6 + $0x1a4] ss:$16 sps:$4 sm:$0xff]  }
 0x265   :  { %1636 = vmatprep.mubr.bf16.mxu0 %v1281_v50  ;;  %1677 = vmatprep.mubr.bf16.mxu1 %v1281_v50  ;;  %v13698_v50 = vld [vmem:[#allocation6 + $0x1ac] ss:$16 sps:$4 sm:$0xff]  }
 0x266   :  { %1637 = vmatmul.mubr.bf16.vlgmr.msra.gmra.mrb[8].mxu0 %v1274_v53  ;;  %1678 = vmatmul.mubr.bf16.vlgmr.msra.gmra.mrb[8].mxu1 %v1274_v53  ;;  %v13701_v53 = vld [vmem:[#allocation6 + $0x1c4] ss:$16 sps:$4 sm:$0xff]  }
 0x267   :  { %2011 = vmatpush1.bf16.msra.mxu0 %v13615_v51  ;;  %2052 = vmatpush1.bf16.msra.mxu1 %v13618_v52  ;;  %v13693_v51 = vld [vmem:[#allocation6 + $0x1a0] ss:$16 sps:$4 sm:$0xff]   ;;  %v13696_v52 = vld [vmem:[#allocation6 + $0x1a8] ss:$16 sps:$4 sm:$0xff]  }
 0x268   :  { %2042 = vmatprep.mubr.bf16.mxu0 %v12056_v56  ;;  %2083 = vmatprep.mubr.bf16.mxu1 %v12056_v56  ;;  %v13702_v56 = vld [vmem:[#allocation6 + $0x1c8] ss:$16 sps:$4 sm:$0xff]  }
 0x269   :  { %2012 = vmatprep.subr.bf16.mxu0 %v13623_v54  ;;  %2053 = vmatprep.subr.bf16.mxu1 %v13626_v55  ;;  %v13704_v54 = vld [vmem:[#allocation6 + $0x1cc] ss:$16 sps:$4 sm:$0xff]   ;;  %v13699_v55 = vld [vmem:[#allocation6 + $0x1c0] ss:$16 sps:$4 sm:$0xff]  }
 0x26b   :  { %2013 = vmatpush1.bf16.msra.mxu0 %v13621_v57  ;;  %2054 = vmatpush1.bf16.msra.mxu1 %v13624_v58  ;;  %v13707_v57 = vld [vmem:[#allocation6 + $0x1e4] ss:$16 sps:$4 sm:$0xff]   ;;  %v13710_v58 = vld [vmem:[#allocation6 + $0x1ec] ss:$16 sps:$4 sm:$0xff]  }
 0x26c   :  { %2014 = vmatprep.subr.bf16.mxu0 %v13629_v59  ;;  %2055 = vmatprep.subr.bf16.mxu1 %v13632_v60  ;;  %v15809_v59 = vld [vmem:[#allocation3] sm:$0xee] }
 0x26d   :  { %v13705_v60 = vld [vmem:[#allocation6 + $0x1e0] ss:$16 sps:$4 sm:$0xff]  }
 0x26f   :  { %2015 = vmatpush1.bf16.msra.mxu0 %v13627_v61  ;;  %2056 = vmatpush1.bf16.msra.mxu1 %v13630_v62  ;;  %v13708_v61 = vld [vmem:[#allocation6 + $0x1e8] ss:$16 sps:$4 sm:$0xff]   ;;  %v13713_v62 = vld [vmem:[#allocation6 + $0x404] ss:$16 sps:$4 sm:$0xff]  }
 0x270   :  { %2016 = vmatprep.subr.bf16.mxu0 %v13635_v63  ;;  %2057 = vmatprep.subr.bf16.mxu1 %v13638_v2  ;;  %v13716_v63 = vld [vmem:[#allocation6 + $0x40c] ss:$16 sps:$4 sm:$0xff]   ;;  %v12122_v2 = vcombine.high %v15809_v59, %v15801_v41 }
 0x273   :  { %2017 = vmatpush1.bf16.msra.mxu0 %v13633_v3  ;;  %2058 = vmatpush1.bf16.msra.mxu1 %v13636_v4  ;;  %v13711_v3 = vld [vmem:[#allocation6 + $0x400] ss:$16 sps:$4 sm:$0xff]   ;;  %v12055_v4 = vcombine.low %v15798_v39, %v15798_v39 }
 0x274   :  { %2018 = vmatprep.subr.bf16.mxu0 %v13641_v5  ;;  %2059 = vmatprep.subr.bf16.mxu1 %v13644_v6  ;;  %v13714_v5 = vld [vmem:[#allocation6 + $0x408] ss:$16 sps:$4 sm:$0xff]   ;;  %v2164_v6 = vrot.slane %v12122_v2, 1  ;;  %v13725_v39 = vld [vmem:[#allocation6 + $0x440] ss:$16 sps:$4 sm:$0xff]  }
 0x275   :  { %v13796_v2 = vld [vmem:[#allocation6 + $0x5ac] ss:$16 sps:$4 sm:$0xff]  }
 0x277   :  { %2019 = vmatpush1.bf16.msra.mxu0 %v13639_v7  ;;  %2060 = vmatpush1.bf16.msra.mxu1 %v13642_v9  ;;  %v13721_v7 = vld [vmem:[#allocation6 + $0x424] ss:$16 sps:$4 sm:$0xff]   ;;  %v13724_v9 = vld [vmem:[#allocation6 + $0x42c] ss:$16 sps:$4 sm:$0xff]  }
 0x278   :  { %2020 = vmatprep.subr.bf16.mxu0 %v13647_v10  ;;  %2061 = vmatprep.subr.bf16.mxu1 %v13650_v11  ;;  %v13719_v10 = vld [vmem:[#allocation6 + $0x420] ss:$16 sps:$4 sm:$0xff]   ;;  %v13722_v11 = vld [vmem:[#allocation6 + $0x428] ss:$16 sps:$4 sm:$0xff]  }
 0x27b   :  { %2021 = vmatpush1.bf16.msra.mxu0 %v13645_v12  ;;  %2062 = vmatpush1.bf16.msra.mxu1 %v13648_v13  ;;  %v13727_v12 = vld [vmem:[#allocation6 + $0x444] ss:$16 sps:$4 sm:$0xff]   ;;  %v13730_v13 = vld [vmem:[#allocation6 + $0x44c] ss:$16 sps:$4 sm:$0xff]  }
 0x27c   :  { %2022 = vmatprep.subr.bf16.mxu0 %v13653_v14  ;;  %2063 = vmatprep.subr.bf16.mxu1 %v13656_v15  ;;  %v13728_v14 = vld [vmem:[#allocation6 + $0x448] ss:$16 sps:$4 sm:$0xff]   ;;  %v13733_v15 = vld [vmem:[#allocation6 + $0x464] ss:$16 sps:$4 sm:$0xff]  }
 0x27f   :  { %2023 = vmatpush1.bf16.msra.mxu0 %v13651_v16  ;;  %2064 = vmatpush1.bf16.msra.mxu1 %v13654_v17  ;;  %v13736_v16 = vld [vmem:[#allocation6 + $0x46c] ss:$16 sps:$4 sm:$0xff]   ;;  %v13731_v17 = vld [vmem:[#allocation6 + $0x460] ss:$16 sps:$4 sm:$0xff]  }
 0x280   :  { %2024 = vmatprep.subr.bf16.mxu0 %v13659_v0  ;;  %2065 = vmatprep.subr.bf16.mxu1 %v13662_v18  ;;  %v13734_v0 = vld [vmem:[#allocation6 + $0x468] ss:$16 sps:$4 sm:$0xff]   ;;  %v13739_v18 = vld [vmem:[#allocation6 + $0x484] ss:$16 sps:$4 sm:$0xff]  }
 0x283   :  { %2025 = vmatpush1.bf16.msra.mxu0 %v13657_v19  ;;  %2066 = vmatpush1.bf16.msra.mxu1 %v13660_v20  ;;  %v13742_v19 = vld [vmem:[#allocation6 + $0x48c] ss:$16 sps:$4 sm:$0xff]   ;;  %v13737_v20 = vld [vmem:[#allocation6 + $0x480] ss:$16 sps:$4 sm:$0xff]  }
 0x284   :  { %2026 = vmatprep.subr.bf16.mxu0 %v13665_v22  ;;  %2067 = vmatprep.subr.bf16.mxu1 %v13668_v23  ;;  %v13740_v22 = vld [vmem:[#allocation6 + $0x488] ss:$16 sps:$4 sm:$0xff]   ;;  %v13745_v23 = vld [vmem:[#allocation6 + $0x4a4] ss:$16 sps:$4 sm:$0xff]  }
 0x287   :  { %2027 = vmatpush1.bf16.msra.mxu0 %v13663_v24  ;;  %2068 = vmatpush1.bf16.msra.mxu1 %v13666_v29  ;;  %v13748_v24 = vld [vmem:[#allocation6 + $0x4ac] ss:$16 sps:$4 sm:$0xff]   ;;  %v13743_v29 = vld [vmem:[#allocation6 + $0x4a0] ss:$16 sps:$4 sm:$0xff]  }
 0x288   :  { %2028 = vmatprep.subr.bf16.mxu0 %v13671_v30  ;;  %2069 = vmatprep.subr.bf16.mxu1 %v13674_v31  ;;  %v13746_v30 = vld [vmem:[#allocation6 + $0x4a8] ss:$16 sps:$4 sm:$0xff]   ;;  %v13751_v31 = vld [vmem:[#allocation6 + $0x4c4] ss:$16 sps:$4 sm:$0xff]  }
 0x28b   :  { %2029 = vmatpush1.bf16.msra.mxu0 %v13669_v32  ;;  %2070 = vmatpush1.bf16.msra.mxu1 %v13672_v33  ;;  %v13754_v32 = vld [vmem:[#allocation6 + $0x4cc] ss:$16 sps:$4 sm:$0xff]   ;;  %v13749_v33 = vld [vmem:[#allocation6 + $0x4c0] ss:$16 sps:$4 sm:$0xff]  }
 0x28c   :  { %2030 = vmatprep.subr.bf16.mxu0 %v13677_v34  ;;  %2071 = vmatprep.subr.bf16.mxu1 %v13680_v35  ;;  %v13752_v34 = vld [vmem:[#allocation6 + $0x4c8] ss:$16 sps:$4 sm:$0xff]   ;;  %v13757_v35 = vld [vmem:[#allocation6 + $0x4e4] ss:$16 sps:$4 sm:$0xff]  }
 0x28f   :  { %2031 = vmatpush1.bf16.msra.mxu0 %v13675_v36  ;;  %2072 = vmatpush1.bf16.msra.mxu1 %v13678_v37  ;;  %v13760_v36 = vld [vmem:[#allocation6 + $0x4ec] ss:$16 sps:$4 sm:$0xff]   ;;  %v13755_v37 = vld [vmem:[#allocation6 + $0x4e0] ss:$16 sps:$4 sm:$0xff]  }
 0x290   :  { %2032 = vmatprep.subr.bf16.mxu0 %v13683_v40  ;;  %2073 = vmatprep.subr.bf16.mxu1 %v13686_v42  ;;  %v13758_v40 = vld [vmem:[#allocation6 + $0x4e8] ss:$16 sps:$4 sm:$0xff]   ;;  %v13763_v42 = vld [vmem:[#allocation6 + $0x504] ss:$16 sps:$4 sm:$0xff]  }
 0x293   :  { %2033 = vmatpush1.bf16.msra.mxu0 %v13681_v43  ;;  %2074 = vmatpush1.bf16.msra.mxu1 %v13684_v44  ;;  %v13766_v43 = vld [vmem:[#allocation6 + $0x50c] ss:$16 sps:$4 sm:$0xff]   ;;  %v13761_v44 = vld [vmem:[#allocation6 + $0x500] ss:$16 sps:$4 sm:$0xff]  }
 0x294   :  { %2034 = vmatprep.subr.bf16.mxu0 %v13689_v45  ;;  %2075 = vmatprep.subr.bf16.mxu1 %v13692_v46  ;;  %v13764_v45 = vld [vmem:[#allocation6 + $0x508] ss:$16 sps:$4 sm:$0xff]   ;;  %v13769_v46 = vld [vmem:[#allocation6 + $0x524] ss:$16 sps:$4 sm:$0xff]  }
 0x297   :  { %2035 = vmatpush1.bf16.msra.mxu0 %v13687_v47  ;;  %2076 = vmatpush1.bf16.msra.mxu1 %v13690_v48  ;;  %v13772_v47 = vld [vmem:[#allocation6 + $0x52c] ss:$16 sps:$4 sm:$0xff]   ;;  %v13767_v48 = vld [vmem:[#allocation6 + $0x520] ss:$16 sps:$4 sm:$0xff]  }
 0x298   :  { %2036 = vmatprep.subr.bf16.mxu0 %v13695_v49  ;;  %2077 = vmatprep.subr.bf16.mxu1 %v13698_v50  ;;  %v13770_v49 = vld [vmem:[#allocation6 + $0x528] ss:$16 sps:$4 sm:$0xff]   ;;  %v13775_v50 = vld [vmem:[#allocation6 + $0x544] ss:$16 sps:$4 sm:$0xff]  }
 0x29b   :  { %2037 = vmatpush1.bf16.msra.mxu0 %v13693_v51  ;;  %2078 = vmatpush1.bf16.msra.mxu1 %v13696_v52  ;;  %v13778_v51 = vld [vmem:[#allocation6 + $0x54c] ss:$16 sps:$4 sm:$0xff]   ;;  %v13773_v52 = vld [vmem:[#allocation6 + $0x540] ss:$16 sps:$4 sm:$0xff]  }
 0x29c   :  { %2038 = vmatprep.subr.bf16.mxu0 %v13701_v53  ;;  %2079 = vmatprep.subr.bf16.mxu1 %v13704_v54  ;;  %v13776_v53 = vld [vmem:[#allocation6 + $0x548] ss:$16 sps:$4 sm:$0xff]   ;;  %v13781_v54 = vld [vmem:[#allocation6 + $0x564] ss:$16 sps:$4 sm:$0xff]  }
 0x29f   :  { %2039 = vmatpush1.bf16.msra.mxu0 %v13699_v55  ;;  %2080 = vmatpush1.bf16.msra.mxu1 %v13702_v56  ;;  %v13784_v55 = vld [vmem:[#allocation6 + $0x56c] ss:$16 sps:$4 sm:$0xff]   ;;  %v13779_v56 = vld [vmem:[#allocation6 + $0x560] ss:$16 sps:$4 sm:$0xff]  }
 0x2a0   :  { %2040 = vmatprep.subr.bf16.mxu0 %v13707_v57  ;;  %2081 = vmatprep.subr.bf16.mxu1 %v13710_v58  ;;  %v13782_v57 = vld [vmem:[#allocation6 + $0x568] ss:$16 sps:$4 sm:$0xff]   ;;  %v13787_v58 = vld [vmem:[#allocation6 + $0x584] ss:$16 sps:$4 sm:$0xff]  }
 0x2a3   :  { %2041 = vmatpush1.bf16.msra.mxu0 %v13705_v60  ;;  %2082 = vmatpush1.bf16.msra.mxu1 %v13708_v61  ;;  %v13790_v60 = vld [vmem:[#allocation6 + $0x58c] ss:$16 sps:$4 sm:$0xff]   ;;  %v13785_v61 = vld [vmem:[#allocation6 + $0x580] ss:$16 sps:$4 sm:$0xff]  }
 0x2a4   :  { %2487 = vmatprep.subr.bf16.mxu0 %v13713_v62  ;;  %2528 = vmatprep.subr.bf16.mxu1 %v13716_v63  ;;  %v13788_v62 = vld [vmem:[#allocation6 + $0x588] ss:$16 sps:$4 sm:$0xff]   ;;  %v13793_v63 = vld [vmem:[#allocation6 + $0x5a4] ss:$16 sps:$4 sm:$0xff]  }
 0x2a6   :  { %2043 = vmatmul.mubr.bf16.vlgmr.msra.gmra.mrb[12].mxu0 %v12055_v4  ;;  %2084 = vmatmul.mubr.bf16.vlgmr.msra.gmra.mrb[12].mxu1 %v12055_v4  ;;  %v13794_v4 = vld [vmem:[#allocation6 + $0x5a8] ss:$16 sps:$4 sm:$0xff]  }
 0x2a7   :  { %2488 = vmatpush1.bf16.msra.mxu0 %v13711_v3  ;;  %2519 = vmatprep.mubr.bf16.mxu0 %v2164_v6  ;;  %v13791_v3 = vld [vmem:[#allocation6 + $0x5a0] ss:$16 sps:$4 sm:$0xff]  }
 0x2a8   :  { %2529 = vmatpush1.bf16.msra.mxu1 %v13714_v5  ;;  %2560 = vmatprep.mubr.bf16.mxu1 %v2164_v6  ;;  %v13799_v5 = vld [vmem:[#allocation6 + $0x5c4] ss:$16 sps:$4 sm:$0xff]   ;;  %v13802_v6 = vld [vmem:[#allocation6 + $0x5cc] ss:$16 sps:$4 sm:$0xff]  }
 0x2a9   :  { %2489 = vmatprep.subr.bf16.mxu0 %v13721_v7  ;;  %2530 = vmatprep.subr.bf16.mxu1 %v13724_v9  ;;  %v13797_v7 = vld [vmem:[#allocation6 + $0x5c0] ss:$16 sps:$4 sm:$0xff]   ;;  %v13800_v9 = vld [vmem:[#allocation6 + $0x5c8] ss:$16 sps:$4 sm:$0xff]  }
 0x2ab   :  { %2490 = vmatpush1.bf16.msra.mxu0 %v13719_v10  ;;  %v13805_v10 = vld [vmem:[#allocation6 + $0x5e4] ss:$16 sps:$4 sm:$0xff]  }
 0x2ac   :  { %2531 = vmatpush1.bf16.msra.mxu1 %v13722_v11  ;;  %2491 = vmatprep.subr.bf16.mxu0 %v13727_v12  ;;  %v13808_v11 = vld [vmem:[#allocation6 + $0x5ec] ss:$16 sps:$4 sm:$0xff]   ;;  %v13803_v12 = vld [vmem:[#allocation6 + $0x5e0] ss:$16 sps:$4 sm:$0xff]  }
 0x2ad   :  { %2532 = vmatprep.subr.bf16.mxu1 %v13730_v13  ;;  %v12121_v13 = vcombine.low %v15809_v59, %v15801_v41 }
 0x2af   :  { %2492 = vmatpush1.bf16.msra.mxu0 %v13725_v39  ;;  %v13806_v39 = vld [vmem:[#allocation6 + $0x5e8] ss:$16 sps:$4 sm:$0xff]  }
 0x2b0   :  { %2533 = vmatpush1.bf16.msra.mxu1 %v13728_v14  ;;  %2493 = vmatprep.subr.bf16.mxu0 %v13733_v15  ;;  %v2163_v14 = vrot.slane %v12121_v13, 1  ;;  %v13821_v13 = vld [vmem:[#allocation9 + $0x110] ss:$8 sps:$4 sm:$0xff]  }
 0x2b1   :  { %2534 = vmatprep.subr.bf16.mxu1 %v13736_v16 }
 0x2b3   :  { %2494 = vmatpush1.bf16.msra.mxu0 %v13731_v17 }
 0x2b4   :  { %2535 = vmatpush1.bf16.msra.mxu1 %v13734_v0  ;;  %2495 = vmatprep.subr.bf16.mxu0 %v13739_v18 }
 0x2b5   :  { %2536 = vmatprep.subr.bf16.mxu1 %v13742_v19 }
 0x2b7   :  { %2496 = vmatpush1.bf16.msra.mxu0 %v13737_v20 }
 0x2b8   :  { %2537 = vmatpush1.bf16.msra.mxu1 %v13740_v22  ;;  %2497 = vmatprep.subr.bf16.mxu0 %v13745_v23 }
 0x2b9   :  { %2538 = vmatprep.subr.bf16.mxu1 %v13748_v24 }
 0x2bb   :  { %2498 = vmatpush1.bf16.msra.mxu0 %v13743_v29 }
 0x2bc   :  { %2539 = vmatpush1.bf16.msra.mxu1 %v13746_v30  ;;  %2499 = vmatprep.subr.bf16.mxu0 %v13751_v31 }
 0x2bd   :  { %2540 = vmatprep.subr.bf16.mxu1 %v13754_v32 }
 0x2bf   :  { %2500 = vmatpush1.bf16.msra.mxu0 %v13749_v33 }
 0x2c0   :  { %2541 = vmatpush1.bf16.msra.mxu1 %v13752_v34  ;;  %2501 = vmatprep.subr.bf16.mxu0 %v13757_v35 }
 0x2c1   :  { %2542 = vmatprep.subr.bf16.mxu1 %v13760_v36 }
 0x2c3   :  { %2502 = vmatpush1.bf16.msra.mxu0 %v13755_v37  ;;  %v2573_v37 = vld [vmem:[%s16248_s4] sm:$0xf] }
 0x2c4   :  { %2543 = vmatpush1.bf16.msra.mxu1 %v13758_v40  ;;  %2503 = vmatprep.subr.bf16.mxu0 %v13763_v42  ;;  %v2578_v40 = vrot.slane %v2573_v37, %v15757_v25 }
 0x2c5   :  { %2544 = vmatprep.subr.bf16.mxu1 %v13766_v43  ;;  %v2586_v43 = vrot.slane %v2573_v37, %v15759_v26 }
 0x2c7   :  { %2504 = vmatpush1.bf16.msra.mxu0 %v13761_v44  ;;  %v2582_v44 = vrot.slane %v2573_v37, %v15761_v27 }
 0x2c8   :  { %2545 = vmatpush1.bf16.msra.mxu1 %v13764_v45  ;;  %2505 = vmatprep.subr.bf16.mxu0 %v13769_v46 }
 0x2c9   :  { %2546 = vmatprep.subr.bf16.mxu1 %v13772_v47 }
 0x2cb   :  { %2506 = vmatpush1.bf16.msra.mxu0 %v13767_v48  ;;  %v2590_v48 = vrot.slane %v2573_v37, %v15763_v28  ;;  %v13856_v37 = vld [vmem:[#allocation9 + $0x84] ss:$8 sps:$4 sm:$0xff]  }
 0x2cc   :  { %2547 = vmatpush1.bf16.msra.mxu1 %v13770_v49  ;;  %2507 = vmatprep.subr.bf16.mxu0 %v13775_v50 }
 0x2cd   :  { %2548 = vmatprep.subr.bf16.mxu1 %v13778_v51 }
 0x2cf   :  { %2508 = vmatpush1.bf16.msra.mxu0 %v13773_v52 }
 0x2d0   :  { %2549 = vmatpush1.bf16.msra.mxu1 %v13776_v53  ;;  %2509 = vmatprep.subr.bf16.mxu0 %v13781_v54 }
 0x2d1   :  { %2550 = vmatprep.subr.bf16.mxu1 %v13784_v55 }
 0x2d3   :  { %2510 = vmatpush1.bf16.msra.mxu0 %v13779_v56 }
 0x2d4   :  { %2551 = vmatpush1.bf16.msra.mxu1 %v13782_v57  ;;  %2511 = vmatprep.subr.bf16.mxu0 %v13787_v58 }
 0x2d5   :  { %2552 = vmatprep.subr.bf16.mxu1 %v13790_v60 }
 0x2d7   :  { %2512 = vmatpush1.bf16.msra.mxu0 %v13785_v61 }
 0x2d8   :  { %2553 = vmatpush1.bf16.msra.mxu1 %v13788_v62  ;;  %2513 = vmatprep.subr.bf16.mxu0 %v13793_v63 }
 0x2d9   :  { %2554 = vmatprep.subr.bf16.mxu1 %v13796_v2 }
 0x2db   :  { %2514 = vmatpush1.bf16.msra.mxu0 %v13791_v3 }
 0x2dc   :  { %2555 = vmatpush1.bf16.msra.mxu1 %v13794_v4  ;;  %2515 = vmatprep.subr.bf16.mxu0 %v13799_v5  ;;  %v13811_v4 = vld [vmem:[#allocation9 + $0x4] ss:$8 sps:$4 sm:$0xff]   ;;  %v13809_v5 = vld [vmem:[#allocation9] ss:$8 sps:$4 sm:$0xff]  }
 0x2dd   :  { %2556 = vmatprep.subr.bf16.mxu1 %v13802_v6  ;;  %v13817_v6 = vld [vmem:[#allocation9 + $0x104] ss:$8 sps:$4 sm:$0xff]  }
 0x2df   :  { %2516 = vmatpush1.bf16.msra.mxu0 %v13797_v7  ;;  %v13814_v7 = vld [vmem:[#allocation9 + $0x14] ss:$8 sps:$4 sm:$0xff]  }
 0x2e0   :  { %2557 = vmatpush1.bf16.msra.mxu1 %v13800_v9  ;;  %2517 = vmatprep.subr.bf16.mxu0 %v13805_v10  ;;  %v13815_v9 = vld [vmem:[#allocation9 + $0x100] ss:$8 sps:$4 sm:$0xff]   ;;  %v13823_v10 = vld [vmem:[#allocation9 + $0x114] ss:$8 sps:$4 sm:$0xff]  }
 0x2e1   :  { %2558 = vmatprep.subr.bf16.mxu1 %v13808_v11  ;;  %v13812_v11 = vld [vmem:[#allocation9 + $0x10] ss:$8 sps:$4 sm:$0xff]  }
 0x2e3   :  { %2518 = vmatpush1.bf16.msra.mxu0 %v13803_v12  ;;  %v13820_v12 = vld [vmem:[#allocation9 + $0x24] ss:$8 sps:$4 sm:$0xff]  }
 0x2e4   :  { %2559 = vmatpush1.bf16.msra.mxu1 %v13806_v39  ;;  %v13829_v39 = vld [vmem:[#allocation9 + $0x124] ss:$8 sps:$4 sm:$0xff]  }
 0x2e6   :  { %2520 = vmatmul.mubr.bf16.vlgmr.msra.gmra.mrb[16].mxu0 %v2163_v14 }
 0x2e7   :  { %2561 = vmatmul.mubr.bf16.vlgmr.msra.gmra.mrb[16].mxu1 %v2163_v14  ;;  %2670 = vmatprep.mubr.f32.mxu0 %v15441_v21  ;;  %v13818_v14 = vld [vmem:[#allocation9 + $0x20] ss:$8 sps:$4 sm:$0xff]  }
 0x2e8   :  { %2741 = vmatprep.mubr.f32.mxu1 %v15441_v21 }
 0x339   :  { %v1638_v15 = vpop.f32.mrb[8].mxu0  ;;  %v1679_v16 = vpop.f32.mrb[8].mxu1 }
 0x33a   :  { %v1640_v17 = vpop.f32.mrb[9].mxu0  ;;  %v1681_v0 = vpop.f32.mrb[9].mxu1 }
 0x33b   :  { %v1642_v18 = vpop.f32.mrb[10].mxu0  ;;  %v1683_v19 = vpop.f32.mrb[10].mxu1 }
 0x33c   :  { %v1643_v41 = vpop.f32.mrb[11].mxu0  ;;  %v1684_v59 = vpop.f32.mrb[11].mxu1  ;;  %v13832_v18 = vld [vmem:[#allocation9 + $0x44] ss:$8 sps:$4 sm:$0xff]   ;;  %v13833_v19 = vld [vmem:[#allocation9 + $0x130] ss:$8 sps:$4 sm:$0xff]  }
 0x33d   :  { %v13841_v41 = vld [vmem:[#allocation9 + $0x144] ss:$8 sps:$4 sm:$0xff]   ;;  %v13830_v59 = vld [vmem:[#allocation9 + $0x40] ss:$8 sps:$4 sm:$0xff]  }
 0x379   :  { %v2044_v20 = vpop.f32.mrb[12].mxu0  ;;  %v2085_v22 = vpop.f32.mrb[12].mxu1 }
 0x37a   :  { %v2045_v23 = vadd.f32 %v2044_v20, %v1638_v15  ;;  %v2086_v24 = vadd.f32 %v2085_v22, %v1679_v16  ;;  %v2046_v29 = vpop.f32.mrb[13].mxu0  ;;  %v2087_v30 = vpop.f32.mrb[13].mxu1  ;;  %v13826_v15 = vld [vmem:[#allocation9 + $0x34] ss:$8 sps:$4 sm:$0xff]   ;;  %v13827_v16 = vld [vmem:[#allocation9 + $0x120] ss:$8 sps:$4 sm:$0xff]  }
 0x37b   :  { %v2047_v31 = vadd.f32 %v2046_v29, %v1640_v17  ;;  %v2088_v32 = vadd.f32 %v2087_v30, %v1681_v0  ;;  %v2048_v33 = vpop.f32.mrb[14].mxu0  ;;  %v2089_v34 = vpop.f32.mrb[14].mxu1  ;;  %v13835_v17 = vld [vmem:[#allocation9 + $0x134] ss:$8 sps:$4 sm:$0xff]   ;;  %v13824_v0 = vld [vmem:[#allocation9 + $0x30] ss:$8 sps:$4 sm:$0xff]  }
 0x37c   :  { %v2049_v35 = vpop.f32.mrb[15].mxu0  ;;  %v2090_v36 = vpop.f32.mrb[15].mxu1  ;;  %v13838_v20 = vld [vmem:[#allocation9 + $0x54] ss:$8 sps:$4 sm:$0xff]   ;;  %v13839_v22 = vld [vmem:[#allocation9 + $0x140] ss:$8 sps:$4 sm:$0xff]  }
 0x37d   :  { %v13844_v29 = vld [vmem:[#allocation9 + $0x64] ss:$8 sps:$4 sm:$0xff]   ;;  %v13845_v30 = vld [vmem:[#allocation9 + $0x150] ss:$8 sps:$4 sm:$0xff]   ;;  %v13850_v33 = vld [vmem:[#allocation9 + $0x74] ss:$8 sps:$4 sm:$0xff]  }
 0x37e   :  { %v13851_v34 = vld [vmem:[#allocation9 + $0x160] ss:$8 sps:$4 sm:$0xff]   ;;  %v13859_v35 = vld [vmem:[#allocation9 + $0x174] ss:$8 sps:$4 sm:$0xff]   ;;  %v13848_v36 = vld [vmem:[#allocation9 + $0x70] ss:$8 sps:$4 sm:$0xff]  }
 0x3b9   :  { %v2521_v42 = vpop.f32.mrb[16].mxu0 }
 0x3ba   :  { %v2569_v45 = vadd.f32 %v2521_v42, %v2045_v23  ;;  %v2562_v46 = vpop.f32.mrb[16].mxu1  ;;  %v2523_v47 = vpop.f32.mrb[17].mxu0  ;;  %v13847_v23 = vld [vmem:[#allocation9 + $0x154] ss:$8 sps:$4 sm:$0xff]   ;;  %v13854_v42 = vld [vmem:[#allocation9 + $0x80] ss:$8 sps:$4 sm:$0xff]  }
 0x3bb   :  { %v2571_v49 = vadd.f32 %v2562_v46, %v2086_v24  ;;  %v2570_v50 = vadd.f32 %v2523_v47, %v2047_v31  ;;  %v2564_v51 = vpop.f32.mrb[17].mxu1  ;;  %v2525_v52 = vpop.f32.mrb[18].mxu0  ;;  %v13836_v24 = vld [vmem:[#allocation9 + $0x50] ss:$8 sps:$4 sm:$0xff]   ;;  %v13853_v31 = vld [vmem:[#allocation9 + $0x164] ss:$8 sps:$4 sm:$0xff]  }
 0x3bc   :  { %v2595_v53 = vadd.f32 %v2578_v40, %v2569_v45  ;;  %v2572_v54 = vadd.f32 %v2564_v51, %v2088_v32  ;;  %v2566_v55 = vpop.f32.mrb[18].mxu1  ;;  %v2526_v56 = vpop.f32.mrb[19].mxu0  ;;  %v13842_v32 = vld [vmem:[#allocation9 + $0x60] ss:$8 sps:$4 sm:$0xff]   ;;  %v13857_v40 = vld [vmem:[#allocation9 + $0x170] ss:$8 sps:$4 sm:$0xff]  }
 0x3bd   :  { %v2597_v57 = vadd.f32 %v2586_v43, %v2571_v49  ;;  %v2596_v58 = vadd.f32 %v2582_v44, %v2570_v50  ;;  %v2567_v60 = vpop.f32.mrb[19].mxu1  ;;  %v13860_v43 = vld [vmem:[#allocation9 + $0x90] ss:$8 sps:$4 sm:$0xff]   ;;  %v13862_v44 = vld [vmem:[#allocation9 + $0x94] ss:$8 sps:$4 sm:$0xff]  }
 0x3be   :  { %v2598_v61 = vadd.f32 %v2590_v48, %v2572_v54  ;;  %v2599_v63 = vmax.f32 %v2595_v53, 0.0  ;;  %v13863_v45 = vld [vmem:[#allocation9 + $0x180] ss:$8 sps:$4 sm:$0xff]   ;;  %v13865_v46 = vld [vmem:[#allocation9 + $0x184] ss:$8 sps:$4 sm:$0xff]  }
 0x3bf   :  { %v2600_v62 = vmax.f32 %v2596_v58, 0.0  ;;  %v2601_v3 = vmax.f32 %v2597_v57, 0.0  ;;  %v13868_v47 = vld [vmem:[#allocation9 + $0xa4] ss:$8 sps:$4 sm:$0xff]   ;;  %v13866_v48 = vld [vmem:[#allocation9 + $0xa0] ss:$8 sps:$4 sm:$0xff]  }
 0x3c0   :  { %v2602_v2 = vmax.f32 %v2598_v61, 0.0  ;;  %v13871_v49 = vld [vmem:[#allocation9 + $0x194] ss:$8 sps:$4 sm:$0xff]   ;;  %v13869_v50 = vld [vmem:[#allocation9 + $0x190] ss:$8 sps:$4 sm:$0xff]  }
 0x3c1   :  { %2606 = vmatprep.subr.mxu0 %v2600_v62  ;;  %v13874_v51 = vld [vmem:[#allocation9 + $0xb4] ss:$8 sps:$4 sm:$0xff]   ;;  %v13872_v52 = vld [vmem:[#allocation9 + $0xb0] ss:$8 sps:$4 sm:$0xff]   ;;  %v13877_v53 = vld [vmem:[#allocation9 + $0x1a4] ss:$8 sps:$4 sm:$0xff]  }
 0x3c2   :  { %2677 = vmatprep.subr.mxu1 %v2602_v2  ;;  %2607 = vmatpush1.msra.mxu0 %v2599_v63  ;;  %v13875_v54 = vld [vmem:[#allocation9 + $0x1a0] ss:$8 sps:$4 sm:$0xff]   ;;  %v13880_v55 = vld [vmem:[#allocation9 + $0xc4] ss:$8 sps:$4 sm:$0xff]   ;;  %v13883_v57 = vld [vmem:[#allocation9 + $0x1b4] ss:$8 sps:$4 sm:$0xff]  }
 0x3c3   :  { %2678 = vmatpush1.msra.mxu1 %v2601_v3  ;;  %12187 = vmatmul.mubr.msk.f32.vlgmr.msra.gmra.mrb[20].mxu0 %vm2603_vm1, %v15770_v1  ;;  %v13878_v56 = vld [vmem:[#allocation9 + $0xc0] ss:$8 sps:$4 sm:$0xff]   ;;  %v13881_v58 = vld [vmem:[#allocation9 + $0x1b0] ss:$8 sps:$4 sm:$0xff]   ;;  %v13886_v60 = vld [vmem:[#allocation9 + $0xd4] ss:$8 sps:$4 sm:$0xff]  }
 0x3c4   :  { %12188 = vmatmul.mubr.msk.f32.vlgmr.msra.gmra.mrb[20].mxu1 %vm2603_vm1, %v15770_v1  ;;  %2750 = vmatprep.subr.mxu0 %v2600_v62  ;;  %v13884_v61 = vld [vmem:[#allocation9 + $0xd0] ss:$8 sps:$4 sm:$0xff]   ;;  %v13889_v62 = vld [vmem:[#allocation9 + $0x1c4] ss:$8 sps:$4 sm:$0xff]  }
 0x3c5   :  { %2821 = vmatprep.subr.mxu1 %v2602_v2  ;;  %2751 = vmatpush1.msra.mxu0 %v2599_v63  ;;  %v13887_v63 = vld [vmem:[#allocation9 + $0x1c0] ss:$8 sps:$4 sm:$0xff]  }
 0x3c6   :  { %2822 = vmatpush1.msra.mxu1 %v2601_v3  ;;  %2814 = vmatprep.mubr.f32.mxu0 %v15441_v21  ;;  %v13890_v2 = vld [vmem:[#allocation9 + $0xe0] ss:$8 sps:$4 sm:$0xff]   ;;  %v13892_v3 = vld [vmem:[#allocation9 + $0xe4] ss:$8 sps:$4 sm:$0xff]  }
 0x3c7   :  { %2885 = vmatprep.mubr.f32.mxu1 %v15441_v21  ;;  %12189 = vmatmul.mubr.msk.f32.vlgmr.msra.gmra.mrb[22].mxu0 %vm2603_vm1, %v15777_v8 }
 0x3c8   :  { %12190 = vmatmul.mubr.msk.f32.vlgmr.msra.gmra.mrb[22].mxu1 %vm2603_vm1, %v15777_v8  ;;  %3379 = vmatprep.subr.bf16.mxu1 %v13811_v4  ;;  %v13895_v4 = vld [vmem:[#allocation9 + $0x1d4] ss:$8 sps:$4 sm:$0xff]  }
 0x3c9   :  { %3380 = vmatpush1.bf16.msra.mxu1 %v13809_v5  ;;  %3171 = vmatprep.subr.bf16.mxu0 %v13817_v6  ;;  %v13893_v5 = vld [vmem:[#allocation9 + $0x1d0] ss:$8 sps:$4 sm:$0xff]   ;;  %v13898_v6 = vld [vmem:[#allocation9 + $0xf4] ss:$8 sps:$4 sm:$0xff]  }
 0x3ca   :  { %3381 = vmatprep.subr.bf16.mxu1 %v13814_v7  ;;  %3172 = vmatpush1.bf16.msra.mxu0 %v13815_v9  ;;  %v13901_v7 = vld [vmem:[#allocation9 + $0x1e4] ss:$8 sps:$4 sm:$0xff]   ;;  %v13896_v9 = vld [vmem:[#allocation9 + $0xf0] ss:$8 sps:$4 sm:$0xff]  }
 0x3cb   :  { %3173 = vmatprep.subr.bf16.mxu0 %v13823_v10  ;;  %v13899_v10 = vld [vmem:[#allocation9 + $0x1e0] ss:$8 sps:$4 sm:$0xff]  }
 0x3cd   :  { %3382 = vmatpush1.bf16.msra.mxu1 %v13812_v11  ;;  %v13904_v11 = vld [vmem:[#allocation9 + $0x1f0] ss:$8 sps:$4 sm:$0xff]  }
 0x3ce   :  { %3383 = vmatprep.subr.bf16.mxu1 %v13820_v12  ;;  %3174 = vmatpush1.bf16.msra.mxu0 %v13821_v13  ;;  %v13906_v12 = vld [vmem:[#allocation9 + $0x1f4] ss:$8 sps:$4 sm:$0xff]   ;;  %v13911_v13 = vld [vmem:[#allocation9 + $0x204] ss:$8 sps:$4 sm:$0xff]  }
 0x3cf   :  { %3175 = vmatprep.subr.bf16.mxu0 %v13829_v39 }
 0x3d1   :  { %3384 = vmatpush1.bf16.msra.mxu1 %v13818_v14 }
 0x3d2   :  { %3385 = vmatprep.subr.bf16.mxu1 %v13826_v15  ;;  %3176 = vmatpush1.bf16.msra.mxu0 %v13827_v16 }
 0x3d3   :  { %3177 = vmatprep.subr.bf16.mxu0 %v13835_v17 }
 0x3d5   :  { %3386 = vmatpush1.bf16.msra.mxu1 %v13824_v0 }
 0x3d6   :  { %3387 = vmatprep.subr.bf16.mxu1 %v13832_v18  ;;  %3178 = vmatpush1.bf16.msra.mxu0 %v13833_v19 }
 0x3d7   :  { %3179 = vmatprep.subr.bf16.mxu0 %v13841_v41 }
 0x3d9   :  { %3388 = vmatpush1.bf16.msra.mxu1 %v13830_v59 }
 0x3da   :  { %3389 = vmatprep.subr.bf16.mxu1 %v13838_v20  ;;  %3180 = vmatpush1.bf16.msra.mxu0 %v13839_v22 }
 0x3db   :  { %3181 = vmatprep.subr.bf16.mxu0 %v13847_v23 }
 0x3dd   :  { %3390 = vmatpush1.bf16.msra.mxu1 %v13836_v24 }
 0x3de   :  { %3391 = vmatprep.subr.bf16.mxu1 %v13844_v29  ;;  %3182 = vmatpush1.bf16.msra.mxu0 %v13845_v30 }
 0x3df   :  { %3183 = vmatprep.subr.bf16.mxu0 %v13853_v31 }
 0x3e1   :  { %3392 = vmatpush1.bf16.msra.mxu1 %v13842_v32 }
 0x3e2   :  { %3393 = vmatprep.subr.bf16.mxu1 %v13850_v33  ;;  %3184 = vmatpush1.bf16.msra.mxu0 %v13851_v34  ;;  %v2920_v33 = vld [vmem:[#allocation4] sm:$0x77] }
 0x3e3   :  { %3185 = vmatprep.subr.bf16.mxu0 %v13859_v35 }
 0x3e5   :  { %3394 = vmatpush1.bf16.msra.mxu1 %v13848_v36 }
 0x3e6   :  { %3395 = vmatprep.subr.bf16.mxu1 %v13856_v37  ;;  %3186 = vmatpush1.bf16.msra.mxu0 %v13857_v40 }
 0x3e7   :  { %3187 = vmatprep.subr.bf16.mxu0 %v13865_v46 }
 0x3e9   :  { %3396 = vmatpush1.bf16.msra.mxu1 %v13854_v42 }
 0x3ea   :  { %3397 = vmatprep.subr.bf16.mxu1 %v13862_v44  ;;  %3188 = vmatpush1.bf16.msra.mxu0 %v13863_v45 }
 0x3eb   :  { %3189 = vmatprep.subr.bf16.mxu0 %v13871_v49 }
 0x3ed   :  { %3398 = vmatpush1.bf16.msra.mxu1 %v13860_v43 }
 0x3ee   :  { %3399 = vmatprep.subr.bf16.mxu1 %v13868_v47  ;;  %3190 = vmatpush1.bf16.msra.mxu0 %v13869_v50 }
 0x3ef   :  { %3191 = vmatprep.subr.bf16.mxu0 %v13877_v53 }
 0x3f1   :  { %3400 = vmatpush1.bf16.msra.mxu1 %v13866_v48 }
 0x3f2   :  { %3401 = vmatprep.subr.bf16.mxu1 %v13874_v51  ;;  %3192 = vmatpush1.bf16.msra.mxu0 %v13875_v54  ;;  %v13909_v54 = vld [vmem:[#allocation9 + $0x200] ss:$8 sps:$4 sm:$0xff]  }
 0x3f3   :  { %3193 = vmatprep.subr.bf16.mxu0 %v13883_v57 }
 0x3f5   :  { %3402 = vmatpush1.bf16.msra.mxu1 %v13872_v52 }
 0x3f6   :  { %3403 = vmatprep.subr.bf16.mxu1 %v13880_v55  ;;  %3194 = vmatpush1.bf16.msra.mxu0 %v13881_v58  ;;  %v13914_v58 = vld [vmem:[#allocation9 + $0x210] ss:$8 sps:$4 sm:$0xff]  }
 0x3f7   :  { %3195 = vmatprep.subr.bf16.mxu0 %v13889_v62  ;;  %v13922_v62 = vld [vmem:[#allocation9 + $0x234] ss:$8 sps:$4 sm:$0xff]  }
 0x3f9   :  { %3404 = vmatpush1.bf16.msra.mxu1 %v13878_v56  ;;  %v13916_v56 = vld [vmem:[#allocation9 + $0x214] ss:$8 sps:$4 sm:$0xff]  }
 0x3fa   :  { %3405 = vmatprep.subr.bf16.mxu1 %v13886_v60  ;;  %3196 = vmatpush1.bf16.msra.mxu0 %v13887_v63  ;;  %v13919_v60 = vld [vmem:[#allocation9 + $0x224] ss:$8 sps:$4 sm:$0xff]   ;;  %v13920_v63 = vld [vmem:[#allocation9 + $0x230] ss:$8 sps:$4 sm:$0xff]  }
 0x3fb   :  { %3197 = vmatprep.subr.bf16.mxu0 %v13895_v4  ;;  %v13928_v4 = vld [vmem:[#allocation9 + $0x254] ss:$8 sps:$4 sm:$0xff]  }
 0x3fd   :  { %3406 = vmatpush1.bf16.msra.mxu1 %v13884_v61  ;;  %v13917_v61 = vld [vmem:[#allocation9 + $0x220] ss:$8 sps:$4 sm:$0xff]  }
 0x3fe   :  { %3407 = vmatprep.subr.bf16.mxu1 %v13892_v3  ;;  %3198 = vmatpush1.bf16.msra.mxu0 %v13893_v5  ;;  %v13923_v3 = vld [vmem:[#allocation9 + $0x240] ss:$8 sps:$4 sm:$0xff]   ;;  %v13926_v5 = vld [vmem:[#allocation9 + $0x250] ss:$8 sps:$4 sm:$0xff]  }
 0x3ff   :  { %3199 = vmatprep.subr.bf16.mxu0 %v13901_v7  ;;  %v13929_v7 = vld [vmem:[#allocation9 + $0x260] ss:$8 sps:$4 sm:$0xff]  }
 0x401   :  { %3408 = vmatpush1.bf16.msra.mxu1 %v13890_v2  ;;  %v13925_v2 = vld [vmem:[#allocation9 + $0x244] ss:$8 sps:$4 sm:$0xff]  }
 0x402   :  { %3409 = vmatprep.subr.bf16.mxu1 %v13898_v6  ;;  %3200 = vmatpush1.bf16.msra.mxu0 %v13899_v10  ;;  %v13931_v6 = vld [vmem:[#allocation9 + $0x264] ss:$8 sps:$4 sm:$0xff]   ;;  %v13932_v10 = vld [vmem:[#allocation9 + $0x270] ss:$8 sps:$4 sm:$0xff]  }
 0x403   :  { %3201 = vmatprep.subr.bf16.mxu0 %v13906_v12  ;;  %v13935_v12 = vld [vmem:[#allocation9 + $0x280] ss:$8 sps:$4 sm:$0xff]  }
 0x405   :  { %3410 = vmatpush1.bf16.msra.mxu1 %v13896_v9  ;;  %v13934_v9 = vld [vmem:[#allocation9 + $0x274] ss:$8 sps:$4 sm:$0xff]  }
 0x406   :  { %3202 = vmatpush1.bf16.msra.mxu0 %v13904_v11  ;;  %v13937_v11 = vld [vmem:[#allocation9 + $0x284] ss:$8 sps:$4 sm:$0xff]  }
 0x407   :  { %3623 = vmatprep.subr.bf16.mxu0 %v13911_v13  ;;  %v13940_v13 = vld [vmem:[#allocation9 + $0x294] ss:$8 sps:$4 sm:$0xff]  }
 0x496   :  { %v2672_v39 = vpop.f32.mrb[20].mxu0 }
 0x497   :  { %v2743_v14 = vpop.f32.mrb[20].mxu1  ;;  %v2674_v15 = vpop.f32.mrb[21].mxu0 }
 0x498   :  { %v2745_v16 = vpop.f32.mrb[21].mxu1 }
 0x49a   :  { %v2816_v17 = vpop.f32.mrb[22].mxu0 }
 0x49b   :  { %v2892_v0 = vmax.f32 %v2672_v39, %v2816_v17  ;;  %v2887_v18 = vpop.f32.mrb[22].mxu1  ;;  %v2818_v19 = vpop.f32.mrb[23].mxu0  ;;  %v13938_v39 = vld [vmem:[#allocation9 + $0x290] ss:$8 sps:$4 sm:$0xff]  }
 0x49c   :  { %v2894_v41 = vmax.f32 %v2743_v14, %v2887_v18  ;;  %v2893_v59 = vmax.f32 %v2674_v15, %v2818_v19  ;;  %v2889_v20 = vpop.f32.mrb[23].mxu1  ;;  %v13943_v14 = vld [vmem:[#allocation9 + $0x2a4] ss:$8 sps:$4 sm:$0xff]   ;;  %v13941_v15 = vld [vmem:[#allocation9 + $0x2a0] ss:$8 sps:$4 sm:$0xff]  }
 0x49d   :  { %v2895_v22 = vmax.f32 %v2745_v16, %v2889_v20  ;;  %v13946_v16 = vld [vmem:[#allocation9 + $0x2b4] ss:$8 sps:$4 sm:$0xff]   ;;  %v13944_v17 = vld [vmem:[#allocation9 + $0x2b0] ss:$8 sps:$4 sm:$0xff]   ;;  %v13947_v18 = vld [vmem:[#allocation9 + $0x2c0] ss:$8 sps:$4 sm:$0xff]  }
 0x49e   :  { %v2896_v23 = vmax.f32 %v2892_v0, %v2894_v41  ;;  %v13949_v0 = vld [vmem:[#allocation9 + $0x2c4] ss:$8 sps:$4 sm:$0xff]   ;;  %v13952_v19 = vld [vmem:[#allocation9 + $0x2d4] ss:$8 sps:$4 sm:$0xff]   ;;  %v13950_v41 = vld [vmem:[#allocation9 + $0x2d0] ss:$8 sps:$4 sm:$0xff]  }
 0x49f   :  { %v2897_v24 = vmax.f32 %v2893_v59, %v2895_v22  ;;  %v13955_v59 = vld [vmem:[#allocation9 + $0x2e4] ss:$8 sps:$4 sm:$0xff]   ;;  %v13953_v20 = vld [vmem:[#allocation9 + $0x2e0] ss:$8 sps:$4 sm:$0xff]   ;;  %v13958_v22 = vld [vmem:[#allocation9 + $0x2f4] ss:$8 sps:$4 sm:$0xff]  }
 0x4a1   :  { %v13275_v29 = vpack.c.bf16 %v2897_v24, %v2896_v23  ;;  %v13956_v23 = vld [vmem:[#allocation9 + $0x2f0] ss:$8 sps:$4 sm:$0xff]  }
 0x4a3   :  { %v2906_v30 = vshrl.u32 %v13275_v29, 16  ;;  %v2909_v32 = vshll.u32 %v13275_v29, 16 }
 0x4a5   :  { %v2908_v31 = vrot.slane %v2906_v30, 7  ;;  %v13959_v30 = vld [vmem:[#allocation11 + $0x200] ss:$16 sps:$4 sm:$0xff]  }
 0x4a7   :  { %v2911_v34 = vor.u32 %v2909_v32, %v2908_v31  ;;  %v13961_v31 = vld [vmem:[#allocation11 + $0x204] ss:$16 sps:$4 sm:$0xff]   ;;  %v13962_v32 = vld [vmem:[#allocation11 + $0x208] ss:$16 sps:$4 sm:$0xff]  }
 0x4a8   :  { %4165 = vmatprep.subr.bf16.mxu1 %v13961_v31  ;;  %v14043_v31 = vld [vmem:[#allocation11 + $0x3c0] ss:$16 sps:$4 sm:$0xff]  }
 0x4a9   :  { %v2921_v35 = vsel %vm2919_vm4, %v2911_v34, %v2920_v33  ;;  %v13964_v33 = vld [vmem:[#allocation11 + $0x20c] ss:$16 sps:$4 sm:$0xff]   ;;  %v13967_v34 = vld [vmem:[#allocation11 + $0x224] ss:$16 sps:$4 sm:$0xff]  }
 0x4aa   :  { %2922 = vst [vmem:[#allocation4] sm:$0x77] %v2921_v35  ;;  %v13970_v35 = vld [vmem:[#allocation11 + $0x22c] ss:$16 sps:$4 sm:$0xff]  }
 0x4b1   :  { %v2923_v36 = vld [vmem:[#allocation4] sm:$0x33] }
 0x4b2   :  { %v2956_v37 = vld [vmem:[#allocation4] sm:$0x77]  ;;  %v12226_v40 = vcombine.low %v2923_v36, %v2923_v36  ;;  %v12227_v42 = vcombine.high %v2923_v36, %v2923_v36  ;;  %v13965_v36 = vld [vmem:[#allocation11 + $0x220] ss:$16 sps:$4 sm:$0xff]  }
 0x4b3   :  { %v12192_v43 = vcombine.low %v2956_v37, %v2956_v37  ;;  %v12193_v44 = vcombine.high %v2956_v37, %v2956_v37  ;;  %v15836_v45 = vld [vmem:[#allocation4] sm:$0x66] }
 0x4b4   :  { %3411 = vmatprep.mubr.bf16.mxu1 %v12227_v42  ;;  %v12261_v48 = vcombine.high %v15836_v45, %v15836_v45  ;;  %v12260_v24 = vcombine.low %v15836_v45, %v15836_v45  ;;  %v13968_v37 = vld [vmem:[#allocation11 + $0x228] ss:$16 sps:$4 sm:$0xff]   ;;  %v13976_v42 = vld [vmem:[#allocation11 + $0x24c] ss:$16 sps:$4 sm:$0xff]   ;;  %v13979_v45 = vld [vmem:[#allocation11 + $0x264] ss:$16 sps:$4 sm:$0xff]  }
 0x4b5   :  { %v3005_v46 = vshll.u32 %v12193_v44, 16  ;;  %v2998_v47 = vshll.u32 %v12192_v43, 16  ;;  %3412 = vmatmul.mubr.bf16.vlgmr.msra.gmra.mrb[24].mxu1 %v12226_v40  ;;  %v3003_v49 = vshrl.u32 %v12193_v44, 16  ;;  %v2996_v51 = vshrl.u32 %v12192_v43, 16  ;;  %v13973_v40 = vld [vmem:[#allocation11 + $0x244] ss:$16 sps:$4 sm:$0xff]  }
 0x4b6   :  { %v3460_v57 = vrot.slane %v12261_v48, 1  ;;  %v3459_v29 = vrot.slane %v12260_v24, 1  ;;  %4166 = vmatpush1.bf16.msra.mxu1 %v13959_v30  ;;  %v13971_v43 = vld [vmem:[#allocation11 + $0x240] ss:$16 sps:$4 sm:$0xff]   ;;  %v13974_v44 = vld [vmem:[#allocation11 + $0x248] ss:$16 sps:$4 sm:$0xff]  }
 0x4b7   :  { %v3007_v50 = vrot.slane %v3005_v46, 1  ;;  %v3000_v52 = vrot.slane %v2998_v47, 1  ;;  %4167 = vmatprep.subr.bf16.mxu1 %v13967_v34  ;;  %v13982_v46 = vld [vmem:[#allocation11 + $0x26c] ss:$16 sps:$4 sm:$0xff]   ;;  %v13977_v47 = vld [vmem:[#allocation11 + $0x260] ss:$16 sps:$4 sm:$0xff]  }
 0x4b8   :  { %v13980_v48 = vld [vmem:[#allocation11 + $0x268] ss:$16 sps:$4 sm:$0xff]   ;;  %v14037_v24 = vld [vmem:[#allocation11 + $0x3a0] ss:$16 sps:$4 sm:$0xff]   ;;  %v14045_v30 = vld [vmem:[#allocation11 + $0x3c4] ss:$16 sps:$4 sm:$0xff]  }
 0x4b9   :  { %v3008_v53 = vor.u32 %v3007_v50, %v3003_v49  ;;  %v3001_v55 = vor.u32 %v3000_v52, %v2996_v51  ;;  %v13985_v49 = vld [vmem:[#allocation11 + $0x284] ss:$16 sps:$4 sm:$0xff]   ;;  %v13988_v50 = vld [vmem:[#allocation11 + $0x28c] ss:$16 sps:$4 sm:$0xff]   ;;  %v13983_v51 = vld [vmem:[#allocation11 + $0x280] ss:$16 sps:$4 sm:$0xff]  }
 0x4ba   :  { %4168 = vmatpush1.bf16.msra.mxu1 %v13965_v36  ;;  %v13986_v52 = vld [vmem:[#allocation11 + $0x288] ss:$16 sps:$4 sm:$0xff]   ;;  %v14051_v34 = vld [vmem:[#allocation11 + $0x3e4] ss:$16 sps:$4 sm:$0xff]   ;;  %v14049_v36 = vld [vmem:[#allocation11 + $0x3e0] ss:$16 sps:$4 sm:$0xff]  }
 0x4bb   :  { %3203 = vmatprep.mubr.bf16.mxu0 %v3008_v53  ;;  %4169 = vmatprep.subr.bf16.mxu1 %v13973_v40  ;;  %v13991_v53 = vld [vmem:[#allocation11 + $0x2a4] ss:$16 sps:$4 sm:$0xff]  }
 0x4bc   :  { %3204 = vmatmul.mubr.bf16.vlgmr.msra.gmra.mrb[24].mxu0 %v3001_v55  ;;  %v13989_v55 = vld [vmem:[#allocation11 + $0x2a0] ss:$16 sps:$4 sm:$0xff]   ;;  %v14057_v40 = vld [vmem:[#allocation11 + $0x4] ss:$16 sps:$4 sm:$0xff]  }
 0x4bd   :  { %3624 = vmatpush1.bf16.msra.mxu0 %v13909_v54  ;;  %3655 = vmatprep.mubr.bf16.mxu0 %v3460_v57  ;;  %v13994_v54 = vld [vmem:[#allocation11 + $0x2ac] ss:$16 sps:$4 sm:$0xff]   ;;  %v13997_v57 = vld [vmem:[#allocation11 + $0x2c4] ss:$16 sps:$4 sm:$0xff]  }
 0x4be   :  { %3625 = vmatprep.subr.bf16.mxu0 %v13916_v56  ;;  %4170 = vmatpush1.bf16.msra.mxu1 %v13971_v43  ;;  %v13992_v56 = vld [vmem:[#allocation11 + $0x2a8] ss:$16 sps:$4 sm:$0xff]  }
 0x4bf   :  { %4171 = vmatprep.subr.bf16.mxu1 %v13979_v45 }
 0x4c1   :  { %3626 = vmatpush1.bf16.msra.mxu0 %v13914_v58  ;;  %v14000_v58 = vld [vmem:[#allocation11 + $0x2cc] ss:$16 sps:$4 sm:$0xff]  }
 0x4c2   :  { %3627 = vmatprep.subr.bf16.mxu0 %v13919_v60  ;;  %4172 = vmatpush1.bf16.msra.mxu1 %v13977_v47  ;;  %v13995_v60 = vld [vmem:[#allocation11 + $0x2c0] ss:$16 sps:$4 sm:$0xff]  }
 0x4c3   :  { %4173 = vmatprep.subr.bf16.mxu1 %v13985_v49 }
 0x4c5   :  { %3628 = vmatpush1.bf16.msra.mxu0 %v13917_v61  ;;  %v13998_v61 = vld [vmem:[#allocation11 + $0x2c8] ss:$16 sps:$4 sm:$0xff]  }
 0x4c6   :  { %3629 = vmatprep.subr.bf16.mxu0 %v13922_v62  ;;  %4174 = vmatpush1.bf16.msra.mxu1 %v13983_v51  ;;  %v14003_v62 = vld [vmem:[#allocation11 + $0x2e4] ss:$16 sps:$4 sm:$0xff]  }
 0x4c7   :  { %4175 = vmatprep.subr.bf16.mxu1 %v13991_v53  ;;  %v3666_v53 = vld [vmem:[%s16250_s6] sm:$0x3] }
 0x4c9   :  { %3630 = vmatpush1.bf16.msra.mxu0 %v13920_v63  ;;  %v14006_v63 = vld [vmem:[#allocation11 + $0x2ec] ss:$16 sps:$4 sm:$0xff]  }
 0x4ca   :  { %3631 = vmatprep.subr.bf16.mxu0 %v13925_v2  ;;  %4176 = vmatpush1.bf16.msra.mxu1 %v13989_v55  ;;  %v14001_v2 = vld [vmem:[#allocation11 + $0x2e0] ss:$16 sps:$4 sm:$0xff]  }
 0x4cb   :  { %4177 = vmatprep.subr.bf16.mxu1 %v13997_v57 }
 0x4cd   :  { %3632 = vmatpush1.bf16.msra.mxu0 %v13923_v3  ;;  %v14004_v3 = vld [vmem:[#allocation11 + $0x2e8] ss:$16 sps:$4 sm:$0xff]  }
 0x4ce   :  { %3633 = vmatprep.subr.bf16.mxu0 %v13928_v4  ;;  %4178 = vmatpush1.bf16.msra.mxu1 %v13995_v60  ;;  %v14009_v4 = vld [vmem:[#allocation11 + $0x304] ss:$16 sps:$4 sm:$0xff]  }
 0x4cf   :  { %4179 = vmatprep.subr.bf16.mxu1 %v14003_v62 }
 0x4d1   :  { %3634 = vmatpush1.bf16.msra.mxu0 %v13926_v5  ;;  %v14012_v5 = vld [vmem:[#allocation11 + $0x30c] ss:$16 sps:$4 sm:$0xff]  }
 0x4d2   :  { %3635 = vmatprep.subr.bf16.mxu0 %v13931_v6  ;;  %4180 = vmatpush1.bf16.msra.mxu1 %v14001_v2  ;;  %v14007_v6 = vld [vmem:[#allocation11 + $0x300] ss:$16 sps:$4 sm:$0xff]  }
 0x4d3   :  { %4181 = vmatprep.subr.bf16.mxu1 %v14009_v4 }
 0x4d5   :  { %3636 = vmatpush1.bf16.msra.mxu0 %v13929_v7  ;;  %v14010_v7 = vld [vmem:[#allocation11 + $0x308] ss:$16 sps:$4 sm:$0xff]  }
 0x4d6   :  { %3637 = vmatprep.subr.bf16.mxu0 %v13934_v9  ;;  %v14015_v9 = vld [vmem:[#allocation11 + $0x324] ss:$16 sps:$4 sm:$0xff]   ;;  %4182 = vmatpush1.bf16.msra.mxu1 %v14007_v6 }
 0x4d7   :  { %4183 = vmatprep.subr.bf16.mxu1 %v14015_v9 }
 0x4d9   :  { %3638 = vmatpush1.bf16.msra.mxu0 %v13932_v10  ;;  %v14018_v10 = vld [vmem:[#allocation11 + $0x32c] ss:$16 sps:$4 sm:$0xff]  }
 0x4da   :  { %3639 = vmatprep.subr.bf16.mxu0 %v13937_v11  ;;  %v14013_v11 = vld [vmem:[#allocation11 + $0x320] ss:$16 sps:$4 sm:$0xff]  }
 0x4db   :  { %4184 = vmatpush1.bf16.msra.mxu1 %v14013_v11 }
 0x4dd   :  { %3640 = vmatpush1.bf16.msra.mxu0 %v13935_v12  ;;  %v14016_v12 = vld [vmem:[#allocation11 + $0x328] ss:$16 sps:$4 sm:$0xff]  }
 0x4de   :  { %3641 = vmatprep.subr.bf16.mxu0 %v13940_v13  ;;  %v14021_v13 = vld [vmem:[#allocation11 + $0x344] ss:$16 sps:$4 sm:$0xff]  }
 0x4df   :  { %4185 = vmatprep.subr.bf16.mxu1 %v14021_v13  ;;  %v14055_v13 = vld [vmem:[#allocation11] ss:$16 sps:$4 sm:$0xff]  }
 0x4e1   :  { %3642 = vmatpush1.bf16.msra.mxu0 %v13938_v39  ;;  %v14024_v39 = vld [vmem:[#allocation11 + $0x34c] ss:$16 sps:$4 sm:$0xff]  }
 0x4e2   :  { %3643 = vmatprep.subr.bf16.mxu0 %v13943_v14  ;;  %v14019_v14 = vld [vmem:[#allocation11 + $0x340] ss:$16 sps:$4 sm:$0xff]  }
 0x4e3   :  { %4186 = vmatpush1.bf16.msra.mxu1 %v14019_v14 }
 0x4e5   :  { %3644 = vmatpush1.bf16.msra.mxu0 %v13941_v15  ;;  %v14022_v15 = vld [vmem:[#allocation11 + $0x348] ss:$16 sps:$4 sm:$0xff]  }
 0x4e6   :  { %3645 = vmatprep.subr.bf16.mxu0 %v13946_v16  ;;  %v14027_v16 = vld [vmem:[#allocation11 + $0x364] ss:$16 sps:$4 sm:$0xff]  }
 0x4e7   :  { %4187 = vmatprep.subr.bf16.mxu1 %v14027_v16  ;;  %v14066_v16 = vld [vmem:[#allocation11 + $0x2c] ss:$16 sps:$4 sm:$0xff]  }
 0x4e9   :  { %3646 = vmatpush1.bf16.msra.mxu0 %v13944_v17  ;;  %v14030_v17 = vld [vmem:[#allocation11 + $0x36c] ss:$16 sps:$4 sm:$0xff]  }
 0x4ea   :  { %3647 = vmatprep.subr.bf16.mxu0 %v13949_v0  ;;  %v14025_v0 = vld [vmem:[#allocation11 + $0x360] ss:$16 sps:$4 sm:$0xff]  }
 0x4eb   :  { %4188 = vmatpush1.bf16.msra.mxu1 %v14025_v0  ;;  %v14061_v0 = vld [vmem:[#allocation11 + $0x20] ss:$16 sps:$4 sm:$0xff]  }
 0x4ed   :  { %3648 = vmatpush1.bf16.msra.mxu0 %v13947_v18  ;;  %v14028_v18 = vld [vmem:[#allocation11 + $0x368] ss:$16 sps:$4 sm:$0xff]  }
 0x4ee   :  { %3649 = vmatprep.subr.bf16.mxu0 %v13952_v19  ;;  %v14033_v19 = vld [vmem:[#allocation11 + $0x384] ss:$16 sps:$4 sm:$0xff]  }
 0x4ef   :  { %4189 = vmatprep.subr.bf16.mxu1 %v14033_v19  ;;  %v14069_v19 = vld [vmem:[#allocation11 + $0x44] ss:$16 sps:$4 sm:$0xff]  }
 0x4f1   :  { %3650 = vmatpush1.bf16.msra.mxu0 %v13950_v41  ;;  %v14036_v41 = vld [vmem:[#allocation11 + $0x38c] ss:$16 sps:$4 sm:$0xff]  }
 0x4f2   :  { %3651 = vmatprep.subr.bf16.mxu0 %v13955_v59  ;;  %v14031_v59 = vld [vmem:[#allocation11 + $0x380] ss:$16 sps:$4 sm:$0xff]  }
 0x4f3   :  { %4190 = vmatpush1.bf16.msra.mxu1 %v14031_v59  ;;  %v14067_v59 = vld [vmem:[#allocation11 + $0x40] ss:$16 sps:$4 sm:$0xff]  }
 0x4f5   :  { %3652 = vmatpush1.bf16.msra.mxu0 %v13953_v20  ;;  %v14034_v20 = vld [vmem:[#allocation11 + $0x388] ss:$16 sps:$4 sm:$0xff]  }
 0x4f6   :  { %3653 = vmatprep.subr.bf16.mxu0 %v13958_v22  ;;  %v14039_v22 = vld [vmem:[#allocation11 + $0x3a4] ss:$16 sps:$4 sm:$0xff]  }
 0x4f7   :  { %4191 = vmatprep.subr.bf16.mxu1 %v14039_v22  ;;  %v14075_v22 = vld [vmem:[#allocation11 + $0x64] ss:$16 sps:$4 sm:$0xff]  }
 0x4f8   :  { %4192 = vmatpush1.bf16.msra.mxu1 %v14037_v24  ;;  %v14073_v24 = vld [vmem:[#allocation11 + $0x60] ss:$16 sps:$4 sm:$0xff]  }
 0x4f9   :  { %3654 = vmatpush1.bf16.msra.mxu0 %v13956_v23  ;;  %v14042_v23 = vld [vmem:[#allocation11 + $0x3ac] ss:$16 sps:$4 sm:$0xff]   ;;  %4193 = vmatprep.subr.bf16.mxu1 %v14045_v30  ;;  %v14081_v30 = vld [vmem:[#allocation11 + $0x84] ss:$16 sps:$4 sm:$0xff]  }
 0x4fa   :  { %4206 = vmatprep.subr.bf16.mxu0 %v13964_v33  ;;  %v14048_v33 = vld [vmem:[#allocation11 + $0x3cc] ss:$16 sps:$4 sm:$0xff]  }
 0x4fc   :  { %3656 = vmatmul.mubr.bf16.vlgmr.msra.gmra.mrb[28].mxu0 %v3459_v29  ;;  %v14040_v29 = vld [vmem:[#allocation11 + $0x3a8] ss:$16 sps:$4 sm:$0xff]   ;;  %4194 = vmatpush1.bf16.msra.mxu1 %v14043_v31  ;;  %v14084_v31 = vld [vmem:[#allocation11 + $0x8c] ss:$16 sps:$4 sm:$0xff]  }
 0x4fd   :  { %4207 = vmatpush1.bf16.msra.mxu0 %v13962_v32  ;;  %v14046_v32 = vld [vmem:[#allocation11 + $0x3c8] ss:$16 sps:$4 sm:$0xff]   ;;  %4195 = vmatprep.subr.bf16.mxu1 %v14051_v34  ;;  %v14087_v34 = vld [vmem:[#allocation11 + $0xa4] ss:$16 sps:$4 sm:$0xff]  }
 0x4fe   :  { %4208 = vmatprep.subr.bf16.mxu0 %v13970_v35  ;;  %v14054_v35 = vld [vmem:[#allocation11 + $0x3ec] ss:$16 sps:$4 sm:$0xff]  }
 0x500   :  { %4196 = vmatpush1.bf16.msra.mxu1 %v14049_v36  ;;  %v14085_v36 = vld [vmem:[#allocation11 + $0xa0] ss:$16 sps:$4 sm:$0xff]  }
 0x501   :  { %4209 = vmatpush1.bf16.msra.mxu0 %v13968_v37  ;;  %v14052_v37 = vld [vmem:[#allocation11 + $0x3e8] ss:$16 sps:$4 sm:$0xff]   ;;  %4567 = vmatprep.subr.bf16.mxu1 %v14057_v40  ;;  %v14093_v40 = vld [vmem:[#allocation11 + $0xc4] ss:$16 sps:$4 sm:$0xff]  }
 0x502   :  { %4210 = vmatprep.subr.bf16.mxu0 %v13976_v42  ;;  %v14060_v42 = vld [vmem:[#allocation11 + $0xc] ss:$16 sps:$4 sm:$0xff]  }
 0x505   :  { %4211 = vmatpush1.bf16.msra.mxu0 %v13974_v44 }
 0x506   :  { %4212 = vmatprep.subr.bf16.mxu0 %v13982_v46 }
 0x509   :  { %4213 = vmatpush1.bf16.msra.mxu0 %v13980_v48 }
 0x50a   :  { %4214 = vmatprep.subr.bf16.mxu0 %v13988_v50 }
 0x50d   :  { %4215 = vmatpush1.bf16.msra.mxu0 %v13986_v52 }
 0x50e   :  { %4216 = vmatprep.subr.bf16.mxu0 %v13994_v54  ;;  %v3671_v54 = vrot.slane %v3666_v53, %v15757_v25 }
 0x511   :  { %4217 = vmatpush1.bf16.msra.mxu0 %v13992_v56  ;;  %v3675_v56 = vrot.slane %v3666_v53, %v15761_v27  ;;  %v14111_v53 = vld [vmem:[#allocation11 + $0x124] ss:$16 sps:$4 sm:$0xff]  }
 0x512   :  { %4218 = vmatprep.subr.bf16.mxu0 %v14000_v58 }
 0x515   :  { %4219 = vmatpush1.bf16.msra.mxu0 %v13998_v61 }
 0x516   :  { %4220 = vmatprep.subr.bf16.mxu0 %v14006_v63 }
 0x519   :  { %4221 = vmatpush1.bf16.msra.mxu0 %v14004_v3 }
 0x51a   :  { %4222 = vmatprep.subr.bf16.mxu0 %v14012_v5 }
 0x51d   :  { %4223 = vmatpush1.bf16.msra.mxu0 %v14010_v7 }
 0x51e   :  { %4224 = vmatprep.subr.bf16.mxu0 %v14018_v10 }
 0x521   :  { %4225 = vmatpush1.bf16.msra.mxu0 %v14016_v12 }
 0x522   :  { %4226 = vmatprep.subr.bf16.mxu0 %v14024_v39  ;;  %v14058_v39 = vld [vmem:[#allocation11 + $0x8] ss:$16 sps:$4 sm:$0xff]  }
 0x525   :  { %4227 = vmatpush1.bf16.msra.mxu0 %v14022_v15  ;;  %v14063_v15 = vld [vmem:[#allocation11 + $0x24] ss:$16 sps:$4 sm:$0xff]  }
 0x526   :  { %4228 = vmatprep.subr.bf16.mxu0 %v14030_v17 }
 0x529   :  { %4229 = vmatpush1.bf16.msra.mxu0 %v14028_v18  ;;  %v14064_v18 = vld [vmem:[#allocation11 + $0x28] ss:$16 sps:$4 sm:$0xff]  }
 0x52a   :  { %4230 = vmatprep.subr.bf16.mxu0 %v14036_v41  ;;  %v14072_v41 = vld [vmem:[#allocation11 + $0x4c] ss:$16 sps:$4 sm:$0xff]  }
 0x52d   :  { %4231 = vmatpush1.bf16.msra.mxu0 %v14034_v20  ;;  %v14070_v20 = vld [vmem:[#allocation11 + $0x48] ss:$16 sps:$4 sm:$0xff]  }
 0x52e   :  { %4232 = vmatprep.subr.bf16.mxu0 %v14042_v23  ;;  %v14078_v23 = vld [vmem:[#allocation11 + $0x6c] ss:$16 sps:$4 sm:$0xff]  }
 0x531   :  { %4233 = vmatpush1.bf16.msra.mxu0 %v14040_v29  ;;  %v14076_v29 = vld [vmem:[#allocation11 + $0x68] ss:$16 sps:$4 sm:$0xff]  }
 0x532   :  { %4234 = vmatprep.subr.bf16.mxu0 %v14048_v33  ;;  %v14082_v33 = vld [vmem:[#allocation11 + $0x88] ss:$16 sps:$4 sm:$0xff]  }
 0x535   :  { %4235 = vmatpush1.bf16.msra.mxu0 %v14046_v32  ;;  %v14079_v32 = vld [vmem:[#allocation11 + $0x80] ss:$16 sps:$4 sm:$0xff]  }
 0x536   :  { %4236 = vmatprep.subr.bf16.mxu0 %v14054_v35  ;;  %v14090_v35 = vld [vmem:[#allocation11 + $0xac] ss:$16 sps:$4 sm:$0xff]  }
 0x539   :  { %4237 = vmatpush1.bf16.msra.mxu0 %v14052_v37  ;;  %v14088_v37 = vld [vmem:[#allocation11 + $0xa8] ss:$16 sps:$4 sm:$0xff]  }
 0x53a   :  { %4608 = vmatprep.subr.bf16.mxu0 %v14060_v42  ;;  %v14096_v42 = vld [vmem:[#allocation11 + $0xcc] ss:$16 sps:$4 sm:$0xff]  }
 0x588   :  { %v3413_v43 = vpop.f32.mrb[24].mxu1 }
 0x589   :  { %v3415_v44 = vpop.f32.mrb[25].mxu1 }
 0x58a   :  { %v3417_v45 = vpop.f32.mrb[26].mxu1 }
 0x58b   :  { %v3418_v46 = vpop.f32.mrb[27].mxu1  ;;  %v14099_v45 = vld [vmem:[#allocation11 + $0xe4] ss:$16 sps:$4 sm:$0xff]  }
 0x58c   :  { %v14102_v46 = vld [vmem:[#allocation11 + $0xec] ss:$16 sps:$4 sm:$0xff]  }
 0x58f   :  { %v3205_v47 = vpop.f32.mrb[24].mxu0 }
 0x590   :  { %v3414_v48 = vadd.f32 %v3413_v43, %v3205_v47  ;;  %v3207_v49 = vpop.f32.mrb[25].mxu0  ;;  %v14091_v43 = vld [vmem:[#allocation11 + $0xc0] ss:$16 sps:$4 sm:$0xff]  }
 0x591   :  { %v3416_v50 = vadd.f32 %v3415_v44, %v3207_v49  ;;  %v3209_v51 = vpop.f32.mrb[26].mxu0  ;;  %v14094_v44 = vld [vmem:[#allocation11 + $0xc8] ss:$16 sps:$4 sm:$0xff]   ;;  %v14097_v47 = vld [vmem:[#allocation11 + $0xe0] ss:$16 sps:$4 sm:$0xff]  }
 0x592   :  { %v3210_v52 = vpop.f32.mrb[27].mxu0  ;;  %v14105_v49 = vld [vmem:[#allocation11 + $0x104] ss:$16 sps:$4 sm:$0xff]   ;;  %v14103_v51 = vld [vmem:[#allocation11 + $0x100] ss:$16 sps:$4 sm:$0xff]  }
 0x593   :  { %v14106_v52 = vld [vmem:[#allocation11 + $0x108] ss:$16 sps:$4 sm:$0xff]  }
 0x5cf   :  { %v3657_v55 = vpop.f32.mrb[28].mxu0 }
 0x5d0   :  { %v3664_v57 = vadd.f32 %v3657_v55, %v3414_v48  ;;  %v3659_v58 = vpop.f32.mrb[29].mxu0  ;;  %v14100_v48 = vld [vmem:[#allocation11 + $0xe8] ss:$16 sps:$4 sm:$0xff]   ;;  %v14109_v55 = vld [vmem:[#allocation11 + $0x120] ss:$16 sps:$4 sm:$0xff]  }
 0x5d1   :  { %v3665_v60 = vadd.f32 %v3659_v58, %v3416_v50  ;;  %v3661_v61 = vpop.f32.mrb[30].mxu0  ;;  %v14108_v50 = vld [vmem:[#allocation11 + $0x10c] ss:$16 sps:$4 sm:$0xff]  }
 0x5d2   :  { %v3678_v62 = vadd.f32 %v3671_v54, %v3664_v57  ;;  %v3662_v63 = vpop.f32.mrb[31].mxu0  ;;  %v14114_v54 = vld [vmem:[#allocation11 + $0x12c] ss:$16 sps:$4 sm:$0xff]   ;;  %v14117_v57 = vld [vmem:[#allocation11 + $0x144] ss:$16 sps:$4 sm:$0xff]  }
 0x5d3   :  { %v3679_v2 = vadd.f32 %v3675_v56, %v3665_v60  ;;  %v14112_v56 = vld [vmem:[#allocation11 + $0x128] ss:$16 sps:$4 sm:$0xff]   ;;  %v14120_v58 = vld [vmem:[#allocation11 + $0x14c] ss:$16 sps:$4 sm:$0xff]   ;;  %v14115_v60 = vld [vmem:[#allocation11 + $0x140] ss:$16 sps:$4 sm:$0xff]  }
 0x5d4   :  { %v3680_v3 = vmax.f32 %v3678_v62, 0.0  ;;  %v14118_v61 = vld [vmem:[#allocation11 + $0x148] ss:$16 sps:$4 sm:$0xff]   ;;  %v14123_v62 = vld [vmem:[#allocation11 + $0x164] ss:$16 sps:$4 sm:$0xff]  }
 0x5d5   :  { %v3681_v4 = vmax.f32 %v3679_v2, 0.0  ;;  %v14126_v63 = vld [vmem:[#allocation11 + $0x16c] ss:$16 sps:$4 sm:$0xff]   ;;  %v14121_v2 = vld [vmem:[#allocation11 + $0x160] ss:$16 sps:$4 sm:$0xff]  }
 0x5d7   :  { %v3684_v5 = vcombine.low %v3680_v3, %v3681_v4  ;;  %v14124_v3 = vld [vmem:[#allocation11 + $0x168] ss:$16 sps:$4 sm:$0xff]   ;;  %v14129_v4 = vld [vmem:[#allocation11 + $0x184] ss:$16 sps:$4 sm:$0xff]  }
 0x5d9   :  { %3686 = vst [vmem:[#allocation5] sm:$0xff] %v3684_v5  ;;  %v14132_v5 = vld [vmem:[#allocation11 + $0x18c] ss:$16 sps:$4 sm:$0xff]  }
 0x5e0   :  { %v3766_v6 = vld [vmem:[#allocation5 + $0x1] ss:$4 sm:$0x3]  ;;  %v15847_v7 = vld [vmem:[#allocation5] ss:$4 sm:$0x3] }
 0x5e1   :  { %v3775_v9 = vrot.slane %v3766_v6, %v15761_v27  ;;  %v3771_v10 = vrot.slane %v3766_v6, %v15757_v25  ;;  %v3696_v11 = vrot.slane %v15847_v7, %v15761_v27  ;;  %v14127_v6 = vld [vmem:[#allocation11 + $0x180] ss:$16 sps:$4 sm:$0xff]  }
 0x5e3   :  { %v3779_v12 = vpack.c.bf16 %v3775_v9, %v3775_v9  ;;  %v3778_v14 = vpack.c.bf16 %v3771_v10, %v3771_v10  ;;  %v3700_v17 = vpack.c.bf16 %v3696_v11, %v3696_v11  ;;  %v14130_v9 = vld [vmem:[#allocation11 + $0x188] ss:$16 sps:$4 sm:$0xff]   ;;  %v14135_v10 = vld [vmem:[#allocation11 + $0x1a4] ss:$16 sps:$4 sm:$0xff]   ;;  %v14138_v11 = vld [vmem:[#allocation11 + $0x1ac] ss:$16 sps:$4 sm:$0xff]  }
 0x5e5   :  { %4197 = vmatprep.mubr.bf16.mxu1 %v3779_v12  ;;  %4238 = vmatprep.mubr.bf16.mxu0 %v3779_v12  ;;  %v14133_v12 = vld [vmem:[#allocation11 + $0x1a0] ss:$16 sps:$4 sm:$0xff]  }
 0x5e6   :  { %4198 = vmatmul.mubr.bf16.vlgmr.msra.gmra.mrb[28].mxu1 %v3778_v14  ;;  %4239 = vmatmul.mubr.bf16.vlgmr.msra.gmra.mrb[32].mxu0 %v3778_v14  ;;  %v14144_v14 = vld [vmem:[#allocation11 + $0x1cc] ss:$16 sps:$4 sm:$0xff]  }
 0x5e7   :  { %4568 = vmatpush1.bf16.msra.mxu1 %v14055_v13  ;;  %4609 = vmatpush1.bf16.msra.mxu0 %v14058_v39  ;;  %v14136_v13 = vld [vmem:[#allocation11 + $0x1a8] ss:$16 sps:$4 sm:$0xff]   ;;  %v14141_v39 = vld [vmem:[#allocation11 + $0x1c4] ss:$16 sps:$4 sm:$0xff]  }
 0x5e8   :  { %4599 = vmatprep.mubr.bf16.mxu1 %v3700_v17  ;;  %4640 = vmatprep.mubr.bf16.mxu0 %v3700_v17  ;;  %v14147_v17 = vld [vmem:[#allocation11 + $0x1e4] ss:$16 sps:$4 sm:$0xff]  }
 0x5e9   :  { %4569 = vmatprep.subr.bf16.mxu1 %v14063_v15  ;;  %4610 = vmatprep.subr.bf16.mxu0 %v14066_v16  ;;  %v14139_v15 = vld [vmem:[#allocation11 + $0x1c0] ss:$16 sps:$4 sm:$0xff]   ;;  %v14142_v16 = vld [vmem:[#allocation11 + $0x1c8] ss:$16 sps:$4 sm:$0xff]  }
 0x5eb   :  { %4570 = vmatpush1.bf16.msra.mxu1 %v14061_v0  ;;  %4611 = vmatpush1.bf16.msra.mxu0 %v14064_v18  ;;  %v14150_v0 = vld [vmem:[#allocation11 + $0x1ec] ss:$16 sps:$4 sm:$0xff]  }
 0x5ec   :  { %4571 = vmatprep.subr.bf16.mxu1 %v14069_v19  ;;  %4612 = vmatprep.subr.bf16.mxu0 %v14072_v41  ;;  %v15853_v18 = vld [vmem:[#allocation5 + $0x2] ss:$4 sm:$0x3]  ;;  %v14145_v19 = vld [vmem:[#allocation11 + $0x1e0] ss:$16 sps:$4 sm:$0xff]  }
 0x5ed   :  { %v14148_v41 = vld [vmem:[#allocation11 + $0x1e8] ss:$16 sps:$4 sm:$0xff]  }
 0x5ef   :  { %4572 = vmatpush1.bf16.msra.mxu1 %v14067_v59  ;;  %4613 = vmatpush1.bf16.msra.mxu0 %v14070_v20  ;;  %v3692_v59 = vrot.slane %v15847_v7, %v15757_v25  ;;  %v14153_v20 = vld [vmem:[#allocation11 + $0x404] ss:$16 sps:$4 sm:$0xff]   ;;  %v14157_v7 = vld [vmem:[#allocation11 + $0x420] ss:$16 sps:$4 sm:$0xff]  }
 0x5f0   :  { %4573 = vmatprep.subr.bf16.mxu1 %v14075_v22  ;;  %4614 = vmatprep.subr.bf16.mxu0 %v14078_v23  ;;  %v14156_v22 = vld [vmem:[#allocation11 + $0x40c] ss:$16 sps:$4 sm:$0xff]   ;;  %v4659_v23 = vrot.slane %v15853_v18, %v15761_v27 }
 0x5f3   :  { %4574 = vmatpush1.bf16.msra.mxu1 %v14073_v24  ;;  %4615 = vmatpush1.bf16.msra.mxu0 %v14076_v29  ;;  %v14151_v24 = vld [vmem:[#allocation11 + $0x400] ss:$16 sps:$4 sm:$0xff]   ;;  %v3699_v29 = vpack.c.bf16 %v3692_v59, %v3692_v59  ;;  %v14226_v59 = vld [vmem:[#allocation11 + $0x588] ss:$16 sps:$4 sm:$0xff]  }
 0x5f4   :  { %4575 = vmatprep.subr.bf16.mxu1 %v14081_v30  ;;  %4616 = vmatprep.subr.bf16.mxu0 %v14084_v31  ;;  %v14154_v30 = vld [vmem:[#allocation11 + $0x408] ss:$16 sps:$4 sm:$0xff]   ;;  %v4663_v31 = vpack.c.bf16 %v4659_v23, %v4659_v23  ;;  %v14229_v23 = vld [vmem:[#allocation11 + $0x5a0] ss:$16 sps:$4 sm:$0xff]  }
 0x5f7   :  { %4576 = vmatpush1.bf16.msra.mxu1 %v14079_v32  ;;  %4617 = vmatpush1.bf16.msra.mxu0 %v14082_v33  ;;  %v14159_v32 = vld [vmem:[#allocation11 + $0x424] ss:$16 sps:$4 sm:$0xff]   ;;  %v14162_v33 = vld [vmem:[#allocation11 + $0x42c] ss:$16 sps:$4 sm:$0xff]  }
 0x5f8   :  { %4577 = vmatprep.subr.bf16.mxu1 %v14087_v34  ;;  %4618 = vmatprep.subr.bf16.mxu0 %v14090_v35  ;;  %v14160_v34 = vld [vmem:[#allocation11 + $0x428] ss:$16 sps:$4 sm:$0xff]   ;;  %v14165_v35 = vld [vmem:[#allocation11 + $0x444] ss:$16 sps:$4 sm:$0xff]  }
 0x5fb   :  { %4578 = vmatpush1.bf16.msra.mxu1 %v14085_v36  ;;  %4619 = vmatpush1.bf16.msra.mxu0 %v14088_v37  ;;  %v14168_v36 = vld [vmem:[#allocation11 + $0x44c] ss:$16 sps:$4 sm:$0xff]   ;;  %v14163_v37 = vld [vmem:[#allocation11 + $0x440] ss:$16 sps:$4 sm:$0xff]  }
 0x5fc   :  { %4579 = vmatprep.subr.bf16.mxu1 %v14093_v40  ;;  %4620 = vmatprep.subr.bf16.mxu0 %v14096_v42  ;;  %v14166_v40 = vld [vmem:[#allocation11 + $0x448] ss:$16 sps:$4 sm:$0xff]   ;;  %v14171_v42 = vld [vmem:[#allocation11 + $0x464] ss:$16 sps:$4 sm:$0xff]  }
 0x5ff   :  { %4580 = vmatpush1.bf16.msra.mxu1 %v14091_v43  ;;  %4621 = vmatpush1.bf16.msra.mxu0 %v14094_v44  ;;  %v14174_v43 = vld [vmem:[#allocation11 + $0x46c] ss:$16 sps:$4 sm:$0xff]   ;;  %v14169_v44 = vld [vmem:[#allocation11 + $0x460] ss:$16 sps:$4 sm:$0xff]  }
 0x600   :  { %4581 = vmatprep.subr.bf16.mxu1 %v14099_v45  ;;  %4622 = vmatprep.subr.bf16.mxu0 %v14102_v46  ;;  %v14172_v45 = vld [vmem:[#allocation11 + $0x468] ss:$16 sps:$4 sm:$0xff]   ;;  %v14177_v46 = vld [vmem:[#allocation11 + $0x484] ss:$16 sps:$4 sm:$0xff]  }
 0x603   :  { %4582 = vmatpush1.bf16.msra.mxu1 %v14097_v47  ;;  %4623 = vmatpush1.bf16.msra.mxu0 %v14100_v48  ;;  %v14180_v47 = vld [vmem:[#allocation11 + $0x48c] ss:$16 sps:$4 sm:$0xff]   ;;  %v14175_v48 = vld [vmem:[#allocation11 + $0x480] ss:$16 sps:$4 sm:$0xff]  }
 0x604   :  { %4583 = vmatprep.subr.bf16.mxu1 %v14105_v49  ;;  %4624 = vmatprep.subr.bf16.mxu0 %v14108_v50  ;;  %v14178_v49 = vld [vmem:[#allocation11 + $0x488] ss:$16 sps:$4 sm:$0xff]   ;;  %v14183_v50 = vld [vmem:[#allocation11 + $0x4a4] ss:$16 sps:$4 sm:$0xff]  }
 0x607   :  { %4584 = vmatpush1.bf16.msra.mxu1 %v14103_v51  ;;  %4625 = vmatpush1.bf16.msra.mxu0 %v14106_v52  ;;  %v14186_v51 = vld [vmem:[#allocation11 + $0x4ac] ss:$16 sps:$4 sm:$0xff]   ;;  %v14181_v52 = vld [vmem:[#allocation11 + $0x4a0] ss:$16 sps:$4 sm:$0xff]  }
 0x608   :  { %4585 = vmatprep.subr.bf16.mxu1 %v14111_v53  ;;  %4626 = vmatprep.subr.bf16.mxu0 %v14114_v54  ;;  %v14184_v53 = vld [vmem:[#allocation11 + $0x4a8] ss:$16 sps:$4 sm:$0xff]   ;;  %v14189_v54 = vld [vmem:[#allocation11 + $0x4c4] ss:$16 sps:$4 sm:$0xff]  }
 0x60b   :  { %4586 = vmatpush1.bf16.msra.mxu1 %v14109_v55  ;;  %4627 = vmatpush1.bf16.msra.mxu0 %v14112_v56  ;;  %v14192_v55 = vld [vmem:[#allocation11 + $0x4cc] ss:$16 sps:$4 sm:$0xff]   ;;  %v14187_v56 = vld [vmem:[#allocation11 + $0x4c0] ss:$16 sps:$4 sm:$0xff]  }
 0x60c   :  { %4587 = vmatprep.subr.bf16.mxu1 %v14117_v57  ;;  %4628 = vmatprep.subr.bf16.mxu0 %v14120_v58  ;;  %v14190_v57 = vld [vmem:[#allocation11 + $0x4c8] ss:$16 sps:$4 sm:$0xff]   ;;  %v14195_v58 = vld [vmem:[#allocation11 + $0x4e4] ss:$16 sps:$4 sm:$0xff]  }
 0x60f   :  { %4588 = vmatpush1.bf16.msra.mxu1 %v14115_v60  ;;  %4629 = vmatpush1.bf16.msra.mxu0 %v14118_v61  ;;  %v14198_v60 = vld [vmem:[#allocation11 + $0x4ec] ss:$16 sps:$4 sm:$0xff]   ;;  %v14193_v61 = vld [vmem:[#allocation11 + $0x4e0] ss:$16 sps:$4 sm:$0xff]  }
 0x610   :  { %4589 = vmatprep.subr.bf16.mxu1 %v14123_v62  ;;  %4630 = vmatprep.subr.bf16.mxu0 %v14126_v63  ;;  %v14196_v62 = vld [vmem:[#allocation11 + $0x4e8] ss:$16 sps:$4 sm:$0xff]   ;;  %v14201_v63 = vld [vmem:[#allocation11 + $0x504] ss:$16 sps:$4 sm:$0xff]  }
 0x613   :  { %4590 = vmatpush1.bf16.msra.mxu1 %v14121_v2  ;;  %4631 = vmatpush1.bf16.msra.mxu0 %v14124_v3  ;;  %v14204_v2 = vld [vmem:[#allocation11 + $0x50c] ss:$16 sps:$4 sm:$0xff]   ;;  %v14199_v3 = vld [vmem:[#allocation11 + $0x500] ss:$16 sps:$4 sm:$0xff]  }
 0x614   :  { %4591 = vmatprep.subr.bf16.mxu1 %v14129_v4  ;;  %4632 = vmatprep.subr.bf16.mxu0 %v14132_v5  ;;  %v14202_v4 = vld [vmem:[#allocation11 + $0x508] ss:$16 sps:$4 sm:$0xff]   ;;  %v14207_v5 = vld [vmem:[#allocation11 + $0x524] ss:$16 sps:$4 sm:$0xff]  }
 0x617   :  { %4592 = vmatpush1.bf16.msra.mxu1 %v14127_v6  ;;  %4633 = vmatpush1.bf16.msra.mxu0 %v14130_v9  ;;  %v14210_v6 = vld [vmem:[#allocation11 + $0x52c] ss:$16 sps:$4 sm:$0xff]   ;;  %v14205_v9 = vld [vmem:[#allocation11 + $0x520] ss:$16 sps:$4 sm:$0xff]  }
 0x618   :  { %4593 = vmatprep.subr.bf16.mxu1 %v14135_v10  ;;  %4634 = vmatprep.subr.bf16.mxu0 %v14138_v11  ;;  %v14208_v10 = vld [vmem:[#allocation11 + $0x528] ss:$16 sps:$4 sm:$0xff]   ;;  %v14213_v11 = vld [vmem:[#allocation11 + $0x544] ss:$16 sps:$4 sm:$0xff]  }
 0x61b   :  { %4594 = vmatpush1.bf16.msra.mxu1 %v14133_v12  ;;  %4635 = vmatpush1.bf16.msra.mxu0 %v14136_v13  ;;  %v14216_v12 = vld [vmem:[#allocation11 + $0x54c] ss:$16 sps:$4 sm:$0xff]   ;;  %v14211_v13 = vld [vmem:[#allocation11 + $0x540] ss:$16 sps:$4 sm:$0xff]  }
 0x61c   :  { %4595 = vmatprep.subr.bf16.mxu1 %v14141_v39  ;;  %4636 = vmatprep.subr.bf16.mxu0 %v14144_v14  ;;  %v14214_v39 = vld [vmem:[#allocation11 + $0x548] ss:$16 sps:$4 sm:$0xff]   ;;  %v14219_v14 = vld [vmem:[#allocation11 + $0x564] ss:$16 sps:$4 sm:$0xff]  }
 0x61f   :  { %4596 = vmatpush1.bf16.msra.mxu1 %v14139_v15  ;;  %4637 = vmatpush1.bf16.msra.mxu0 %v14142_v16  ;;  %v14222_v15 = vld [vmem:[#allocation11 + $0x56c] ss:$16 sps:$4 sm:$0xff]   ;;  %v14217_v16 = vld [vmem:[#allocation11 + $0x560] ss:$16 sps:$4 sm:$0xff]  }
 0x620   :  { %4597 = vmatprep.subr.bf16.mxu1 %v14147_v17  ;;  %4638 = vmatprep.subr.bf16.mxu0 %v14150_v0  ;;  %v14220_v17 = vld [vmem:[#allocation11 + $0x568] ss:$16 sps:$4 sm:$0xff]   ;;  %v14225_v0 = vld [vmem:[#allocation11 + $0x584] ss:$16 sps:$4 sm:$0xff]  }
 0x623   :  { %4598 = vmatpush1.bf16.msra.mxu1 %v14145_v19  ;;  %4639 = vmatpush1.bf16.msra.mxu0 %v14148_v41  ;;  %v14228_v19 = vld [vmem:[#allocation11 + $0x58c] ss:$16 sps:$4 sm:$0xff]   ;;  %v14223_v41 = vld [vmem:[#allocation11 + $0x580] ss:$16 sps:$4 sm:$0xff]  }
 0x624   :  { %5049 = vmatprep.subr.bf16.mxu1 %v14153_v20  ;;  %5090 = vmatprep.subr.bf16.mxu0 %v14156_v22  ;;  %v14231_v20 = vld [vmem:[#allocation11 + $0x5a4] ss:$16 sps:$4 sm:$0xff]   ;;  %v14234_v22 = vld [vmem:[#allocation11 + $0x5ac] ss:$16 sps:$4 sm:$0xff]  }
 0x626   :  { %4600 = vmatmul.mubr.bf16.vlgmr.msra.gmra.mrb[32].mxu1 %v3699_v29  ;;  %4641 = vmatmul.mubr.bf16.vlgmr.msra.gmra.mrb[36].mxu0 %v3699_v29  ;;  %v14237_v29 = vld [vmem:[#allocation11 + $0x5c4] ss:$16 sps:$4 sm:$0xff]  }
 0x627   :  { %5050 = vmatpush1.bf16.msra.mxu1 %v14151_v24  ;;  %5081 = vmatprep.mubr.bf16.mxu1 %v4663_v31  ;;  %v14232_v24 = vld [vmem:[#allocation11 + $0x5a8] ss:$16 sps:$4 sm:$0xff]  }
 0x628   :  { %5091 = vmatpush1.bf16.msra.mxu0 %v14154_v30  ;;  %5122 = vmatprep.mubr.bf16.mxu0 %v4663_v31  ;;  %v14240_v30 = vld [vmem:[#allocation11 + $0x5cc] ss:$16 sps:$4 sm:$0xff]   ;;  %v14235_v31 = vld [vmem:[#allocation11 + $0x5c0] ss:$16 sps:$4 sm:$0xff]  }
 0x629   :  { %5051 = vmatprep.subr.bf16.mxu1 %v14159_v32  ;;  %5092 = vmatprep.subr.bf16.mxu0 %v14162_v33  ;;  %v14238_v32 = vld [vmem:[#allocation11 + $0x5c8] ss:$16 sps:$4 sm:$0xff]   ;;  %v14243_v33 = vld [vmem:[#allocation11 + $0x5e4] ss:$16 sps:$4 sm:$0xff]  }
 0x62b   :  { %5052 = vmatpush1.bf16.msra.mxu1 %v14157_v7  ;;  %v14246_v7 = vld [vmem:[#allocation11 + $0x5ec] ss:$16 sps:$4 sm:$0xff]  }
 0x62c   :  { %5093 = vmatpush1.bf16.msra.mxu0 %v14160_v34  ;;  %5053 = vmatprep.subr.bf16.mxu1 %v14165_v35  ;;  %v14241_v34 = vld [vmem:[#allocation11 + $0x5e0] ss:$16 sps:$4 sm:$0xff]   ;;  %v15859_v35 = vld [vmem:[#allocation5 + $0x3] ss:$4 sm:$0x3] }
 0x62d   :  { %5094 = vmatprep.subr.bf16.mxu0 %v14168_v36  ;;  %v14244_v36 = vld [vmem:[#allocation11 + $0x5e8] ss:$16 sps:$4 sm:$0xff]  }
 0x62f   :  { %5054 = vmatpush1.bf16.msra.mxu1 %v14163_v37  ;;  %v4655_v37 = vrot.slane %v15853_v18, %v15757_v25  ;;  %v14253_v18 = vld [vmem:[#allocation11 + $0x620] ss:$16 sps:$4 sm:$0xff]  }
 0x630   :  { %5095 = vmatpush1.bf16.msra.mxu0 %v14166_v40  ;;  %5055 = vmatprep.subr.bf16.mxu1 %v14171_v42  ;;  %v14249_v40 = vld [vmem:[#allocation11 + $0x604] ss:$16 sps:$4 sm:$0xff]   ;;  %v14252_v42 = vld [vmem:[#allocation11 + $0x60c] ss:$16 sps:$4 sm:$0xff]  }
 0x631   :  { %5096 = vmatprep.subr.bf16.mxu0 %v14174_v43  ;;  %v5145_v43 = vrot.slane %v15859_v35, %v15761_v27 }
 0x633   :  { %5056 = vmatpush1.bf16.msra.mxu1 %v14169_v44  ;;  %v14247_v44 = vld [vmem:[#allocation11 + $0x600] ss:$16 sps:$4 sm:$0xff]  }
 0x634   :  { %5097 = vmatpush1.bf16.msra.mxu0 %v14172_v45  ;;  %5057 = vmatprep.subr.bf16.mxu1 %v14177_v46  ;;  %v4662_v45 = vpack.c.bf16 %v4655_v37, %v4655_v37  ;;  %v14250_v46 = vld [vmem:[#allocation11 + $0x608] ss:$16 sps:$4 sm:$0xff]  }
 0x635   :  { %5098 = vmatprep.subr.bf16.mxu0 %v14180_v47  ;;  %v14255_v47 = vld [vmem:[#allocation11 + $0x624] ss:$16 sps:$4 sm:$0xff]   ;;  %v14322_v37 = vld [vmem:[#allocation11 + $0x788] ss:$16 sps:$4 sm:$0xff]  }
 0x637   :  { %5058 = vmatpush1.bf16.msra.mxu1 %v14175_v48  ;;  %v5149_v48 = vpack.c.bf16 %v5145_v43, %v5145_v43  ;;  %v14325_v43 = vld [vmem:[#allocation11 + $0x7a0] ss:$16 sps:$4 sm:$0xff]  }
 0x638   :  { %5099 = vmatpush1.bf16.msra.mxu0 %v14178_v49  ;;  %5059 = vmatprep.subr.bf16.mxu1 %v14183_v50  ;;  %v14258_v49 = vld [vmem:[#allocation11 + $0x62c] ss:$16 sps:$4 sm:$0xff]   ;;  %v14256_v50 = vld [vmem:[#allocation11 + $0x628] ss:$16 sps:$4 sm:$0xff]  }
 0x639   :  { %5100 = vmatprep.subr.bf16.mxu0 %v14186_v51  ;;  %v14261_v51 = vld [vmem:[#allocation11 + $0x644] ss:$16 sps:$4 sm:$0xff]  }
 0x63b   :  { %5060 = vmatpush1.bf16.msra.mxu1 %v14181_v52  ;;  %v14264_v52 = vld [vmem:[#allocation11 + $0x64c] ss:$16 sps:$4 sm:$0xff]  }
 0x63c   :  { %5101 = vmatpush1.bf16.msra.mxu0 %v14184_v53  ;;  %5061 = vmatprep.subr.bf16.mxu1 %v14189_v54  ;;  %v14259_v53 = vld [vmem:[#allocation11 + $0x640] ss:$16 sps:$4 sm:$0xff]   ;;  %v14262_v54 = vld [vmem:[#allocation11 + $0x648] ss:$16 sps:$4 sm:$0xff]  }
 0x63d   :  { %5102 = vmatprep.subr.bf16.mxu0 %v14192_v55  ;;  %v14267_v55 = vld [vmem:[#allocation11 + $0x664] ss:$16 sps:$4 sm:$0xff]  }
 0x63f   :  { %5062 = vmatpush1.bf16.msra.mxu1 %v14187_v56  ;;  %v14270_v56 = vld [vmem:[#allocation11 + $0x66c] ss:$16 sps:$4 sm:$0xff]  }
 0x640   :  { %5103 = vmatpush1.bf16.msra.mxu0 %v14190_v57  ;;  %5063 = vmatprep.subr.bf16.mxu1 %v14195_v58  ;;  %v14265_v57 = vld [vmem:[#allocation11 + $0x660] ss:$16 sps:$4 sm:$0xff]   ;;  %v14268_v58 = vld [vmem:[#allocation11 + $0x668] ss:$16 sps:$4 sm:$0xff]  }
 0x641   :  { %5104 = vmatprep.subr.bf16.mxu0 %v14198_v60  ;;  %v14273_v60 = vld [vmem:[#allocation11 + $0x684] ss:$16 sps:$4 sm:$0xff]  }
 0x643   :  { %5064 = vmatpush1.bf16.msra.mxu1 %v14193_v61  ;;  %v14276_v61 = vld [vmem:[#allocation11 + $0x68c] ss:$16 sps:$4 sm:$0xff]  }
 0x644   :  { %5105 = vmatpush1.bf16.msra.mxu0 %v14196_v62  ;;  %5065 = vmatprep.subr.bf16.mxu1 %v14201_v63  ;;  %v14271_v62 = vld [vmem:[#allocation11 + $0x680] ss:$16 sps:$4 sm:$0xff]   ;;  %v14274_v63 = vld [vmem:[#allocation11 + $0x688] ss:$16 sps:$4 sm:$0xff]  }
 0x645   :  { %5106 = vmatprep.subr.bf16.mxu0 %v14204_v2  ;;  %v14279_v2 = vld [vmem:[#allocation11 + $0x6a4] ss:$16 sps:$4 sm:$0xff]  }
 0x647   :  { %5066 = vmatpush1.bf16.msra.mxu1 %v14199_v3  ;;  %v14282_v3 = vld [vmem:[#allocation11 + $0x6ac] ss:$16 sps:$4 sm:$0xff]  }
 0x648   :  { %5107 = vmatpush1.bf16.msra.mxu0 %v14202_v4  ;;  %5067 = vmatprep.subr.bf16.mxu1 %v14207_v5  ;;  %v14277_v4 = vld [vmem:[#allocation11 + $0x6a0] ss:$16 sps:$4 sm:$0xff]   ;;  %v14280_v5 = vld [vmem:[#allocation11 + $0x6a8] ss:$16 sps:$4 sm:$0xff]  }
 0x649   :  { %5108 = vmatprep.subr.bf16.mxu0 %v14210_v6  ;;  %v14285_v6 = vld [vmem:[#allocation11 + $0x6c4] ss:$16 sps:$4 sm:$0xff]  }
 0x64b   :  { %5068 = vmatpush1.bf16.msra.mxu1 %v14205_v9  ;;  %v14288_v9 = vld [vmem:[#allocation11 + $0x6cc] ss:$16 sps:$4 sm:$0xff]  }
 0x64c   :  { %5109 = vmatpush1.bf16.msra.mxu0 %v14208_v10  ;;  %5069 = vmatprep.subr.bf16.mxu1 %v14213_v11  ;;  %v14283_v10 = vld [vmem:[#allocation11 + $0x6c0] ss:$16 sps:$4 sm:$0xff]   ;;  %v14286_v11 = vld [vmem:[#allocation11 + $0x6c8] ss:$16 sps:$4 sm:$0xff]  }
 0x64d   :  { %5110 = vmatprep.subr.bf16.mxu0 %v14216_v12  ;;  %v14291_v12 = vld [vmem:[#allocation11 + $0x6e4] ss:$16 sps:$4 sm:$0xff]  }
 0x64f   :  { %5070 = vmatpush1.bf16.msra.mxu1 %v14211_v13  ;;  %v14294_v13 = vld [vmem:[#allocation11 + $0x6ec] ss:$16 sps:$4 sm:$0xff]  }
 0x650   :  { %5111 = vmatpush1.bf16.msra.mxu0 %v14214_v39  ;;  %5071 = vmatprep.subr.bf16.mxu1 %v14219_v14  ;;  %v14289_v39 = vld [vmem:[#allocation11 + $0x6e0] ss:$16 sps:$4 sm:$0xff]   ;;  %v14292_v14 = vld [vmem:[#allocation11 + $0x6e8] ss:$16 sps:$4 sm:$0xff]  }
 0x651   :  { %5112 = vmatprep.subr.bf16.mxu0 %v14222_v15  ;;  %v14297_v15 = vld [vmem:[#allocation11 + $0x704] ss:$16 sps:$4 sm:$0xff]  }
 0x653   :  { %5072 = vmatpush1.bf16.msra.mxu1 %v14217_v16  ;;  %v14300_v16 = vld [vmem:[#allocation11 + $0x70c] ss:$16 sps:$4 sm:$0xff]  }
 0x654   :  { %5113 = vmatpush1.bf16.msra.mxu0 %v14220_v17  ;;  %5073 = vmatprep.subr.bf16.mxu1 %v14225_v0  ;;  %v14295_v17 = vld [vmem:[#allocation11 + $0x700] ss:$16 sps:$4 sm:$0xff]   ;;  %v14298_v0 = vld [vmem:[#allocation11 + $0x708] ss:$16 sps:$4 sm:$0xff]  }
 0x655   :  { %5114 = vmatprep.subr.bf16.mxu0 %v14228_v19  ;;  %v14303_v19 = vld [vmem:[#allocation11 + $0x724] ss:$16 sps:$4 sm:$0xff]  }
 0x657   :  { %5074 = vmatpush1.bf16.msra.mxu1 %v14223_v41  ;;  %v14306_v41 = vld [vmem:[#allocation11 + $0x72c] ss:$16 sps:$4 sm:$0xff]  }
 0x658   :  { %5115 = vmatpush1.bf16.msra.mxu0 %v14226_v59  ;;  %5075 = vmatprep.subr.bf16.mxu1 %v14231_v20  ;;  %v14301_v59 = vld [vmem:[#allocation11 + $0x720] ss:$16 sps:$4 sm:$0xff]   ;;  %v14304_v20 = vld [vmem:[#allocation11 + $0x728] ss:$16 sps:$4 sm:$0xff]  }
 0x659   :  { %5116 = vmatprep.subr.bf16.mxu0 %v14234_v22  ;;  %v14309_v22 = vld [vmem:[#allocation11 + $0x744] ss:$16 sps:$4 sm:$0xff]  }
 0x65b   :  { %5076 = vmatpush1.bf16.msra.mxu1 %v14229_v23  ;;  %v14312_v23 = vld [vmem:[#allocation11 + $0x74c] ss:$16 sps:$4 sm:$0xff]  }
 0x65c   :  { %5117 = vmatpush1.bf16.msra.mxu0 %v14232_v24  ;;  %5077 = vmatprep.subr.bf16.mxu1 %v14237_v29  ;;  %v14307_v24 = vld [vmem:[#allocation11 + $0x740] ss:$16 sps:$4 sm:$0xff]   ;;  %v14310_v29 = vld [vmem:[#allocation11 + $0x748] ss:$16 sps:$4 sm:$0xff]  }
 0x65d   :  { %5118 = vmatprep.subr.bf16.mxu0 %v14240_v30  ;;  %v14315_v30 = vld [vmem:[#allocation11 + $0x764] ss:$16 sps:$4 sm:$0xff]  }
 0x65f   :  { %5078 = vmatpush1.bf16.msra.mxu1 %v14235_v31  ;;  %v14318_v31 = vld [vmem:[#allocation11 + $0x76c] ss:$16 sps:$4 sm:$0xff]  }
 0x660   :  { %5119 = vmatpush1.bf16.msra.mxu0 %v14238_v32  ;;  %5079 = vmatprep.subr.bf16.mxu1 %v14243_v33  ;;  %v14313_v32 = vld [vmem:[#allocation11 + $0x760] ss:$16 sps:$4 sm:$0xff]   ;;  %v14316_v33 = vld [vmem:[#allocation11 + $0x768] ss:$16 sps:$4 sm:$0xff]  }
 0x661   :  { %5120 = vmatprep.subr.bf16.mxu0 %v14246_v7  ;;  %v14321_v7 = vld [vmem:[#allocation11 + $0x784] ss:$16 sps:$4 sm:$0xff]  }
 0x663   :  { %5080 = vmatpush1.bf16.msra.mxu1 %v14241_v34  ;;  %v14324_v34 = vld [vmem:[#allocation11 + $0x78c] ss:$16 sps:$4 sm:$0xff]  }
 0x664   :  { %5121 = vmatpush1.bf16.msra.mxu0 %v14244_v36  ;;  %5535 = vmatprep.subr.bf16.mxu1 %v14249_v40  ;;  %v14319_v36 = vld [vmem:[#allocation11 + $0x780] ss:$16 sps:$4 sm:$0xff]   ;;  %v14327_v40 = vld [vmem:[#allocation11 + $0x7a4] ss:$16 sps:$4 sm:$0xff]  }
 0x665   :  { %5576 = vmatprep.subr.bf16.mxu0 %v14252_v42  ;;  %v14330_v42 = vld [vmem:[#allocation11 + $0x7ac] ss:$16 sps:$4 sm:$0xff]  }
 0x666   :  { %5082 = vmatmul.mubr.bf16.vlgmr.msra.gmra.mrb[36].mxu1 %v4662_v45 }
 0x667   :  { %5123 = vmatmul.mubr.bf16.vlgmr.msra.gmra.mrb[40].mxu0 %v4662_v45  ;;  %5536 = vmatpush1.bf16.msra.mxu1 %v14247_v44  ;;  %v14328_v44 = vld [vmem:[#allocation11 + $0x7a8] ss:$16 sps:$4 sm:$0xff]   ;;  %v14333_v45 = vld [vmem:[#allocation11 + $0x7c4] ss:$16 sps:$4 sm:$0xff]  }
 0x668   :  { %5567 = vmatprep.mubr.bf16.mxu1 %v5149_v48  ;;  %5577 = vmatpush1.bf16.msra.mxu0 %v14250_v46  ;;  %v14336_v46 = vld [vmem:[#allocation11 + $0x7cc] ss:$16 sps:$4 sm:$0xff]  }
 0x669   :  { %5608 = vmatprep.mubr.bf16.mxu0 %v5149_v48  ;;  %5537 = vmatprep.subr.bf16.mxu1 %v14255_v47  ;;  %v14331_v47 = vld [vmem:[#allocation11 + $0x7c0] ss:$16 sps:$4 sm:$0xff]   ;;  %v14334_v48 = vld [vmem:[#allocation11 + $0x7c8] ss:$16 sps:$4 sm:$0xff]  }
 0x66a   :  { %5578 = vmatprep.subr.bf16.mxu0 %v14258_v49  ;;  %v14339_v49 = vld [vmem:[#allocation11 + $0x7e4] ss:$16 sps:$4 sm:$0xff]  }
 0x66b   :  { %5538 = vmatpush1.bf16.msra.mxu1 %v14253_v18  ;;  %v14342_v18 = vld [vmem:[#allocation11 + $0x7ec] ss:$16 sps:$4 sm:$0xff]  }
 0x66c   :  { %5579 = vmatpush1.bf16.msra.mxu0 %v14256_v50  ;;  %5539 = vmatprep.subr.bf16.mxu1 %v14261_v51  ;;  %v14337_v50 = vld [vmem:[#allocation11 + $0x7e0] ss:$16 sps:$4 sm:$0xff]   ;;  %v14340_v51 = vld [vmem:[#allocation11 + $0x7e8] ss:$16 sps:$4 sm:$0xff]  }
 0x66d   :  { %5580 = vmatprep.subr.bf16.mxu0 %v14264_v52  ;;  %v5141_v52 = vrot.slane %v15859_v35, %v15757_v25  ;;  %v14346_v35 = vld [vmem:[#allocation12 + $0x8] sm:$0xff]  }
 0x66f   :  { %5540 = vmatpush1.bf16.msra.mxu1 %v14259_v53  ;;  %v5148_v53 = vpack.c.bf16 %v5141_v52, %v5141_v52  ;;  %v14360_v52 = vld [vmem:[#allocation12 + $0x78] sm:$0xff]  }
 0x670   :  { %5581 = vmatpush1.bf16.msra.mxu0 %v14262_v54  ;;  %5541 = vmatprep.subr.bf16.mxu1 %v14267_v55 }
 0x671   :  { %5582 = vmatprep.subr.bf16.mxu0 %v14270_v56 }
 0x673   :  { %5542 = vmatpush1.bf16.msra.mxu1 %v14265_v57 }
 0x674   :  { %5583 = vmatpush1.bf16.msra.mxu0 %v14268_v58  ;;  %5543 = vmatprep.subr.bf16.mxu1 %v14273_v60 }
 0x675   :  { %5584 = vmatprep.subr.bf16.mxu0 %v14276_v61 }
 0x677   :  { %5544 = vmatpush1.bf16.msra.mxu1 %v14271_v62 }
 0x678   :  { %5585 = vmatpush1.bf16.msra.mxu0 %v14274_v63  ;;  %5545 = vmatprep.subr.bf16.mxu1 %v14279_v2  ;;  %v14343_v63 = vld [vmem:[#allocation12 + $0x40] sm:$0xff]  }
 0x679   :  { %5586 = vmatprep.subr.bf16.mxu0 %v14282_v3  ;;  %v14344_v2 = vld [vmem:[#allocation12] sm:$0xff]   ;;  %v14345_v3 = vld [vmem:[#allocation12 + $0x48] sm:$0xff]  }
 0x67b   :  { %5546 = vmatpush1.bf16.msra.mxu1 %v14277_v4  ;;  %v14347_v4 = vld [vmem:[#allocation12 + $0x50] sm:$0xff]  }
 0x67c   :  { %5587 = vmatpush1.bf16.msra.mxu0 %v14280_v5  ;;  %5547 = vmatprep.subr.bf16.mxu1 %v14285_v6  ;;  %v14348_v5 = vld [vmem:[#allocation12 + $0x10] sm:$0xff]   ;;  %v14349_v6 = vld [vmem:[#allocation12 + $0x58] sm:$0xff]  }
 0x67d   :  { %5588 = vmatprep.subr.bf16.mxu0 %v14288_v9  ;;  %v14350_v9 = vld [vmem:[#allocation12 + $0x18] sm:$0xff]  }
 0x67f   :  { %5548 = vmatpush1.bf16.msra.mxu1 %v14283_v10  ;;  %v14351_v10 = vld [vmem:[#allocation12 + $0x60] sm:$0xff]  }
 0x680   :  { %5589 = vmatpush1.bf16.msra.mxu0 %v14286_v11  ;;  %5549 = vmatprep.subr.bf16.mxu1 %v14291_v12  ;;  %v14352_v11 = vld [vmem:[#allocation12 + $0x20] sm:$0xff]   ;;  %v14353_v12 = vld [vmem:[#allocation12 + $0x68] sm:$0xff]  }
 0x681   :  { %5590 = vmatprep.subr.bf16.mxu0 %v14294_v13  ;;  %v14354_v13 = vld [vmem:[#allocation12 + $0x28] sm:$0xff]  }
 0x683   :  { %5550 = vmatpush1.bf16.msra.mxu1 %v14289_v39  ;;  %v5993_v39 = vld [vmem:[%s16244_s0 + $0x10] sm:$0xff] }
 0x684   :  { %5591 = vmatpush1.bf16.msra.mxu0 %v14292_v14  ;;  %5551 = vmatprep.subr.bf16.mxu1 %v14297_v15  ;;  %v5994_v14 = vld [vmem:[%s16244_s0 + $0x18] sm:$0xff]  ;;  %v13276_v15 = vpack.c.bf16 %v5993_v39, %v5993_v39 }
 0x685   :  { %5592 = vmatprep.subr.bf16.mxu0 %v14300_v16  ;;  %v13277_v16 = vpack.c.bf16 %v5994_v14, %v5994_v14 }
 0x687   :  { %5552 = vmatpush1.bf16.msra.mxu1 %v14295_v17  ;;  %v6005_v17 = vshrl.u32 %v13276_v15, 16 }
 0x688   :  { %5593 = vmatpush1.bf16.msra.mxu0 %v14298_v0  ;;  %5553 = vmatprep.subr.bf16.mxu1 %v14303_v19  ;;  %v6008_v0 = vshll.u32 %v13276_v15, 16  ;;  %v6014_v19 = vshrl.u32 %v13277_v16, 16 }
 0x689   :  { %5594 = vmatprep.subr.bf16.mxu0 %v14306_v41  ;;  %v6017_v41 = vshll.u32 %v13277_v16, 16 }
 0x68b   :  { %5554 = vmatpush1.bf16.msra.mxu1 %v14301_v59  ;;  %v6007_v59 = vrot.slane %v6005_v17, 6 }
 0x68c   :  { %5595 = vmatpush1.bf16.msra.mxu0 %v14304_v20  ;;  %5555 = vmatprep.subr.bf16.mxu1 %v14309_v22  ;;  %v6010_v20 = vrot.slane %v6008_v0, 7  ;;  %v6016_v22 = vrot.slane %v6014_v19, 6  ;;  %v14377_v0 = vld [vmem:[%s16245_s1] ss:$16 sps:$4 sm:$0xff]  }
 0x68d   :  { %5596 = vmatprep.subr.bf16.mxu0 %v14312_v23  ;;  %v6019_v23 = vrot.slane %v6017_v41, 7  ;;  %v14386_v41 = vld [vmem:[%s16245_s1 + $0x24] ss:$16 sps:$4 sm:$0xff]  }
 0x68f   :  { %5556 = vmatpush1.bf16.msra.mxu1 %v14307_v24 }
 0x690   :  { %5597 = vmatpush1.bf16.msra.mxu0 %v14310_v29  ;;  %5557 = vmatprep.subr.bf16.mxu1 %v14315_v30  ;;  %v6011_v30 = vor.u32 %v6010_v20, %v6007_v59  ;;  %v14384_v20 = vld [vmem:[%s16245_s1 + $0x20] ss:$16 sps:$4 sm:$0xff]  }
 0x691   :  { %5598 = vmatprep.subr.bf16.mxu0 %v14318_v31 }
 0x693   :  { %5558 = vmatpush1.bf16.msra.mxu1 %v14313_v32 }
 0x694   :  { %5599 = vmatpush1.bf16.msra.mxu0 %v14316_v33  ;;  %5559 = vmatprep.subr.bf16.mxu1 %v14321_v7 }
 0x695   :  { %5600 = vmatprep.subr.bf16.mxu0 %v14324_v34  ;;  %v6020_v34 = vor.u32 %v6019_v23, %v6016_v22  ;;  %v14391_v22 = vld [vmem:[%s16245_s1 + $0x44] ss:$16 sps:$4 sm:$0xff]   ;;  %v14389_v23 = vld [vmem:[%s16245_s1 + $0x40] ss:$16 sps:$4 sm:$0xff]  }
 0x697   :  { %5560 = vmatpush1.bf16.msra.mxu1 %v14319_v36 }
 0x698   :  { %5601 = vmatpush1.bf16.msra.mxu0 %v14322_v37  ;;  %5561 = vmatprep.subr.bf16.mxu1 %v14327_v40 }
 0x699   :  { %5602 = vmatprep.subr.bf16.mxu0 %v14330_v42 }
 0x69b   :  { %5562 = vmatpush1.bf16.msra.mxu1 %v14325_v43  ;;  %v14355_v43 = vld [vmem:[#allocation12 + $0x70] sm:$0xff]  }
 0x69c   :  { %5603 = vmatpush1.bf16.msra.mxu0 %v14328_v44  ;;  %5563 = vmatprep.subr.bf16.mxu1 %v14333_v45 }
 0x69d   :  { %5604 = vmatprep.subr.bf16.mxu0 %v14336_v46  ;;  %v14356_v46 = vld [vmem:[#allocation12 + $0x30] sm:$0xff]  }
 0x69f   :  { %5564 = vmatpush1.bf16.msra.mxu1 %v14331_v47  ;;  %v14359_v47 = vld [vmem:[%s16245_s1 + $0x84] ss:$16 sps:$4 sm:$0xff]  }
 0x6a0   :  { %5605 = vmatpush1.bf16.msra.mxu0 %v14334_v48  ;;  %5565 = vmatprep.subr.bf16.mxu1 %v14339_v49  ;;  %v6012_v48 = vrot.slane %v6011_v30, 4  ;;  %v14357_v49 = vld [vmem:[%s16245_s1 + $0x80] ss:$16 sps:$4 sm:$0xff]  }
 0x6a1   :  { %5606 = vmatprep.subr.bf16.mxu0 %v14342_v18  ;;  %v6022_v18 = vrot.slane %v6020_v34, 4 }
 0x6a3   :  { %5566 = vmatpush1.bf16.msra.mxu1 %v14337_v50 }
 0x6a4   :  { %5607 = vmatpush1.bf16.msra.mxu0 %v14340_v51  ;;  %13280 = vmatprep.subr.bf16.mxu1 %v14343_v63  ;;  %v6029_v51 = vld [vmem:[#allocation2 + $0x8] sm:$0xe]  ;;  %v14367_v63 = vld [vmem:[%s16245_s1 + $0xc0] ss:$16 sps:$4 sm:$0xff]  }
 0x6a5   :  { %6183 = vmatprep.subr.bf16.mxu0 %v14359_v47 }
 0x6a6   :  { %5568 = vmatmul.mubr.bf16.vlgmr.msra.gmra.mrb[40].mxu1 %v5148_v53 }
 0x6a7   :  { %5609 = vmatmul.mubr.bf16.vlgmr.msra.gmra.mrb[44].mxu0 %v5148_v53  ;;  %13281 = vmatpush3.bf16.msra.mxu1 %v14344_v2  ;;  %v6021_v53 = vsel %vm6003_vm11, %v6012_v48, %v6020_v34  ;;  %v14401_v34 = vld [vmem:[%s16245_s1 + $0x104] ss:$16 sps:$4 sm:$0xff]   ;;  %vm7000_vm11 = vcmask 1041408  }
 0x6a8   :  { %6215 = vmatprep.mubr.bf16.mxu0 %v15795_v38  ;;  %13282 = vmatprep.subr.bf16.mxu1 %v14345_v3  ;;  %6032 = vst.msk [vmem:[#allocation2 + $0xc] sm:$0xf] %vm95_vm0, %v6021_v53  ;;  %v14374_v3 = vld [vmem:[%s16245_s1 + $0xe4] ss:$16 sps:$4 sm:$0xff]   ;;  %vm6082_vm0 = vsmask.f32 6400 }
 0x6a9   :  { %6184 = vmatpush1.bf16.msra.mxu0 %v14357_v49  ;;  %v14419_v48 = vld [vmem:[%s16245_s1 + $0x164] ss:$16 sps:$4 sm:$0xff]  }
 0x6ab   :  { %13283 = vmatpush3.bf16.msra.mxu1 %v14346_v35 }
 0x6ac   :  { %13284 = vmatprep.subr.bf16.mxu1 %v14347_v4  ;;  %v14372_v4 = vld [vmem:[%s16245_s1 + $0xe0] ss:$16 sps:$4 sm:$0xff]  }
 0x6af   :  { %13285 = vmatpush3.bf16.msra.mxu1 %v14348_v5  ;;  %v6039_v2 = vld [vmem:[#allocation2 + $0xc] sm:$0xf] }
 0x6b0   :  { %13286 = vmatprep.subr.bf16.mxu1 %v14349_v6 }
 0x6b3   :  { %13287 = vmatpush3.bf16.msra.mxu1 %v14350_v9 }
 0x6b4   :  { %13288 = vmatprep.subr.bf16.mxu1 %v14351_v10 }
 0x6b7   :  { %13289 = vmatpush3.bf16.msra.mxu1 %v14352_v11 }
 0x6b8   :  { %13290 = vmatprep.subr.bf16.mxu1 %v14353_v12 }
 0x6b9   :  { %v4199_v54 = vpop.f32.mrb[28].mxu1  ;;  %v4240_v55 = vpop.f32.mrb[32].mxu0 }
 0x6ba   :  { %v4201_v56 = vpop.f32.mrb[29].mxu1  ;;  %v4242_v57 = vpop.f32.mrb[33].mxu0 }
 0x6bb   :  { %v4203_v58 = vpop.f32.mrb[30].mxu1  ;;  %v4244_v60 = vpop.f32.mrb[34].mxu0  ;;  %13291 = vmatpush3.bf16.msra.mxu1 %v14354_v13  ;;  %v14379_v13 = vld [vmem:[%s16245_s1 + $0x4] ss:$16 sps:$4 sm:$0xff]  }
 0x6bc   :  { %v4204_v61 = vpop.f32.mrb[31].mxu1  ;;  %v4245_v62 = vpop.f32.mrb[35].mxu0  ;;  %13292 = vmatprep.subr.bf16.mxu1 %v14355_v43  ;;  %v14362_v60 = vld [vmem:[%s16245_s1 + $0xa0] ss:$16 sps:$4 sm:$0xff]   ;;  %v14407_v43 = vld [vmem:[%s16245_s1 + $0x124] ss:$16 sps:$4 sm:$0xff]  }
 0x6bd   :  { %v14365_v61 = vld [vmem:[#allocation12 + $0xc0] sm:$0xff]  }
 0x6be   :  { %v14369_v62 = vld [vmem:[%s16245_s1 + $0xc4] ss:$16 sps:$4 sm:$0xff]  }
 0x6bf   :  { %13293 = vmatpush3.bf16.msra.mxu1 %v14356_v46  ;;  %v14411_v46 = vld [vmem:[%s16245_s1 + $0x140] ss:$16 sps:$4 sm:$0xff]  }
 0x6c0   :  { %13294 = vmatprep.subr.bf16.mxu1 %v14360_v52 }
 0x6f9   :  { %v4601_v24 = vpop.f32.mrb[32].mxu1  ;;  %v4642_v29 = vpop.f32.mrb[36].mxu0 }
 0x6fa   :  { %v15876_v31 = vadd.f32 %v4601_v24, %v4199_v54  ;;  %v15878_v32 = vadd.f32 %v4642_v29, %v4240_v55  ;;  %v4603_v33 = vpop.f32.mrb[33].mxu1  ;;  %v4644_v7 = vpop.f32.mrb[37].mxu0  ;;  %v6035_v54 = vld [vmem:[#allocation2 + $0x10] sm:$0x3]  ;;  %v14361_v55 = vld [vmem:[#allocation12 + $0x38] sm:$0xff]  }
 0x6fb   :  { %v15880_v36 = vadd.f32 %v4603_v33, %v4201_v56  ;;  %v15882_v37 = vadd.f32 %v4644_v7, %v4242_v57  ;;  %v4605_v40 = vpop.f32.mrb[34].mxu1  ;;  %v4646_v42 = vpop.f32.mrb[38].mxu0  ;;  %v14364_v56 = vld [vmem:[%s16245_s1 + $0xa4] ss:$16 sps:$4 sm:$0xff]   ;;  %v6030_v57 = vsel %vm6028_vm10, %v6011_v30, %v6029_v51  ;;  %v6036_v58 = vsel %vm15892_vm8, %v6022_v18, %v6035_v54  ;;  %13295 = vmatpush3.bf16.msra.mxu1 %v14361_v55  ;;  %v14394_v30 = vld [vmem:[%s16245_s1 + $0x60] ss:$16 sps:$4 sm:$0xff]  }
 0x6fc   :  { %v4606_v44 = vpop.f32.mrb[35].mxu1  ;;  %v4647_v45 = vpop.f32.mrb[39].mxu0  ;;  %6031 = vst [vmem:[#allocation2 + $0x8] sm:$0xe] %v6030_v57  ;;  %6037 = vst [vmem:[#allocation2 + $0x10] sm:$0x3] %v6036_v58  ;;  %6185 = vmatprep.subr.bf16.mxu0 %v14364_v56  ;;  %13302 = vmatprep.subr.bf16.mxu1 %v14365_v61 }
 0x6fd   :  { %6186 = vmatpush1.bf16.msra.mxu0 %v14362_v60  ;;  %v14396_v24 = vld [vmem:[%s16245_s1 + $0x64] ss:$16 sps:$4 sm:$0xff]   ;;  %v14399_v40 = vld [vmem:[%s16245_s1 + $0x100] ss:$16 sps:$4 sm:$0xff]   ;;  %vm6994_vm8 = vsmask.f32 7958 }
 0x6fe   :  { %6187 = vmatprep.subr.bf16.mxu0 %v14369_v62  ;;  %v14405_v44 = vld [vmem:[%s16245_s1 + $0x120] ss:$16 sps:$4 sm:$0xff]   ;;  %v14413_v45 = vld [vmem:[%s16245_s1 + $0x144] ss:$16 sps:$4 sm:$0xff]   ;;  %vm7002_vm10 = vcmask 1045508  }
 0x6ff   :  { %v14417_v18 = vld [vmem:[%s16245_s1 + $0x160] ss:$16 sps:$4 sm:$0xff]  }
 0x701   :  { %6188 = vmatpush1.bf16.msra.mxu0 %v14367_v63 }
 0x702   :  { %6189 = vmatprep.subr.bf16.mxu0 %v14374_v3 }
 0x703   :  { %v6038_v35 = vld [vmem:[#allocation2 + $0x8] sm:$0xe]  ;;  %v14381_v6 = vld [vmem:[#allocation2 + $0x10] ss:$0 sps:$4 sm:$0x33]  }
 0x704   :  { %v12600_v5 = vcombine.low %v6038_v35, %v6039_v2  ;;  %v6092_v11 = vshrl.u32 %v14381_v6, 16  ;;  %v6095_v12 = vshll.u32 %v14381_v6, 16  ;;  %v14402_v29 = vld [vmem:[#allocation2 + $0x10] ss:$0 sps:$4 sm:$0x11]   ;;  %v6466_v51 = vrot.slane %v14381_v6, 2 }
 0x705   :  { %6190 = vmatpush1.bf16.msra.mxu0 %v14372_v4  ;;  %v6273_v7 = vrot.slane %v14402_v29, 1  ;;  %v6444_v47 = vld [vmem:[#allocation2 + $0x8] sm:$0xc]  ;;  %v5621_v35 = vld [vmem:[%s16252_s8] sm:$0xf]  ;;  %v14370_v29 = vld [vmem:[#allocation12 + $0xc8] sm:$0xff]  }
 0x706   :  { %v6084_v9 = vshrl.u32 %v12600_v5, 16  ;;  %v6087_v10 = vshll.u32 %v12600_v5, 16  ;;  %6358 = vmatprep.subr.bf16.mxu0 %v14379_v13  ;;  %v6094_v15 = vrot.slane %v6092_v11, 1  ;;  %v6097_v16 = vrot.slane %v6095_v12, 2 }
 0x707   :  { %v6272_v33 = vrot.slane %v12600_v5, 1  ;;  %v12655_v49 = vcombine.low %v6444_v47, %v6039_v2  ;;  %v5626_v4 = vrot.slane %v5621_v35, %v15757_v25  ;;  %v5630_v5 = vrot.slane %v5621_v35, %v15761_v27  ;;  %v14393_v47 = vld [vmem:[#allocation12 + $0xa8] sm:$0xff]  }
 0x708   :  { %v6086_v39 = vrot.slane %v6084_v9, 1  ;;  %v6089_v14 = vrot.slane %v6087_v10, 2  ;;  %v6098_v19 = vor.u32 %v6097_v16, %v6094_v15 }
 0x709   :  { %v15955_v42 = vsel %vm16264_vm12, %v6272_v33, %v6273_v7  ;;  %v6465_v50 = vrot.slane %v12655_v49, 2  ;;  %v14371_v33 = vld [vmem:[#allocation12 + $0x88] sm:$0xff]   ;;  %v14375_v7 = vld [vmem:[#allocation12 + $0xd0] sm:$0xff]   ;;  %vm6995_vm12 = vmand %vm6993_vm7, %vm6994_vm8 }
 0x70a   :  { %v6090_v17 = vor.u32 %v6089_v14, %v6086_v39  ;;  %v14397_v49 = vld [vmem:[#allocation12 + $0xf0] sm:$0xff]   ;;  %vm6996_vm3 = vmor %vm6995_vm12, %vm16121_vm13 }
 0x70b   :  { %v15978_v52 = vsel %vm6464_vm14, %v6465_v50, %v6466_v51  ;;  %v14403_v51 = vld [vmem:[#allocation12 + $0xf8] sm:$0xff]   ;;  %vm16126_vm14 = vmand %vm7000_vm11, %vm6001_vm6  ;;  %vm8798_vm6 = vsmask.f32 7950 }
 0x70c   :  { %v15928_v59 = vsel %vm6082_vm0, %v6090_v17, %v6098_v19  ;;  %vm7003_vm0 = vsmask.f32 5376 }
 0x70d   :  { %12618 = vmatmul.mubr.msk.bf16.vlgmr.msra.gmra.mrb[48].mxu0 %vm299_vm9, %v15928_v59 }
 0x70e   :  { %6359 = vmatpush1.bf16.msra.mxu0 %v14377_v0  ;;  %6390 = vmatprep.mubr.bf16.mxu0 %v15795_v38 }
 0x70f   :  { %6360 = vmatprep.subr.bf16.mxu0 %v14386_v41 }
 0x712   :  { %6361 = vmatpush1.bf16.msra.mxu0 %v14384_v20 }
 0x713   :  { %6362 = vmatprep.subr.bf16.mxu0 %v14391_v22 }
 0x716   :  { %6363 = vmatpush1.bf16.msra.mxu0 %v14389_v23  ;;  %v14366_v23 = vld [vmem:[#allocation12 + $0x80] sm:$0xff]  }
 0x717   :  { %6364 = vmatprep.subr.bf16.mxu0 %v14396_v24 }
 0x71a   :  { %6365 = vmatpush1.bf16.msra.mxu0 %v14394_v30 }
 0x71b   :  { %6551 = vmatprep.subr.bf16.mxu0 %v14401_v34  ;;  %v14376_v34 = vld [vmem:[#allocation12 + $0x90] sm:$0xff]  }
 0x71d   :  { %12637 = vmatmul.mubr.msk.bf16.vlgmr.msra.gmra.mrb[48].mxu0 %vm299_vm9, %v15955_v42 }
 0x71e   :  { %6552 = vmatpush1.bf16.msra.mxu0 %v14399_v40  ;;  %6583 = vmatprep.mubr.bf16.mxu0 %v15795_v38  ;;  %v14382_v40 = vld [vmem:[#allocation12 + $0xd8] sm:$0xff]  }
 0x71f   :  { %6553 = vmatprep.subr.bf16.mxu0 %v14407_v43  ;;  %v14383_v43 = vld [vmem:[#allocation12 + $0x98] sm:$0xff]  }
 0x722   :  { %6554 = vmatpush1.bf16.msra.mxu0 %v14405_v44  ;;  %v14387_v44 = vld [vmem:[#allocation12 + $0xe0] sm:$0xff]  }
 0x723   :  { %6555 = vmatprep.subr.bf16.mxu0 %v14413_v45  ;;  %v14388_v45 = vld [vmem:[#allocation12 + $0xa0] sm:$0xff]  }
 0x726   :  { %6556 = vmatpush1.bf16.msra.mxu0 %v14411_v46  ;;  %v14392_v46 = vld [vmem:[#allocation12 + $0xe8] sm:$0xff]  }
 0x727   :  { %6557 = vmatprep.subr.bf16.mxu0 %v14419_v48  ;;  %v5634_v48 = vrot.slane %v5621_v35, %v15759_v26 }
 0x72a   :  { %6558 = vmatpush1.bf16.msra.mxu0 %v14417_v18  ;;  %v14398_v18 = vld [vmem:[#allocation12 + $0xb0] sm:$0xff]  }
 0x72d   :  { %12672 = vmatmul.mubr.msk.bf16.vlgmr.msra.gmra.mrb[48].mxu0 %vm299_vm9, %v15978_v52 }
 0x72e   :  { %6747 = vmatprep.mubr.f32.mxu0 %v15441_v21 }
 0x739   :  { %v5083_v53 = vpop.f32.mrb[36].mxu1 }
 0x73a   :  { %v5131_v54 = vadd.f32 %v5083_v53, %v15876_v31  ;;  %v5124_v55 = vpop.f32.mrb[40].mxu0  ;;  %v5085_v56 = vpop.f32.mrb[37].mxu1  ;;  %v14404_v53 = vld [vmem:[#allocation12 + $0xb8] sm:$0xff]  }
 0x73b   :  { %v5133_v57 = vadd.f32 %v5124_v55, %v15878_v32  ;;  %v5132_v58 = vadd.f32 %v5085_v56, %v15880_v36  ;;  %v5126_v60 = vpop.f32.mrb[41].mxu0  ;;  %v5087_v61 = vpop.f32.mrb[38].mxu1  ;;  %v5638_v36 = vrot.slane %v5621_v35, %v15763_v28  ;;  %v14410_v55 = vld [vmem:[%s16245_s1 + $0x8c] ss:$16 sps:$4 sm:$0xff]   ;;  %v14408_v56 = vld [vmem:[%s16245_s1 + $0x88] ss:$16 sps:$4 sm:$0xff]  }
 0x73c   :  { %v5134_v62 = vadd.f32 %v5126_v60, %v15882_v37  ;;  %v5128_v63 = vpop.f32.mrb[42].mxu0  ;;  %v5088_v2 = vpop.f32.mrb[39].mxu1  ;;  %v14414_v60 = vld [vmem:[%s16245_s1 + $0xa8] ss:$16 sps:$4 sm:$0xff]   ;;  %v14422_v61 = vld [vmem:[%s16245_s1 + $0xcc] ss:$16 sps:$4 sm:$0xff]  }
 0x73d   :  { %v5129_v3 = vpop.f32.mrb[43].mxu0  ;;  %v14426_v63 = vld [vmem:[%s16245_s1 + $0xec] ss:$16 sps:$4 sm:$0xff]   ;;  %v14424_v2 = vld [vmem:[%s16245_s1 + $0xe8] ss:$16 sps:$4 sm:$0xff]  }
 0x73e   :  { %v14429_v3 = vld [vmem:[%s16245_s1 + $0xc] ss:$16 sps:$4 sm:$0xff]   ;;  %v14427_v35 = vld [vmem:[%s16245_s1 + $0x8] ss:$16 sps:$4 sm:$0xff]  }
 0x779   :  { %v5569_v31 = vpop.f32.mrb[40].mxu1 }
 0x77a   :  { %v5617_v6 = vadd.f32 %v5569_v31, %v5131_v54  ;;  %v5610_v32 = vpop.f32.mrb[44].mxu0  ;;  %v5571_v9 = vpop.f32.mrb[41].mxu1  ;;  %v14430_v31 = vld [vmem:[%s16245_s1 + $0x28] ss:$16 sps:$4 sm:$0xff]  }
 0x77b   :  { %v5619_v10 = vadd.f32 %v5610_v32, %v5133_v57  ;;  %v5618_v11 = vadd.f32 %v5571_v9, %v5132_v58  ;;  %v5612_v37 = vpop.f32.mrb[45].mxu0  ;;  %v5573_v12 = vpop.f32.mrb[42].mxu1  ;;  %v14416_v58 = vld [vmem:[%s16245_s1 + $0xac] ss:$16 sps:$4 sm:$0xff]   ;;  %v14436_v32 = vld [vmem:[%s16245_s1 + $0x68] ss:$16 sps:$4 sm:$0xff]  }
 0x77c   :  { %v5643_v13 = vadd.f32 %v5626_v4, %v5617_v6  ;;  %v5620_v39 = vadd.f32 %v5612_v37, %v5134_v62  ;;  %v5614_v14 = vpop.f32.mrb[46].mxu0  ;;  %v5574_v15 = vpop.f32.mrb[43].mxu1  ;;  %v14420_v62 = vld [vmem:[%s16245_s1 + $0xc8] ss:$16 sps:$4 sm:$0xff]   ;;  %v14432_v4 = vld [vmem:[%s16245_s1 + $0x2c] ss:$16 sps:$4 sm:$0xff]  }
 0x77d   :  { %v5644_v16 = vadd.f32 %v5630_v5, %v5618_v11  ;;  %v5615_v17 = vpop.f32.mrb[47].mxu0  ;;  %v5645_v50 = vadd.f32 %v5634_v48, %v5619_v10  ;;  %v14435_v5 = vld [vmem:[%s16245_s1 + $0x4c] ss:$16 sps:$4 sm:$0xff]   ;;  %v14433_v6 = vld [vmem:[%s16245_s1 + $0x48] ss:$16 sps:$4 sm:$0xff]  }
 0x77e   :  { %v5647_v0 = vmax.f32 %v5643_v13, 0.0  ;;  %v5646_v19 = vadd.f32 %v5638_v36, %v5620_v39  ;;  %v14441_v9 = vld [vmem:[%s16245_s1 + $0x10c] ss:$16 sps:$4 sm:$0xff]   ;;  %v14439_v36 = vld [vmem:[%s16245_s1 + $0x108] ss:$16 sps:$4 sm:$0xff]  }
 0x77f   :  { %v5648_v41 = vmax.f32 %v5644_v16, 0.0  ;;  %v5649_v54 = vmax.f32 %v5645_v50, 0.0  ;;  %v14444_v10 = vld [vmem:[%s16245_s1 + $0x12c] ss:$16 sps:$4 sm:$0xff]   ;;  %v14442_v11 = vld [vmem:[%s16245_s1 + $0x128] ss:$16 sps:$4 sm:$0xff]  }
 0x780   :  { %v5650_v20 = vmax.f32 %v5646_v19, 0.0  ;;  %v5651_v24 = vpack.c.bf16 %v5647_v0, %v5647_v0  ;;  %v14447_v37 = vld [vmem:[%s16245_s1 + $0x14c] ss:$16 sps:$4 sm:$0xff]   ;;  %v14445_v12 = vld [vmem:[%s16245_s1 + $0x148] ss:$16 sps:$4 sm:$0xff]  }
 0x781   :  { %v5652_v22 = vpack.c.bf16 %v5648_v41, %v5648_v41  ;;  %v5653_v57 = vpack.c.bf16 %v5649_v54, %v5649_v54  ;;  %v16079_v13 = vld [vmem:[%s16246_s2] sm:$0xf]  ;;  %v14477_v48 = vld [vmem:[#allocation6 + $0x284] ss:$16 sps:$4 sm:$0xff]   ;;  %v14481_v50 = vld [vmem:[#allocation6 + $0x2a0] ss:$16 sps:$4 sm:$0xff]  }
 0x782   :  { %v5654_v30 = vpack.c.bf16 %v5650_v20, %v5650_v20  ;;  %v6650_v39 = vrot.slane %v16079_v13, %v15757_v25  ;;  %v6654_v14 = vrot.slane %v16079_v13, %v15761_v27 }
 0x783   :  { %5944 = vmatprep.mubr.bf16.mxu1 %v5652_v22 }
 0x784   :  { %5945 = vmatmul.mubr.bf16.vlgmr.msra.gmra.mrb[44].mxu1 %v5651_v24 }
 0x785   :  { %13303 = vmatpush3.bf16.msra.mxu1 %v14366_v23  ;;  %5984 = vmatprep.mubr.bf16.mxu1 %v5654_v30 }
 0x786   :  { %13304 = vmatprep.subr.bf16.mxu1 %v14370_v29 }
 0x789   :  { %13305 = vmatpush3.bf16.msra.mxu1 %v14371_v33 }
 0x78a   :  { %13306 = vmatprep.subr.bf16.mxu1 %v14375_v7  ;;  %v14451_v7 = vld [vmem:[#allocation6 + $0x200] ss:$16 sps:$4 sm:$0xff]  }
 0x78d   :  { %13307 = vmatpush3.bf16.msra.mxu1 %v14376_v34  ;;  %v14453_v34 = vld [vmem:[#allocation6 + $0x204] ss:$16 sps:$4 sm:$0xff]  }
 0x78e   :  { %13308 = vmatprep.subr.bf16.mxu1 %v14382_v40  ;;  %v14459_v40 = vld [vmem:[#allocation6 + $0x224] ss:$16 sps:$4 sm:$0xff]  }
 0x791   :  { %13309 = vmatpush3.bf16.msra.mxu1 %v14383_v43  ;;  %v14457_v43 = vld [vmem:[#allocation6 + $0x220] ss:$16 sps:$4 sm:$0xff]  }
 0x792   :  { %13310 = vmatprep.subr.bf16.mxu1 %v14387_v44  ;;  %v14465_v44 = vld [vmem:[#allocation6 + $0x244] ss:$16 sps:$4 sm:$0xff]  }
 0x795   :  { %13311 = vmatpush3.bf16.msra.mxu1 %v14388_v45  ;;  %v14463_v45 = vld [vmem:[#allocation6 + $0x240] ss:$16 sps:$4 sm:$0xff]  }
 0x796   :  { %13312 = vmatprep.subr.bf16.mxu1 %v14392_v46  ;;  %v14471_v46 = vld [vmem:[#allocation6 + $0x264] ss:$16 sps:$4 sm:$0xff]  }
 0x799   :  { %13313 = vmatpush3.bf16.msra.mxu1 %v14393_v47  ;;  %v14469_v47 = vld [vmem:[#allocation6 + $0x260] ss:$16 sps:$4 sm:$0xff]  }
 0x79a   :  { %13314 = vmatprep.subr.bf16.mxu1 %v14397_v49  ;;  %v14475_v49 = vld [vmem:[#allocation6 + $0x280] ss:$16 sps:$4 sm:$0xff]  }
 0x79d   :  { %13315 = vmatpush3.bf16.msra.mxu1 %v14398_v18  ;;  %v14483_v18 = vld [vmem:[#allocation6 + $0x2a4] ss:$16 sps:$4 sm:$0xff]  }
 0x79e   :  { %13316 = vmatprep.subr.bf16.mxu1 %v14403_v51 }
 0x7a1   :  { %13317 = vmatpush3.bf16.msra.mxu1 %v14404_v53 }
 0x7a2   :  { %6226 = vmatprep.subr.bf16.mxu1 %v14410_v55 }
 0x7a4   :  { %5985 = vmatmul.mubr.bf16.vlgmr.msra.gmra.mrb[48].mxu1 %v5653_v57  ;;  %v14487_v57 = vld [vmem:[#allocation6 + $0x2c0] ss:$16 sps:$4 sm:$0xff]  }
 0x7a5   :  { %6227 = vmatpush1.bf16.msra.mxu1 %v14408_v56  ;;  %6258 = vmatprep.mubr.bf16.mxu1 %v15795_v38 }
 0x7a6   :  { %6228 = vmatprep.subr.bf16.mxu1 %v14416_v58  ;;  %v14489_v58 = vld [vmem:[#allocation6 + $0x2c4] ss:$16 sps:$4 sm:$0xff]  }
 0x7a9   :  { %6229 = vmatpush1.bf16.msra.mxu1 %v14414_v60  ;;  %v5719_v60 = vld [vmem:[%s16254_s10] sm:$0x1] }
 0x7aa   :  { %6230 = vmatprep.subr.bf16.mxu1 %v14422_v61 }
 0x7ad   :  { %6231 = vmatpush1.bf16.msra.mxu1 %v14420_v62 }
 0x7ae   :  { %6232 = vmatprep.subr.bf16.mxu1 %v14426_v63 }
 0x7b1   :  { %6233 = vmatpush1.bf16.msra.mxu1 %v14424_v2 }
 0x7b2   :  { %6401 = vmatprep.subr.bf16.mxu1 %v14429_v3 }
 0x7b4   :  { %12619 = vmatmul.mubr.msk.bf16.vlgmr.msra.gmra.mrb[52].mxu1 %vm299_vm9, %v15928_v59  ;;  %v14438_v59 = vld [vmem:[%s16245_s1 + $0x6c] ss:$16 sps:$4 sm:$0xff]  }
 0x7b5   :  { %6402 = vmatpush1.bf16.msra.mxu1 %v14427_v35  ;;  %6433 = vmatprep.mubr.bf16.mxu1 %v15795_v38 }
 0x7b6   :  { %6403 = vmatprep.subr.bf16.mxu1 %v14432_v4 }
 0x7b9   :  { %6404 = vmatpush1.bf16.msra.mxu1 %v14430_v31  ;;  %v6658_v31 = vrot.slane %v16079_v13, %v15759_v26 }
 0x7ba   :  { %6405 = vmatprep.subr.bf16.mxu1 %v14435_v5  ;;  %v6662_v5 = vrot.slane %v16079_v13, %v15763_v28  ;;  %v14454_v13 = vld [vmem:[#allocation6 + $0x208] ss:$16 sps:$4 sm:$0xff]  }
 0x7bd   :  { %6406 = vmatpush1.bf16.msra.mxu1 %v14433_v6 }
 0x7be   :  { %6407 = vmatprep.subr.bf16.mxu1 %v14438_v59 }
 0x7c1   :  { %6408 = vmatpush1.bf16.msra.mxu1 %v14436_v32 }
 0x7c2   :  { %6594 = vmatprep.subr.bf16.mxu1 %v14441_v9 }
 0x7c4   :  { %12638 = vmatmul.mubr.msk.bf16.vlgmr.msra.gmra.mrb[52].mxu1 %vm299_vm9, %v15955_v42  ;;  %v14450_v42 = vld [vmem:[%s16245_s1 + $0x16c] ss:$16 sps:$4 sm:$0xff]  }
 0x7c5   :  { %6595 = vmatpush1.bf16.msra.mxu1 %v14439_v36  ;;  %6626 = vmatprep.mubr.bf16.mxu1 %v15795_v38  ;;  %v14448_v38 = vld [vmem:[%s16245_s1 + $0x168] ss:$16 sps:$4 sm:$0xff]  }
 0x7c6   :  { %6596 = vmatprep.subr.bf16.mxu1 %v14444_v10 }
 0x7c9   :  { %6597 = vmatpush1.bf16.msra.mxu1 %v14442_v11 }
 0x7ca   :  { %6598 = vmatprep.subr.bf16.mxu1 %v14447_v37 }
 0x7cd   :  { %6599 = vmatpush1.bf16.msra.mxu1 %v14445_v12 }
 0x7ce   :  { %6600 = vmatprep.subr.bf16.mxu1 %v14450_v42 }
 0x7d1   :  { %6601 = vmatpush1.bf16.msra.mxu1 %v14448_v38 }
 0x7d4   :  { %12673 = vmatmul.mubr.msk.bf16.vlgmr.msra.gmra.mrb[52].mxu1 %vm299_vm9, %v15978_v52  ;;  %vm16265_vm9 = vcmask 130048  }
 0x7d5   :  { %6818 = vmatprep.mubr.f32.mxu1 %v15441_v21  ;;  %vm16266_vm15 = vmmov %vm16265_vm9 }
 0x7d6   :  { %vm16267_vm2 = vmmov %vm16265_vm9 }
 0x7d7   :  { %vm16268_vm4 = vmmov %vm16267_vm2 }
 0x800   :  { %v6585_v15 = vpop.f32.mrb[48].mxu0 }
 0x801   :  { %v6667_v16 = vadd.f32 %v6650_v39, %v6585_v15  ;;  %v6587_v17 = vpop.f32.mrb[49].mxu0 }
 0x802   :  { %v6668_v0 = vadd.f32 %v6654_v14, %v6587_v17  ;;  %v6589_v19 = vpop.f32.mrb[50].mxu0  ;;  %v14462_v17 = vld [vmem:[#allocation6 + $0x22c] ss:$16 sps:$4 sm:$0xff]  }
 0x803   :  { %v6675_v41 = vmax.f32 %v6667_v16, 0.0  ;;  %v6671_v52 = vadd.f32 %v6650_v39, %v6589_v19  ;;  %v6591_v20 = vpop.f32.mrb[51].mxu0  ;;  %v14456_v16 = vld [vmem:[#allocation6 + $0x20c] ss:$16 sps:$4 sm:$0xff]  }
 0x804   :  { %v6676_v22 = vmax.f32 %v6668_v0, 0.0  ;;  %v6672_v23 = vadd.f32 %v6654_v14, %v6591_v20  ;;  %v14460_v0 = vld [vmem:[#allocation6 + $0x228] ss:$16 sps:$4 sm:$0xff]   ;;  %v14468_v19 = vld [vmem:[#allocation6 + $0x24c] ss:$16 sps:$4 sm:$0xff]  }
 0x805   :  { %v6679_v24 = vmax.f32 %v6671_v52, 0.0  ;;  %v14474_v52 = vld [vmem:[#allocation6 + $0x26c] ss:$16 sps:$4 sm:$0xff]   ;;  %v14472_v20 = vld [vmem:[#allocation6 + $0x268] ss:$16 sps:$4 sm:$0xff]  }
 0x806   :  { %v6680_v29 = vmax.f32 %v6672_v23, 0.0  ;;  %v14478_v23 = vld [vmem:[#allocation6 + $0x288] ss:$16 sps:$4 sm:$0xff]  }
 0x807   :  { %v13386_v30 = vpack.c.bf16 %v6679_v24, %v6675_v41  ;;  %v14466_v41 = vld [vmem:[#allocation6 + $0x248] ss:$16 sps:$4 sm:$0xff]   ;;  %v14486_v24 = vld [vmem:[#allocation6 + $0x2ac] ss:$16 sps:$4 sm:$0xff]  }
 0x808   :  { %v13384_v33 = vpack.c.bf16 %v6680_v29, %v6676_v22  ;;  %v14480_v22 = vld [vmem:[#allocation6 + $0x28c] ss:$16 sps:$4 sm:$0xff]   ;;  %v14484_v29 = vld [vmem:[#allocation6 + $0x2a8] ss:$16 sps:$4 sm:$0xff]  }
 0x80a   :  { %13385 = vmatprep.subr.bf16.mxu0 %v13384_v33 }
 0x80b   :  { %13387 = vmatpush1.bf16.msra.mxu0 %v13386_v30 }
 0x80c   :  { %13393 = vmatprep.subr.bf16.mxu0 %v13384_v33  ;;  %v14490_v33 = vld [vmem:[#allocation6 + $0x2c8] ss:$16 sps:$4 sm:$0xff]  }
 0x80e   :  { %12674 = vmatmul.mubr.msk.f32.vlgmr.msra.gmra.mrb[52].mxu0 %vm16265_vm9, %v15770_v1  ;;  %vm16130_vm9 = vmand %vm7002_vm10, %vm7003_vm0 }
 0x80f   :  { %13395 = vmatpush1.bf16.msra.mxu0 %v13386_v30  ;;  %6889 = vmatprep.mubr.f32.mxu0 %v15441_v21  ;;  %v14492_v30 = vld [vmem:[#allocation6 + $0x2cc] ss:$16 sps:$4 sm:$0xff]  }
 0x810   :  { %7486 = vmatprep.subr.bf16.mxu0 %v14453_v34 }
 0x812   :  { %12676 = vmatmul.mubr.msk.f32.vlgmr.msra.gmra.mrb[54].mxu0 %vm16266_vm15, %v15777_v8  ;;  %vm7005_vm15 = vmor %vm16130_vm9, %vm16126_vm14 }
 0x813   :  { %7487 = vmatpush1.bf16.msra.mxu0 %v14451_v7 }
 0x814   :  { %7488 = vmatprep.subr.bf16.mxu0 %v14459_v40 }
 0x817   :  { %7489 = vmatpush1.bf16.msra.mxu0 %v14457_v43 }
 0x818   :  { %7490 = vmatprep.subr.bf16.mxu0 %v14465_v44 }
 0x81b   :  { %7491 = vmatpush1.bf16.msra.mxu0 %v14463_v45  ;;  %v14495_v45 = vld [vmem:[#allocation6 + $0x2e4] ss:$16 sps:$4 sm:$0xff]  }
 0x81c   :  { %7492 = vmatprep.subr.bf16.mxu0 %v14471_v46  ;;  %v14498_v46 = vld [vmem:[#allocation6 + $0x2ec] ss:$16 sps:$4 sm:$0xff]  }
 0x81f   :  { %7493 = vmatpush1.bf16.msra.mxu0 %v14469_v47 }
 0x820   :  { %7494 = vmatprep.subr.bf16.mxu0 %v14477_v48  ;;  %v14493_v48 = vld [vmem:[#allocation6 + $0x2e0] ss:$16 sps:$4 sm:$0xff]  }
 0x823   :  { %7495 = vmatpush1.bf16.msra.mxu0 %v14475_v49  ;;  %v14496_v49 = vld [vmem:[#allocation6 + $0x2e8] ss:$16 sps:$4 sm:$0xff]  }
 0x824   :  { %7496 = vmatprep.subr.bf16.mxu0 %v14483_v18  ;;  %v14501_v18 = vld [vmem:[#allocation6 + $0x304] ss:$16 sps:$4 sm:$0xff]  }
 0x827   :  { %7497 = vmatpush1.bf16.msra.mxu0 %v14481_v50  ;;  %v14504_v50 = vld [vmem:[#allocation6 + $0x30c] ss:$16 sps:$4 sm:$0xff]  }
 0x828   :  { %7498 = vmatprep.subr.bf16.mxu0 %v14489_v58  ;;  %v14513_v58 = vld [vmem:[#allocation6 + $0x344] ss:$16 sps:$4 sm:$0xff]  }
 0x82b   :  { %7499 = vmatpush1.bf16.msra.mxu0 %v14487_v57  ;;  %v14508_v57 = vld [vmem:[#allocation6 + $0x328] ss:$16 sps:$4 sm:$0xff]  }
 0x82c   :  { %7500 = vmatprep.subr.bf16.mxu0 %v14495_v45  ;;  %v7006_v45 = vld [vmem:[#allocation3 + $0x10] sm:$0x33] }
 0x82f   :  { %7501 = vmatpush1.bf16.msra.mxu0 %v14493_v48 }
 0x830   :  { %7502 = vmatprep.subr.bf16.mxu0 %v14501_v18 }
 0x857   :  { %v13296_v51 = vpop.f32.mrb[44].mxu1 }
 0x858   :  { %v13297_v53 = vpop.f32.mrb[45].mxu1 }
 0x859   :  { %v13298_v54 = vadd.f32 %v13297_v53, %v13296_v51  ;;  %v13299_v55 = vpop.f32.mrb[46].mxu1  ;;  %v14499_v51 = vld [vmem:[#allocation6 + $0x300] ss:$16 sps:$4 sm:$0xff]   ;;  %v14502_v53 = vld [vmem:[#allocation6 + $0x308] ss:$16 sps:$4 sm:$0xff]  }
 0x85a   :  { %v13300_v56 = vpop.f32.mrb[47].mxu1  ;;  %7503 = vmatpush1.bf16.msra.mxu0 %v14499_v51  ;;  %v14510_v55 = vld [vmem:[#allocation6 + $0x32c] ss:$16 sps:$4 sm:$0xff]  }
 0x85b   :  { %v5947_v63 = vadd.f32 %v13298_v54, %v5719_v60  ;;  %v14507_v54 = vld [vmem:[#allocation6 + $0x324] ss:$16 sps:$4 sm:$0xff]   ;;  %v14505_v56 = vld [vmem:[#allocation6 + $0x320] ss:$16 sps:$4 sm:$0xff]   ;;  %v14516_v60 = vld [vmem:[#allocation6 + $0x34c] ss:$16 sps:$4 sm:$0xff]  }
 0x85c   :  { %7504 = vmatprep.subr.bf16.mxu0 %v14507_v54 }
 0x85e   :  { %7505 = vmatpush1.bf16.msra.mxu0 %v14505_v56 }
 0x85f   :  { %7506 = vmatprep.subr.bf16.mxu0 %v14513_v58 }
 0x877   :  { %v13318_v61 = vpop.f32.mrb[48].mxu1 }
 0x878   :  { %v13319_v62 = vpop.f32.mrb[49].mxu1 }
 0x879   :  { %v13320_v2 = vadd.f32 %v13319_v62, %v13318_v61  ;;  %v13321_v3 = vpop.f32.mrb[50].mxu1  ;;  %v14511_v61 = vld [vmem:[#allocation6 + $0x340] ss:$16 sps:$4 sm:$0xff]   ;;  %v14514_v62 = vld [vmem:[#allocation6 + $0x348] ss:$16 sps:$4 sm:$0xff]  }
 0x87a   :  { %v13322_v35 = vpop.f32.mrb[51].mxu1  ;;  %7507 = vmatpush1.bf16.msra.mxu0 %v14511_v61  ;;  %v14520_v3 = vld [vmem:[#allocation6 + $0x368] ss:$16 sps:$4 sm:$0xff]  }
 0x87b   :  { %v5987_v4 = vadd.f32 %v13320_v2, %v5947_v63  ;;  %v14519_v63 = vld [vmem:[#allocation6 + $0x364] ss:$16 sps:$4 sm:$0xff]   ;;  %v14517_v2 = vld [vmem:[#allocation6 + $0x360] ss:$16 sps:$4 sm:$0xff]   ;;  %v14522_v35 = vld [vmem:[#allocation6 + $0x36c] ss:$16 sps:$4 sm:$0xff]  }
 0x87c   :  { %7508 = vmatprep.subr.bf16.mxu0 %v14519_v63 }
 0x87d   :  { %5992 = vst [vmem:[#allocation14] sm:$0x1] %v5987_v4  ;;  %v14525_v4 = vld [vmem:[#allocation6 + $0x384] ss:$16 sps:$4 sm:$0xff]  }
 0x87e   :  { %7509 = vmatpush1.bf16.msra.mxu0 %v14517_v2 }
 0x87f   :  { %7510 = vmatprep.subr.bf16.mxu0 %v14525_v4 }
 0x8a7   :  { %v6628_v6 = vpop.f32.mrb[52].mxu1 }
 0x8a8   :  { %v6669_v59 = vadd.f32 %v6658_v31, %v6628_v6  ;;  %v6630_v32 = vpop.f32.mrb[53].mxu1  ;;  %v14526_v6 = vld [vmem:[#allocation6 + $0x388] ss:$16 sps:$4 sm:$0xff]  }
 0x8a9   :  { %v6670_v9 = vadd.f32 %v6662_v5, %v6630_v32  ;;  %v6632_v36 = vpop.f32.mrb[54].mxu1  ;;  %v14529_v32 = vld [vmem:[#allocation6 + $0x3a0] ss:$16 sps:$4 sm:$0xff]  }
 0x8aa   :  { %v6673_v10 = vadd.f32 %v6658_v31, %v6632_v36  ;;  %v6634_v11 = vpop.f32.mrb[55].mxu1  ;;  %v6677_v12 = vmax.f32 %v6669_v59, 0.0  ;;  %v14528_v31 = vld [vmem:[#allocation6 + $0x38c] ss:$16 sps:$4 sm:$0xff]   ;;  %v14531_v59 = vld [vmem:[#allocation6 + $0x3a4] ss:$16 sps:$4 sm:$0xff]  }
 0x8ab   :  { %v6674_v37 = vadd.f32 %v6662_v5, %v6634_v11  ;;  %v6678_v38 = vmax.f32 %v6670_v9, 0.0  ;;  %v14523_v5 = vld [vmem:[#allocation6 + $0x380] ss:$16 sps:$4 sm:$0xff]   ;;  %v14534_v9 = vld [vmem:[#allocation6 + $0x3ac] ss:$16 sps:$4 sm:$0xff]  }
 0x8ac   :  { %v6681_v42 = vmax.f32 %v6673_v10, 0.0  ;;  %7511 = vmatpush1.bf16.msra.mxu0 %v14523_v5  ;;  %v14537_v36 = vld [vmem:[#allocation6 + $0x3c4] ss:$16 sps:$4 sm:$0xff]   ;;  %v14532_v10 = vld [vmem:[#allocation6 + $0x3a8] ss:$16 sps:$4 sm:$0xff]  }
 0x8ad   :  { %v6682_v39 = vmax.f32 %v6674_v37, 0.0  ;;  %7512 = vmatprep.subr.bf16.mxu0 %v14531_v59  ;;  %v14535_v11 = vld [vmem:[#allocation6 + $0x3c0] ss:$16 sps:$4 sm:$0xff]   ;;  %v14540_v37 = vld [vmem:[#allocation6 + $0x3cc] ss:$16 sps:$4 sm:$0xff]  }
 0x8ae   :  { %v13390_v14 = vpack.c.bf16 %v6681_v42, %v6677_v12  ;;  %v14543_v12 = vld [vmem:[#allocation6 + $0x3e4] ss:$16 sps:$4 sm:$0xff]   ;;  %v14538_v42 = vld [vmem:[#allocation6 + $0x3c8] ss:$16 sps:$4 sm:$0xff]   ;;  %v14562_v5 = vld [vmem:[#allocation6 + $0x2c] ss:$16 sps:$4 sm:$0xff]  }
 0x8af   :  { %v13388_v15 = vpack.c.bf16 %v6682_v39, %v6678_v38  ;;  %v14541_v38 = vld [vmem:[#allocation6 + $0x3e0] ss:$16 sps:$4 sm:$0xff]   ;;  %v14546_v39 = vld [vmem:[#allocation6 + $0x3ec] ss:$16 sps:$4 sm:$0xff]  }
 0x8b0   :  { %7513 = vmatpush1.bf16.msra.mxu0 %v14529_v32  ;;  %v14557_v59 = vld [vmem:[#allocation6 + $0x20] ss:$16 sps:$4 sm:$0xff]   ;;  %v14560_v32 = vld [vmem:[#allocation6 + $0x28] ss:$16 sps:$4 sm:$0xff]  }
 0x8b1   :  { %13389 = vmatprep.subr.bf16.mxu1 %v13388_v15  ;;  %7514 = vmatprep.subr.bf16.mxu0 %v14537_v36  ;;  %v14568_v36 = vld [vmem:[#allocation6 + $0x4c] ss:$16 sps:$4 sm:$0xff]  }
 0x8b2   :  { %13391 = vmatpush1.bf16.msra.mxu1 %v13390_v14 }
 0x8b3   :  { %13397 = vmatprep.subr.bf16.mxu1 %v13388_v15  ;;  %v14550_v15 = vld [vmem:[#allocation6 + $0x4] ss:$16 sps:$4 sm:$0xff]  }
 0x8b4   :  { %7515 = vmatpush1.bf16.msra.mxu0 %v14535_v11  ;;  %v14566_v11 = vld [vmem:[#allocation6 + $0x48] ss:$16 sps:$4 sm:$0xff]  }
 0x8b5   :  { %12675 = vmatmul.mubr.msk.f32.vlgmr.msra.gmra.mrb[56].mxu1 %vm16267_vm2, %v15770_v1  ;;  %7516 = vmatprep.subr.bf16.mxu0 %v14543_v12  ;;  %v14574_v12 = vld [vmem:[#allocation6 + $0x6c] ss:$16 sps:$4 sm:$0xff]   ;;  %vm8800_vm2 = vcmask 1047559  }
 0x8b6   :  { %13399 = vmatpush1.bf16.msra.mxu1 %v13390_v14  ;;  %6960 = vmatprep.mubr.f32.mxu1 %v15441_v21  ;;  %v14544_v14 = vld [vmem:[#allocation6 + $0x3e8] ss:$16 sps:$4 sm:$0xff]  }
 0x8b7   :  { %7527 = vmatprep.subr.bf16.mxu1 %v14456_v16  ;;  %v14553_v16 = vld [vmem:[#allocation6 + $0xc] ss:$16 sps:$4 sm:$0xff]  }
 0x8b8   :  { %7517 = vmatpush1.bf16.msra.mxu0 %v14541_v38  ;;  %v14572_v38 = vld [vmem:[#allocation6 + $0x68] ss:$16 sps:$4 sm:$0xff]  }
 0x8b9   :  { %12677 = vmatmul.mubr.msk.f32.vlgmr.msra.gmra.mrb[58].mxu1 %vm16268_vm4, %v15777_v8  ;;  %7897 = vmatprep.subr.bf16.mxu0 %v14550_v15  ;;  %v14575_v15 = vld [vmem:[#allocation6 + $0x80] ss:$16 sps:$4 sm:$0xff]   ;;  %vm8801_vm4 = vsmask.f32 7966 }
 0x8ba   :  { %7528 = vmatpush1.bf16.msra.mxu1 %v14454_v13  ;;  %vm8802_vm7 = vmand %vm8800_vm2, %vm8801_vm4 }
 0x8bb   :  { %7529 = vmatprep.subr.bf16.mxu1 %v14462_v17 }
 0x8be   :  { %7530 = vmatpush1.bf16.msra.mxu1 %v14460_v0 }
 0x8bf   :  { %7531 = vmatprep.subr.bf16.mxu1 %v14468_v19 }
 0x8c2   :  { %7532 = vmatpush1.bf16.msra.mxu1 %v14466_v41 }
 0x8c3   :  { %7533 = vmatprep.subr.bf16.mxu1 %v14474_v52 }
 0x8c6   :  { %7534 = vmatpush1.bf16.msra.mxu1 %v14472_v20 }
 0x8c7   :  { %7535 = vmatprep.subr.bf16.mxu1 %v14480_v22 }
 0x8ca   :  { %7536 = vmatpush1.bf16.msra.mxu1 %v14478_v23 }
 0x8cb   :  { %7537 = vmatprep.subr.bf16.mxu1 %v14486_v24  ;;  %v14598_v24 = vld [vmem:[#allocation6 + $0xec] ss:$16 sps:$4 sm:$0xff]  }
 0x8ce   :  { %7538 = vmatpush1.bf16.msra.mxu1 %v14484_v29 }
 0x8cf   :  { %7539 = vmatprep.subr.bf16.mxu1 %v14492_v30 }
 0x8d2   :  { %7540 = vmatpush1.bf16.msra.mxu1 %v14490_v33 }
 0x8d3   :  { %7541 = vmatprep.subr.bf16.mxu1 %v14498_v46 }
 0x8d6   :  { %7542 = vmatpush1.bf16.msra.mxu1 %v14496_v49 }
 0x8d7   :  { %7543 = vmatprep.subr.bf16.mxu1 %v14504_v50 }
 0x8da   :  { %7544 = vmatpush1.bf16.msra.mxu1 %v14502_v53 }
 0x8db   :  { %7545 = vmatprep.subr.bf16.mxu1 %v14510_v55 }
 0x8de   :  { %7546 = vmatpush1.bf16.msra.mxu1 %v14508_v57 }
 0x8df   :  { %7547 = vmatprep.subr.bf16.mxu1 %v14516_v60 }
 0x8e1   :  { %v16102_v7 = vpop.f32.mrb[52].mxu0 }
 0x8e2   :  { %v16104_v34 = vpop.f32.mrb[53].mxu0  ;;  %7548 = vmatpush1.bf16.msra.mxu1 %v14514_v62 }
 0x8e3   :  { %7549 = vmatprep.subr.bf16.mxu1 %v14522_v35  ;;  %v14551_v35 = vld [vmem:[#allocation6 + $0x8] ss:$16 sps:$4 sm:$0xff]  }
 0x8e5   :  { %v16106_v40 = vpop.f32.mrb[54].mxu0 }
 0x8e6   :  { %v6967_v43 = vmax.f32 %v16102_v7, %v16106_v40  ;;  %v16110_v44 = vpop.f32.mrb[55].mxu0  ;;  %7550 = vmatpush1.bf16.msra.mxu1 %v14520_v3  ;;  %v14548_v3 = vld [vmem:[#allocation6] ss:$16 sps:$4 sm:$0xff]  }
 0x8e7   :  { %v6968_v47 = vmax.f32 %v16104_v34, %v16110_v44  ;;  %7551 = vmatprep.subr.bf16.mxu1 %v14528_v31  ;;  %v14559_v31 = vld [vmem:[#allocation6 + $0x24] ss:$16 sps:$4 sm:$0xff]  }
 0x8ea   :  { %7552 = vmatpush1.bf16.msra.mxu1 %v14526_v6 }
 0x8eb   :  { %7553 = vmatprep.subr.bf16.mxu1 %v14534_v9  ;;  %v14565_v9 = vld [vmem:[#allocation6 + $0x44] ss:$16 sps:$4 sm:$0xff]  }
 0x8ee   :  { %7554 = vmatpush1.bf16.msra.mxu1 %v14532_v10  ;;  %v14563_v10 = vld [vmem:[#allocation6 + $0x40] ss:$16 sps:$4 sm:$0xff]  }
 0x8ef   :  { %7555 = vmatprep.subr.bf16.mxu1 %v14540_v37  ;;  %v14571_v37 = vld [vmem:[#allocation6 + $0x64] ss:$16 sps:$4 sm:$0xff]  }
 0x8f2   :  { %7556 = vmatpush1.bf16.msra.mxu1 %v14538_v42  ;;  %v14569_v42 = vld [vmem:[#allocation6 + $0x60] ss:$16 sps:$4 sm:$0xff]  }
 0x8f3   :  { %7557 = vmatprep.subr.bf16.mxu1 %v14546_v39  ;;  %v14577_v39 = vld [vmem:[#allocation6 + $0x84] ss:$16 sps:$4 sm:$0xff]  }
 0x8f6   :  { %7558 = vmatpush1.bf16.msra.mxu1 %v14544_v14  ;;  %v14580_v14 = vld [vmem:[#allocation6 + $0x8c] ss:$16 sps:$4 sm:$0xff]  }
 0x8f7   :  { %7938 = vmatprep.subr.bf16.mxu1 %v14553_v16  ;;  %v14578_v16 = vld [vmem:[#allocation6 + $0x88] ss:$16 sps:$4 sm:$0xff]  }
 0x988   :  { %v6820_v13 = vpop.f32.mrb[56].mxu1 }
 0x989   :  { %v6822_v17 = vpop.f32.mrb[57].mxu1 }
 0x98c   :  { %v6962_v0 = vpop.f32.mrb[58].mxu1 }
 0x98d   :  { %v6969_v19 = vmax.f32 %v6820_v13, %v6962_v0  ;;  %v6964_v41 = vpop.f32.mrb[59].mxu1  ;;  %v14583_v13 = vld [vmem:[#allocation6 + $0xa4] ss:$16 sps:$4 sm:$0xff]   ;;  %v14581_v0 = vld [vmem:[#allocation6 + $0xa0] ss:$16 sps:$4 sm:$0xff]  }
 0x98e   :  { %v6970_v52 = vmax.f32 %v6822_v17, %v6964_v41  ;;  %v14586_v17 = vld [vmem:[#allocation6 + $0xac] ss:$16 sps:$4 sm:$0xff]   ;;  %v14589_v41 = vld [vmem:[#allocation6 + $0xc4] ss:$16 sps:$4 sm:$0xff]  }
 0x98f   :  { %v6971_v20 = vmax.f32 %v6967_v43, %v6969_v19  ;;  %v6997_v43 = vld [vmem:[#allocation3 + $0x8] sm:$0xee] }
 0x990   :  { %v6972_v22 = vmax.f32 %v6968_v47, %v6970_v52  ;;  %v14584_v19 = vld [vmem:[#allocation6 + $0xa8] ss:$16 sps:$4 sm:$0xff]   ;;  %v14592_v52 = vld [vmem:[#allocation6 + $0xcc] ss:$16 sps:$4 sm:$0xff]  }
 0x992   :  { %v13278_v23 = vpack.c.bf16 %v6972_v22, %v6971_v20  ;;  %v14587_v20 = vld [vmem:[#allocation6 + $0xc0] ss:$16 sps:$4 sm:$0xff]   ;;  %v14590_v22 = vld [vmem:[#allocation6 + $0xc8] ss:$16 sps:$4 sm:$0xff]  }
 0x994   :  { %v6981_v29 = vshrl.u32 %v13278_v23, 16  ;;  %v6984_v30 = vshll.u32 %v13278_v23, 16  ;;  %v14595_v23 = vld [vmem:[#allocation6 + $0xe4] ss:$16 sps:$4 sm:$0xff]  }
 0x996   :  { %v6983_v7 = vrot.slane %v6981_v29, 6  ;;  %v6986_v34 = vrot.slane %v6984_v30, 7  ;;  %v14593_v29 = vld [vmem:[#allocation6 + $0xe0] ss:$16 sps:$4 sm:$0xff]   ;;  %v14596_v30 = vld [vmem:[#allocation6 + $0xe8] ss:$16 sps:$4 sm:$0xff]  }
 0x998   :  { %v6987_v44 = vor.u32 %v6986_v34, %v6983_v7  ;;  %v14601_v7 = vld [vmem:[#allocation6 + $0x104] ss:$16 sps:$4 sm:$0xff]   ;;  %v14604_v34 = vld [vmem:[#allocation6 + $0x10c] ss:$16 sps:$4 sm:$0xff]  }
 0x99a   :  { %v6988_v46 = vrot.slane %v6987_v44, 4  ;;  %v6998_v47 = vsel %vm6996_vm3, %v6987_v44, %v6997_v43  ;;  %v14599_v43 = vld [vmem:[#allocation6 + $0x100] ss:$16 sps:$4 sm:$0xff]   ;;  %v14602_v44 = vld [vmem:[#allocation6 + $0x108] ss:$16 sps:$4 sm:$0xff]  }
 0x99b   :  { %6999 = vst [vmem:[#allocation3 + $0x8] sm:$0xee] %v6998_v47  ;;  %v14605_v47 = vld [vmem:[#allocation6 + $0x120] ss:$16 sps:$4 sm:$0xff]  }
 0x99c   :  { %v7007_v48 = vsel %vm7005_vm15, %v6988_v46, %v7006_v45  ;;  %v14607_v45 = vld [vmem:[#allocation6 + $0x124] ss:$16 sps:$4 sm:$0xff]   ;;  %v14610_v46 = vld [vmem:[#allocation6 + $0x12c] ss:$16 sps:$4 sm:$0xff]  }
 0x99d   :  { %7008 = vst [vmem:[#allocation3 + $0x10] sm:$0x33] %v7007_v48  ;;  %v14608_v48 = vld [vmem:[#allocation6 + $0x128] ss:$16 sps:$4 sm:$0xff]  }
 0x9a2   :  { %v16145_v49 = vld [vmem:[#allocation3 + $0x8] sm:$0xee] }
 0x9a4   :  { %v16147_v18 = vld [vmem:[#allocation3 + $0x10] sm:$0x33] }
 0x9a5   :  { %v12680_v50 = vcombine.high %v16145_v49, %v16147_v18  ;;  %v12679_v51 = vcombine.low %v16145_v49, %v16147_v18  ;;  %v16153_v57 = vld [vmem:[#allocation3 + $0x10] sm:$0x11] }
 0x9a6   :  { %v12746_v63 = vcombine.high %v16145_v49, %v16153_v57 }
 0x9a7   :  { %v7157_v53 = vshrl.u32 %v12680_v50, 16  ;;  %v7160_v54 = vshll.u32 %v12680_v50, 16  ;;  %v7149_v55 = vshrl.u32 %v12679_v51, 16  ;;  %v7152_v56 = vshll.u32 %v12679_v51, 16  ;;  %v14613_v50 = vld [vmem:[#allocation6 + $0x144] ss:$16 sps:$4 sm:$0xff]  }
 0x9a8   :  { %v7574_v6 = vrot.slane %v12746_v63, 1  ;;  %v14616_v51 = vld [vmem:[#allocation6 + $0x14c] ss:$16 sps:$4 sm:$0xff]   ;;  %v14623_v63 = vld [vmem:[#allocation6 + $0x180] ss:$16 sps:$4 sm:$0xff]  }
 0x9a9   :  { %v7159_v58 = vrot.slane %v7157_v53, 1  ;;  %v7162_v60 = vrot.slane %v7160_v54, 2  ;;  %v7151_v61 = vrot.slane %v7149_v55, 1  ;;  %v7154_v62 = vrot.slane %v7152_v56, 2  ;;  %v14611_v53 = vld [vmem:[#allocation6 + $0x140] ss:$16 sps:$4 sm:$0xff]  }
 0x9aa   :  { %v14614_v54 = vld [vmem:[#allocation6 + $0x148] ss:$16 sps:$4 sm:$0xff]   ;;  %v14619_v55 = vld [vmem:[#allocation6 + $0x164] ss:$16 sps:$4 sm:$0xff]   ;;  %v14622_v56 = vld [vmem:[#allocation6 + $0x16c] ss:$16 sps:$4 sm:$0xff]  }
 0x9ab   :  { %v7163_v2 = vor.u32 %v7162_v60, %v7159_v58  ;;  %v7155_v4 = vor.u32 %v7154_v62, %v7151_v61  ;;  %v14617_v58 = vld [vmem:[#allocation6 + $0x160] ss:$16 sps:$4 sm:$0xff]   ;;  %v14620_v60 = vld [vmem:[#allocation6 + $0x168] ss:$16 sps:$4 sm:$0xff]   ;;  %v14625_v61 = vld [vmem:[#allocation6 + $0x184] ss:$16 sps:$4 sm:$0xff]  }
 0x9ac   :  { %v14628_v62 = vld [vmem:[#allocation6 + $0x18c] ss:$16 sps:$4 sm:$0xff]  }
 0x9ad   :  { %7518 = vmatprep.mubr.bf16.mxu0 %v7163_v2  ;;  %7559 = vmatprep.mubr.bf16.mxu1 %v7163_v2  ;;  %v14626_v2 = vld [vmem:[#allocation6 + $0x188] ss:$16 sps:$4 sm:$0xff]  }
 0x9ae   :  { %7519 = vmatmul.mubr.bf16.vlgmr.msra.gmra.mrb[56].mxu0 %v7155_v4  ;;  %7560 = vmatmul.mubr.bf16.vlgmr.msra.gmra.mrb[60].mxu1 %v7155_v4  ;;  %v14629_v4 = vld [vmem:[#allocation6 + $0x1a0] ss:$16 sps:$4 sm:$0xff]  }
 0x9af   :  { %7898 = vmatpush1.bf16.msra.mxu0 %v14548_v3  ;;  %7939 = vmatpush1.bf16.msra.mxu1 %v14551_v35  ;;  %v14631_v3 = vld [vmem:[#allocation6 + $0x1a4] ss:$16 sps:$4 sm:$0xff]   ;;  %v14634_v35 = vld [vmem:[#allocation6 + $0x1ac] ss:$16 sps:$4 sm:$0xff]  }
 0x9b0   :  { %7929 = vmatprep.mubr.bf16.mxu0 %v7574_v6  ;;  %7970 = vmatprep.mubr.bf16.mxu1 %v7574_v6  ;;  %v14640_v6 = vld [vmem:[#allocation6 + $0x1cc] ss:$16 sps:$4 sm:$0xff]  }
 0x9b1   :  { %7899 = vmatprep.subr.bf16.mxu0 %v14559_v31  ;;  %7940 = vmatprep.subr.bf16.mxu1 %v14562_v5  ;;  %v14632_v31 = vld [vmem:[#allocation6 + $0x1a8] ss:$16 sps:$4 sm:$0xff]   ;;  %v14637_v5 = vld [vmem:[#allocation6 + $0x1c4] ss:$16 sps:$4 sm:$0xff]  }
 0x9b3   :  { %7900 = vmatpush1.bf16.msra.mxu0 %v14557_v59  ;;  %7941 = vmatpush1.bf16.msra.mxu1 %v14560_v32  ;;  %v14635_v59 = vld [vmem:[#allocation6 + $0x1c0] ss:$16 sps:$4 sm:$0xff]   ;;  %v14638_v32 = vld [vmem:[#allocation6 + $0x1c8] ss:$16 sps:$4 sm:$0xff]  }
 0x9b4   :  { %7901 = vmatprep.subr.bf16.mxu0 %v14565_v9  ;;  %7942 = vmatprep.subr.bf16.mxu1 %v14568_v36  ;;  %v14643_v9 = vld [vmem:[#allocation6 + $0x1e4] ss:$16 sps:$4 sm:$0xff]   ;;  %v14646_v36 = vld [vmem:[#allocation6 + $0x1ec] ss:$16 sps:$4 sm:$0xff]  }
 0x9b7   :  { %7902 = vmatpush1.bf16.msra.mxu0 %v14563_v10  ;;  %7943 = vmatpush1.bf16.msra.mxu1 %v14566_v11  ;;  %v14641_v10 = vld [vmem:[#allocation6 + $0x1e0] ss:$16 sps:$4 sm:$0xff]   ;;  %v14644_v11 = vld [vmem:[#allocation6 + $0x1e8] ss:$16 sps:$4 sm:$0xff]  }
 0x9b8   :  { %7903 = vmatprep.subr.bf16.mxu0 %v14571_v37  ;;  %7944 = vmatprep.subr.bf16.mxu1 %v14574_v12  ;;  %v12745_v37 = vcombine.low %v16145_v49, %v16153_v57  ;;  %v14649_v12 = vld [vmem:[#allocation6 + $0x404] ss:$16 sps:$4 sm:$0xff]   ;;  %v14655_v49 = vld [vmem:[#allocation6 + $0x420] ss:$16 sps:$4 sm:$0xff]   ;;  %v14658_v57 = vld [vmem:[#allocation6 + $0x428] ss:$16 sps:$4 sm:$0xff]  }
 0x9bb   :  { %7904 = vmatpush1.bf16.msra.mxu0 %v14569_v42  ;;  %7945 = vmatpush1.bf16.msra.mxu1 %v14572_v38  ;;  %v14652_v42 = vld [vmem:[#allocation6 + $0x40c] ss:$16 sps:$4 sm:$0xff]  }
 0x9bc   :  { %7905 = vmatprep.subr.bf16.mxu0 %v14577_v39  ;;  %7946 = vmatprep.subr.bf16.mxu1 %v14580_v14  ;;  %v16159_v38 = vld [vmem:[#allocation3 + $0x8] sm:$0xcc]  ;;  %v14647_v14 = vld [vmem:[#allocation6 + $0x400] ss:$16 sps:$4 sm:$0xff]  }
 0x9bd   :  { %v12812_v39 = vcombine.high %v16159_v38, %v16147_v18 }
 0x9bf   :  { %7906 = vmatpush1.bf16.msra.mxu0 %v14575_v15  ;;  %7947 = vmatpush1.bf16.msra.mxu1 %v14578_v16  ;;  %v7573_v15 = vrot.slane %v12745_v37, 1  ;;  %v14650_v16 = vld [vmem:[#allocation6 + $0x408] ss:$16 sps:$4 sm:$0xff]   ;;  %v14726_v37 = vld [vmem:[#allocation6 + $0x58c] ss:$16 sps:$4 sm:$0xff]  }
 0x9c0   :  { %7907 = vmatprep.subr.bf16.mxu0 %v14583_v13  ;;  %7948 = vmatprep.subr.bf16.mxu1 %v14586_v17  ;;  %v8050_v13 = vrot.slane %v12812_v39, 2  ;;  %v14657_v17 = vld [vmem:[#allocation6 + $0x424] ss:$16 sps:$4 sm:$0xff]  }
 0x9c1   :  { %v14729_v39 = vld [vmem:[#allocation6 + $0x5a4] ss:$16 sps:$4 sm:$0xff]  }
 0x9c3   :  { %7908 = vmatpush1.bf16.msra.mxu0 %v14581_v0  ;;  %7949 = vmatpush1.bf16.msra.mxu1 %v14584_v19  ;;  %v14660_v0 = vld [vmem:[#allocation6 + $0x42c] ss:$16 sps:$4 sm:$0xff]   ;;  %v14663_v19 = vld [vmem:[#allocation6 + $0x444] ss:$16 sps:$4 sm:$0xff]  }
 0x9c4   :  { %7909 = vmatprep.subr.bf16.mxu0 %v14589_v41  ;;  %7950 = vmatprep.subr.bf16.mxu1 %v14592_v52  ;;  %v14666_v41 = vld [vmem:[#allocation6 + $0x44c] ss:$16 sps:$4 sm:$0xff]   ;;  %v14661_v52 = vld [vmem:[#allocation6 + $0x440] ss:$16 sps:$4 sm:$0xff]  }
 0x9c7   :  { %7910 = vmatpush1.bf16.msra.mxu0 %v14587_v20  ;;  %7951 = vmatpush1.bf16.msra.mxu1 %v14590_v22  ;;  %v14664_v20 = vld [vmem:[#allocation6 + $0x448] ss:$16 sps:$4 sm:$0xff]   ;;  %v14669_v22 = vld [vmem:[#allocation6 + $0x464] ss:$16 sps:$4 sm:$0xff]  }
 0x9c8   :  { %7911 = vmatprep.subr.bf16.mxu0 %v14595_v23  ;;  %7952 = vmatprep.subr.bf16.mxu1 %v14598_v24  ;;  %v14672_v23 = vld [vmem:[#allocation6 + $0x46c] ss:$16 sps:$4 sm:$0xff]   ;;  %v14667_v24 = vld [vmem:[#allocation6 + $0x460] ss:$16 sps:$4 sm:$0xff]  }
 0x9cb   :  { %7912 = vmatpush1.bf16.msra.mxu0 %v14593_v29  ;;  %7953 = vmatpush1.bf16.msra.mxu1 %v14596_v30  ;;  %v14670_v29 = vld [vmem:[#allocation6 + $0x468] ss:$16 sps:$4 sm:$0xff]   ;;  %v14675_v30 = vld [vmem:[#allocation6 + $0x484] ss:$16 sps:$4 sm:$0xff]  }
 0x9cc   :  { %7913 = vmatprep.subr.bf16.mxu0 %v14601_v7  ;;  %7954 = vmatprep.subr.bf16.mxu1 %v14604_v34  ;;  %v14678_v7 = vld [vmem:[#allocation6 + $0x48c] ss:$16 sps:$4 sm:$0xff]   ;;  %v14673_v34 = vld [vmem:[#allocation6 + $0x480] ss:$16 sps:$4 sm:$0xff]  }
 0x9cf   :  { %7914 = vmatpush1.bf16.msra.mxu0 %v14599_v43  ;;  %7955 = vmatpush1.bf16.msra.mxu1 %v14602_v44  ;;  %v14676_v43 = vld [vmem:[#allocation6 + $0x488] ss:$16 sps:$4 sm:$0xff]   ;;  %v14681_v44 = vld [vmem:[#allocation6 + $0x4a4] ss:$16 sps:$4 sm:$0xff]  }
 0x9d0   :  { %7915 = vmatprep.subr.bf16.mxu0 %v14607_v45  ;;  %7956 = vmatprep.subr.bf16.mxu1 %v14610_v46  ;;  %v14684_v45 = vld [vmem:[#allocation6 + $0x4ac] ss:$16 sps:$4 sm:$0xff]   ;;  %v14679_v46 = vld [vmem:[#allocation6 + $0x4a0] ss:$16 sps:$4 sm:$0xff]  }
 0x9d3   :  { %7916 = vmatpush1.bf16.msra.mxu0 %v14605_v47  ;;  %7957 = vmatpush1.bf16.msra.mxu1 %v14608_v48  ;;  %v14682_v47 = vld [vmem:[#allocation6 + $0x4a8] ss:$16 sps:$4 sm:$0xff]   ;;  %v14687_v48 = vld [vmem:[#allocation6 + $0x4c4] ss:$16 sps:$4 sm:$0xff]  }
 0x9d4   :  { %7917 = vmatprep.subr.bf16.mxu0 %v14613_v50  ;;  %7958 = vmatprep.subr.bf16.mxu1 %v14616_v51  ;;  %v14690_v50 = vld [vmem:[#allocation6 + $0x4cc] ss:$16 sps:$4 sm:$0xff]   ;;  %v14685_v51 = vld [vmem:[#allocation6 + $0x4c0] ss:$16 sps:$4 sm:$0xff]  }
 0x9d7   :  { %7918 = vmatpush1.bf16.msra.mxu0 %v14611_v53  ;;  %7959 = vmatpush1.bf16.msra.mxu1 %v14614_v54  ;;  %v14688_v53 = vld [vmem:[#allocation6 + $0x4c8] ss:$16 sps:$4 sm:$0xff]   ;;  %v14693_v54 = vld [vmem:[#allocation6 + $0x4e4] ss:$16 sps:$4 sm:$0xff]  }
 0x9d8   :  { %7919 = vmatprep.subr.bf16.mxu0 %v14619_v55  ;;  %7960 = vmatprep.subr.bf16.mxu1 %v14622_v56  ;;  %v14696_v55 = vld [vmem:[#allocation6 + $0x4ec] ss:$16 sps:$4 sm:$0xff]   ;;  %v14691_v56 = vld [vmem:[#allocation6 + $0x4e0] ss:$16 sps:$4 sm:$0xff]  }
 0x9db   :  { %7920 = vmatpush1.bf16.msra.mxu0 %v14617_v58  ;;  %7961 = vmatpush1.bf16.msra.mxu1 %v14620_v60  ;;  %v14694_v58 = vld [vmem:[#allocation6 + $0x4e8] ss:$16 sps:$4 sm:$0xff]   ;;  %v14699_v60 = vld [vmem:[#allocation6 + $0x504] ss:$16 sps:$4 sm:$0xff]  }
 0x9dc   :  { %7921 = vmatprep.subr.bf16.mxu0 %v14625_v61  ;;  %7962 = vmatprep.subr.bf16.mxu1 %v14628_v62  ;;  %v14702_v61 = vld [vmem:[#allocation6 + $0x50c] ss:$16 sps:$4 sm:$0xff]   ;;  %v14697_v62 = vld [vmem:[#allocation6 + $0x500] ss:$16 sps:$4 sm:$0xff]  }
 0x9df   :  { %7922 = vmatpush1.bf16.msra.mxu0 %v14623_v63  ;;  %7963 = vmatpush1.bf16.msra.mxu1 %v14626_v2  ;;  %v14700_v63 = vld [vmem:[#allocation6 + $0x508] ss:$16 sps:$4 sm:$0xff]   ;;  %v14705_v2 = vld [vmem:[#allocation6 + $0x524] ss:$16 sps:$4 sm:$0xff]  }
 0x9e0   :  { %7923 = vmatprep.subr.bf16.mxu0 %v14631_v3  ;;  %7964 = vmatprep.subr.bf16.mxu1 %v14634_v35  ;;  %v14708_v3 = vld [vmem:[#allocation6 + $0x52c] ss:$16 sps:$4 sm:$0xff]   ;;  %v14703_v35 = vld [vmem:[#allocation6 + $0x520] ss:$16 sps:$4 sm:$0xff]  }
 0x9e3   :  { %7924 = vmatpush1.bf16.msra.mxu0 %v14629_v4  ;;  %7965 = vmatpush1.bf16.msra.mxu1 %v14632_v31  ;;  %v14706_v4 = vld [vmem:[#allocation6 + $0x528] ss:$16 sps:$4 sm:$0xff]   ;;  %v14711_v31 = vld [vmem:[#allocation6 + $0x544] ss:$16 sps:$4 sm:$0xff]  }
 0x9e4   :  { %7925 = vmatprep.subr.bf16.mxu0 %v14637_v5  ;;  %7966 = vmatprep.subr.bf16.mxu1 %v14640_v6  ;;  %v14714_v5 = vld [vmem:[#allocation6 + $0x54c] ss:$16 sps:$4 sm:$0xff]   ;;  %v14709_v6 = vld [vmem:[#allocation6 + $0x540] ss:$16 sps:$4 sm:$0xff]  }
 0x9e7   :  { %7926 = vmatpush1.bf16.msra.mxu0 %v14635_v59  ;;  %7967 = vmatpush1.bf16.msra.mxu1 %v14638_v32  ;;  %v14712_v59 = vld [vmem:[#allocation6 + $0x548] ss:$16 sps:$4 sm:$0xff]   ;;  %v14717_v32 = vld [vmem:[#allocation6 + $0x564] ss:$16 sps:$4 sm:$0xff]  }
 0x9e8   :  { %7927 = vmatprep.subr.bf16.mxu0 %v14643_v9  ;;  %7968 = vmatprep.subr.bf16.mxu1 %v14646_v36  ;;  %v14720_v9 = vld [vmem:[#allocation6 + $0x56c] ss:$16 sps:$4 sm:$0xff]   ;;  %v14715_v36 = vld [vmem:[#allocation6 + $0x560] ss:$16 sps:$4 sm:$0xff]  }
 0x9eb   :  { %7928 = vmatpush1.bf16.msra.mxu0 %v14641_v10  ;;  %7969 = vmatpush1.bf16.msra.mxu1 %v14644_v11  ;;  %v14718_v10 = vld [vmem:[#allocation6 + $0x568] ss:$16 sps:$4 sm:$0xff]   ;;  %v14723_v11 = vld [vmem:[#allocation6 + $0x584] ss:$16 sps:$4 sm:$0xff]  }
 0x9ec   :  { %8373 = vmatprep.subr.bf16.mxu0 %v14649_v12  ;;  %8414 = vmatprep.subr.bf16.mxu1 %v14652_v42  ;;  %v14721_v12 = vld [vmem:[#allocation6 + $0x580] ss:$16 sps:$4 sm:$0xff]   ;;  %v14724_v42 = vld [vmem:[#allocation6 + $0x588] ss:$16 sps:$4 sm:$0xff]  }
 0x9ee   :  { %7930 = vmatmul.mubr.bf16.vlgmr.msra.gmra.mrb[60].mxu0 %v7573_v15  ;;  %7971 = vmatmul.mubr.bf16.vlgmr.msra.gmra.mrb[64].mxu1 %v7573_v15  ;;  %v14727_v15 = vld [vmem:[#allocation6 + $0x5a0] ss:$16 sps:$4 sm:$0xff]  }
 0x9ef   :  { %8374 = vmatpush1.bf16.msra.mxu0 %v14647_v14  ;;  %8405 = vmatprep.mubr.bf16.mxu0 %v8050_v13  ;;  %v14732_v14 = vld [vmem:[#allocation6 + $0x5ac] ss:$16 sps:$4 sm:$0xff]  }
 0x9f0   :  { %8415 = vmatpush1.bf16.msra.mxu1 %v14650_v16  ;;  %8446 = vmatprep.mubr.bf16.mxu1 %v8050_v13  ;;  %v14730_v16 = vld [vmem:[#allocation6 + $0x5a8] ss:$16 sps:$4 sm:$0xff]   ;;  %v14735_v13 = vld [vmem:[#allocation6 + $0x5c4] ss:$16 sps:$4 sm:$0xff]  }
 0x9f1   :  { %8375 = vmatprep.subr.bf16.mxu0 %v14657_v17  ;;  %8416 = vmatprep.subr.bf16.mxu1 %v14660_v0  ;;  %v14738_v17 = vld [vmem:[#allocation6 + $0x5cc] ss:$16 sps:$4 sm:$0xff]   ;;  %v14733_v0 = vld [vmem:[#allocation6 + $0x5c0] ss:$16 sps:$4 sm:$0xff]  }
 0x9f3   :  { %8376 = vmatpush1.bf16.msra.mxu0 %v14655_v49  ;;  %v14736_v49 = vld [vmem:[#allocation6 + $0x5c8] ss:$16 sps:$4 sm:$0xff]  }
 0x9f4   :  { %8417 = vmatpush1.bf16.msra.mxu1 %v14658_v57  ;;  %8377 = vmatprep.subr.bf16.mxu0 %v14663_v19  ;;  %v14741_v57 = vld [vmem:[#allocation6 + $0x5e4] ss:$16 sps:$4 sm:$0xff]   ;;  %v14744_v19 = vld [vmem:[#allocation6 + $0x5ec] ss:$16 sps:$4 sm:$0xff]  }
 0x9f5   :  { %8418 = vmatprep.subr.bf16.mxu1 %v14666_v41  ;;  %v14739_v41 = vld [vmem:[#allocation6 + $0x5e0] ss:$16 sps:$4 sm:$0xff]  }
 0x9f7   :  { %8378 = vmatpush1.bf16.msra.mxu0 %v14661_v52  ;;  %v12811_v52 = vcombine.low %v16159_v38, %v16147_v18 }
 0x9f8   :  { %8419 = vmatpush1.bf16.msra.mxu1 %v14664_v20  ;;  %8379 = vmatprep.subr.bf16.mxu0 %v14669_v22  ;;  %v14742_v20 = vld [vmem:[#allocation6 + $0x5e8] ss:$16 sps:$4 sm:$0xff]  }
 0x9f9   :  { %8420 = vmatprep.subr.bf16.mxu1 %v14672_v23  ;;  %v8049_v22 = vrot.slane %v12811_v52, 2  ;;  %v14759_v52 = vld [vmem:[#allocation9 + $0x24] ss:$8 sps:$4 sm:$0xff]  }
 0x9fb   :  { %8380 = vmatpush1.bf16.msra.mxu0 %v14667_v24 }
 0x9fc   :  { %8421 = vmatpush1.bf16.msra.mxu1 %v14670_v29  ;;  %8381 = vmatprep.subr.bf16.mxu0 %v14675_v30 }
 0x9fd   :  { %8422 = vmatprep.subr.bf16.mxu1 %v14678_v7 }
 0x9ff   :  { %8382 = vmatpush1.bf16.msra.mxu0 %v14673_v34 }
 0xa00   :  { %8423 = vmatpush1.bf16.msra.mxu1 %v14676_v43  ;;  %8383 = vmatprep.subr.bf16.mxu0 %v14681_v44 }
 0xa01   :  { %8424 = vmatprep.subr.bf16.mxu1 %v14684_v45 }
 0xa03   :  { %8384 = vmatpush1.bf16.msra.mxu0 %v14679_v46 }
 0xa04   :  { %8425 = vmatpush1.bf16.msra.mxu1 %v14682_v47  ;;  %8385 = vmatprep.subr.bf16.mxu0 %v14687_v48 }
 0xa05   :  { %8426 = vmatprep.subr.bf16.mxu1 %v14690_v50 }
 0xa07   :  { %8386 = vmatpush1.bf16.msra.mxu0 %v14685_v51 }
 0xa08   :  { %8427 = vmatpush1.bf16.msra.mxu1 %v14688_v53  ;;  %8387 = vmatprep.subr.bf16.mxu0 %v14693_v54 }
 0xa09   :  { %8428 = vmatprep.subr.bf16.mxu1 %v14696_v55 }
 0xa0b   :  { %8388 = vmatpush1.bf16.msra.mxu0 %v14691_v56 }
 0xa0c   :  { %8429 = vmatpush1.bf16.msra.mxu1 %v14694_v58  ;;  %8389 = vmatprep.subr.bf16.mxu0 %v14699_v60  ;;  %v8459_v58 = vld [vmem:[%s16248_s4] sm:$0xf] }
 0xa0d   :  { %8430 = vmatprep.subr.bf16.mxu1 %v14702_v61  ;;  %v8464_v60 = vrot.slane %v8459_v58, %v15757_v25 }
 0xa0f   :  { %8390 = vmatpush1.bf16.msra.mxu0 %v14697_v62  ;;  %v8472_v62 = vrot.slane %v8459_v58, %v15759_v26 }
 0xa10   :  { %8431 = vmatpush1.bf16.msra.mxu1 %v14700_v63  ;;  %8391 = vmatprep.subr.bf16.mxu0 %v14705_v2  ;;  %v8468_v63 = vrot.slane %v8459_v58, %v15761_v27 }
 0xa11   :  { %8432 = vmatprep.subr.bf16.mxu1 %v14708_v3 }
 0xa13   :  { %8392 = vmatpush1.bf16.msra.mxu0 %v14703_v35 }
 0xa14   :  { %8433 = vmatpush1.bf16.msra.mxu1 %v14706_v4  ;;  %8393 = vmatprep.subr.bf16.mxu0 %v14711_v31  ;;  %v8476_v4 = vrot.slane %v8459_v58, %v15763_v28  ;;  %v14795_v58 = vld [vmem:[#allocation9 + $0x84] ss:$8 sps:$4 sm:$0xff]  }
 0xa15   :  { %8434 = vmatprep.subr.bf16.mxu1 %v14714_v5 }
 0xa17   :  { %8394 = vmatpush1.bf16.msra.mxu0 %v14709_v6 }
 0xa18   :  { %8435 = vmatpush1.bf16.msra.mxu1 %v14712_v59  ;;  %8395 = vmatprep.subr.bf16.mxu0 %v14717_v32 }
 0xa19   :  { %8436 = vmatprep.subr.bf16.mxu1 %v14720_v9 }
 0xa1b   :  { %8396 = vmatpush1.bf16.msra.mxu0 %v14715_v36 }
 0xa1c   :  { %8437 = vmatpush1.bf16.msra.mxu1 %v14718_v10  ;;  %8397 = vmatprep.subr.bf16.mxu0 %v14723_v11 }
 0xa1d   :  { %8438 = vmatprep.subr.bf16.mxu1 %v14726_v37 }
 0xa1f   :  { %8398 = vmatpush1.bf16.msra.mxu0 %v14721_v12 }
 0xa20   :  { %8439 = vmatpush1.bf16.msra.mxu1 %v14724_v42  ;;  %8399 = vmatprep.subr.bf16.mxu0 %v14729_v39 }
 0xa21   :  { %8440 = vmatprep.subr.bf16.mxu1 %v14732_v14 }
 0xa23   :  { %8400 = vmatpush1.bf16.msra.mxu0 %v14727_v15 }
 0xa24   :  { %8441 = vmatpush1.bf16.msra.mxu1 %v14730_v16  ;;  %8401 = vmatprep.subr.bf16.mxu0 %v14735_v13  ;;  %v14747_v13 = vld [vmem:[#allocation9 + $0x4] ss:$8 sps:$4 sm:$0xff]  }
 0xa25   :  { %8442 = vmatprep.subr.bf16.mxu1 %v14738_v17  ;;  %v14745_v17 = vld [vmem:[#allocation9] ss:$8 sps:$4 sm:$0xff]  }
 0xa27   :  { %8402 = vmatpush1.bf16.msra.mxu0 %v14733_v0  ;;  %v14750_v0 = vld [vmem:[#allocation9 + $0x104] ss:$8 sps:$4 sm:$0xff]  }
 0xa28   :  { %8443 = vmatpush1.bf16.msra.mxu1 %v14736_v49  ;;  %8403 = vmatprep.subr.bf16.mxu0 %v14741_v57  ;;  %v14748_v49 = vld [vmem:[#allocation9 + $0x100] ss:$8 sps:$4 sm:$0xff]   ;;  %v14753_v57 = vld [vmem:[#allocation9 + $0x14] ss:$8 sps:$4 sm:$0xff]  }
 0xa29   :  { %8444 = vmatprep.subr.bf16.mxu1 %v14744_v19  ;;  %v14756_v19 = vld [vmem:[#allocation9 + $0x114] ss:$8 sps:$4 sm:$0xff]  }
 0xa2b   :  { %8404 = vmatpush1.bf16.msra.mxu0 %v14739_v41  ;;  %v14754_v41 = vld [vmem:[#allocation9 + $0x110] ss:$8 sps:$4 sm:$0xff]  }
 0xa2c   :  { %8445 = vmatpush1.bf16.msra.mxu1 %v14742_v20  ;;  %v14762_v20 = vld [vmem:[#allocation9 + $0x124] ss:$8 sps:$4 sm:$0xff]  }
 0xa2e   :  { %8406 = vmatmul.mubr.bf16.vlgmr.msra.gmra.mrb[64].mxu0 %v8049_v22 }
 0xa2f   :  { %8447 = vmatmul.mubr.bf16.vlgmr.msra.gmra.mrb[68].mxu1 %v8049_v22  ;;  %8553 = vmatprep.mubr.f32.mxu0 %v15441_v21  ;;  %v14757_v22 = vld [vmem:[#allocation9 + $0x20] ss:$8 sps:$4 sm:$0xff]  }
 0xa30   :  { %8624 = vmatprep.mubr.f32.mxu1 %v15441_v21 }
 0xa81   :  { %v7520_v23 = vpop.f32.mrb[56].mxu0  ;;  %v7561_v24 = vpop.f32.mrb[60].mxu1 }
 0xa82   :  { %v7522_v29 = vpop.f32.mrb[57].mxu0  ;;  %v7563_v30 = vpop.f32.mrb[61].mxu1 }
 0xa83   :  { %v7524_v7 = vpop.f32.mrb[58].mxu0  ;;  %v7565_v34 = vpop.f32.mrb[62].mxu1 }
 0xa84   :  { %v7525_v18 = vpop.f32.mrb[59].mxu0  ;;  %v7566_v38 = vpop.f32.mrb[63].mxu1  ;;  %v14774_v7 = vld [vmem:[#allocation9 + $0x144] ss:$8 sps:$4 sm:$0xff]   ;;  %v14769_v34 = vld [vmem:[#allocation9 + $0x40] ss:$8 sps:$4 sm:$0xff]  }
 0xa85   :  { %v14772_v18 = vld [vmem:[#allocation9 + $0x140] ss:$8 sps:$4 sm:$0xff]   ;;  %v14777_v38 = vld [vmem:[#allocation9 + $0x54] ss:$8 sps:$4 sm:$0xff]  }
 0xac1   :  { %v7931_v43 = vpop.f32.mrb[60].mxu0  ;;  %v7972_v44 = vpop.f32.mrb[64].mxu1 }
 0xac2   :  { %v7932_v45 = vadd.f32 %v7931_v43, %v7520_v23  ;;  %v7973_v46 = vadd.f32 %v7972_v44, %v7561_v24  ;;  %v7933_v47 = vpop.f32.mrb[61].mxu0  ;;  %v7974_v48 = vpop.f32.mrb[65].mxu1  ;;  %v14765_v23 = vld [vmem:[#allocation9 + $0x34] ss:$8 sps:$4 sm:$0xff]   ;;  %v14775_v44 = vld [vmem:[#allocation9 + $0x50] ss:$8 sps:$4 sm:$0xff]  }
 0xac3   :  { %v7934_v50 = vadd.f32 %v7933_v47, %v7522_v29  ;;  %v7975_v51 = vadd.f32 %v7974_v48, %v7563_v30  ;;  %v7935_v53 = vpop.f32.mrb[62].mxu0  ;;  %v7976_v54 = vpop.f32.mrb[66].mxu1  ;;  %v14768_v24 = vld [vmem:[#allocation9 + $0x134] ss:$8 sps:$4 sm:$0xff]   ;;  %v14766_v29 = vld [vmem:[#allocation9 + $0x130] ss:$8 sps:$4 sm:$0xff]  }
 0xac4   :  { %v7936_v55 = vpop.f32.mrb[63].mxu0  ;;  %v7977_v56 = vpop.f32.mrb[67].mxu1  ;;  %v14771_v30 = vld [vmem:[#allocation9 + $0x44] ss:$8 sps:$4 sm:$0xff]   ;;  %v14780_v43 = vld [vmem:[#allocation9 + $0x154] ss:$8 sps:$4 sm:$0xff]  }
 0xac5   :  { %v14786_v47 = vld [vmem:[#allocation9 + $0x164] ss:$8 sps:$4 sm:$0xff]   ;;  %v14781_v48 = vld [vmem:[#allocation9 + $0x60] ss:$8 sps:$4 sm:$0xff]   ;;  %v14792_v53 = vld [vmem:[#allocation9 + $0x174] ss:$8 sps:$4 sm:$0xff]  }
 0xac6   :  { %v14787_v54 = vld [vmem:[#allocation9 + $0x70] ss:$8 sps:$4 sm:$0xff]   ;;  %v14793_v56 = vld [vmem:[#allocation9 + $0x80] ss:$8 sps:$4 sm:$0xff]  }
 0xac7   :  { %v14790_v55 = vld [vmem:[#allocation9 + $0x170] ss:$8 sps:$4 sm:$0xff]  }
 0xb01   :  { %v8407_v61 = vpop.f32.mrb[64].mxu0 }
 0xb02   :  { %v8455_v2 = vadd.f32 %v8407_v61, %v7932_v45  ;;  %v8448_v3 = vpop.f32.mrb[68].mxu1  ;;  %v8409_v35 = vpop.f32.mrb[65].mxu0  ;;  %v14778_v45 = vld [vmem:[#allocation9 + $0x150] ss:$8 sps:$4 sm:$0xff]   ;;  %v14796_v61 = vld [vmem:[#allocation9 + $0x180] ss:$8 sps:$4 sm:$0xff]  }
 0xb03   :  { %v8457_v31 = vadd.f32 %v8448_v3, %v7973_v46  ;;  %v8456_v5 = vadd.f32 %v8409_v35, %v7934_v50  ;;  %v8450_v6 = vpop.f32.mrb[69].mxu1  ;;  %v8411_v59 = vpop.f32.mrb[66].mxu0  ;;  %v14783_v46 = vld [vmem:[#allocation9 + $0x64] ss:$8 sps:$4 sm:$0xff]   ;;  %v14784_v50 = vld [vmem:[#allocation9 + $0x160] ss:$8 sps:$4 sm:$0xff]  }
 0xb04   :  { %v8481_v32 = vadd.f32 %v8464_v60, %v8455_v2  ;;  %v8458_v9 = vadd.f32 %v8450_v6, %v7975_v51  ;;  %v8452_v36 = vpop.f32.mrb[70].mxu1  ;;  %v8412_v10 = vpop.f32.mrb[67].mxu0  ;;  %v14789_v51 = vld [vmem:[#allocation9 + $0x74] ss:$8 sps:$4 sm:$0xff]   ;;  %v14798_v60 = vld [vmem:[#allocation9 + $0x184] ss:$8 sps:$4 sm:$0xff]  }
 0xb05   :  { %v8483_v11 = vadd.f32 %v8472_v62, %v8457_v31  ;;  %v8482_v37 = vadd.f32 %v8468_v63, %v8456_v5  ;;  %v8453_v12 = vpop.f32.mrb[71].mxu1  ;;  %v14801_v62 = vld [vmem:[#allocation9 + $0x94] ss:$8 sps:$4 sm:$0xff]   ;;  %v14799_v63 = vld [vmem:[#allocation9 + $0x90] ss:$8 sps:$4 sm:$0xff]  }
 0xb06   :  { %v8484_v42 = vadd.f32 %v8476_v4, %v8458_v9  ;;  %v8485_v14 = vmax.f32 %v8481_v32, 0.0  ;;  %v14804_v2 = vld [vmem:[#allocation9 + $0x194] ss:$8 sps:$4 sm:$0xff]   ;;  %v14802_v3 = vld [vmem:[#allocation9 + $0x190] ss:$8 sps:$4 sm:$0xff]  }
 0xb07   :  { %v8486_v39 = vmax.f32 %v8482_v37, 0.0  ;;  %v8487_v16 = vmax.f32 %v8483_v11, 0.0  ;;  %v14807_v35 = vld [vmem:[#allocation9 + $0xa4] ss:$8 sps:$4 sm:$0xff]   ;;  %v14805_v4 = vld [vmem:[#allocation9 + $0xa0] ss:$8 sps:$4 sm:$0xff]  }
 0xb08   :  { %v8488_v15 = vmax.f32 %v8484_v42, 0.0  ;;  %v14810_v31 = vld [vmem:[#allocation9 + $0x1a4] ss:$8 sps:$4 sm:$0xff]   ;;  %v14808_v5 = vld [vmem:[#allocation9 + $0x1a0] ss:$8 sps:$4 sm:$0xff]  }
 0xb09   :  { %8489 = vmatprep.subr.mxu0 %v8486_v39  ;;  %v14813_v6 = vld [vmem:[#allocation9 + $0xb4] ss:$8 sps:$4 sm:$0xff]   ;;  %v14811_v59 = vld [vmem:[#allocation9 + $0xb0] ss:$8 sps:$4 sm:$0xff]   ;;  %v14819_v36 = vld [vmem:[#allocation9 + $0xc4] ss:$8 sps:$4 sm:$0xff]  }
 0xb0a   :  { %8560 = vmatprep.subr.mxu1 %v8488_v15  ;;  %8490 = vmatpush1.msra.mxu0 %v8485_v14  ;;  %v14816_v32 = vld [vmem:[#allocation9 + $0x1b4] ss:$8 sps:$4 sm:$0xff]   ;;  %v14814_v9 = vld [vmem:[#allocation9 + $0x1b0] ss:$8 sps:$4 sm:$0xff]   ;;  %v14817_v10 = vld [vmem:[#allocation9 + $0xc0] ss:$8 sps:$4 sm:$0xff]  }
 0xb0b   :  { %8561 = vmatpush1.msra.mxu1 %v8487_v16  ;;  %12877 = vmatmul.mubr.msk.f32.vlgmr.msra.gmra.mrb[68].mxu0 %vm2603_vm1, %v15770_v1  ;;  %v14822_v11 = vld [vmem:[#allocation9 + $0x1c4] ss:$8 sps:$4 sm:$0xff]   ;;  %v14820_v37 = vld [vmem:[#allocation9 + $0x1c0] ss:$8 sps:$4 sm:$0xff]   ;;  %v14823_v12 = vld [vmem:[#allocation9 + $0xd0] ss:$8 sps:$4 sm:$0xff]  }
 0xb0c   :  { %12878 = vmatmul.mubr.msk.f32.vlgmr.msra.gmra.mrb[72].mxu1 %vm2603_vm1, %v15770_v1  ;;  %8631 = vmatprep.subr.mxu0 %v8486_v39  ;;  %v14751_v1 = vld [vmem:[#allocation9 + $0x10] ss:$8 sps:$4 sm:$0xff]   ;;  %v14825_v42 = vld [vmem:[#allocation9 + $0xd4] ss:$8 sps:$4 sm:$0xff]  }
 0xb0d   :  { %8702 = vmatprep.subr.mxu1 %v8488_v15  ;;  %8632 = vmatpush1.msra.mxu0 %v8485_v14  ;;  %v14828_v39 = vld [vmem:[#allocation9 + $0x1d4] ss:$8 sps:$4 sm:$0xff]   ;;  %v14826_v14 = vld [vmem:[#allocation9 + $0x1d0] ss:$8 sps:$4 sm:$0xff]   ;;  %v14831_v15 = vld [vmem:[#allocation9 + $0xe4] ss:$8 sps:$4 sm:$0xff]  }
 0xb0e   :  { %8703 = vmatpush1.msra.mxu1 %v8487_v16  ;;  %8695 = vmatprep.mubr.f32.mxu0 %v15441_v21  ;;  %v14834_v16 = vld [vmem:[#allocation9 + $0x1e4] ss:$8 sps:$4 sm:$0xff]  }
 0xb0f   :  { %8766 = vmatprep.mubr.f32.mxu1 %v15441_v21  ;;  %12879 = vmatmul.mubr.msk.f32.vlgmr.msra.gmra.mrb[70].mxu0 %vm2603_vm1, %v15777_v8  ;;  %v14760_v21 = vld [vmem:[#allocation9 + $0x120] ss:$8 sps:$4 sm:$0xff]  }
 0xb10   :  { %12880 = vmatmul.mubr.msk.f32.vlgmr.msra.gmra.mrb[74].mxu1 %vm2603_vm1, %v15777_v8  ;;  %9273 = vmatprep.subr.bf16.mxu1 %v14747_v13  ;;  %v14763_v8 = vld [vmem:[#allocation9 + $0x30] ss:$8 sps:$4 sm:$0xff]   ;;  %v14829_v13 = vld [vmem:[#allocation9 + $0xe0] ss:$8 sps:$4 sm:$0xff]   ;;  %vm8797_vm1 = vcmask 1043459  }
 0xb11   :  { %9274 = vmatpush1.bf16.msra.mxu1 %v14745_v17  ;;  %9063 = vmatprep.subr.bf16.mxu0 %v14750_v0  ;;  %v14837_v17 = vld [vmem:[#allocation9 + $0xf4] ss:$8 sps:$4 sm:$0xff]   ;;  %v14832_v0 = vld [vmem:[#allocation9 + $0x1e0] ss:$8 sps:$4 sm:$0xff]   ;;  %vm8799_vm5 = vmand %vm8797_vm1, %vm8798_vm6 }
 0xb12   :  { %9064 = vmatpush1.bf16.msra.mxu0 %v14748_v49  ;;  %9275 = vmatprep.subr.bf16.mxu1 %v14753_v57  ;;  %v14840_v49 = vld [vmem:[#allocation9 + $0x1f4] ss:$8 sps:$4 sm:$0xff]   ;;  %v14835_v57 = vld [vmem:[#allocation9 + $0xf0] ss:$8 sps:$4 sm:$0xff]   ;;  %vm8803_vm8 = vmor %vm8802_vm7, %vm8799_vm5 }
 0xb13   :  { %9065 = vmatprep.subr.bf16.mxu0 %v14756_v19  ;;  %v14838_v19 = vld [vmem:[#allocation9 + $0x1f0] ss:$8 sps:$4 sm:$0xff]  }
 0xb15   :  { %9276 = vmatpush1.bf16.msra.mxu1 %v14751_v1  ;;  %v14846_v1 = vld [vmem:[#allocation9 + $0x204] ss:$8 sps:$4 sm:$0xff]  }
 0xb16   :  { %9066 = vmatpush1.bf16.msra.mxu0 %v14754_v41  ;;  %9277 = vmatprep.subr.bf16.mxu1 %v14759_v52 }
 0xb17   :  { %9067 = vmatprep.subr.bf16.mxu0 %v14762_v20 }
 0xb19   :  { %9278 = vmatpush1.bf16.msra.mxu1 %v14757_v22 }
 0xb1a   :  { %9068 = vmatpush1.bf16.msra.mxu0 %v14760_v21  ;;  %9279 = vmatprep.subr.bf16.mxu1 %v14765_v23 }
 0xb1b   :  { %9069 = vmatprep.subr.bf16.mxu0 %v14768_v24 }
 0xb1d   :  { %9280 = vmatpush1.bf16.msra.mxu1 %v14763_v8 }
 0xb1e   :  { %9070 = vmatpush1.bf16.msra.mxu0 %v14766_v29  ;;  %9281 = vmatprep.subr.bf16.mxu1 %v14771_v30 }
 0xb1f   :  { %9071 = vmatprep.subr.bf16.mxu0 %v14774_v7 }
 0xb21   :  { %9282 = vmatpush1.bf16.msra.mxu1 %v14769_v34 }
 0xb22   :  { %9072 = vmatpush1.bf16.msra.mxu0 %v14772_v18  ;;  %9283 = vmatprep.subr.bf16.mxu1 %v14777_v38 }
 0xb23   :  { %9073 = vmatprep.subr.bf16.mxu0 %v14780_v43 }
 0xb25   :  { %9284 = vmatpush1.bf16.msra.mxu1 %v14775_v44 }
 0xb26   :  { %9074 = vmatpush1.bf16.msra.mxu0 %v14778_v45  ;;  %9285 = vmatprep.subr.bf16.mxu1 %v14783_v46  ;;  %v8804_v46 = vld [vmem:[#allocation4] sm:$0x88] }
 0xb27   :  { %9075 = vmatprep.subr.bf16.mxu0 %v14786_v47 }
 0xb29   :  { %9286 = vmatpush1.bf16.msra.mxu1 %v14781_v48 }
 0xb2a   :  { %9076 = vmatpush1.bf16.msra.mxu0 %v14784_v50  ;;  %9287 = vmatprep.subr.bf16.mxu1 %v14789_v51 }
 0xb2b   :  { %9077 = vmatprep.subr.bf16.mxu0 %v14792_v53  ;;  %v8807_v53 = vld [vmem:[#allocation4 + $0x8] sm:$0x33] }
 0xb2d   :  { %9288 = vmatpush1.bf16.msra.mxu1 %v14787_v54 }
 0xb2e   :  { %9078 = vmatpush1.bf16.msra.mxu0 %v14790_v55  ;;  %9289 = vmatprep.subr.bf16.mxu1 %v14795_v58 }
 0xb2f   :  { %9079 = vmatprep.subr.bf16.mxu0 %v14798_v60 }
 0xb31   :  { %9290 = vmatpush1.bf16.msra.mxu1 %v14793_v56 }
 0xb32   :  { %9080 = vmatpush1.bf16.msra.mxu0 %v14796_v61  ;;  %9291 = vmatprep.subr.bf16.mxu1 %v14801_v62 }
 0xb33   :  { %9081 = vmatprep.subr.bf16.mxu0 %v14804_v2 }
 0xb35   :  { %9292 = vmatpush1.bf16.msra.mxu1 %v14799_v63 }
 0xb36   :  { %9082 = vmatpush1.bf16.msra.mxu0 %v14802_v3  ;;  %9293 = vmatprep.subr.bf16.mxu1 %v14807_v35 }
 0xb37   :  { %9083 = vmatprep.subr.bf16.mxu0 %v14810_v31 }
 0xb39   :  { %9294 = vmatpush1.bf16.msra.mxu1 %v14805_v4 }
 0xb3a   :  { %9084 = vmatpush1.bf16.msra.mxu0 %v14808_v5  ;;  %9295 = vmatprep.subr.bf16.mxu1 %v14813_v6 }
 0xb3b   :  { %9085 = vmatprep.subr.bf16.mxu0 %v14816_v32 }
 0xb3d   :  { %9296 = vmatpush1.bf16.msra.mxu1 %v14811_v59 }
 0xb3e   :  { %9086 = vmatpush1.bf16.msra.mxu0 %v14814_v9  ;;  %9297 = vmatprep.subr.bf16.mxu1 %v14819_v36  ;;  %v14844_v36 = vld [vmem:[#allocation9 + $0x200] ss:$8 sps:$4 sm:$0xff]  }
 0xb3f   :  { %9087 = vmatprep.subr.bf16.mxu0 %v14822_v11  ;;  %v14851_v11 = vld [vmem:[#allocation9 + $0x214] ss:$8 sps:$4 sm:$0xff]  }
 0xb41   :  { %9298 = vmatpush1.bf16.msra.mxu1 %v14817_v10 }
 0xb42   :  { %9088 = vmatpush1.bf16.msra.mxu0 %v14820_v37  ;;  %9299 = vmatprep.subr.bf16.mxu1 %v14825_v42  ;;  %v14854_v42 = vld [vmem:[#allocation9 + $0x224] ss:$8 sps:$4 sm:$0xff]  }
 0xb43   :  { %9089 = vmatprep.subr.bf16.mxu0 %v14828_v39  ;;  %v14852_v39 = vld [vmem:[#allocation9 + $0x220] ss:$8 sps:$4 sm:$0xff]  }
 0xb45   :  { %9300 = vmatpush1.bf16.msra.mxu1 %v14823_v12  ;;  %v14849_v12 = vld [vmem:[#allocation9 + $0x210] ss:$8 sps:$4 sm:$0xff]  }
 0xb46   :  { %9301 = vmatprep.subr.bf16.mxu1 %v14831_v15  ;;  %9090 = vmatpush1.bf16.msra.mxu0 %v14826_v14  ;;  %v14857_v14 = vld [vmem:[#allocation9 + $0x234] ss:$8 sps:$4 sm:$0xff]   ;;  %v14855_v15 = vld [vmem:[#allocation9 + $0x230] ss:$8 sps:$4 sm:$0xff]  }
 0xb47   :  { %9091 = vmatprep.subr.bf16.mxu0 %v14834_v16  ;;  %v14860_v16 = vld [vmem:[#allocation9 + $0x244] ss:$8 sps:$4 sm:$0xff]  }
 0xb49   :  { %9302 = vmatpush1.bf16.msra.mxu1 %v14829_v13  ;;  %v14858_v13 = vld [vmem:[#allocation9 + $0x240] ss:$8 sps:$4 sm:$0xff]  }
 0xb4a   :  { %9303 = vmatprep.subr.bf16.mxu1 %v14837_v17  ;;  %9092 = vmatpush1.bf16.msra.mxu0 %v14832_v0  ;;  %v14863_v17 = vld [vmem:[#allocation9 + $0x254] ss:$8 sps:$4 sm:$0xff]   ;;  %v14861_v0 = vld [vmem:[#allocation9 + $0x250] ss:$8 sps:$4 sm:$0xff]  }
 0xb4b   :  { %9093 = vmatprep.subr.bf16.mxu0 %v14840_v49  ;;  %v14866_v49 = vld [vmem:[#allocation9 + $0x264] ss:$8 sps:$4 sm:$0xff]  }
 0xb4d   :  { %9304 = vmatpush1.bf16.msra.mxu1 %v14835_v57  ;;  %v14864_v57 = vld [vmem:[#allocation9 + $0x260] ss:$8 sps:$4 sm:$0xff]  }
 0xb4e   :  { %9094 = vmatpush1.bf16.msra.mxu0 %v14838_v19  ;;  %v14869_v19 = vld [vmem:[#allocation9 + $0x274] ss:$8 sps:$4 sm:$0xff]  }
 0xb4f   :  { %9510 = vmatprep.subr.bf16.mxu0 %v14846_v1  ;;  %v14867_v1 = vld [vmem:[#allocation9 + $0x270] ss:$8 sps:$4 sm:$0xff]  }
 0xbde   :  { %v8555_v41 = vpop.f32.mrb[68].mxu0 }
 0xbdf   :  { %v8626_v52 = vpop.f32.mrb[72].mxu1  ;;  %v8557_v20 = vpop.f32.mrb[69].mxu0 }
 0xbe0   :  { %v8628_v22 = vpop.f32.mrb[73].mxu1 }
 0xbe2   :  { %v8697_v21 = vpop.f32.mrb[70].mxu0 }
 0xbe3   :  { %v8773_v23 = vmax.f32 %v8555_v41, %v8697_v21  ;;  %v8768_v24 = vpop.f32.mrb[74].mxu1  ;;  %v8699_v8 = vpop.f32.mrb[71].mxu0  ;;  %v14872_v41 = vld [vmem:[#allocation9 + $0x284] ss:$8 sps:$4 sm:$0xff]  }
 0xbe4   :  { %v8775_v29 = vmax.f32 %v8626_v52, %v8768_v24  ;;  %v8774_v30 = vmax.f32 %v8557_v20, %v8699_v8  ;;  %v8770_v7 = vpop.f32.mrb[75].mxu1  ;;  %v14870_v52 = vld [vmem:[#allocation9 + $0x280] ss:$8 sps:$4 sm:$0xff]   ;;  %v14875_v20 = vld [vmem:[#allocation9 + $0x294] ss:$8 sps:$4 sm:$0xff]  }
 0xbe5   :  { %v8776_v34 = vmax.f32 %v8628_v22, %v8770_v7  ;;  %v14873_v22 = vld [vmem:[#allocation9 + $0x290] ss:$8 sps:$4 sm:$0xff]   ;;  %v14878_v21 = vld [vmem:[#allocation9 + $0x2a4] ss:$8 sps:$4 sm:$0xff]   ;;  %v14881_v24 = vld [vmem:[#allocation9 + $0x2b4] ss:$8 sps:$4 sm:$0xff]  }
 0xbe6   :  { %v8777_v18 = vmax.f32 %v8773_v23, %v8775_v29  ;;  %v14876_v23 = vld [vmem:[#allocation9 + $0x2a0] ss:$8 sps:$4 sm:$0xff]   ;;  %v14879_v8 = vld [vmem:[#allocation9 + $0x2b0] ss:$8 sps:$4 sm:$0xff]   ;;  %v14884_v29 = vld [vmem:[#allocation9 + $0x2c4] ss:$8 sps:$4 sm:$0xff]  }
 0xbe7   :  { %v8778_v38 = vmax.f32 %v8774_v30, %v8776_v34  ;;  %v14882_v30 = vld [vmem:[#allocation9 + $0x2c0] ss:$8 sps:$4 sm:$0xff]   ;;  %v14887_v7 = vld [vmem:[#allocation9 + $0x2d4] ss:$8 sps:$4 sm:$0xff]   ;;  %v14885_v34 = vld [vmem:[#allocation9 + $0x2d0] ss:$8 sps:$4 sm:$0xff]  }
 0xbe9   :  { %v13279_v43 = vpack.c.bf16 %v8778_v38, %v8777_v18  ;;  %v14890_v18 = vld [vmem:[#allocation9 + $0x2e4] ss:$8 sps:$4 sm:$0xff]   ;;  %v14888_v38 = vld [vmem:[#allocation9 + $0x2e0] ss:$8 sps:$4 sm:$0xff]  }
 0xbeb   :  { %v8787_v44 = vshll.u32 %v13279_v43, 16  ;;  %v8790_v45 = vshrl.u32 %v13279_v43, 16  ;;  %v14893_v43 = vld [vmem:[#allocation9 + $0x2f4] ss:$8 sps:$4 sm:$0xff]  }
 0xbed   :  { %v8789_v47 = vrot.slane %v8787_v44, 5  ;;  %v8792_v48 = vrot.slane %v8790_v45, 4  ;;  %v14891_v44 = vld [vmem:[#allocation9 + $0x2f0] ss:$8 sps:$4 sm:$0xff]  }
 0xbef   :  { %v8793_v50 = vor.u32 %v8792_v48, %v8789_v47  ;;  %v8805_v51 = vsel %vm8803_vm8, %v8789_v47, %v8804_v46  ;;  %v14895_v46 = vld [vmem:[#allocation11 + $0x200] ss:$16 sps:$4 sm:$0xff]   ;;  %v14897_v47 = vld [vmem:[#allocation11 + $0x204] ss:$16 sps:$4 sm:$0xff]   ;;  %v14898_v48 = vld [vmem:[#allocation11 + $0x208] ss:$16 sps:$4 sm:$0xff]  }
 0xbf0   :  { %8806 = vst [vmem:[#allocation4] sm:$0x88] %v8805_v51  ;;  %v14903_v51 = vld [vmem:[#allocation11 + $0x224] ss:$16 sps:$4 sm:$0xff]   ;;  %10050 = vmatprep.subr.bf16.mxu1 %v14897_v47  ;;  %v14990_v47 = vld [vmem:[#allocation11 + $0x3ec] ss:$16 sps:$4 sm:$0xff]  }
 0xbf1   :  { %v8794_v54 = vrot.slane %v8793_v50, 4  ;;  %v14900_v50 = vld [vmem:[#allocation11 + $0x20c] ss:$16 sps:$4 sm:$0xff]  }
 0xbf3   :  { %v8808_v55 = vsel %vm7005_vm15, %v8794_v54, %v8807_v53  ;;  %v14906_v53 = vld [vmem:[#allocation11 + $0x22c] ss:$16 sps:$4 sm:$0xff]   ;;  %v14901_v54 = vld [vmem:[#allocation11 + $0x220] ss:$16 sps:$4 sm:$0xff]  }
 0xbf4   :  { %8809 = vst [vmem:[#allocation4 + $0x8] sm:$0x33] %v8808_v55  ;;  %v14904_v55 = vld [vmem:[#allocation11 + $0x228] ss:$16 sps:$4 sm:$0xff]  }
 0xbf7   :  { %v8810_v56 = vld [vmem:[#allocation4] sm:$0x88] }
 0xbfb   :  { %v8811_v58 = vld [vmem:[#allocation4 + $0x8] sm:$0x11] }
 0xbfc   :  { %v16189_v60 = vld [vmem:[#allocation4 + $0x8] sm:$0x33]  ;;  %v12916_v61 = vcombine.low %v8810_v56, %v8811_v58  ;;  %v12917_v62 = vcombine.high %v8810_v56, %v8811_v58  ;;  %v14912_v58 = vld [vmem:[#allocation11 + $0x24c] ss:$16 sps:$4 sm:$0xff]  }
 0xbfd   :  { %v12883_v63 = vcombine.high %v8810_v56, %v16189_v60  ;;  %v12882_v2 = vcombine.low %v8810_v56, %v16189_v60  ;;  %v12951_v37 = vcombine.high %v16189_v60, %v16189_v60  ;;  %v12950_v45 = vcombine.low %v16189_v60, %v16189_v60  ;;  %v14909_v56 = vld [vmem:[#allocation11 + $0x244] ss:$16 sps:$4 sm:$0xff]   ;;  %v14910_v60 = vld [vmem:[#allocation11 + $0x248] ss:$16 sps:$4 sm:$0xff]  }
 0xbfe   :  { %v9109_v3 = vrot.slane %v12916_v61, 3  ;;  %v9110_v35 = vrot.slane %v12917_v62, 3  ;;  %v14907_v61 = vld [vmem:[#allocation11 + $0x240] ss:$16 sps:$4 sm:$0xff]   ;;  %v14915_v62 = vld [vmem:[#allocation11 + $0x264] ss:$16 sps:$4 sm:$0xff]  }
 0xbff   :  { %v8894_v4 = vshrl.u32 %v12883_v63, 16  ;;  %v8897_v31 = vshll.u32 %v12883_v63, 16  ;;  %v8886_v40 = vshrl.u32 %v12882_v2, 16  ;;  %v8889_v5 = vshll.u32 %v12882_v2, 16  ;;  %v14918_v63 = vld [vmem:[#allocation11 + $0x26c] ss:$16 sps:$4 sm:$0xff]  }
 0xc00   :  { %9305 = vmatprep.mubr.bf16.mxu1 %v9110_v35  ;;  %v14913_v2 = vld [vmem:[#allocation11 + $0x260] ss:$16 sps:$4 sm:$0xff]   ;;  %v14921_v35 = vld [vmem:[#allocation11 + $0x284] ss:$16 sps:$4 sm:$0xff]  }
 0xc01   :  { %v8896_v33 = vrot.slane %v8894_v4, 3  ;;  %v8899_v6 = vrot.slane %v8897_v31, 4  ;;  %9306 = vmatmul.mubr.bf16.vlgmr.msra.gmra.mrb[76].mxu1 %v9109_v3  ;;  %v8888_v59 = vrot.slane %v8886_v40, 3  ;;  %v8891_v32 = vrot.slane %v8889_v5, 4  ;;  %v14916_v3 = vld [vmem:[#allocation11 + $0x268] ss:$16 sps:$4 sm:$0xff]  }
 0xc02   :  { %10051 = vmatpush1.bf16.msra.mxu1 %v14895_v46  ;;  %v14924_v4 = vld [vmem:[#allocation11 + $0x28c] ss:$16 sps:$4 sm:$0xff]   ;;  %v14919_v31 = vld [vmem:[#allocation11 + $0x280] ss:$16 sps:$4 sm:$0xff]   ;;  %v14922_v40 = vld [vmem:[#allocation11 + $0x288] ss:$16 sps:$4 sm:$0xff]  }
 0xc03   :  { %v8900_v9 = vor.u32 %v8899_v6, %v8896_v33  ;;  %v8892_v10 = vor.u32 %v8891_v32, %v8888_v59  ;;  %10052 = vmatprep.subr.bf16.mxu1 %v14903_v51  ;;  %v14927_v5 = vld [vmem:[#allocation11 + $0x2a4] ss:$16 sps:$4 sm:$0xff]   ;;  %v14930_v33 = vld [vmem:[#allocation11 + $0x2ac] ss:$16 sps:$4 sm:$0xff]   ;;  %v14925_v6 = vld [vmem:[#allocation11 + $0x2a0] ss:$16 sps:$4 sm:$0xff]  }
 0xc04   :  { %v14928_v59 = vld [vmem:[#allocation11 + $0x2a8] ss:$16 sps:$4 sm:$0xff]   ;;  %v14933_v32 = vld [vmem:[#allocation11 + $0x2c4] ss:$16 sps:$4 sm:$0xff]  }
 0xc05   :  { %9095 = vmatprep.mubr.bf16.mxu0 %v8900_v9  ;;  %v14936_v9 = vld [vmem:[#allocation11 + $0x2cc] ss:$16 sps:$4 sm:$0xff]   ;;  %v14987_v46 = vld [vmem:[#allocation11 + $0x3e4] ss:$16 sps:$4 sm:$0xff]  }
 0xc06   :  { %9096 = vmatmul.mubr.bf16.vlgmr.msra.gmra.mrb[72].mxu0 %v8892_v10  ;;  %10053 = vmatpush1.bf16.msra.mxu1 %v14901_v54  ;;  %v14934_v10 = vld [vmem:[#allocation11 + $0x2c8] ss:$16 sps:$4 sm:$0xff]   ;;  %v14993_v51 = vld [vmem:[#allocation11 + $0x4] ss:$16 sps:$4 sm:$0xff]  }
 0xc07   :  { %9511 = vmatpush1.bf16.msra.mxu0 %v14844_v36  ;;  %9542 = vmatprep.mubr.bf16.mxu0 %v12951_v37  ;;  %v14931_v36 = vld [vmem:[#allocation11 + $0x2c0] ss:$16 sps:$4 sm:$0xff]   ;;  %v14942_v37 = vld [vmem:[#allocation11 + $0x2ec] ss:$16 sps:$4 sm:$0xff]  }
 0xc08   :  { %9512 = vmatprep.subr.bf16.mxu0 %v14851_v11  ;;  %10054 = vmatprep.subr.bf16.mxu1 %v14909_v56  ;;  %v14939_v11 = vld [vmem:[#allocation11 + $0x2e4] ss:$16 sps:$4 sm:$0xff]  }
 0xc0a   :  { %10055 = vmatpush1.bf16.msra.mxu1 %v14907_v61 }
 0xc0b   :  { %9513 = vmatpush1.bf16.msra.mxu0 %v14849_v12  ;;  %10056 = vmatprep.subr.bf16.mxu1 %v14915_v62  ;;  %v14937_v12 = vld [vmem:[#allocation11 + $0x2e0] ss:$16 sps:$4 sm:$0xff]  }
 0xc0c   :  { %9514 = vmatprep.subr.bf16.mxu0 %v14854_v42  ;;  %v14940_v42 = vld [vmem:[#allocation11 + $0x2e8] ss:$16 sps:$4 sm:$0xff]  }
 0xc0e   :  { %10057 = vmatpush1.bf16.msra.mxu1 %v14913_v2 }
 0xc0f   :  { %9515 = vmatpush1.bf16.msra.mxu0 %v14852_v39  ;;  %10058 = vmatprep.subr.bf16.mxu1 %v14921_v35  ;;  %v14945_v39 = vld [vmem:[#allocation11 + $0x304] ss:$16 sps:$4 sm:$0xff]   ;;  %v9553_v35 = vld [vmem:[%s16250_s6] sm:$0x3] }
 0xc10   :  { %9516 = vmatprep.subr.bf16.mxu0 %v14857_v14  ;;  %v14948_v14 = vld [vmem:[#allocation11 + $0x30c] ss:$16 sps:$4 sm:$0xff]  }
 0xc12   :  { %10059 = vmatpush1.bf16.msra.mxu1 %v14919_v31 }
 0xc13   :  { %9517 = vmatpush1.bf16.msra.mxu0 %v14855_v15  ;;  %10060 = vmatprep.subr.bf16.mxu1 %v14927_v5  ;;  %v14943_v15 = vld [vmem:[#allocation11 + $0x300] ss:$16 sps:$4 sm:$0xff]  }
 0xc14   :  { %9518 = vmatprep.subr.bf16.mxu0 %v14860_v16  ;;  %v14946_v16 = vld [vmem:[#allocation11 + $0x308] ss:$16 sps:$4 sm:$0xff]  }
 0xc16   :  { %10061 = vmatpush1.bf16.msra.mxu1 %v14925_v6 }
 0xc17   :  { %9519 = vmatpush1.bf16.msra.mxu0 %v14858_v13  ;;  %10062 = vmatprep.subr.bf16.mxu1 %v14933_v32  ;;  %v14951_v13 = vld [vmem:[#allocation11 + $0x324] ss:$16 sps:$4 sm:$0xff]  }
 0xc18   :  { %9520 = vmatprep.subr.bf16.mxu0 %v14863_v17  ;;  %v14954_v17 = vld [vmem:[#allocation11 + $0x32c] ss:$16 sps:$4 sm:$0xff]  }
 0xc1a   :  { %10063 = vmatpush1.bf16.msra.mxu1 %v14931_v36 }
 0xc1b   :  { %9521 = vmatpush1.bf16.msra.mxu0 %v14861_v0  ;;  %10064 = vmatprep.subr.bf16.mxu1 %v14939_v11  ;;  %v14949_v0 = vld [vmem:[#allocation11 + $0x320] ss:$16 sps:$4 sm:$0xff]  }
 0xc1c   :  { %9522 = vmatprep.subr.bf16.mxu0 %v14866_v49  ;;  %v14952_v49 = vld [vmem:[#allocation11 + $0x328] ss:$16 sps:$4 sm:$0xff]  }
 0xc1e   :  { %10065 = vmatpush1.bf16.msra.mxu1 %v14937_v12 }
 0xc1f   :  { %9523 = vmatpush1.bf16.msra.mxu0 %v14864_v57  ;;  %10066 = vmatprep.subr.bf16.mxu1 %v14945_v39  ;;  %v14957_v57 = vld [vmem:[#allocation11 + $0x344] ss:$16 sps:$4 sm:$0xff]  }
 0xc20   :  { %9524 = vmatprep.subr.bf16.mxu0 %v14869_v19  ;;  %v14960_v19 = vld [vmem:[#allocation11 + $0x34c] ss:$16 sps:$4 sm:$0xff]  }
 0xc22   :  { %10067 = vmatpush1.bf16.msra.mxu1 %v14943_v15 }
 0xc23   :  { %9525 = vmatpush1.bf16.msra.mxu0 %v14867_v1  ;;  %10068 = vmatprep.subr.bf16.mxu1 %v14951_v13  ;;  %v14955_v1 = vld [vmem:[#allocation11 + $0x340] ss:$16 sps:$4 sm:$0xff]  }
 0xc24   :  { %9526 = vmatprep.subr.bf16.mxu0 %v14872_v41  ;;  %v14958_v41 = vld [vmem:[#allocation11 + $0x348] ss:$16 sps:$4 sm:$0xff]  }
 0xc26   :  { %10069 = vmatpush1.bf16.msra.mxu1 %v14949_v0  ;;  %v14994_v0 = vld [vmem:[#allocation11 + $0x8] ss:$16 sps:$4 sm:$0xff]  }
 0xc27   :  { %9527 = vmatpush1.bf16.msra.mxu0 %v14870_v52  ;;  %10070 = vmatprep.subr.bf16.mxu1 %v14957_v57  ;;  %v14963_v52 = vld [vmem:[#allocation11 + $0x364] ss:$16 sps:$4 sm:$0xff]   ;;  %v15002_v57 = vld [vmem:[#allocation11 + $0x2c] ss:$16 sps:$4 sm:$0xff]  }
 0xc28   :  { %9528 = vmatprep.subr.bf16.mxu0 %v14875_v20  ;;  %v14966_v20 = vld [vmem:[#allocation11 + $0x36c] ss:$16 sps:$4 sm:$0xff]  }
 0xc2a   :  { %10071 = vmatpush1.bf16.msra.mxu1 %v14955_v1  ;;  %v14997_v1 = vld [vmem:[#allocation11 + $0x20] ss:$16 sps:$4 sm:$0xff]  }
 0xc2b   :  { %9529 = vmatpush1.bf16.msra.mxu0 %v14873_v22  ;;  %v14961_v22 = vld [vmem:[#allocation11 + $0x360] ss:$16 sps:$4 sm:$0xff]   ;;  %10072 = vmatprep.subr.bf16.mxu1 %v14963_v52  ;;  %v15005_v52 = vld [vmem:[#allocation11 + $0x44] ss:$16 sps:$4 sm:$0xff]  }
 0xc2c   :  { %9530 = vmatprep.subr.bf16.mxu0 %v14878_v21  ;;  %v14964_v21 = vld [vmem:[#allocation11 + $0x368] ss:$16 sps:$4 sm:$0xff]  }
 0xc2e   :  { %10073 = vmatpush1.bf16.msra.mxu1 %v14961_v22  ;;  %v15003_v22 = vld [vmem:[#allocation11 + $0x40] ss:$16 sps:$4 sm:$0xff]  }
 0xc2f   :  { %9531 = vmatpush1.bf16.msra.mxu0 %v14876_v23  ;;  %v14969_v23 = vld [vmem:[#allocation11 + $0x384] ss:$16 sps:$4 sm:$0xff]  }
 0xc30   :  { %9532 = vmatprep.subr.bf16.mxu0 %v14881_v24  ;;  %v14972_v24 = vld [vmem:[#allocation11 + $0x38c] ss:$16 sps:$4 sm:$0xff]   ;;  %10074 = vmatprep.subr.bf16.mxu1 %v14969_v23  ;;  %v15011_v23 = vld [vmem:[#allocation11 + $0x64] ss:$16 sps:$4 sm:$0xff]  }
 0xc33   :  { %9533 = vmatpush1.bf16.msra.mxu0 %v14879_v8  ;;  %v14967_v8 = vld [vmem:[#allocation11 + $0x380] ss:$16 sps:$4 sm:$0xff]  }
 0xc34   :  { %9534 = vmatprep.subr.bf16.mxu0 %v14884_v29  ;;  %v14970_v29 = vld [vmem:[#allocation11 + $0x388] ss:$16 sps:$4 sm:$0xff]   ;;  %10075 = vmatpush1.bf16.msra.mxu1 %v14967_v8  ;;  %v15009_v8 = vld [vmem:[#allocation11 + $0x60] ss:$16 sps:$4 sm:$0xff]  }
 0xc37   :  { %9535 = vmatpush1.bf16.msra.mxu0 %v14882_v30  ;;  %v14975_v30 = vld [vmem:[#allocation11 + $0x3a4] ss:$16 sps:$4 sm:$0xff]  }
 0xc38   :  { %9536 = vmatprep.subr.bf16.mxu0 %v14887_v7  ;;  %v14978_v7 = vld [vmem:[#allocation11 + $0x3ac] ss:$16 sps:$4 sm:$0xff]   ;;  %10076 = vmatprep.subr.bf16.mxu1 %v14975_v30  ;;  %v15017_v30 = vld [vmem:[#allocation11 + $0x84] ss:$16 sps:$4 sm:$0xff]  }
 0xc3b   :  { %9537 = vmatpush1.bf16.msra.mxu0 %v14885_v34  ;;  %v14973_v34 = vld [vmem:[#allocation11 + $0x3a0] ss:$16 sps:$4 sm:$0xff]  }
 0xc3c   :  { %9538 = vmatprep.subr.bf16.mxu0 %v14890_v18  ;;  %v14976_v18 = vld [vmem:[#allocation11 + $0x3a8] ss:$16 sps:$4 sm:$0xff]   ;;  %10077 = vmatpush1.bf16.msra.mxu1 %v14973_v34  ;;  %v15015_v34 = vld [vmem:[#allocation11 + $0x80] ss:$16 sps:$4 sm:$0xff]  }
 0xc3f   :  { %9539 = vmatpush1.bf16.msra.mxu0 %v14888_v38  ;;  %v14981_v38 = vld [vmem:[#allocation11 + $0x3c4] ss:$16 sps:$4 sm:$0xff]  }
 0xc40   :  { %9540 = vmatprep.subr.bf16.mxu0 %v14893_v43  ;;  %v14979_v43 = vld [vmem:[#allocation11 + $0x3c0] ss:$16 sps:$4 sm:$0xff]   ;;  %10078 = vmatprep.subr.bf16.mxu1 %v14981_v38  ;;  %v15023_v38 = vld [vmem:[#allocation11 + $0xa4] ss:$16 sps:$4 sm:$0xff]  }
 0xc41   :  { %10079 = vmatpush1.bf16.msra.mxu1 %v14979_v43  ;;  %v15026_v43 = vld [vmem:[#allocation11 + $0xac] ss:$16 sps:$4 sm:$0xff]  }
 0xc42   :  { %10080 = vmatprep.subr.bf16.mxu1 %v14987_v46  ;;  %v15029_v46 = vld [vmem:[#allocation11 + $0xc4] ss:$16 sps:$4 sm:$0xff]  }
 0xc43   :  { %9541 = vmatpush1.bf16.msra.mxu0 %v14891_v44  ;;  %v14982_v44 = vld [vmem:[#allocation11 + $0x3c8] ss:$16 sps:$4 sm:$0xff]  }
 0xc44   :  { %10091 = vmatprep.subr.bf16.mxu0 %v14900_v50  ;;  %v14988_v50 = vld [vmem:[#allocation11 + $0x3e8] ss:$16 sps:$4 sm:$0xff]  }
 0xc46   :  { %9543 = vmatmul.mubr.bf16.vlgmr.msra.gmra.mrb[76].mxu0 %v12950_v45  ;;  %v14984_v45 = vld [vmem:[#allocation11 + $0x3cc] ss:$16 sps:$4 sm:$0xff]  }
 0xc47   :  { %10092 = vmatpush1.bf16.msra.mxu0 %v14898_v48  ;;  %v14985_v48 = vld [vmem:[#allocation11 + $0x3e0] ss:$16 sps:$4 sm:$0xff]  }
 0xc48   :  { %10093 = vmatprep.subr.bf16.mxu0 %v14906_v53  ;;  %10081 = vmatpush1.bf16.msra.mxu1 %v14985_v48  ;;  %v14996_v53 = vld [vmem:[#allocation11 + $0xc] ss:$16 sps:$4 sm:$0xff]   ;;  %v15027_v48 = vld [vmem:[#allocation11 + $0xc0] ss:$16 sps:$4 sm:$0xff]  }
 0xc49   :  { %10452 = vmatprep.subr.bf16.mxu1 %v14993_v51  ;;  %v15035_v51 = vld [vmem:[#allocation11 + $0xe4] ss:$16 sps:$4 sm:$0xff]  }
 0xc4b   :  { %10094 = vmatpush1.bf16.msra.mxu0 %v14904_v55 }
 0xc4c   :  { %10095 = vmatprep.subr.bf16.mxu0 %v14912_v58 }
 0xc4f   :  { %10096 = vmatpush1.bf16.msra.mxu0 %v14910_v60 }
 0xc50   :  { %10097 = vmatprep.subr.bf16.mxu0 %v14918_v63 }
 0xc53   :  { %10098 = vmatpush1.bf16.msra.mxu0 %v14916_v3 }
 0xc54   :  { %10099 = vmatprep.subr.bf16.mxu0 %v14924_v4  ;;  %v9558_v4 = vrot.slane %v9553_v35, %v15757_v25 }
 0xc57   :  { %10100 = vmatpush1.bf16.msra.mxu0 %v14922_v40  ;;  %v9562_v40 = vrot.slane %v9553_v35, %v15761_v27  ;;  %v15053_v35 = vld [vmem:[#allocation11 + $0x144] ss:$16 sps:$4 sm:$0xff]  }
 0xc58   :  { %10101 = vmatprep.subr.bf16.mxu0 %v14930_v33 }
 0xc5b   :  { %10102 = vmatpush1.bf16.msra.mxu0 %v14928_v59 }
 0xc5c   :  { %10103 = vmatprep.subr.bf16.mxu0 %v14936_v9 }
 0xc5f   :  { %10104 = vmatpush1.bf16.msra.mxu0 %v14934_v10 }
 0xc60   :  { %10105 = vmatprep.subr.bf16.mxu0 %v14942_v37 }
 0xc63   :  { %10106 = vmatpush1.bf16.msra.mxu0 %v14940_v42 }
 0xc64   :  { %10107 = vmatprep.subr.bf16.mxu0 %v14948_v14 }
 0xc67   :  { %10108 = vmatpush1.bf16.msra.mxu0 %v14946_v16 }
 0xc68   :  { %10109 = vmatprep.subr.bf16.mxu0 %v14954_v17  ;;  %v14991_v17 = vld [vmem:[#allocation11] ss:$16 sps:$4 sm:$0xff]  }
 0xc6b   :  { %10110 = vmatpush1.bf16.msra.mxu0 %v14952_v49  ;;  %v14999_v49 = vld [vmem:[#allocation11 + $0x24] ss:$16 sps:$4 sm:$0xff]  }
 0xc6c   :  { %10111 = vmatprep.subr.bf16.mxu0 %v14960_v19 }
 0xc6f   :  { %10112 = vmatpush1.bf16.msra.mxu0 %v14958_v41  ;;  %v15000_v41 = vld [vmem:[#allocation11 + $0x28] ss:$16 sps:$4 sm:$0xff]  }
 0xc70   :  { %10113 = vmatprep.subr.bf16.mxu0 %v14966_v20  ;;  %v15008_v20 = vld [vmem:[#allocation11 + $0x4c] ss:$16 sps:$4 sm:$0xff]  }
 0xc73   :  { %10114 = vmatpush1.bf16.msra.mxu0 %v14964_v21  ;;  %v15006_v21 = vld [vmem:[#allocation11 + $0x48] ss:$16 sps:$4 sm:$0xff]  }
 0xc74   :  { %10115 = vmatprep.subr.bf16.mxu0 %v14972_v24  ;;  %v15014_v24 = vld [vmem:[#allocation11 + $0x6c] ss:$16 sps:$4 sm:$0xff]  }
 0xc77   :  { %10116 = vmatpush1.bf16.msra.mxu0 %v14970_v29  ;;  %v15012_v29 = vld [vmem:[#allocation11 + $0x68] ss:$16 sps:$4 sm:$0xff]  }
 0xc78   :  { %10117 = vmatprep.subr.bf16.mxu0 %v14978_v7  ;;  %v15020_v7 = vld [vmem:[#allocation11 + $0x8c] ss:$16 sps:$4 sm:$0xff]  }
 0xc7b   :  { %10118 = vmatpush1.bf16.msra.mxu0 %v14976_v18  ;;  %v15018_v18 = vld [vmem:[#allocation11 + $0x88] ss:$16 sps:$4 sm:$0xff]  }
 0xc7c   :  { %10119 = vmatprep.subr.bf16.mxu0 %v14984_v45  ;;  %v15024_v45 = vld [vmem:[#allocation11 + $0xa8] ss:$16 sps:$4 sm:$0xff]  }
 0xc7f   :  { %10120 = vmatpush1.bf16.msra.mxu0 %v14982_v44  ;;  %v15021_v44 = vld [vmem:[#allocation11 + $0xa0] ss:$16 sps:$4 sm:$0xff]  }
 0xc80   :  { %10121 = vmatprep.subr.bf16.mxu0 %v14990_v47  ;;  %v15032_v47 = vld [vmem:[#allocation11 + $0xcc] ss:$16 sps:$4 sm:$0xff]  }
 0xc83   :  { %10122 = vmatpush1.bf16.msra.mxu0 %v14988_v50  ;;  %v15030_v50 = vld [vmem:[#allocation11 + $0xc8] ss:$16 sps:$4 sm:$0xff]  }
 0xc84   :  { %10493 = vmatprep.subr.bf16.mxu0 %v14996_v53  ;;  %v15038_v53 = vld [vmem:[#allocation11 + $0xec] ss:$16 sps:$4 sm:$0xff]  }
 0xcd4   :  { %v9307_v54 = vpop.f32.mrb[76].mxu1 }
 0xcd5   :  { %v9309_v55 = vpop.f32.mrb[77].mxu1 }
 0xcd6   :  { %v9311_v56 = vpop.f32.mrb[78].mxu1 }
 0xcd7   :  { %v9312_v58 = vpop.f32.mrb[79].mxu1  ;;  %v15041_v56 = vld [vmem:[#allocation11 + $0x104] ss:$16 sps:$4 sm:$0xff]  }
 0xcd8   :  { %v15044_v58 = vld [vmem:[#allocation11 + $0x10c] ss:$16 sps:$4 sm:$0xff]  }
 0xcd9   :  { %v9097_v61 = vpop.f32.mrb[72].mxu0 }
 0xcda   :  { %v9308_v60 = vadd.f32 %v9307_v54, %v9097_v61  ;;  %v9099_v62 = vpop.f32.mrb[73].mxu0  ;;  %v15033_v54 = vld [vmem:[#allocation11 + $0xe0] ss:$16 sps:$4 sm:$0xff]  }
 0xcdb   :  { %v9310_v63 = vadd.f32 %v9309_v55, %v9099_v62  ;;  %v9101_v2 = vpop.f32.mrb[74].mxu0  ;;  %v15036_v55 = vld [vmem:[#allocation11 + $0xe8] ss:$16 sps:$4 sm:$0xff]   ;;  %v15039_v61 = vld [vmem:[#allocation11 + $0x100] ss:$16 sps:$4 sm:$0xff]  }
 0xcdc   :  { %v9102_v3 = vpop.f32.mrb[75].mxu0  ;;  %v15047_v62 = vld [vmem:[#allocation11 + $0x124] ss:$16 sps:$4 sm:$0xff]   ;;  %v15045_v2 = vld [vmem:[#allocation11 + $0x120] ss:$16 sps:$4 sm:$0xff]  }
 0xcdd   :  { %v15048_v3 = vld [vmem:[#allocation11 + $0x128] ss:$16 sps:$4 sm:$0xff]  }
 0xd19   :  { %v9544_v31 = vpop.f32.mrb[76].mxu0 }
 0xd1a   :  { %v9551_v5 = vadd.f32 %v9544_v31, %v9308_v60  ;;  %v9546_v33 = vpop.f32.mrb[77].mxu0  ;;  %v15042_v60 = vld [vmem:[#allocation11 + $0x108] ss:$16 sps:$4 sm:$0xff]   ;;  %v15051_v31 = vld [vmem:[#allocation11 + $0x140] ss:$16 sps:$4 sm:$0xff]  }
 0xd1b   :  { %v9552_v6 = vadd.f32 %v9546_v33, %v9310_v63  ;;  %v9548_v59 = vpop.f32.mrb[78].mxu0  ;;  %v15050_v63 = vld [vmem:[#allocation11 + $0x12c] ss:$16 sps:$4 sm:$0xff]  }
 0xd1c   :  { %v9565_v32 = vadd.f32 %v9558_v4, %v9551_v5  ;;  %v9549_v9 = vpop.f32.mrb[79].mxu0  ;;  %v15056_v4 = vld [vmem:[#allocation11 + $0x14c] ss:$16 sps:$4 sm:$0xff]   ;;  %v15059_v5 = vld [vmem:[#allocation11 + $0x164] ss:$16 sps:$4 sm:$0xff]  }
 0xd1d   :  { %v9566_v36 = vadd.f32 %v9562_v40, %v9552_v6  ;;  %v15054_v40 = vld [vmem:[#allocation11 + $0x148] ss:$16 sps:$4 sm:$0xff]   ;;  %v15062_v33 = vld [vmem:[#allocation11 + $0x16c] ss:$16 sps:$4 sm:$0xff]   ;;  %v15057_v6 = vld [vmem:[#allocation11 + $0x160] ss:$16 sps:$4 sm:$0xff]  }
 0xd1e   :  { %v9567_v10 = vmax.f32 %v9565_v32, 0.0  ;;  %v15060_v59 = vld [vmem:[#allocation11 + $0x168] ss:$16 sps:$4 sm:$0xff]   ;;  %v15065_v32 = vld [vmem:[#allocation11 + $0x184] ss:$16 sps:$4 sm:$0xff]  }
 0xd1f   :  { %v9568_v11 = vmax.f32 %v9566_v36, 0.0  ;;  %v15068_v9 = vld [vmem:[#allocation11 + $0x18c] ss:$16 sps:$4 sm:$0xff]   ;;  %v15063_v36 = vld [vmem:[#allocation11 + $0x180] ss:$16 sps:$4 sm:$0xff]  }
 0xd21   :  { %v9571_v37 = vcombine.low %v9567_v10, %v9568_v11  ;;  %v15066_v10 = vld [vmem:[#allocation11 + $0x188] ss:$16 sps:$4 sm:$0xff]   ;;  %v15071_v11 = vld [vmem:[#allocation11 + $0x1a4] ss:$16 sps:$4 sm:$0xff]  }
 0xd23   :  { %9573 = vst [vmem:[#allocation5] sm:$0xff] %v9571_v37  ;;  %v15074_v37 = vld [vmem:[#allocation11 + $0x1ac] ss:$16 sps:$4 sm:$0xff]  }
 0xd2a   :  { %v9652_v12 = vld [vmem:[#allocation5 + $0x1] ss:$4 sm:$0x3]  ;;  %v16202_v42 = vld [vmem:[#allocation5] ss:$4 sm:$0x3] }
 0xd2b   :  { %v9657_v39 = vrot.slane %v9652_v12, %v15757_v25  ;;  %v9661_v14 = vrot.slane %v9652_v12, %v15761_v27  ;;  %v9583_v15 = vrot.slane %v16202_v42, %v15761_v27  ;;  %v15069_v12 = vld [vmem:[#allocation11 + $0x1a0] ss:$16 sps:$4 sm:$0xff]  }
 0xd2d   :  { %v9664_v16 = vpack.c.bf16 %v9657_v39, %v9657_v39  ;;  %v9665_v13 = vpack.c.bf16 %v9661_v14, %v9661_v14  ;;  %v9587_v19 = vpack.c.bf16 %v9583_v15, %v9583_v15  ;;  %v15072_v39 = vld [vmem:[#allocation11 + $0x1a8] ss:$16 sps:$4 sm:$0xff]   ;;  %v15077_v14 = vld [vmem:[#allocation11 + $0x1c4] ss:$16 sps:$4 sm:$0xff]   ;;  %v15080_v15 = vld [vmem:[#allocation11 + $0x1cc] ss:$16 sps:$4 sm:$0xff]  }
 0xd2f   :  { %10082 = vmatprep.mubr.bf16.mxu1 %v9665_v13  ;;  %10123 = vmatprep.mubr.bf16.mxu0 %v9665_v13  ;;  %v15078_v13 = vld [vmem:[#allocation11 + $0x1c8] ss:$16 sps:$4 sm:$0xff]  }
 0xd30   :  { %10083 = vmatmul.mubr.bf16.vlgmr.msra.gmra.mrb[80].mxu1 %v9664_v16  ;;  %10124 = vmatmul.mubr.bf16.vlgmr.msra.gmra.mrb[80].mxu0 %v9664_v16  ;;  %v15075_v16 = vld [vmem:[#allocation11 + $0x1c0] ss:$16 sps:$4 sm:$0xff]  }
 0xd31   :  { %10453 = vmatpush1.bf16.msra.mxu1 %v14991_v17  ;;  %10494 = vmatpush1.bf16.msra.mxu0 %v14994_v0  ;;  %v15083_v17 = vld [vmem:[#allocation11 + $0x1e4] ss:$16 sps:$4 sm:$0xff]   ;;  %v15086_v0 = vld [vmem:[#allocation11 + $0x1ec] ss:$16 sps:$4 sm:$0xff]  }
 0xd32   :  { %10484 = vmatprep.mubr.bf16.mxu1 %v9587_v19  ;;  %10525 = vmatprep.mubr.bf16.mxu0 %v9587_v19  ;;  %v15084_v19 = vld [vmem:[#allocation11 + $0x1e8] ss:$16 sps:$4 sm:$0xff]  }
 0xd33   :  { %10454 = vmatprep.subr.bf16.mxu1 %v14999_v49  ;;  %10495 = vmatprep.subr.bf16.mxu0 %v15002_v57  ;;  %v16208_v49 = vld [vmem:[#allocation5 + $0x2] ss:$4 sm:$0x3]  ;;  %v15081_v57 = vld [vmem:[#allocation11 + $0x1e0] ss:$16 sps:$4 sm:$0xff]  }
 0xd35   :  { %10455 = vmatpush1.bf16.msra.mxu1 %v14997_v1  ;;  %10496 = vmatpush1.bf16.msra.mxu0 %v15000_v41  ;;  %v9579_v1 = vrot.slane %v16202_v42, %v15757_v25  ;;  %v15089_v41 = vld [vmem:[#allocation11 + $0x404] ss:$16 sps:$4 sm:$0xff]   ;;  %v15093_v42 = vld [vmem:[#allocation11 + $0x420] ss:$16 sps:$4 sm:$0xff]  }
 0xd36   :  { %10456 = vmatprep.subr.bf16.mxu1 %v15005_v52  ;;  %10497 = vmatprep.subr.bf16.mxu0 %v15008_v20  ;;  %v15092_v52 = vld [vmem:[#allocation11 + $0x40c] ss:$16 sps:$4 sm:$0xff]   ;;  %v10543_v20 = vrot.slane %v16208_v49, %v15761_v27 }
 0xd39   :  { %10457 = vmatpush1.bf16.msra.mxu1 %v15003_v22  ;;  %10498 = vmatpush1.bf16.msra.mxu0 %v15006_v21  ;;  %v15087_v22 = vld [vmem:[#allocation11 + $0x400] ss:$16 sps:$4 sm:$0xff]   ;;  %v9586_v21 = vpack.c.bf16 %v9579_v1, %v9579_v1  ;;  %v15168_v1 = vld [vmem:[#allocation11 + $0x5a8] ss:$16 sps:$4 sm:$0xff]  }
 0xd3a   :  { %10458 = vmatprep.subr.bf16.mxu1 %v15011_v23  ;;  %10499 = vmatprep.subr.bf16.mxu0 %v15014_v24  ;;  %v15090_v23 = vld [vmem:[#allocation11 + $0x408] ss:$16 sps:$4 sm:$0xff]   ;;  %v10547_v24 = vpack.c.bf16 %v10543_v20, %v10543_v20  ;;  %v15171_v20 = vld [vmem:[#allocation11 + $0x5c0] ss:$16 sps:$4 sm:$0xff]  }
 0xd3d   :  { %10459 = vmatpush1.bf16.msra.mxu1 %v15009_v8  ;;  %10500 = vmatpush1.bf16.msra.mxu0 %v15012_v29  ;;  %v15095_v8 = vld [vmem:[#allocation11 + $0x424] ss:$16 sps:$4 sm:$0xff]   ;;  %v15098_v29 = vld [vmem:[#allocation11 + $0x42c] ss:$16 sps:$4 sm:$0xff]  }
 0xd3e   :  { %10460 = vmatprep.subr.bf16.mxu1 %v15017_v30  ;;  %10501 = vmatprep.subr.bf16.mxu0 %v15020_v7  ;;  %v15096_v30 = vld [vmem:[#allocation11 + $0x428] ss:$16 sps:$4 sm:$0xff]   ;;  %v15101_v7 = vld [vmem:[#allocation11 + $0x444] ss:$16 sps:$4 sm:$0xff]  }
 0xd41   :  { %10461 = vmatpush1.bf16.msra.mxu1 %v15015_v34  ;;  %10502 = vmatpush1.bf16.msra.mxu0 %v15018_v18  ;;  %v15104_v34 = vld [vmem:[#allocation11 + $0x44c] ss:$16 sps:$4 sm:$0xff]   ;;  %v15099_v18 = vld [vmem:[#allocation11 + $0x440] ss:$16 sps:$4 sm:$0xff]  }
 0xd42   :  { %10462 = vmatprep.subr.bf16.mxu1 %v15023_v38  ;;  %10503 = vmatprep.subr.bf16.mxu0 %v15026_v43  ;;  %v15102_v38 = vld [vmem:[#allocation11 + $0x448] ss:$16 sps:$4 sm:$0xff]   ;;  %v15107_v43 = vld [vmem:[#allocation11 + $0x464] ss:$16 sps:$4 sm:$0xff]  }
 0xd45   :  { %10463 = vmatpush1.bf16.msra.mxu1 %v15021_v44  ;;  %10504 = vmatpush1.bf16.msra.mxu0 %v15024_v45  ;;  %v15110_v44 = vld [vmem:[#allocation11 + $0x46c] ss:$16 sps:$4 sm:$0xff]   ;;  %v15105_v45 = vld [vmem:[#allocation11 + $0x460] ss:$16 sps:$4 sm:$0xff]  }
 0xd46   :  { %10464 = vmatprep.subr.bf16.mxu1 %v15029_v46  ;;  %10505 = vmatprep.subr.bf16.mxu0 %v15032_v47  ;;  %v15108_v46 = vld [vmem:[#allocation11 + $0x468] ss:$16 sps:$4 sm:$0xff]   ;;  %v15113_v47 = vld [vmem:[#allocation11 + $0x484] ss:$16 sps:$4 sm:$0xff]  }
 0xd49   :  { %10465 = vmatpush1.bf16.msra.mxu1 %v15027_v48  ;;  %10506 = vmatpush1.bf16.msra.mxu0 %v15030_v50  ;;  %v15116_v48 = vld [vmem:[#allocation11 + $0x48c] ss:$16 sps:$4 sm:$0xff]   ;;  %v15111_v50 = vld [vmem:[#allocation11 + $0x480] ss:$16 sps:$4 sm:$0xff]  }
 0xd4a   :  { %10466 = vmatprep.subr.bf16.mxu1 %v15035_v51  ;;  %10507 = vmatprep.subr.bf16.mxu0 %v15038_v53  ;;  %v15114_v51 = vld [vmem:[#allocation11 + $0x488] ss:$16 sps:$4 sm:$0xff]   ;;  %v15119_v53 = vld [vmem:[#allocation11 + $0x4a4] ss:$16 sps:$4 sm:$0xff]  }
 0xd4d   :  { %10467 = vmatpush1.bf16.msra.mxu1 %v15033_v54  ;;  %10508 = vmatpush1.bf16.msra.mxu0 %v15036_v55  ;;  %v15122_v54 = vld [vmem:[#allocation11 + $0x4ac] ss:$16 sps:$4 sm:$0xff]   ;;  %v15117_v55 = vld [vmem:[#allocation11 + $0x4a0] ss:$16 sps:$4 sm:$0xff]  }
 0xd4e   :  { %10468 = vmatprep.subr.bf16.mxu1 %v15041_v56  ;;  %10509 = vmatprep.subr.bf16.mxu0 %v15044_v58  ;;  %v15120_v56 = vld [vmem:[#allocation11 + $0x4a8] ss:$16 sps:$4 sm:$0xff]   ;;  %v15125_v58 = vld [vmem:[#allocation11 + $0x4c4] ss:$16 sps:$4 sm:$0xff]  }
 0xd51   :  { %10469 = vmatpush1.bf16.msra.mxu1 %v15039_v61  ;;  %10510 = vmatpush1.bf16.msra.mxu0 %v15042_v60  ;;  %v15128_v61 = vld [vmem:[#allocation11 + $0x4cc] ss:$16 sps:$4 sm:$0xff]   ;;  %v15123_v60 = vld [vmem:[#allocation11 + $0x4c0] ss:$16 sps:$4 sm:$0xff]  }
 0xd52   :  { %10470 = vmatprep.subr.bf16.mxu1 %v15047_v62  ;;  %10511 = vmatprep.subr.bf16.mxu0 %v15050_v63  ;;  %v15126_v62 = vld [vmem:[#allocation11 + $0x4c8] ss:$16 sps:$4 sm:$0xff]   ;;  %v15131_v63 = vld [vmem:[#allocation11 + $0x4e4] ss:$16 sps:$4 sm:$0xff]  }
 0xd55   :  { %10471 = vmatpush1.bf16.msra.mxu1 %v15045_v2  ;;  %10512 = vmatpush1.bf16.msra.mxu0 %v15048_v3  ;;  %v15134_v2 = vld [vmem:[#allocation11 + $0x4ec] ss:$16 sps:$4 sm:$0xff]   ;;  %v15129_v3 = vld [vmem:[#allocation11 + $0x4e0] ss:$16 sps:$4 sm:$0xff]  }
 0xd56   :  { %10472 = vmatprep.subr.bf16.mxu1 %v15053_v35  ;;  %10513 = vmatprep.subr.bf16.mxu0 %v15056_v4  ;;  %v15132_v35 = vld [vmem:[#allocation11 + $0x4e8] ss:$16 sps:$4 sm:$0xff]   ;;  %v15137_v4 = vld [vmem:[#allocation11 + $0x504] ss:$16 sps:$4 sm:$0xff]  }
 0xd59   :  { %10473 = vmatpush1.bf16.msra.mxu1 %v15051_v31  ;;  %10514 = vmatpush1.bf16.msra.mxu0 %v15054_v40  ;;  %v15140_v31 = vld [vmem:[#allocation11 + $0x50c] ss:$16 sps:$4 sm:$0xff]   ;;  %v15135_v40 = vld [vmem:[#allocation11 + $0x500] ss:$16 sps:$4 sm:$0xff]  }
 0xd5a   :  { %10474 = vmatprep.subr.bf16.mxu1 %v15059_v5  ;;  %10515 = vmatprep.subr.bf16.mxu0 %v15062_v33  ;;  %v15138_v5 = vld [vmem:[#allocation11 + $0x508] ss:$16 sps:$4 sm:$0xff]   ;;  %v15143_v33 = vld [vmem:[#allocation11 + $0x524] ss:$16 sps:$4 sm:$0xff]  }
 0xd5d   :  { %10475 = vmatpush1.bf16.msra.mxu1 %v15057_v6  ;;  %10516 = vmatpush1.bf16.msra.mxu0 %v15060_v59  ;;  %v15146_v6 = vld [vmem:[#allocation11 + $0x52c] ss:$16 sps:$4 sm:$0xff]   ;;  %v15141_v59 = vld [vmem:[#allocation11 + $0x520] ss:$16 sps:$4 sm:$0xff]  }
 0xd5e   :  { %10476 = vmatprep.subr.bf16.mxu1 %v15065_v32  ;;  %10517 = vmatprep.subr.bf16.mxu0 %v15068_v9  ;;  %v15144_v32 = vld [vmem:[#allocation11 + $0x528] ss:$16 sps:$4 sm:$0xff]   ;;  %v15149_v9 = vld [vmem:[#allocation11 + $0x544] ss:$16 sps:$4 sm:$0xff]  }
 0xd61   :  { %10477 = vmatpush1.bf16.msra.mxu1 %v15063_v36  ;;  %10518 = vmatpush1.bf16.msra.mxu0 %v15066_v10  ;;  %v15152_v36 = vld [vmem:[#allocation11 + $0x54c] ss:$16 sps:$4 sm:$0xff]   ;;  %v15147_v10 = vld [vmem:[#allocation11 + $0x540] ss:$16 sps:$4 sm:$0xff]  }
 0xd62   :  { %10478 = vmatprep.subr.bf16.mxu1 %v15071_v11  ;;  %10519 = vmatprep.subr.bf16.mxu0 %v15074_v37  ;;  %v15150_v11 = vld [vmem:[#allocation11 + $0x548] ss:$16 sps:$4 sm:$0xff]   ;;  %v15155_v37 = vld [vmem:[#allocation11 + $0x564] ss:$16 sps:$4 sm:$0xff]  }
 0xd65   :  { %10479 = vmatpush1.bf16.msra.mxu1 %v15069_v12  ;;  %10520 = vmatpush1.bf16.msra.mxu0 %v15072_v39  ;;  %v15158_v12 = vld [vmem:[#allocation11 + $0x56c] ss:$16 sps:$4 sm:$0xff]   ;;  %v15153_v39 = vld [vmem:[#allocation11 + $0x560] ss:$16 sps:$4 sm:$0xff]  }
 0xd66   :  { %10480 = vmatprep.subr.bf16.mxu1 %v15077_v14  ;;  %10521 = vmatprep.subr.bf16.mxu0 %v15080_v15  ;;  %v15156_v14 = vld [vmem:[#allocation11 + $0x568] ss:$16 sps:$4 sm:$0xff]   ;;  %v15161_v15 = vld [vmem:[#allocation11 + $0x584] ss:$16 sps:$4 sm:$0xff]  }
 0xd69   :  { %10481 = vmatpush1.bf16.msra.mxu1 %v15075_v16  ;;  %10522 = vmatpush1.bf16.msra.mxu0 %v15078_v13  ;;  %v15164_v16 = vld [vmem:[#allocation11 + $0x58c] ss:$16 sps:$4 sm:$0xff]   ;;  %v15159_v13 = vld [vmem:[#allocation11 + $0x580] ss:$16 sps:$4 sm:$0xff]  }
 0xd6a   :  { %10482 = vmatprep.subr.bf16.mxu1 %v15083_v17  ;;  %10523 = vmatprep.subr.bf16.mxu0 %v15086_v0  ;;  %v15162_v17 = vld [vmem:[#allocation11 + $0x588] ss:$16 sps:$4 sm:$0xff]   ;;  %v15167_v0 = vld [vmem:[#allocation11 + $0x5a4] ss:$16 sps:$4 sm:$0xff]  }
 0xd6d   :  { %10483 = vmatpush1.bf16.msra.mxu1 %v15081_v57  ;;  %10524 = vmatpush1.bf16.msra.mxu0 %v15084_v19  ;;  %v15170_v57 = vld [vmem:[#allocation11 + $0x5ac] ss:$16 sps:$4 sm:$0xff]   ;;  %v15165_v19 = vld [vmem:[#allocation11 + $0x5a0] ss:$16 sps:$4 sm:$0xff]  }
 0xd6e   :  { %10932 = vmatprep.subr.bf16.mxu1 %v15089_v41  ;;  %10973 = vmatprep.subr.bf16.mxu0 %v15092_v52  ;;  %v15173_v41 = vld [vmem:[#allocation11 + $0x5c4] ss:$16 sps:$4 sm:$0xff]   ;;  %v15176_v52 = vld [vmem:[#allocation11 + $0x5cc] ss:$16 sps:$4 sm:$0xff]  }
 0xd70   :  { %10485 = vmatmul.mubr.bf16.vlgmr.msra.gmra.mrb[84].mxu1 %v9586_v21  ;;  %10526 = vmatmul.mubr.bf16.vlgmr.msra.gmra.mrb[84].mxu0 %v9586_v21  ;;  %v15179_v21 = vld [vmem:[#allocation11 + $0x5e4] ss:$16 sps:$4 sm:$0xff]  }
 0xd71   :  { %10933 = vmatpush1.bf16.msra.mxu1 %v15087_v22  ;;  %10964 = vmatprep.mubr.bf16.mxu1 %v10547_v24  ;;  %v15174_v22 = vld [vmem:[#allocation11 + $0x5c8] ss:$16 sps:$4 sm:$0xff]  }
 0xd72   :  { %10974 = vmatpush1.bf16.msra.mxu0 %v15090_v23  ;;  %11005 = vmatprep.mubr.bf16.mxu0 %v10547_v24  ;;  %v15182_v23 = vld [vmem:[#allocation11 + $0x5ec] ss:$16 sps:$4 sm:$0xff]   ;;  %v15177_v24 = vld [vmem:[#allocation11 + $0x5e0] ss:$16 sps:$4 sm:$0xff]  }
 0xd73   :  { %10934 = vmatprep.subr.bf16.mxu1 %v15095_v8  ;;  %10975 = vmatprep.subr.bf16.mxu0 %v15098_v29  ;;  %v16214_v8 = vld [vmem:[#allocation5 + $0x3] ss:$4 sm:$0x3]  ;;  %v10539_v29 = vrot.slane %v16208_v49, %v15757_v25 }
 0xd74   :  { %v15194_v49 = vld [vmem:[#allocation11 + $0x62c] ss:$16 sps:$4 sm:$0xff]  }
 0xd75   :  { %10935 = vmatpush1.bf16.msra.mxu1 %v15093_v42  ;;  %v15180_v42 = vld [vmem:[#allocation11 + $0x5e8] ss:$16 sps:$4 sm:$0xff]  }
 0xd76   :  { %10976 = vmatpush1.bf16.msra.mxu0 %v15096_v30  ;;  %10936 = vmatprep.subr.bf16.mxu1 %v15101_v7  ;;  %v15185_v30 = vld [vmem:[#allocation11 + $0x604] ss:$16 sps:$4 sm:$0xff]   ;;  %v15188_v7 = vld [vmem:[#allocation11 + $0x60c] ss:$16 sps:$4 sm:$0xff]  }
 0xd77   :  { %10977 = vmatprep.subr.bf16.mxu0 %v15104_v34  ;;  %v11027_v34 = vrot.slane %v16214_v8, %v15761_v27 }
 0xd79   :  { %10937 = vmatpush1.bf16.msra.mxu1 %v15099_v18  ;;  %v15183_v18 = vld [vmem:[#allocation11 + $0x600] ss:$16 sps:$4 sm:$0xff]  }
 0xd7a   :  { %10978 = vmatpush1.bf16.msra.mxu0 %v15102_v38  ;;  %10938 = vmatprep.subr.bf16.mxu1 %v15107_v43  ;;  %v10546_v38 = vpack.c.bf16 %v10539_v29, %v10539_v29  ;;  %v15186_v43 = vld [vmem:[#allocation11 + $0x608] ss:$16 sps:$4 sm:$0xff]   ;;  %v15261_v29 = vld [vmem:[#allocation11 + $0x7a0] ss:$16 sps:$4 sm:$0xff]  }
 0xd7b   :  { %10979 = vmatprep.subr.bf16.mxu0 %v15110_v44  ;;  %v15191_v44 = vld [vmem:[#allocation11 + $0x624] ss:$16 sps:$4 sm:$0xff]  }
 0xd7d   :  { %10939 = vmatpush1.bf16.msra.mxu1 %v15105_v45  ;;  %v11031_v45 = vpack.c.bf16 %v11027_v34, %v11027_v34  ;;  %v15267_v34 = vld [vmem:[#allocation11 + $0x7c0] ss:$16 sps:$4 sm:$0xff]  }
 0xd7e   :  { %10980 = vmatpush1.bf16.msra.mxu0 %v15108_v46  ;;  %10940 = vmatprep.subr.bf16.mxu1 %v15113_v47  ;;  %v15189_v46 = vld [vmem:[#allocation11 + $0x620] ss:$16 sps:$4 sm:$0xff]   ;;  %v15192_v47 = vld [vmem:[#allocation11 + $0x628] ss:$16 sps:$4 sm:$0xff]  }
 0xd7f   :  { %10981 = vmatprep.subr.bf16.mxu0 %v15116_v48  ;;  %v15197_v48 = vld [vmem:[#allocation11 + $0x644] ss:$16 sps:$4 sm:$0xff]  }
 0xd81   :  { %10941 = vmatpush1.bf16.msra.mxu1 %v15111_v50  ;;  %v15200_v50 = vld [vmem:[#allocation11 + $0x64c] ss:$16 sps:$4 sm:$0xff]  }
 0xd82   :  { %10982 = vmatpush1.bf16.msra.mxu0 %v15114_v51  ;;  %10942 = vmatprep.subr.bf16.mxu1 %v15119_v53  ;;  %v15195_v51 = vld [vmem:[#allocation11 + $0x640] ss:$16 sps:$4 sm:$0xff]   ;;  %v15198_v53 = vld [vmem:[#allocation11 + $0x648] ss:$16 sps:$4 sm:$0xff]  }
 0xd83   :  { %10983 = vmatprep.subr.bf16.mxu0 %v15122_v54  ;;  %v15203_v54 = vld [vmem:[#allocation11 + $0x664] ss:$16 sps:$4 sm:$0xff]  }
 0xd85   :  { %10943 = vmatpush1.bf16.msra.mxu1 %v15117_v55  ;;  %v15206_v55 = vld [vmem:[#allocation11 + $0x66c] ss:$16 sps:$4 sm:$0xff]  }
 0xd86   :  { %10984 = vmatpush1.bf16.msra.mxu0 %v15120_v56  ;;  %10944 = vmatprep.subr.bf16.mxu1 %v15125_v58  ;;  %v15201_v56 = vld [vmem:[#allocation11 + $0x660] ss:$16 sps:$4 sm:$0xff]   ;;  %v15204_v58 = vld [vmem:[#allocation11 + $0x668] ss:$16 sps:$4 sm:$0xff]  }
 0xd87   :  { %10985 = vmatprep.subr.bf16.mxu0 %v15128_v61  ;;  %v15209_v61 = vld [vmem:[#allocation11 + $0x684] ss:$16 sps:$4 sm:$0xff]  }
 0xd89   :  { %10945 = vmatpush1.bf16.msra.mxu1 %v15123_v60  ;;  %v15212_v60 = vld [vmem:[#allocation11 + $0x68c] ss:$16 sps:$4 sm:$0xff]  }
 0xd8a   :  { %10986 = vmatpush1.bf16.msra.mxu0 %v15126_v62  ;;  %10946 = vmatprep.subr.bf16.mxu1 %v15131_v63  ;;  %v15207_v62 = vld [vmem:[#allocation11 + $0x680] ss:$16 sps:$4 sm:$0xff]   ;;  %v15210_v63 = vld [vmem:[#allocation11 + $0x688] ss:$16 sps:$4 sm:$0xff]  }
 0xd8b   :  { %10987 = vmatprep.subr.bf16.mxu0 %v15134_v2  ;;  %v15215_v2 = vld [vmem:[#allocation11 + $0x6a4] ss:$16 sps:$4 sm:$0xff]  }
 0xd8d   :  { %10947 = vmatpush1.bf16.msra.mxu1 %v15129_v3  ;;  %v15218_v3 = vld [vmem:[#allocation11 + $0x6ac] ss:$16 sps:$4 sm:$0xff]  }
 0xd8e   :  { %10988 = vmatpush1.bf16.msra.mxu0 %v15132_v35  ;;  %10948 = vmatprep.subr.bf16.mxu1 %v15137_v4  ;;  %v15213_v35 = vld [vmem:[#allocation11 + $0x6a0] ss:$16 sps:$4 sm:$0xff]   ;;  %v15216_v4 = vld [vmem:[#allocation11 + $0x6a8] ss:$16 sps:$4 sm:$0xff]  }
 0xd8f   :  { %10989 = vmatprep.subr.bf16.mxu0 %v15140_v31  ;;  %v15221_v31 = vld [vmem:[#allocation11 + $0x6c4] ss:$16 sps:$4 sm:$0xff]  }
 0xd91   :  { %10949 = vmatpush1.bf16.msra.mxu1 %v15135_v40  ;;  %v15224_v40 = vld [vmem:[#allocation11 + $0x6cc] ss:$16 sps:$4 sm:$0xff]  }
 0xd92   :  { %10990 = vmatpush1.bf16.msra.mxu0 %v15138_v5  ;;  %10950 = vmatprep.subr.bf16.mxu1 %v15143_v33  ;;  %v15219_v5 = vld [vmem:[#allocation11 + $0x6c0] ss:$16 sps:$4 sm:$0xff]   ;;  %v15222_v33 = vld [vmem:[#allocation11 + $0x6c8] ss:$16 sps:$4 sm:$0xff]  }
 0xd93   :  { %10991 = vmatprep.subr.bf16.mxu0 %v15146_v6  ;;  %v15227_v6 = vld [vmem:[#allocation11 + $0x6e4] ss:$16 sps:$4 sm:$0xff]  }
 0xd95   :  { %10951 = vmatpush1.bf16.msra.mxu1 %v15141_v59  ;;  %v15230_v59 = vld [vmem:[#allocation11 + $0x6ec] ss:$16 sps:$4 sm:$0xff]  }
 0xd96   :  { %10992 = vmatpush1.bf16.msra.mxu0 %v15144_v32  ;;  %10952 = vmatprep.subr.bf16.mxu1 %v15149_v9  ;;  %v15225_v32 = vld [vmem:[#allocation11 + $0x6e0] ss:$16 sps:$4 sm:$0xff]   ;;  %v15228_v9 = vld [vmem:[#allocation11 + $0x6e8] ss:$16 sps:$4 sm:$0xff]  }
 0xd97   :  { %10993 = vmatprep.subr.bf16.mxu0 %v15152_v36  ;;  %v15233_v36 = vld [vmem:[#allocation11 + $0x704] ss:$16 sps:$4 sm:$0xff]  }
 0xd99   :  { %10953 = vmatpush1.bf16.msra.mxu1 %v15147_v10  ;;  %v15236_v10 = vld [vmem:[#allocation11 + $0x70c] ss:$16 sps:$4 sm:$0xff]  }
 0xd9a   :  { %10994 = vmatpush1.bf16.msra.mxu0 %v15150_v11  ;;  %10954 = vmatprep.subr.bf16.mxu1 %v15155_v37  ;;  %v15231_v11 = vld [vmem:[#allocation11 + $0x700] ss:$16 sps:$4 sm:$0xff]   ;;  %v15234_v37 = vld [vmem:[#allocation11 + $0x708] ss:$16 sps:$4 sm:$0xff]  }
 0xd9b   :  { %10995 = vmatprep.subr.bf16.mxu0 %v15158_v12  ;;  %v15239_v12 = vld [vmem:[#allocation11 + $0x724] ss:$16 sps:$4 sm:$0xff]  }
 0xd9d   :  { %10955 = vmatpush1.bf16.msra.mxu1 %v15153_v39  ;;  %v15242_v39 = vld [vmem:[#allocation11 + $0x72c] ss:$16 sps:$4 sm:$0xff]  }
 0xd9e   :  { %10996 = vmatpush1.bf16.msra.mxu0 %v15156_v14  ;;  %10956 = vmatprep.subr.bf16.mxu1 %v15161_v15  ;;  %v15237_v14 = vld [vmem:[#allocation11 + $0x720] ss:$16 sps:$4 sm:$0xff]   ;;  %v15240_v15 = vld [vmem:[#allocation11 + $0x728] ss:$16 sps:$4 sm:$0xff]  }
 0xd9f   :  { %10997 = vmatprep.subr.bf16.mxu0 %v15164_v16  ;;  %v15245_v16 = vld [vmem:[#allocation11 + $0x744] ss:$16 sps:$4 sm:$0xff]  }
 0xda1   :  { %10957 = vmatpush1.bf16.msra.mxu1 %v15159_v13  ;;  %v15248_v13 = vld [vmem:[#allocation11 + $0x74c] ss:$16 sps:$4 sm:$0xff]  }
 0xda2   :  { %10998 = vmatpush1.bf16.msra.mxu0 %v15162_v17  ;;  %10958 = vmatprep.subr.bf16.mxu1 %v15167_v0  ;;  %v15243_v17 = vld [vmem:[#allocation11 + $0x740] ss:$16 sps:$4 sm:$0xff]   ;;  %v15246_v0 = vld [vmem:[#allocation11 + $0x748] ss:$16 sps:$4 sm:$0xff]  }
 0xda3   :  { %10999 = vmatprep.subr.bf16.mxu0 %v15170_v57  ;;  %v15251_v57 = vld [vmem:[#allocation11 + $0x764] ss:$16 sps:$4 sm:$0xff]  }
 0xda5   :  { %10959 = vmatpush1.bf16.msra.mxu1 %v15165_v19  ;;  %v15254_v19 = vld [vmem:[#allocation11 + $0x76c] ss:$16 sps:$4 sm:$0xff]  }
 0xda6   :  { %11000 = vmatpush1.bf16.msra.mxu0 %v15168_v1  ;;  %10960 = vmatprep.subr.bf16.mxu1 %v15173_v41  ;;  %v15249_v1 = vld [vmem:[#allocation11 + $0x760] ss:$16 sps:$4 sm:$0xff]   ;;  %v15252_v41 = vld [vmem:[#allocation11 + $0x768] ss:$16 sps:$4 sm:$0xff]  }
 0xda7   :  { %11001 = vmatprep.subr.bf16.mxu0 %v15176_v52  ;;  %v15257_v52 = vld [vmem:[#allocation11 + $0x784] ss:$16 sps:$4 sm:$0xff]  }
 0xda9   :  { %10961 = vmatpush1.bf16.msra.mxu1 %v15171_v20  ;;  %v15260_v20 = vld [vmem:[#allocation11 + $0x78c] ss:$16 sps:$4 sm:$0xff]  }
 0xdaa   :  { %11002 = vmatpush1.bf16.msra.mxu0 %v15174_v22  ;;  %10962 = vmatprep.subr.bf16.mxu1 %v15179_v21  ;;  %v15255_v22 = vld [vmem:[#allocation11 + $0x780] ss:$16 sps:$4 sm:$0xff]   ;;  %v15258_v21 = vld [vmem:[#allocation11 + $0x788] ss:$16 sps:$4 sm:$0xff]  }
 0xdab   :  { %11003 = vmatprep.subr.bf16.mxu0 %v15182_v23  ;;  %v15263_v23 = vld [vmem:[#allocation11 + $0x7a4] ss:$16 sps:$4 sm:$0xff]  }
 0xdad   :  { %10963 = vmatpush1.bf16.msra.mxu1 %v15177_v24  ;;  %v15266_v24 = vld [vmem:[#allocation11 + $0x7ac] ss:$16 sps:$4 sm:$0xff]  }
 0xdae   :  { %11004 = vmatpush1.bf16.msra.mxu0 %v15180_v42  ;;  %11416 = vmatprep.subr.bf16.mxu1 %v15185_v30  ;;  %v15264_v42 = vld [vmem:[#allocation11 + $0x7a8] ss:$16 sps:$4 sm:$0xff]   ;;  %v15269_v30 = vld [vmem:[#allocation11 + $0x7c4] ss:$16 sps:$4 sm:$0xff]  }
 0xdaf   :  { %11457 = vmatprep.subr.bf16.mxu0 %v15188_v7  ;;  %v15272_v7 = vld [vmem:[#allocation11 + $0x7cc] ss:$16 sps:$4 sm:$0xff]  }
 0xdb0   :  { %10965 = vmatmul.mubr.bf16.vlgmr.msra.gmra.mrb[88].mxu1 %v10546_v38 }
 0xdb1   :  { %11006 = vmatmul.mubr.bf16.vlgmr.msra.gmra.mrb[88].mxu0 %v10546_v38  ;;  %11417 = vmatpush1.bf16.msra.mxu1 %v15183_v18  ;;  %v15270_v18 = vld [vmem:[#allocation11 + $0x7c8] ss:$16 sps:$4 sm:$0xff]   ;;  %v15275_v38 = vld [vmem:[#allocation11 + $0x7e4] ss:$16 sps:$4 sm:$0xff]  }
 0xdb2   :  { %11448 = vmatprep.mubr.bf16.mxu1 %v11031_v45  ;;  %11458 = vmatpush1.bf16.msra.mxu0 %v15186_v43  ;;  %v15278_v43 = vld [vmem:[#allocation11 + $0x7ec] ss:$16 sps:$4 sm:$0xff]  }
 0xdb3   :  { %11489 = vmatprep.mubr.bf16.mxu0 %v11031_v45  ;;  %11418 = vmatprep.subr.bf16.mxu1 %v15191_v44  ;;  %v15273_v44 = vld [vmem:[#allocation11 + $0x7e0] ss:$16 sps:$4 sm:$0xff]   ;;  %v11023_v45 = vrot.slane %v16214_v8, %v15757_v25  ;;  %v15281_v8 = vld [vmem:[#allocation12 + $0x48] sm:$0xff]  }
 0xdb4   :  { %11459 = vmatprep.subr.bf16.mxu0 %v15194_v49  ;;  %v15276_v49 = vld [vmem:[#allocation11 + $0x7e8] ss:$16 sps:$4 sm:$0xff]  }
 0xdb5   :  { %11419 = vmatpush1.bf16.msra.mxu1 %v15189_v46  ;;  %v11030_v46 = vpack.c.bf16 %v11023_v45, %v11023_v45 }
 0xdb6   :  { %11460 = vmatpush1.bf16.msra.mxu0 %v15192_v47  ;;  %11420 = vmatprep.subr.bf16.mxu1 %v15197_v48 }
 0xdb7   :  { %11461 = vmatprep.subr.bf16.mxu0 %v15200_v50 }
 0xdb9   :  { %11421 = vmatpush1.bf16.msra.mxu1 %v15195_v51 }
 0xdba   :  { %11462 = vmatpush1.bf16.msra.mxu0 %v15198_v53  ;;  %11422 = vmatprep.subr.bf16.mxu1 %v15203_v54 }
 0xdbb   :  { %11463 = vmatprep.subr.bf16.mxu0 %v15206_v55 }
 0xdbd   :  { %11423 = vmatpush1.bf16.msra.mxu1 %v15201_v56 }
 0xdbe   :  { %11464 = vmatpush1.bf16.msra.mxu0 %v15204_v58  ;;  %11424 = vmatprep.subr.bf16.mxu1 %v15209_v61  ;;  %v15279_v58 = vld [vmem:[#allocation12 + $0x40] sm:$0xff]  }
 0xdbf   :  { %11465 = vmatprep.subr.bf16.mxu0 %v15212_v60  ;;  %v15280_v61 = vld [vmem:[#allocation12] sm:$0xff]   ;;  %v15282_v60 = vld [vmem:[#allocation12 + $0x8] sm:$0xff]  }
 0xdc1   :  { %11425 = vmatpush1.bf16.msra.mxu1 %v15207_v62  ;;  %v15283_v62 = vld [vmem:[#allocation12 + $0x50] sm:$0xff]  }
 0xdc2   :  { %11466 = vmatpush1.bf16.msra.mxu0 %v15210_v63  ;;  %11426 = vmatprep.subr.bf16.mxu1 %v15215_v2  ;;  %v15284_v63 = vld [vmem:[#allocation12 + $0x10] sm:$0xff]   ;;  %v15285_v2 = vld [vmem:[#allocation12 + $0x58] sm:$0xff]  }
 0xdc3   :  { %11467 = vmatprep.subr.bf16.mxu0 %v15218_v3  ;;  %v15286_v3 = vld [vmem:[#allocation12 + $0x18] sm:$0xff]  }
 0xdc5   :  { %11427 = vmatpush1.bf16.msra.mxu1 %v15213_v35  ;;  %v15287_v35 = vld [vmem:[#allocation12 + $0x60] sm:$0xff]  }
 0xdc6   :  { %11468 = vmatpush1.bf16.msra.mxu0 %v15216_v4  ;;  %11428 = vmatprep.subr.bf16.mxu1 %v15221_v31  ;;  %v15288_v4 = vld [vmem:[#allocation12 + $0x20] sm:$0xff]   ;;  %v15289_v31 = vld [vmem:[#allocation12 + $0x68] sm:$0xff]  }
 0xdc7   :  { %11469 = vmatprep.subr.bf16.mxu0 %v15224_v40  ;;  %v15290_v40 = vld [vmem:[#allocation12 + $0x28] sm:$0xff]  }
 0xdc9   :  { %11429 = vmatpush1.bf16.msra.mxu1 %v15219_v5 }
 0xdca   :  { %11470 = vmatpush1.bf16.msra.mxu0 %v15222_v33  ;;  %11430 = vmatprep.subr.bf16.mxu1 %v15227_v6 }
 0xdcb   :  { %11471 = vmatprep.subr.bf16.mxu0 %v15230_v59 }
 0xdcd   :  { %11431 = vmatpush1.bf16.msra.mxu1 %v15225_v32 }
 0xdce   :  { %11472 = vmatpush1.bf16.msra.mxu0 %v15228_v9  ;;  %11432 = vmatprep.subr.bf16.mxu1 %v15233_v36 }
 0xdcf   :  { %11473 = vmatprep.subr.bf16.mxu0 %v15236_v10 }
 0xdd1   :  { %11433 = vmatpush1.bf16.msra.mxu1 %v15231_v11 }
 0xdd2   :  { %11474 = vmatpush1.bf16.msra.mxu0 %v15234_v37  ;;  %11434 = vmatprep.subr.bf16.mxu1 %v15239_v12  ;;  %v15291_v12 = vld [vmem:[#allocation12 + $0x70] sm:$0xff]  }
 0xdd3   :  { %11475 = vmatprep.subr.bf16.mxu0 %v15242_v39 }
 0xdd5   :  { %11435 = vmatpush1.bf16.msra.mxu1 %v15237_v14 }
 0xdd6   :  { %11476 = vmatpush1.bf16.msra.mxu0 %v15240_v15  ;;  %11436 = vmatprep.subr.bf16.mxu1 %v15245_v16  ;;  %v15292_v15 = vld [vmem:[#allocation12 + $0x30] sm:$0xff]   ;;  %v15293_v16 = vld [vmem:[#allocation12 + $0x78] sm:$0xff]  }
 0xdd7   :  { %11477 = vmatprep.subr.bf16.mxu0 %v15248_v13  ;;  %v15294_v13 = vld [vmem:[#allocation12 + $0x38] sm:$0xff]  }
 0xdd9   :  { %11437 = vmatpush1.bf16.msra.mxu1 %v15243_v17  ;;  %v15295_v17 = vld [vmem:[#allocation12 + $0xc0] sm:$0xff]  }
 0xdda   :  { %11478 = vmatpush1.bf16.msra.mxu0 %v15246_v0  ;;  %11438 = vmatprep.subr.bf16.mxu1 %v15251_v57 }
 0xddb   :  { %11479 = vmatprep.subr.bf16.mxu0 %v15254_v19 }
 0xddd   :  { %11439 = vmatpush1.bf16.msra.mxu1 %v15249_v1 }
 0xdde   :  { %11480 = vmatpush1.bf16.msra.mxu0 %v15252_v41  ;;  %11440 = vmatprep.subr.bf16.mxu1 %v15257_v52 }
 0xddf   :  { %11481 = vmatprep.subr.bf16.mxu0 %v15260_v20 }
 0xde1   :  { %11441 = vmatpush1.bf16.msra.mxu1 %v15255_v22 }
 0xde2   :  { %11482 = vmatpush1.bf16.msra.mxu0 %v15258_v21  ;;  %11442 = vmatprep.subr.bf16.mxu1 %v15263_v23 }
 0xde3   :  { %11483 = vmatprep.subr.bf16.mxu0 %v15266_v24 }
 0xde5   :  { %11443 = vmatpush1.bf16.msra.mxu1 %v15261_v29 }
 0xde6   :  { %11484 = vmatpush1.bf16.msra.mxu0 %v15264_v42  ;;  %11444 = vmatprep.subr.bf16.mxu1 %v15269_v30  ;;  %v11502_v42 = vld [vmem:[%s16252_s8] sm:$0xf] }
 0xde7   :  { %11485 = vmatprep.subr.bf16.mxu0 %v15272_v7  ;;  %v11507_v30 = vrot.slane %v11502_v42, %v15757_v25 }
 0xde9   :  { %11445 = vmatpush1.bf16.msra.mxu1 %v15267_v34  ;;  %v11511_v34 = vrot.slane %v11502_v42, %v15761_v27 }
 0xdea   :  { %11486 = vmatpush1.bf16.msra.mxu0 %v15270_v18  ;;  %11446 = vmatprep.subr.bf16.mxu1 %v15275_v38 }
 0xdeb   :  { %11487 = vmatprep.subr.bf16.mxu0 %v15278_v43 }
 0xded   :  { %11447 = vmatpush1.bf16.msra.mxu1 %v15273_v44  ;;  %v11519_v44 = vrot.slane %v11502_v42, %v15763_v28  ;;  %v15298_v28 = vld [vmem:[#allocation12 + $0x88] sm:$0xff]  }
 0xdee   :  { %11488 = vmatpush1.bf16.msra.mxu0 %v15276_v49  ;;  %13324 = vmatprep.subr.bf16.mxu1 %v15279_v58 }
 0xdf0   :  { %11449 = vmatmul.mubr.bf16.vlgmr.msra.gmra.mrb[92].mxu1 %v11030_v46 }
 0xdf1   :  { %11490 = vmatmul.mubr.bf16.vlgmr.msra.gmra.mrb[92].mxu0 %v11030_v46  ;;  %13325 = vmatpush3.bf16.msra.mxu1 %v15280_v61 }
 0xdf2   :  { %13326 = vmatprep.subr.bf16.mxu1 %v15281_v8  ;;  %v15296_v8 = vld [vmem:[#allocation12 + $0x80] sm:$0xff]  }
 0xdf5   :  { %13327 = vmatpush3.bf16.msra.mxu1 %v15282_v60 }
 0xdf6   :  { %13328 = vmatprep.subr.bf16.mxu1 %v15283_v62  ;;  %v15297_v62 = vld [vmem:[#allocation12 + $0xc8] sm:$0xff]  }
 0xdf9   :  { %13329 = vmatpush3.bf16.msra.mxu1 %v15284_v63 }
 0xdfa   :  { %13330 = vmatprep.subr.bf16.mxu1 %v15285_v2  ;;  %v15299_v2 = vld [vmem:[#allocation12 + $0xd0] sm:$0xff]  }
 0xdfd   :  { %13331 = vmatpush3.bf16.msra.mxu1 %v15286_v3  ;;  %v15300_v3 = vld [vmem:[#allocation12 + $0x90] sm:$0xff]  }
 0xdfe   :  { %13332 = vmatprep.subr.bf16.mxu1 %v15287_v35  ;;  %v15301_v35 = vld [vmem:[#allocation12 + $0xd8] sm:$0xff]  }
 0xe01   :  { %13333 = vmatpush3.bf16.msra.mxu1 %v15288_v4  ;;  %v15302_v4 = vld [vmem:[#allocation12 + $0x98] sm:$0xff]  }
 0xe02   :  { %13334 = vmatprep.subr.bf16.mxu1 %v15289_v31  ;;  %v15303_v31 = vld [vmem:[#allocation12 + $0xe0] sm:$0xff]  }
 0xe03   :  { %v10084_v47 = vpop.f32.mrb[80].mxu1  ;;  %v10125_v48 = vpop.f32.mrb[80].mxu0 }
 0xe04   :  { %v10086_v50 = vpop.f32.mrb[81].mxu1  ;;  %v10127_v51 = vpop.f32.mrb[81].mxu0 }
 0xe05   :  { %v10088_v53 = vpop.f32.mrb[82].mxu1  ;;  %v10129_v54 = vpop.f32.mrb[82].mxu0  ;;  %13335 = vmatpush3.bf16.msra.mxu1 %v15290_v40  ;;  %v15304_v40 = vld [vmem:[#allocation12 + $0xa0] sm:$0xff]  }
 0xe06   :  { %v10089_v55 = vpop.f32.mrb[83].mxu1  ;;  %v10130_v56 = vpop.f32.mrb[83].mxu0  ;;  %13336 = vmatprep.subr.bf16.mxu1 %v15291_v12 }
 0xe09   :  { %13337 = vmatpush3.bf16.msra.mxu1 %v15292_v15 }
 0xe0a   :  { %13338 = vmatprep.subr.bf16.mxu1 %v15293_v16 }
 0xe0d   :  { %13339 = vmatpush3.bf16.msra.mxu1 %v15294_v13 }
 0xe0e   :  { %13346 = vmatprep.subr.bf16.mxu1 %v15295_v17 }
 0xe43   :  { %v10486_v5 = vpop.f32.mrb[84].mxu1  ;;  %v10527_v33 = vpop.f32.mrb[84].mxu0 }
 0xe44   :  { %v10487_v6 = vadd.f32 %v10486_v5, %v10084_v47  ;;  %v10528_v59 = vadd.f32 %v10527_v33, %v10125_v48  ;;  %v10488_v32 = vpop.f32.mrb[85].mxu1  ;;  %v10529_v9 = vpop.f32.mrb[85].mxu0  ;;  %v15305_v5 = vld [vmem:[#allocation12 + $0xe8] sm:$0xff]  }
 0xe45   :  { %v10489_v36 = vadd.f32 %v10488_v32, %v10086_v50  ;;  %v10530_v10 = vadd.f32 %v10529_v9, %v10127_v51  ;;  %v10490_v11 = vpop.f32.mrb[86].mxu1  ;;  %v10531_v37 = vpop.f32.mrb[86].mxu0  ;;  %v15306_v33 = vld [vmem:[#allocation12 + $0xa8] sm:$0xff]   ;;  %v15308_v32 = vld [vmem:[#allocation12 + $0xb0] sm:$0xff]  }
 0xe46   :  { %v10491_v39 = vpop.f32.mrb[87].mxu1  ;;  %v10532_v14 = vpop.f32.mrb[87].mxu0 }
 0xe83   :  { %v10966_v0 = vpop.f32.mrb[88].mxu1 }
 0xe84   :  { %v11014_v57 = vadd.f32 %v10966_v0, %v10487_v6  ;;  %v11007_v19 = vpop.f32.mrb[88].mxu0  ;;  %v10968_v1 = vpop.f32.mrb[89].mxu1  ;;  %v11515_v6 = vrot.slane %v11502_v42, %v15759_v26  ;;  %v11600_v26 = vld [vmem:[%s16254_s10] sm:$0x1] }
 0xe85   :  { %v11016_v41 = vadd.f32 %v11007_v19, %v10528_v59  ;;  %v11015_v52 = vadd.f32 %v10968_v1, %v10489_v36  ;;  %v11009_v20 = vpop.f32.mrb[89].mxu0  ;;  %v10970_v22 = vpop.f32.mrb[90].mxu1  ;;  %v15307_v59 = vld [vmem:[#allocation12 + $0xf0] sm:$0xff]   ;;  %v15309_v36 = vld [vmem:[#allocation12 + $0xf8] sm:$0xff]  }
 0xe86   :  { %v11017_v21 = vadd.f32 %v11009_v20, %v10530_v10  ;;  %v11011_v23 = vpop.f32.mrb[90].mxu0  ;;  %v10971_v24 = vpop.f32.mrb[91].mxu1  ;;  %v15310_v10 = vld [vmem:[#allocation12 + $0xb8] sm:$0xff]  }
 0xe87   :  { %v11012_v29 = vpop.f32.mrb[91].mxu0 }
 0xec3   :  { %v11450_v7 = vpop.f32.mrb[92].mxu1 }
 0xec4   :  { %v11498_v18 = vadd.f32 %v11450_v7, %v11014_v57  ;;  %v11491_v38 = vpop.f32.mrb[92].mxu0  ;;  %v11452_v43 = vpop.f32.mrb[93].mxu1 }
 0xec5   :  { %v11500_v45 = vadd.f32 %v11491_v38, %v11016_v41  ;;  %v11499_v49 = vadd.f32 %v11452_v43, %v11015_v52  ;;  %v11493_v46 = vpop.f32.mrb[93].mxu0  ;;  %v11454_v47 = vpop.f32.mrb[94].mxu1 }
 0xec6   :  { %v11524_v48 = vadd.f32 %v11507_v30, %v11498_v18  ;;  %v11501_v50 = vadd.f32 %v11493_v46, %v11017_v21  ;;  %v11495_v51 = vpop.f32.mrb[94].mxu0  ;;  %v11455_v53 = vpop.f32.mrb[95].mxu1 }
 0xec7   :  { %v11525_v54 = vadd.f32 %v11511_v34, %v11499_v49  ;;  %v11496_v55 = vpop.f32.mrb[95].mxu0  ;;  %v11526_v9 = vadd.f32 %v11515_v6, %v11500_v45 }
 0xec8   :  { %v11528_v56 = vmax.f32 %v11524_v48, 0.0  ;;  %v11527_v25 = vadd.f32 %v11519_v44, %v11501_v50 }
 0xec9   :  { %v11529_v58 = vmax.f32 %v11525_v54, 0.0  ;;  %v11530_v11 = vmax.f32 %v11526_v9, 0.0 }
 0xeca   :  { %v11531_v61 = vmax.f32 %v11527_v25, 0.0  ;;  %v11532_v60 = vpack.c.bf16 %v11528_v56, %v11528_v56 }
 0xecb   :  { %v11533_v27 = vpack.c.bf16 %v11529_v58, %v11529_v58  ;;  %v11534_v37 = vpack.c.bf16 %v11530_v11, %v11530_v11 }
 0xecc   :  { %v11535_v63 = vpack.c.bf16 %v11531_v61, %v11531_v61 }
 0xecd   :  { %11825 = vmatprep.mubr.bf16.mxu1 %v11533_v27 }
 0xece   :  { %11826 = vmatmul.mubr.bf16.vlgmr.msra.gmra.mrb[96].mxu1 %v11532_v60 }
 0xecf   :  { %13347 = vmatpush3.bf16.msra.mxu1 %v15296_v8  ;;  %11865 = vmatprep.mubr.bf16.mxu1 %v11535_v63 }
 0xed0   :  { %13348 = vmatprep.subr.bf16.mxu1 %v15297_v62 }
 0xed3   :  { %13349 = vmatpush3.bf16.msra.mxu1 %v15298_v28 }
 0xed4   :  { %13350 = vmatprep.subr.bf16.mxu1 %v15299_v2 }
 0xed7   :  { %13351 = vmatpush3.bf16.msra.mxu1 %v15300_v3 }
 0xed8   :  { %13352 = vmatprep.subr.bf16.mxu1 %v15301_v35 }
 0xedb   :  { %13353 = vmatpush3.bf16.msra.mxu1 %v15302_v4 }
 0xedc   :  { %13354 = vmatprep.subr.bf16.mxu1 %v15303_v31 }
 0xedf   :  { %13355 = vmatpush3.bf16.msra.mxu1 %v15304_v40 }
 0xee0   :  { %13356 = vmatprep.subr.bf16.mxu1 %v15305_v5 }
 0xee3   :  { %13357 = vmatpush3.bf16.msra.mxu1 %v15306_v33 }
 0xee4   :  { %13358 = vmatprep.subr.bf16.mxu1 %v15307_v59 }
 0xee7   :  { %13359 = vmatpush3.bf16.msra.mxu1 %v15308_v32 }
 0xee8   :  { %13360 = vmatprep.subr.bf16.mxu1 %v15309_v36 }
 0xeeb   :  { %13361 = vmatpush3.bf16.msra.mxu1 %v15310_v10 }
 0xeee   :  { %11866 = vmatmul.mubr.bf16.vlgmr.msra.gmra.mrb[100].mxu1 %v11534_v37 }
 0xfa1   :  { %v13340_v12 = vpop.f32.mrb[96].mxu1 }
 0xfa2   :  { %v13341_v39 = vpop.f32.mrb[97].mxu1 }
 0xfa3   :  { %v13342_v14 = vadd.f32 %v13341_v39, %v13340_v12  ;;  %v13343_v15 = vpop.f32.mrb[98].mxu1 }
 0xfa4   :  { %v13344_v16 = vpop.f32.mrb[99].mxu1 }
 0xfa5   :  { %v11828_v0 = vadd.f32 %v13342_v14, %v11600_v26 }
 0xfc1   :  { %v13362_v13 = vpop.f32.mrb[100].mxu1 }
 0xfc2   :  { %v13363_v17 = vpop.f32.mrb[101].mxu1 }
 0xfc3   :  { %v13364_v57 = vadd.f32 %v13363_v17, %v13362_v13  ;;  %v13365_v19 = vpop.f32.mrb[102].mxu1 }
 0xfc4   :  { %v13366_v1 = vpop.f32.mrb[103].mxu1 }
 0xfc5   :  { %v11868_v41 = vadd.f32 %v13364_v57, %v11828_v0 }
 0xfc7   :  { %11873 = vst [vmem:[#allocation14 + $0x1] sm:$0x1] %v11868_v41 }
 0xfc8   :  { %15411 = shalt.err (!%p15408_p8)
}
 0xfc9   :  { %s15412_s17 = scalar_lea.hbm %s16255_s11, 32 }
 0xfca   :  { %p15413_p9 = scmp.ne.s32.totalorder %s16255_s11, %s15412_s17  ;;  %p15416_p10 = scmp.lt.u32.totalorder %s15412_s17, %s16255_s11 }
 0xfcc   :  { %p15418_p11 = pnand %p15416_p10, %p15413_p9 }
 0xfce   :  { %15421 = shalt.err (!%p15418_p11)
}
 0xfcf   :  { %11883 = dma.vmem_to_hbm [thread:$0]  %s11881_s14, 32, %s16255_s11, [#allocation8]  }
 0xfd0   :  { %15428 = dma.done.wait [#allocation8], 32  }
 0xfd1   :  { %15429 = vsyncadd [#allocation8], 4294967264 }
 0xfd2   :  { %11887 = vsyncpa [#allocation7], 1 }
 0xfd3   :  { %11888 = vsyncpa [#allocation10], 1 }
 0xfd4   :  { %11889 = vsyncpa [#allocation13], 1 }
 0xfd5   :  { %11890 = vsyncpa [#allocation8], 1 }

</bundles_post_ra>
